<compile_context>
chip_gen: v7x
topology: tpu7x:2x2x1
jax: 0.10.0
libtpu: 0.0.40
codegen_flags: <defaults>
</compile_context>

<pallas_src>
import functools

import jax
import jax.numpy as jnp
from jax import lax
from jax.experimental import pallas as pl
from jax.experimental.pallas import tpu as pltpu

EPS = 1e-5
_VMEM_LIMIT = 40 * 1024 * 1024


def _round_up(x, m):
    return (x + m - 1) // m * m


def _pad_channels(c):
    # 256-aligned channels feed v6e/v7x's 2x256^2 MXU at full width; don't blow up
    # genuinely small channel counts (e.g. 32) past a single 128-lane vreg.
    return _round_up(c, 256) if c >= 256 else _round_up(c, 128)


# ---------------------------------------------------------------------------
# Kernel 1: SAGEConv (tiled mean aggregation + linears), optionally with the
# previous layer's GraphNorm+ReLU fused onto its input, plus masked partial
# GraphNorm statistics of its output.
# ---------------------------------------------------------------------------
def _sage_conv_kernel(counts_ref, inv_deg_ref, valid_ref, x_ref,
                      nm_ref, nv_ref, ng_ref, nb_ref, na_ref,
                      wl_ref, bl_ref, wr_ref,
                      h_ref, stats_ref, acc_ref, *, tm, tk, apply_norm):
    # Grid indices are read ONLY at kernel top level (never bound inside pl.when
    # bodies: program_id inside a cond branch has no lowering in interpret mode).
    i = pl.program_id(0)
    k = pl.program_id(1)
    nk = pl.num_programs(1)
    i_start = i * tm
    k_start = k * tk

    def feat_tile(rows):
        """Row slice of the VMEM-resident feature array (+ fused GraphNorm1/ReLU)."""
        t = x_ref[rows, :]
        if apply_norm:
            inv_std = lax.rsqrt(nv_ref[...] + EPS)
            t = (ng_ref[...] * (t.astype(jnp.float32) - na_ref[...] * nm_ref[...])
                 * inv_std + nb_ref[...])
            t = jnp.maximum(t, 0.0).astype(jnp.bfloat16)   # dropout = identity (eval)
        return t

    @pl.when(k == 0)
    def _():
        acc_ref[...] = jnp.zeros_like(acc_ref)

    # Partial neighbor sum: counts[i-tile, k-tile] @ feat[k-tile].  int8 counts are
    # upcast just before the MXU dot (int8 -> f32 -> bf16 keeps the convert on a
    # guaranteed-supported path); f32 accumulation in VMEM scratch.
    cnt = counts_ref[...].astype(jnp.float32).astype(jnp.bfloat16)
    acc_ref[...] += jnp.dot(cnt, feat_tile(pl.ds(k_start, tk)),
                            preferred_element_type=jnp.float32)

    @pl.when(k == nk - 1)
    def _():
        # Mean aggregation + the two SAGEConv linears.
        agg = acc_ref[...] * inv_deg_ref[...]
        xi = feat_tile(pl.ds(i_start, tm))
        h = (jnp.dot(agg.astype(jnp.bfloat16), wl_ref[...],
                     preferred_element_type=jnp.float32)
             + bl_ref[...]
             + jnp.dot(xi, wr_ref[...], preferred_element_type=jnp.float32))

        # Masked partial GraphNorm statistics (f32, before the bf16 cast of h).
        hm = h * valid_ref[...]
        stats_ref[...] = jnp.concatenate(
            [jnp.sum(hm, axis=0, keepdims=True),
             jnp.sum(hm * hm, axis=0, keepdims=True)], axis=0)[None]

        h_ref[...] = h.astype(h_ref.dtype)


def _sage_conv(counts, inv_deg, valid, feats, norm, wl, bl, wr, *, tm, tk, apply_norm):
    n_pad = counts.shape[0]
    cin = feats.shape[1]
    cout = wl.shape[1]
    grid = (n_pad // tm, n_pad // tk)
    nm, nv, ng, nb, na = norm
    vec = pl.BlockSpec((1, cin), lambda i, k: (0, 0))
    kernel = functools.partial(_sage_conv_kernel, tm=tm, tk=tk, apply_norm=apply_norm)
    return pl.pallas_call(
        kernel,
        out_shape=(jax.ShapeDtypeStruct((n_pad, cout), jnp.bfloat16),
                   jax.ShapeDtypeStruct((grid[0], 2, cout), jnp.float32)),
        grid_spec=pltpu.PrefetchScalarGridSpec(
            num_scalar_prefetch=0,
            grid=grid,
            in_specs=[
                pl.BlockSpec((tm, tk), lambda i, k: (i, k)),       # counts tile (int8)
                pl.BlockSpec((tm, 1), lambda i, k: (i, 0)),        # 1 / in-degree
                pl.BlockSpec((tm, 1), lambda i, k: (i, 0)),        # valid-row mask
                # Features stay VMEM-resident (constant block index); for graphs too
                # large to fit, fall back to a streamed (tk, cin) block instead.
                pl.BlockSpec((n_pad, cin), lambda i, k: (0, 0)),
                vec, vec, vec, vec, vec,                           # fused-norm params
                pl.BlockSpec((cin, cout), lambda i, k: (0, 0)),    # W_l
                pl.BlockSpec((1, cout), lambda i, k: (0, 0)),      # b_l
                pl.BlockSpec((cin, cout), lambda i, k: (0, 0)),    # W_r
            ],
            out_specs=(
                pl.BlockSpec((tm, cout), lambda i, k: (i, 0)),        # h_pre (bf16)
                pl.BlockSpec((1, 2, cout), lambda i, k: (i, 0, 0)),   # partial stats
            ),
            scratch_shapes=[pltpu.VMEM((tm, cin), jnp.float32)],
        ),
        compiler_params=pltpu.CompilerParams(
            dimension_semantics=("parallel", "arbitrary"),
            vmem_limit_bytes=_VMEM_LIMIT),
    )(counts, inv_deg, valid, feats, nm, nv, ng, nb, na, wl, bl, wr)


def _stats_to_mean_var(stats, alpha, n_valid):
    # stats: (num_row_tiles, 2, C) partial [sum, sum_sq]; tiny reduction in JAX glue.
    sums = jnp.sum(stats, axis=0)                          # (2, C)
    mean = sums[0:1] / n_valid
    ex2 = sums[1:2] / n_valid
    # E[(h - a*m)^2] = E[h^2] - a*(2 - a)*m^2
    var = jnp.maximum(ex2 - alpha * (2.0 - alpha) * mean * mean, 0.0)
    return mean, var


# ---------------------------------------------------------------------------
# Kernel 2: GraphNorm2 + ReLU + residual Linear(x)   (large streaming row tiles)
# ---------------------------------------------------------------------------
def _norm_relu_residual_kernel(h_ref, x_ref, nm_ref, nv_ref, ng_ref, nb_ref, na_ref,
                               wres_ref, bres_ref, out_ref):
    inv_std = lax.rsqrt(nv_ref[...] + EPS)                 # EUP slot
    h = h_ref[...].astype(jnp.float32)
    y = ng_ref[...] * (h - na_ref[...] * nm_ref[...]) * inv_std + nb_ref[...]
    y = jnp.maximum(y, 0.0)
    res = jnp.dot(x_ref[...], wres_ref[...],
                  preferred_element_type=jnp.float32) + bres_ref[...]
    out_ref[...] = res + y


def _norm_relu_residual(h, x, norm, wres, bres, *, tm):
    n_pad, c = h.shape
    cin = x.shape[1]
    nm, nv, ng, nb, na = norm
    vec = pl.BlockSpec((1, c), lambda i: (0, 0))
    return pl.pallas_call(
        _norm_relu_residual_kernel,
        out_shape=jax.ShapeDtypeStruct((n_pad, c), jnp.float32),
        grid=(n_pad // tm,),
        in_specs=[pl.BlockSpec((tm, c), lambda i: (i, 0)),
                  pl.BlockSpec((tm, cin), lambda i: (i, 0)),
                  vec, vec, vec, vec, vec,
                  pl.BlockSpec((cin, c), lambda i: (0, 0)),
                  pl.BlockSpec((1, c), lambda i: (0, 0))],
        out_specs=pl.BlockSpec((tm, c), lambda i: (i, 0)),
        compiler_params=pltpu.CompilerParams(
            dimension_semantics=("parallel",), vmem_limit_bytes=_VMEM_LIMIT),
    )(h, x, nm, nv, ng, nb, na, wres, bres)


# ---------------------------------------------------------------------------
# Full forward (== encode)
# ---------------------------------------------------------------------------
def link_prediction_gnn_forward(x, edge_index, params, *, tm=256, tk=512):
    """encode(x, edge_index) -> z of shape [N, out_channels]."""
    n, in_ch = x.shape
    emb = params["w1l"].shape[1]
    out_ch = params["wres"].shape[1]
    assert out_ch == emb, "residual(x) + x2 requires out_channels == embedding_size"
    assert tk % tm == 0, "tk must be a multiple of tm (node padding = tk, not lcm)"

    n_tile = max(tm, tk)
    n_pad = _round_up(n, n_tile)
    cin_pad = _pad_channels(in_ch)
    c_pad = _pad_channels(emb)

    # --- glue: int8 in-edge multiplicity matrix + O(E) inverse in-degree ---
    # int8 counts assume < 128 parallel edges between any (dst, src) pair.
    # TODO(synk): for large sparse graphs replace the dense N x N counts with CSR
    # row offsets + scalar-prefetch gather of neighbor rows (O(E*C) work, O(E) mem).
    src, dst = edge_index[0], edge_index[1]
    counts = jnp.zeros((n_pad, n_pad), jnp.int8).at[dst, src].add(
        jnp.ones_like(src, dtype=jnp.int8))
    deg = jnp.zeros((n_pad, 1), jnp.float32).at[dst].add(1.0)
    inv_deg = jnp.where(deg > 0.0, 1.0 / jnp.maximum(deg, 1.0), 0.0)
    valid = (jnp.arange(n_pad) < n).astype(jnp.float32)[:, None]

    x_pad = (jnp.zeros((n_pad, cin_pad), jnp.float32)
             .at[:n, :in_ch].set(x).astype(jnp.bfloat16))

    def pad_mat(w, r, c):
        return jnp.zeros((r, c), jnp.float32).at[:w.shape[0], :w.shape[1]].set(w)

    def pad_row(v, c):
        return jnp.zeros((1, c), jnp.float32).at[:, :v.shape[1]].set(v)

    w1l = pad_mat(params["w1l"], cin_pad, c_pad).astype(jnp.bfloat16)
    w1r = pad_mat(params["w1r"], cin_pad, c_pad).astype(jnp.bfloat16)
    w2l = pad_mat(params["w2l"], c_pad, c_pad).astype(jnp.bfloat16)
    w2r = pad_mat(params["w2r"], c_pad, c_pad).astype(jnp.bfloat16)
    wres = pad_mat(params["wres"], cin_pad, c_pad).astype(jnp.bfloat16)
    b1l = pad_row(params["b1l"], c_pad)
    b2l = pad_row(params["b2l"], c_pad)
    bres = pad_row(params["bres"], c_pad)
    g1, bt1, a1 = (pad_row(params["g1"], c_pad), pad_row(params["bt1"], c_pad),
                   pad_row(params["a1"], c_pad))
    g2, bt2, a2 = (pad_row(params["g2"], c_pad), pad_row(params["bt2"], c_pad),
                   pad_row(params["a2"], c_pad))

    # ---- layer 1: SAGEConv + masked partial GraphNorm stats (no input norm) ----
    dummy = jnp.zeros((1, cin_pad), jnp.float32)
    h1_pre, stats1 = _sage_conv(counts, inv_deg, valid, x_pad,
                                (dummy, dummy, dummy, dummy, dummy),
                                w1l, b1l, w1r, tm=tm, tk=tk, apply_norm=False)
    mean1, var1 = _stats_to_mean_var(stats1, a1, n)

    # ---- layer 2: GraphNorm1 + ReLU fused onto the conv input (dropout = identity) ----
    h2_pre, stats2 = _sage_conv(counts, inv_deg, valid, h1_pre,
                                (mean1, var1, g1, bt1, a1),
                                w2l, b2l, w2r, tm=tm, tk=tk, apply_norm=True)
    mean2, var2 = _stats_to_mean_var(stats2, a2, n)

    # ---- GraphNorm2 + ReLU + residual Linear(x), large row tile ----
    z = _norm_relu_residual(h2_pre, x_pad, (mean2, var2, g2, bt2, a2), wres, bres,
                            tm=n_tile)
    return z[:n, :out_ch]


# ---------------------------------------------------------------------------
# Pure-JAX f32 reference (faithful to the PyTorch module) + param init
# ---------------------------------------------------------------------------
def _reference_forward(x, edge_index, params):
    n = x.shape[0]
    src, dst = edge_index[0], edge_index[1]
    counts = jnp.zeros((n, n), jnp.float32).at[dst, src].add(1.0)
    deg = counts.sum(axis=1, keepdims=True)
    adj = counts / jnp.where(deg > 0.0, deg, 1.0)

    def gn(h, g, b, a):
        m = h.mean(0, keepdims=True)
        c = h - a * m
        v = (c * c).mean(0, keepdims=True)
        return g * c / jnp.sqrt(v + EPS) + b

    h1 = adj @ x @ params["w1l"] + params["b1l"] + x @ params["w1r"]
    h1 = jnp.maximum(gn(h1, params["g1"], params["bt1"], params["a1"]), 0.0)
    h2 = adj @ h1 @ params["w2l"] + params["b2l"] + h1 @ params["w2r"]
    h2 = jnp.maximum(gn(h2, params["g2"], params["bt2"], params["a2"]), 0.0)
    return x @ params["wres"] + params["bres"] + h2


def init_params(key, in_channels, embedding_size, out_channels):
    ks = jax.random.split(key, 14)
    s = 0.1
    return {
        # SAGEConv1: lin_l (with bias), lin_r (no bias)
        "w1l": s * jax.random.normal(ks[0], (in_channels, embedding_size), jnp.float32),
        "b1l": s * jax.random.normal(ks[1], (1, embedding_size), jnp.float32),
        "w1r": s * jax.random.normal(ks[2], (in_channels, embedding_size), jnp.float32),
        # GraphNorm1 (perturbed from PyG default init to exercise all terms)
        "g1": 1.0 + 0.1 * jax.random.normal(ks[3], (1, embedding_size), jnp.float32),
        "bt1": 0.1 * jax.random.normal(ks[4], (1, embedding_size), jnp.float32),
        "a1": 1.0 + 0.1 * jax.random.normal(ks[5], (1, embedding_size), jnp.float32),
        # SAGEConv2
        "w2l": s * jax.random.normal(ks[6], (embedding_size, embedding_size), jnp.float32),
        "b2l": s * jax.random.normal(ks[7], (1, embedding_size), jnp.float32),
        "w2r": s * jax.random.normal(ks[8], (embedding_size, embedding_size), jnp.float32),
        # GraphNorm2
        "g2": 1.0 + 0.1 * jax.random.normal(ks[9], (1, embedding_size), jnp.float32),
        "bt2": 0.1 * jax.random.normal(ks[10], (1, embedding_size), jnp.float32),
        "a2": 1.0 + 0.1 * jax.random.normal(ks[11], (1, embedding_size), jnp.float32),
        # residual Linear(in_channels, out_channels)
        "wres": s * jax.random.normal(ks[12], (in_channels, out_channels), jnp.float32),
        "bres": s * jax.random.normal(ks[13], (1, out_channels), jnp.float32),
    }


if __name__ == "__main__":
    # Small shapes: N nodes, in_channels features; out_channels == embedding_size
    # (required by the module: residual(x) + x2 must add elementwise).
    N, IN_CH, EMB, OUT_CH, E = 300, 32, 32, 32, 900

    key = jax.random.PRNGKey(0)
    k_x, k_e, k_p = jax.random.split(key, 3)

    x = jax.random.normal(k_x, (N, IN_CH), jnp.float32)
    edge_index = jax.random.randint(k_e, (2, E), 0, N, dtype=jnp.int32)
    params = init_params(k_p, IN_CH, EMB, OUT_CH)

    # tm=256 / tk=512 -> n_pad = 512, row grid = 2 (even, balances v7x's two cores).
    fwd = jax.jit(functools.partial(link_prediction_gnn_forward, tm=256, tk=512))
    z = jax.block_until_ready(fwd(x, edge_index, params))

    z_ref = _reference_forward(x, edge_index, params)
    assert z.shape == (N, OUT_CH)
    # bf16 matmul operands + bf16 intermediate storage vs the f32 reference.
    assert jnp.allclose(z, z_ref, atol=1e-1, rtol=1e-1), "mismatch vs JAX reference"

    print("KERNEL_OK")
</pallas_src>

<mosaic_0001>
module attributes {stable_mosaic.version = 11 : i64} {
  func.func @_sage_conv_kernel(%arg0: i32, %arg1: i32, %arg2: memref<256x512xi8, #tpu.memory_space<vmem>>, %arg3: memref<256x1xf32, #tpu.memory_space<vmem>>, %arg4: memref<256x1xf32, #tpu.memory_space<vmem>>, %arg5: memref<512x128xbf16, #tpu.memory_space<vmem>>, %arg6: memref<1x128xf32, #tpu.memory_space<vmem>>, %arg7: memref<1x128xf32, #tpu.memory_space<vmem>>, %arg8: memref<1x128xf32, #tpu.memory_space<vmem>>, %arg9: memref<1x128xf32, #tpu.memory_space<vmem>>, %arg10: memref<1x128xf32, #tpu.memory_space<vmem>>, %arg11: memref<128x128xbf16, #tpu.memory_space<vmem>>, %arg12: memref<1x128xf32, #tpu.memory_space<vmem>>, %arg13: memref<128x128xbf16, #tpu.memory_space<vmem>>, %arg14: memref<256x128xbf16, #tpu.memory_space<vmem>>, %arg15: memref<1x2x128xf32, #tpu.memory_space<vmem>>, %arg16: memref<256x128xf32, #tpu.memory_space<vmem>>) attributes {dimension_semantics = [#tpu.dimension_semantics<parallel>, #tpu.dimension_semantics<arbitrary>], iteration_bounds = array<i64: 2, 1>, scalar_prefetch = 0 : i64, scratch_operands = 1 : i64, tpu.core_type = #tpu.core_type<tc>, window_params = [{transform_indices = @transform_0, window_bounds = array<i64: 256, 512>}, {transform_indices = @transform_1, window_bounds = array<i64: 256, 1>}, {transform_indices = @transform_2, window_bounds = array<i64: 256, 1>}, {pipeline_mode = #tpu.pipeline_mode<synchronous>, transform_indices = @transform_3, window_bounds = array<i64: 512, 128>}, {pipeline_mode = #tpu.pipeline_mode<synchronous>, transform_indices = @transform_4, window_bounds = array<i64: 1, 128>}, {pipeline_mode = #tpu.pipeline_mode<synchronous>, transform_indices = @transform_5, window_bounds = array<i64: 1, 128>}, {pipeline_mode = #tpu.pipeline_mode<synchronous>, transform_indices = @transform_6, window_bounds = array<i64: 1, 128>}, {pipeline_mode = #tpu.pipeline_mode<synchronous>, transform_indices = @transform_7, window_bounds = array<i64: 1, 128>}, {pipeline_mode = #tpu.pipeline_mode<synchronous>, transform_indices = @transform_8, window_bounds = array<i64: 1, 128>}, {pipeline_mode = #tpu.pipeline_mode<synchronous>, transform_indices = @transform_9, window_bounds = array<i64: 128, 128>}, {pipeline_mode = #tpu.pipeline_mode<synchronous>, transform_indices = @transform_10, window_bounds = array<i64: 1, 128>}, {pipeline_mode = #tpu.pipeline_mode<synchronous>, transform_indices = @transform_11, window_bounds = array<i64: 128, 128>}, {transform_indices = @transform_12, window_bounds = array<i64: 256, 128>}, {transform_indices = @transform_13, window_bounds = array<i64: 1, 2, 128>}]} {
    %c256_i32 = arith.constant 256 : i32
    %0 = arith.muli %arg0, %c256_i32 : i32
    %c512_i32 = arith.constant 512 : i32
    %1 = arith.muli %arg1, %c512_i32 : i32
    %c0_i32 = arith.constant 0 : i32
    %2 = arith.cmpi eq, %arg1, %c0_i32 : i32
    %3 = arith.extui %2 : i1 to i32
    %c0_i32_0 = arith.constant 0 : i32
    %4 = arith.cmpi ne, %3, %c0_i32_0 : i32
    scf.if %4 {
      %cst_9 = arith.constant 0.000000e+00 : f32
      %17 = vector.broadcast %cst_9 : f32 to vector<256x128xf32>
      %c0_10 = arith.constant 0 : index
      %c0_11 = arith.constant 0 : index
      %18 = vector.load %arg16[%c0_10, %c0_11] : memref<256x128xf32, #tpu.memory_space<vmem>>, vector<256x128xf32>
      tpu.vector_store %arg16[%c0_10, %c0_11], %17 {strides = array<i32>} : memref<256x128xf32, #tpu.memory_space<vmem>>, vector<256x128xf32>,
    } else {
    }
    %c0 = arith.constant 0 : index
    %c0_1 = arith.constant 0 : index
    %5 = vector.load %arg2[%c0, %c0_1] : memref<256x512xi8, #tpu.memory_space<vmem>>, vector<256x512xi8>
    %6 = arith.sitofp %5 : vector<256x512xi8> to vector<256x512xf32>
    %7 = arith.truncf %6 : vector<256x512xf32> to vector<256x512xbf16>
    %c0_2 = arith.constant 0 : index
    %c0_3 = arith.constant 0 : index
    %8 = vector.load %arg16[%c0_2, %c0_3] : memref<256x128xf32, #tpu.memory_space<vmem>>, vector<256x128xf32>
    %9 = arith.index_cast %1 : i32 to index
    %c0_4 = arith.constant 0 : index
    %10 = vector.load %arg5[%9, %c0_4] : memref<512x128xbf16, #tpu.memory_space<vmem>>, vector<512x128xbf16>
    %cst = arith.constant dense<0.000000e+00> : vector<256x128xf32>
    %11 = tpu.matmul %7, %10, %cst {dimension_numbers = #tpu.dot_dimension_numbers<[1], [0], [0], [1], [0, 0, 1, 1], [], []>} : vector<256x512xbf16>, vector<512x128xbf16>, vector<256x128xf32> -> vector<256x128xf32>
    %12 = arith.addf %8, %11 : vector<256x128xf32>
    %c0_5 = arith.constant 0 : index
    %c0_6 = arith.constant 0 : index
    %13 = vector.load %arg16[%c0_5, %c0_6] : memref<256x128xf32, #tpu.memory_space<vmem>>, vector<256x128xf32>
    tpu.vector_store %arg16[%c0_5, %c0_6], %12 {strides = array<i32>} : memref<256x128xf32, #tpu.memory_space<vmem>>, vector<256x128xf32>,
    %c0_i32_7 = arith.constant 0 : i32
    %14 = arith.cmpi eq, %arg1, %c0_i32_7 : i32
    %15 = arith.extui %14 : i1 to i32
    %c0_i32_8 = arith.constant 0 : i32
    %16 = arith.cmpi ne, %15, %c0_i32_8 : i32
    scf.if %16 {
      %c0_9 = arith.constant 0 : index
      %c0_10 = arith.constant 0 : index
      %17 = vector.load %arg16[%c0_9, %c0_10] : memref<256x128xf32, #tpu.memory_space<vmem>>, vector<256x128xf32>
      %c0_11 = arith.constant 0 : index
      %c0_12 = arith.constant 0 : index
      %18 = vector.load %arg3[%c0_11, %c0_12] : memref<256x1xf32, #tpu.memory_space<vmem>>, vector<256x1xf32>
      %19 = vector.broadcast %18 : vector<256x1xf32> to vector<256x128xf32>
      %20 = arith.mulf %17, %19 : vector<256x128xf32>
      %21 = arith.index_cast %0 : i32 to index
      %c0_13 = arith.constant 0 : index
      %22 = vector.load %arg5[%21, %c0_13] : memref<512x128xbf16, #tpu.memory_space<vmem>>, vector<256x128xbf16>
      %23 = arith.truncf %20 : vector<256x128xf32> to vector<256x128xbf16>
      %c0_14 = arith.constant 0 : index
      %c0_15 = arith.constant 0 : index
      %24 = vector.load %arg11[%c0_14, %c0_15] : memref<128x128xbf16, #tpu.memory_space<vmem>>, vector<128x128xbf16>
      %cst_16 = arith.constant dense<0.000000e+00> : vector<256x128xf32>
      %25 = tpu.matmul %23, %24, %cst_16 {dimension_numbers = #tpu.dot_dimension_numbers<[1], [0], [0], [1], [0, 0, 1, 1], [], []>} : vector<256x128xbf16>, vector<128x128xbf16>, vector<256x128xf32> -> vector<256x128xf32>
      %c0_17 = arith.constant 0 : index
      %c0_18 = arith.constant 0 : index
      %26 = vector.load %arg12[%c0_17, %c0_18] : memref<1x128xf32, #tpu.memory_space<vmem>>, vector<1x128xf32>
      %27 = vector.broadcast %26 : vector<1x128xf32> to vector<256x128xf32>
      %28 = arith.addf %25, %27 : vector<256x128xf32>
      %c0_19 = arith.constant 0 : index
      %c0_20 = arith.constant 0 : index
      %29 = vector.load %arg13[%c0_19, %c0_20] : memref<128x128xbf16, #tpu.memory_space<vmem>>, vector<128x128xbf16>
      %cst_21 = arith.constant dense<0.000000e+00> : vector<256x128xf32>
      %30 = tpu.matmul %22, %29, %cst_21 {dimension_numbers = #tpu.dot_dimension_numbers<[1], [0], [0], [1], [0, 0, 1, 1], [], []>} : vector<256x128xbf16>, vector<128x128xbf16>, vector<256x128xf32> -> vector<256x128xf32>
      %31 = arith.addf %28, %30 : vector<256x128xf32>
      %c0_22 = arith.constant 0 : index
      %c0_23 = arith.constant 0 : index
      %32 = vector.load %arg4[%c0_22, %c0_23] : memref<256x1xf32, #tpu.memory_space<vmem>>, vector<256x1xf32>
      %33 = vector.broadcast %32 : vector<256x1xf32> to vector<256x128xf32>
      %34 = arith.mulf %31, %33 : vector<256x128xf32>
      %cst_24 = arith.constant dense<0.000000e+00> : vector<128xf32>
      %35 = vector.multi_reduction <add>, %34, %cst_24 [0] : vector<256x128xf32> to vector<128xf32>
      %36 = vector.shape_cast %35 : vector<128xf32> to vector<1x128xf32>
      %37 = arith.mulf %34, %34 : vector<256x128xf32>
      %cst_25 = arith.constant dense<0.000000e+00> : vector<128xf32>
      %38 = vector.multi_reduction <add>, %37, %cst_25 [0] : vector<256x128xf32> to vector<128xf32>
      %39 = vector.shape_cast %38 : vector<128xf32> to vector<1x128xf32>
      %40 = tpu.concatenate %36, %39 in 0 : vector<1x128xf32>, vector<1x128xf32> -> vector<2x128xf32>
      %41 = vector.shape_cast %40 : vector<2x128xf32> to vector<1x2x128xf32>
      %c0_26 = arith.constant 0 : index
      %c0_27 = arith.constant 0 : index
      %c0_28 = arith.constant 0 : index
      %42 = vector.load %arg15[%c0_26, %c0_27, %c0_28] : memref<1x2x128xf32, #tpu.memory_space<vmem>>, vector<1x2x128xf32>
      tpu.vector_store %arg15[%c0_26, %c0_27, %c0_28], %41 {strides = array<i32>} : memref<1x2x128xf32, #tpu.memory_space<vmem>>, vector<1x2x128xf32>,
      %43 = arith.truncf %31 : vector<256x128xf32> to vector<256x128xbf16>
      %c0_29 = arith.constant 0 : index
      %c0_30 = arith.constant 0 : index
      %44 = vector.load %arg14[%c0_29, %c0_30] : memref<256x128xbf16, #tpu.memory_space<vmem>>, vector<256x128xbf16>
      tpu.vector_store %arg14[%c0_29, %c0_30], %43 {strides = array<i32>} : memref<256x128xbf16, #tpu.memory_space<vmem>>, vector<256x128xbf16>,
    } else {
    }
    return
  }
  func.func @transform_0(%arg0: i32, %arg1: i32) -> (i32, i32) {
    %c0_i32 = arith.constant 0 : i32
    return %arg0, %arg1 : i32, i32
  }
  func.func @transform_1(%arg0: i32, %arg1: i32) -> (i32, i32) {
    %c0_i32 = arith.constant 0 : i32
    %c0_i32_0 = arith.constant 0 : i32
    return %arg0, %c0_i32 : i32, i32
  }
  func.func @transform_2(%arg0: i32, %arg1: i32) -> (i32, i32) {
    %c0_i32 = arith.constant 0 : i32
    %c0_i32_0 = arith.constant 0 : i32
    return %arg0, %c0_i32 : i32, i32
  }
  func.func @transform_3(%arg0: i32, %arg1: i32) -> (i32, i32) {
    %c0_i32 = arith.constant 0 : i32
    %c0_i32_0 = arith.constant 0 : i32
    %c0_i32_1 = arith.constant 0 : i32
    return %c0_i32, %c0_i32_0 : i32, i32
  }
  func.func @transform_4(%arg0: i32, %arg1: i32) -> (i32, i32) {
    %c0_i32 = arith.constant 0 : i32
    %c0_i32_0 = arith.constant 0 : i32
    %c0_i32_1 = arith.constant 0 : i32
    return %c0_i32, %c0_i32_0 : i32, i32
  }
  func.func @transform_5(%arg0: i32, %arg1: i32) -> (i32, i32) {
    %c0_i32 = arith.constant 0 : i32
    %c0_i32_0 = arith.constant 0 : i32
    %c0_i32_1 = arith.constant 0 : i32
    return %c0_i32, %c0_i32_0 : i32, i32
  }
  func.func @transform_6(%arg0: i32, %arg1: i32) -> (i32, i32) {
    %c0_i32 = arith.constant 0 : i32
    %c0_i32_0 = arith.constant 0 : i32
    %c0_i32_1 = arith.constant 0 : i32
    return %c0_i32, %c0_i32_0 : i32, i32
  }
  func.func @transform_7(%arg0: i32, %arg1: i32) -> (i32, i32) {
    %c0_i32 = arith.constant 0 : i32
    %c0_i32_0 = arith.constant 0 : i32
    %c0_i32_1 = arith.constant 0 : i32
    return %c0_i32, %c0_i32_0 : i32, i32
  }
  func.func @transform_8(%arg0: i32, %arg1: i32) -> (i32, i32) {
    %c0_i32 = arith.constant 0 : i32
    %c0_i32_0 = arith.constant 0 : i32
    %c0_i32_1 = arith.constant 0 : i32
    return %c0_i32, %c0_i32_0 : i32, i32
  }
  func.func @transform_9(%arg0: i32, %arg1: i32) -> (i32, i32) {
    %c0_i32 = arith.constant 0 : i32
    %c0_i32_0 = arith.constant 0 : i32
    %c0_i32_1 = arith.constant 0 : i32
    return %c0_i32, %c0_i32_0 : i32, i32
  }
  func.func @transform_10(%arg0: i32, %arg1: i32) -> (i32, i32) {
    %c0_i32 = arith.constant 0 : i32
    %c0_i32_0 = arith.constant 0 : i32
    %c0_i32_1 = arith.constant 0 : i32
    return %c0_i32, %c0_i32_0 : i32, i32
  }
  func.func @transform_11(%arg0: i32, %arg1: i32) -> (i32, i32) {
    %c0_i32 = arith.constant 0 : i32
    %c0_i32_0 = arith.constant 0 : i32
    %c0_i32_1 = arith.constant 0 : i32
    return %c0_i32, %c0_i32_0 : i32, i32
  }
  func.func @transform_12(%arg0: i32, %arg1: i32) -> (i32, i32) {
    %c0_i32 = arith.constant 0 : i32
    %c0_i32_0 = arith.constant 0 : i32
    return %arg0, %c0_i32 : i32, i32
  }
  func.func @transform_13(%arg0: i32, %arg1: i32) -> (i32, i32, i32) {
    %c0_i32 = arith.constant 0 : i32
    %c0_i32_0 = arith.constant 0 : i32
    %c0_i32_1 = arith.constant 0 : i32
    return %arg0, %c0_i32, %c0_i32_0 : i32, i32, i32
  }
}

module attributes {stable_mosaic.version = 11 : i64} {
  func.func @_sage_conv_kernel(%arg0: i32, %arg1: i32, %arg2: memref<256x512xi8, #tpu.memory_space<vmem>>, %arg3: memref<256x1xf32, #tpu.memory_space<vmem>>, %arg4: memref<256x1xf32, #tpu.memory_space<vmem>>, %arg5: memref<512x128xbf16, #tpu.memory_space<vmem>>, %arg6: memref<1x128xf32, #tpu.memory_space<vmem>>, %arg7: memref<1x128xf32, #tpu.memory_space<vmem>>, %arg8: memref<1x128xf32, #tpu.memory_space<vmem>>, %arg9: memref<1x128xf32, #tpu.memory_space<vmem>>, %arg10: memref<1x128xf32, #tpu.memory_space<vmem>>, %arg11: memref<128x128xbf16, #tpu.memory_space<vmem>>, %arg12: memref<1x128xf32, #tpu.memory_space<vmem>>, %arg13: memref<128x128xbf16, #tpu.memory_space<vmem>>, %arg14: memref<256x128xbf16, #tpu.memory_space<vmem>>, %arg15: memref<1x2x128xf32, #tpu.memory_space<vmem>>, %arg16: memref<256x128xf32, #tpu.memory_space<vmem>>) attributes {dimension_semantics = [#tpu.dimension_semantics<parallel>, #tpu.dimension_semantics<arbitrary>], iteration_bounds = array<i64: 2, 1>, scalar_prefetch = 0 : i64, scratch_operands = 1 : i64, tpu.core_type = #tpu.core_type<tc>, window_params = [{transform_indices = @transform_0, window_bounds = array<i64: 256, 512>}, {transform_indices = @transform_1, window_bounds = array<i64: 256, 1>}, {transform_indices = @transform_2, window_bounds = array<i64: 256, 1>}, {pipeline_mode = #tpu.pipeline_mode<synchronous>, transform_indices = @transform_3, window_bounds = array<i64: 512, 128>}, {pipeline_mode = #tpu.pipeline_mode<synchronous>, transform_indices = @transform_4, window_bounds = array<i64: 1, 128>}, {pipeline_mode = #tpu.pipeline_mode<synchronous>, transform_indices = @transform_5, window_bounds = array<i64: 1, 128>}, {pipeline_mode = #tpu.pipeline_mode<synchronous>, transform_indices = @transform_6, window_bounds = array<i64: 1, 128>}, {pipeline_mode = #tpu.pipeline_mode<synchronous>, transform_indices = @transform_7, window_bounds = array<i64: 1, 128>}, {pipeline_mode = #tpu.pipeline_mode<synchronous>, transform_indices = @transform_8, window_bounds = array<i64: 1, 128>}, {pipeline_mode = #tpu.pipeline_mode<synchronous>, transform_indices = @transform_9, window_bounds = array<i64: 128, 128>}, {pipeline_mode = #tpu.pipeline_mode<synchronous>, transform_indices = @transform_10, window_bounds = array<i64: 1, 128>}, {pipeline_mode = #tpu.pipeline_mode<synchronous>, transform_indices = @transform_11, window_bounds = array<i64: 128, 128>}, {transform_indices = @transform_12, window_bounds = array<i64: 256, 128>}, {transform_indices = @transform_13, window_bounds = array<i64: 1, 2, 128>}]} {
    %c256_i32 = arith.constant 256 : i32
    %0 = arith.muli %arg0, %c256_i32 : i32
    %c512_i32 = arith.constant 512 : i32
    %1 = arith.muli %arg1, %c512_i32 : i32
    %c0_i32 = arith.constant 0 : i32
    %2 = arith.cmpi eq, %arg1, %c0_i32 : i32
    %3 = arith.extui %2 : i1 to i32
    %c0_i32_0 = arith.constant 0 : i32
    %4 = arith.cmpi ne, %3, %c0_i32_0 : i32
    scf.if %4 {
      %cst_21 = arith.constant 0.000000e+00 : f32
      %38 = vector.broadcast %cst_21 : f32 to vector<256x128xf32>
      %c0_22 = arith.constant 0 : index
      %c0_23 = arith.constant 0 : index
      %39 = vector.load %arg16[%c0_22, %c0_23] : memref<256x128xf32, #tpu.memory_space<vmem>>, vector<256x128xf32>
      tpu.vector_store %arg16[%c0_22, %c0_23], %38 {strides = array<i32>} : memref<256x128xf32, #tpu.memory_space<vmem>>, vector<256x128xf32>,
    } else {
    }
    %c0 = arith.constant 0 : index
    %c0_1 = arith.constant 0 : index
    %5 = vector.load %arg2[%c0, %c0_1] : memref<256x512xi8, #tpu.memory_space<vmem>>, vector<256x512xi8>
    %6 = arith.sitofp %5 : vector<256x512xi8> to vector<256x512xf32>
    %7 = arith.truncf %6 : vector<256x512xf32> to vector<256x512xbf16>
    %c0_2 = arith.constant 0 : index
    %c0_3 = arith.constant 0 : index
    %8 = vector.load %arg16[%c0_2, %c0_3] : memref<256x128xf32, #tpu.memory_space<vmem>>, vector<256x128xf32>
    %9 = arith.index_cast %1 : i32 to index
    %c0_4 = arith.constant 0 : index
    %10 = vector.load %arg5[%9, %c0_4] : memref<512x128xbf16, #tpu.memory_space<vmem>>, vector<512x128xbf16>
    %c0_5 = arith.constant 0 : index
    %c0_6 = arith.constant 0 : index
    %11 = vector.load %arg7[%c0_5, %c0_6] : memref<1x128xf32, #tpu.memory_space<vmem>>, vector<1x128xf32>
    %cst = arith.constant 9.99999974E-6 : f32
    %12 = vector.broadcast %cst : f32 to vector<1x128xf32>
    %13 = arith.addf %11, %12 : vector<1x128xf32>
    %14 = math.rsqrt %13 : vector<1x128xf32>
    %c0_7 = arith.constant 0 : index
    %c0_8 = arith.constant 0 : index
    %15 = vector.load %arg8[%c0_7, %c0_8] : memref<1x128xf32, #tpu.memory_space<vmem>>, vector<1x128xf32>
    %16 = arith.extf %10 : vector<512x128xbf16> to vector<512x128xf32>
    %c0_9 = arith.constant 0 : index
    %c0_10 = arith.constant 0 : index
    %17 = vector.load %arg10[%c0_9, %c0_10] : memref<1x128xf32, #tpu.memory_space<vmem>>, vector<1x128xf32>
    %c0_11 = arith.constant 0 : index
    %c0_12 = arith.constant 0 : index
    %18 = vector.load %arg6[%c0_11, %c0_12] : memref<1x128xf32, #tpu.memory_space<vmem>>, vector<1x128xf32>
    %19 = arith.mulf %17, %18 : vector<1x128xf32>
    %20 = vector.broadcast %19 : vector<1x128xf32> to vector<512x128xf32>
    %21 = arith.subf %16, %20 : vector<512x128xf32>
    %22 = vector.broadcast %15 : vector<1x128xf32> to vector<512x128xf32>
    %23 = arith.mulf %22, %21 : vector<512x128xf32>
    %24 = vector.broadcast %14 : vector<1x128xf32> to vector<512x128xf32>
    %25 = arith.mulf %23, %24 : vector<512x128xf32>
    %c0_13 = arith.constant 0 : index
    %c0_14 = arith.constant 0 : index
    %26 = vector.load %arg9[%c0_13, %c0_14] : memref<1x128xf32, #tpu.memory_space<vmem>>, vector<1x128xf32>
    %27 = vector.broadcast %26 : vector<1x128xf32> to vector<512x128xf32>
    %28 = arith.addf %25, %27 : vector<512x128xf32>
    %cst_15 = arith.constant 0.000000e+00 : f32
    %29 = vector.broadcast %cst_15 : f32 to vector<512x128xf32>
    %30 = arith.maximumf %28, %29 : vector<512x128xf32>
    %31 = arith.truncf %30 : vector<512x128xf32> to vector<512x128xbf16>
    %cst_16 = arith.constant dense<0.000000e+00> : vector<256x128xf32>
    %32 = tpu.matmul %7, %31, %cst_16 {dimension_numbers = #tpu.dot_dimension_numbers<[1], [0], [0], [1], [0, 0, 1, 1], [], []>} : vector<256x512xbf16>, vector<512x128xbf16>, vector<256x128xf32> -> vector<256x128xf32>
    %33 = arith.addf %8, %32 : vector<256x128xf32>
    %c0_17 = arith.constant 0 : index
    %c0_18 = arith.constant 0 : index
    %34 = vector.load %arg16[%c0_17, %c0_18] : memref<256x128xf32, #tpu.memory_space<vmem>>, vector<256x128xf32>
    tpu.vector_store %arg16[%c0_17, %c0_18], %33 {strides = array<i32>} : memref<256x128xf32, #tpu.memory_space<vmem>>, vector<256x128xf32>,
    %c0_i32_19 = arith.constant 0 : i32
    %35 = arith.cmpi eq, %arg1, %c0_i32_19 : i32
    %36 = arith.extui %35 : i1 to i32
    %c0_i32_20 = arith.constant 0 : i32
    %37 = arith.cmpi ne, %36, %c0_i32_20 : i32
    scf.if %37 {
      %c0_21 = arith.constant 0 : index
      %c0_22 = arith.constant 0 : index
      %38 = vector.load %arg16[%c0_21, %c0_22] : memref<256x128xf32, #tpu.memory_space<vmem>>, vector<256x128xf32>
      %c0_23 = arith.constant 0 : index
      %c0_24 = arith.constant 0 : index
      %39 = vector.load %arg3[%c0_23, %c0_24] : memref<256x1xf32, #tpu.memory_space<vmem>>, vector<256x1xf32>
      %40 = vector.broadcast %39 : vector<256x1xf32> to vector<256x128xf32>
      %41 = arith.mulf %38, %40 : vector<256x128xf32>
      %42 = arith.index_cast %0 : i32 to index
      %c0_25 = arith.constant 0 : index
      %43 = vector.load %arg5[%42, %c0_25] : memref<512x128xbf16, #tpu.memory_space<vmem>>, vector<256x128xbf16>
      %c0_26 = arith.constant 0 : index
      %c0_27 = arith.constant 0 : index
      %44 = vector.load %arg7[%c0_26, %c0_27] : memref<1x128xf32, #tpu.memory_space<vmem>>, vector<1x128xf32>
      %cst_28 = arith.constant 9.99999974E-6 : f32
      %45 = vector.broadcast %cst_28 : f32 to vector<1x128xf32>
      %46 = arith.addf %44, %45 : vector<1x128xf32>
      %47 = math.rsqrt %46 : vector<1x128xf32>
      %c0_29 = arith.constant 0 : index
      %c0_30 = arith.constant 0 : index
      %48 = vector.load %arg8[%c0_29, %c0_30] : memref<1x128xf32, #tpu.memory_space<vmem>>, vector<1x128xf32>
      %49 = arith.extf %43 : vector<256x128xbf16> to vector<256x128xf32>
      %c0_31 = arith.constant 0 : index
      %c0_32 = arith.constant 0 : index
      %50 = vector.load %arg10[%c0_31, %c0_32] : memref<1x128xf32, #tpu.memory_space<vmem>>, vector<1x128xf32>
      %c0_33 = arith.constant 0 : index
      %c0_34 = arith.constant 0 : index
      %51 = vector.load %arg6[%c0_33, %c0_34] : memref<1x128xf32, #tpu.memory_space<vmem>>, vector<1x128xf32>
      %52 = arith.mulf %50, %51 : vector<1x128xf32>
      %53 = vector.broadcast %52 : vector<1x128xf32> to vector<256x128xf32>
      %54 = arith.subf %49, %53 : vector<256x128xf32>
      %55 = vector.broadcast %48 : vector<1x128xf32> to vector<256x128xf32>
      %56 = arith.mulf %55, %54 : vector<256x128xf32>
      %57 = vector.broadcast %47 : vector<1x128xf32> to vector<256x128xf32>
      %58 = arith.mulf %56, %57 : vector<256x128xf32>
      %c0_35 = arith.constant 0 : index
      %c0_36 = arith.constant 0 : index
      %59 = vector.load %arg9[%c0_35, %c0_36] : memref<1x128xf32, #tpu.memory_space<vmem>>, vector<1x128xf32>
      %60 = vector.broadcast %59 : vector<1x128xf32> to vector<256x128xf32>
      %61 = arith.addf %58, %60 : vector<256x128xf32>
      %cst_37 = arith.constant 0.000000e+00 : f32
      %62 = vector.broadcast %cst_37 : f32 to vector<256x128xf32>
      %63 = arith.maximumf %61, %62 : vector<256x128xf32>
      %64 = arith.truncf %63 : vector<256x128xf32> to vector<256x128xbf16>
      %65 = arith.truncf %41 : vector<256x128xf32> to vector<256x128xbf16>
      %c0_38 = arith.constant 0 : index
      %c0_39 = arith.constant 0 : index
      %66 = vector.load %arg11[%c0_38, %c0_39] : memref<128x128xbf16, #tpu.memory_space<vmem>>, vector<128x128xbf16>
      %cst_40 = arith.constant dense<0.000000e+00> : vector<256x128xf32>
      %67 = tpu.matmul %65, %66, %cst_40 {dimension_numbers = #tpu.dot_dimension_numbers<[1], [0], [0], [1], [0, 0, 1, 1], [], []>} : vector<256x128xbf16>, vector<128x128xbf16>, vector<256x128xf32> -> vector<256x128xf32>
      %c0_41 = arith.constant 0 : index
      %c0_42 = arith.constant 0 : index
      %68 = vector.load %arg12[%c0_41, %c0_42] : memref<1x128xf32, #tpu.memory_space<vmem>>, vector<1x128xf32>
      %69 = vector.broadcast %68 : vector<1x128xf32> to vector<256x128xf32>
      %70 = arith.addf %67, %69 : vector<256x128xf32>
      %c0_43 = arith.constant 0 : index
      %c0_44 = arith.constant 0 : index
      %71 = vector.load %arg13[%c0_43, %c0_44] : memref<128x128xbf16, #tpu.memory_space<vmem>>, vector<128x128xbf16>
      %cst_45 = arith.constant dense<0.000000e+00> : vector<256x128xf32>
      %72 = tpu.matmul %64, %71, %cst_45 {dimension_numbers = #tpu.dot_dimension_numbers<[1], [0], [0], [1], [0, 0, 1, 1], [], []>} : vector<256x128xbf16>, vector<128x128xbf16>, vector<256x128xf32> -> vector<256x128xf32>
      %73 = arith.addf %70, %72 : vector<256x128xf32>
      %c0_46 = arith.constant 0 : index
      %c0_47 = arith.constant 0 : index
      %74 = vector.load %arg4[%c0_46, %c0_47] : memref<256x1xf32, #tpu.memory_space<vmem>>, vector<256x1xf32>
      %75 = vector.broadcast %74 : vector<256x1xf32> to vector<256x128xf32>
      %76 = arith.mulf %73, %75 : vector<256x128xf32>
      %cst_48 = arith.constant dense<0.000000e+00> : vector<128xf32>
      %77 = vector.multi_reduction <add>, %76, %cst_48 [0] : vector<256x128xf32> to vector<128xf32>
      %78 = vector.shape_cast %77 : vector<128xf32> to vector<1x128xf32>
      %79 = arith.mulf %76, %76 : vector<256x128xf32>
      %cst_49 = arith.constant dense<0.000000e+00> : vector<128xf32>
      %80 = vector.multi_reduction <add>, %79, %cst_49 [0] : vector<256x128xf32> to vector<128xf32>
      %81 = vector.shape_cast %80 : vector<128xf32> to vector<1x128xf32>
      %82 = tpu.concatenate %78, %81 in 0 : vector<1x128xf32>, vector<1x128xf32> -> vector<2x128xf32>
      %83 = vector.shape_cast %82 : vector<2x128xf32> to vector<1x2x128xf32>
      %c0_50 = arith.constant 0 : index
      %c0_51 = arith.constant 0 : index
      %c0_52 = arith.constant 0 : index
      %84 = vector.load %arg15[%c0_50, %c0_51, %c0_52] : memref<1x2x128xf32, #tpu.memory_space<vmem>>, vector<1x2x128xf32>
      tpu.vector_store %arg15[%c0_50, %c0_51, %c0_52], %83 {strides = array<i32>} : memref<1x2x128xf32, #tpu.memory_space<vmem>>, vector<1x2x128xf32>,
      %85 = arith.truncf %73 : vector<256x128xf32> to vector<256x128xbf16>
      %c0_53 = arith.constant 0 : index
      %c0_54 = arith.constant 0 : index
      %86 = vector.load %arg14[%c0_53, %c0_54] : memref<256x128xbf16, #tpu.memory_space<vmem>>, vector<256x128xbf16>
      tpu.vector_store %arg14[%c0_53, %c0_54], %85 {strides = array<i32>} : memref<256x128xbf16, #tpu.memory_space<vmem>>, vector<256x128xbf16>,
    } else {
    }
    return
  }
  func.func @transform_0(%arg0: i32, %arg1: i32) -> (i32, i32) {
    %c0_i32 = arith.constant 0 : i32
    return %arg0, %arg1 : i32, i32
  }
  func.func @transform_1(%arg0: i32, %arg1: i32) -> (i32, i32) {
    %c0_i32 = arith.constant 0 : i32
    %c0_i32_0 = arith.constant 0 : i32
    return %arg0, %c0_i32 : i32, i32
  }
  func.func @transform_2(%arg0: i32, %arg1: i32) -> (i32, i32) {
    %c0_i32 = arith.constant 0 : i32
    %c0_i32_0 = arith.constant 0 : i32
    return %arg0, %c0_i32 : i32, i32
  }
  func.func @transform_3(%arg0: i32, %arg1: i32) -> (i32, i32) {
    %c0_i32 = arith.constant 0 : i32
    %c0_i32_0 = arith.constant 0 : i32
    %c0_i32_1 = arith.constant 0 : i32
    return %c0_i32, %c0_i32_0 : i32, i32
  }
  func.func @transform_4(%arg0: i32, %arg1: i32) -> (i32, i32) {
    %c0_i32 = arith.constant 0 : i32
    %c0_i32_0 = arith.constant 0 : i32
    %c0_i32_1 = arith.constant 0 : i32
    return %c0_i32, %c0_i32_0 : i32, i32
  }
  func.func @transform_5(%arg0: i32, %arg1: i32) -> (i32, i32) {
    %c0_i32 = arith.constant 0 : i32
    %c0_i32_0 = arith.constant 0 : i32
    %c0_i32_1 = arith.constant 0 : i32
    return %c0_i32, %c0_i32_0 : i32, i32
  }
  func.func @transform_6(%arg0: i32, %arg1: i32) -> (i32, i32) {
    %c0_i32 = arith.constant 0 : i32
    %c0_i32_0 = arith.constant 0 : i32
    %c0_i32_1 = arith.constant 0 : i32
    return %c0_i32, %c0_i32_0 : i32, i32
  }
  func.func @transform_7(%arg0: i32, %arg1: i32) -> (i32, i32) {
    %c0_i32 = arith.constant 0 : i32
    %c0_i32_0 = arith.constant 0 : i32
    %c0_i32_1 = arith.constant 0 : i32
    return %c0_i32, %c0_i32_0 : i32, i32
  }
  func.func @transform_8(%arg0: i32, %arg1: i32) -> (i32, i32) {
    %c0_i32 = arith.constant 0 : i32
    %c0_i32_0 = arith.constant 0 : i32
    %c0_i32_1 = arith.constant 0 : i32
    return %c0_i32, %c0_i32_0 : i32, i32
  }
  func.func @transform_9(%arg0: i32, %arg1: i32) -> (i32, i32) {
    %c0_i32 = arith.constant 0 : i32
    %c0_i32_0 = arith.constant 0 : i32
    %c0_i32_1 = arith.constant 0 : i32
    return %c0_i32, %c0_i32_0 : i32, i32
  }
  func.func @transform_10(%arg0: i32, %arg1: i32) -> (i32, i32) {
    %c0_i32 = arith.constant 0 : i32
    %c0_i32_0 = arith.constant 0 : i32
    %c0_i32_1 = arith.constant 0 : i32
    return %c0_i32, %c0_i32_0 : i32, i32
  }
  func.func @transform_11(%arg0: i32, %arg1: i32) -> (i32, i32) {
    %c0_i32 = arith.constant 0 : i32
    %c0_i32_0 = arith.constant 0 : i32
    %c0_i32_1 = arith.constant 0 : i32
    return %c0_i32, %c0_i32_0 : i32, i32
  }
  func.func @transform_12(%arg0: i32, %arg1: i32) -> (i32, i32) {
    %c0_i32 = arith.constant 0 : i32
    %c0_i32_0 = arith.constant 0 : i32
    return %arg0, %c0_i32 : i32, i32
  }
  func.func @transform_13(%arg0: i32, %arg1: i32) -> (i32, i32, i32) {
    %c0_i32 = arith.constant 0 : i32
    %c0_i32_0 = arith.constant 0 : i32
    %c0_i32_1 = arith.constant 0 : i32
    return %arg0, %c0_i32, %c0_i32_0 : i32, i32, i32
  }
}

module attributes {stable_mosaic.version = 11 : i64} {
  func.func @_norm_relu_residual_kernel(%arg0: i32, %arg1: memref<512x128xbf16, #tpu.memory_space<vmem>>, %arg2: memref<512x128xbf16, #tpu.memory_space<vmem>>, %arg3: memref<1x128xf32, #tpu.memory_space<vmem>>, %arg4: memref<1x128xf32, #tpu.memory_space<vmem>>, %arg5: memref<1x128xf32, #tpu.memory_space<vmem>>, %arg6: memref<1x128xf32, #tpu.memory_space<vmem>>, %arg7: memref<1x128xf32, #tpu.memory_space<vmem>>, %arg8: memref<128x128xbf16, #tpu.memory_space<vmem>>, %arg9: memref<1x128xf32, #tpu.memory_space<vmem>>, %arg10: memref<512x128xf32, #tpu.memory_space<vmem>>) attributes {dimension_semantics = [#tpu.dimension_semantics<parallel>], iteration_bounds = array<i64: 1>, scalar_prefetch = 0 : i64, scratch_operands = 0 : i64, tpu.core_type = #tpu.core_type<tc>, window_params = [{transform_indices = @transform_0, window_bounds = array<i64: 512, 128>}, {transform_indices = @transform_1, window_bounds = array<i64: 512, 128>}, {pipeline_mode = #tpu.pipeline_mode<synchronous>, transform_indices = @transform_2, window_bounds = array<i64: 1, 128>}, {pipeline_mode = #tpu.pipeline_mode<synchronous>, transform_indices = @transform_3, window_bounds = array<i64: 1, 128>}, {pipeline_mode = #tpu.pipeline_mode<synchronous>, transform_indices = @transform_4, window_bounds = array<i64: 1, 128>}, {pipeline_mode = #tpu.pipeline_mode<synchronous>, transform_indices = @transform_5, window_bounds = array<i64: 1, 128>}, {pipeline_mode = #tpu.pipeline_mode<synchronous>, transform_indices = @transform_6, window_bounds = array<i64: 1, 128>}, {pipeline_mode = #tpu.pipeline_mode<synchronous>, transform_indices = @transform_7, window_bounds = array<i64: 128, 128>}, {pipeline_mode = #tpu.pipeline_mode<synchronous>, transform_indices = @transform_8, window_bounds = array<i64: 1, 128>}, {transform_indices = @transform_9, window_bounds = array<i64: 512, 128>}]} {
    %c0 = arith.constant 0 : index
    %c0_0 = arith.constant 0 : index
    %0 = vector.load %arg4[%c0, %c0_0] : memref<1x128xf32, #tpu.memory_space<vmem>>, vector<1x128xf32>
    %cst = arith.constant 9.99999974E-6 : f32
    %1 = vector.broadcast %cst : f32 to vector<1x128xf32>
    %2 = arith.addf %0, %1 : vector<1x128xf32>
    %3 = math.rsqrt %2 : vector<1x128xf32>
    %c0_1 = arith.constant 0 : index
    %c0_2 = arith.constant 0 : index
    %4 = vector.load %arg1[%c0_1, %c0_2] : memref<512x128xbf16, #tpu.memory_space<vmem>>, vector<512x128xbf16>
    %5 = arith.extf %4 : vector<512x128xbf16> to vector<512x128xf32>
    %c0_3 = arith.constant 0 : index
    %c0_4 = arith.constant 0 : index
    %6 = vector.load %arg5[%c0_3, %c0_4] : memref<1x128xf32, #tpu.memory_space<vmem>>, vector<1x128xf32>
    %c0_5 = arith.constant 0 : index
    %c0_6 = arith.constant 0 : index
    %7 = vector.load %arg7[%c0_5, %c0_6] : memref<1x128xf32, #tpu.memory_space<vmem>>, vector<1x128xf32>
    %c0_7 = arith.constant 0 : index
    %c0_8 = arith.constant 0 : index
    %8 = vector.load %arg3[%c0_7, %c0_8] : memref<1x128xf32, #tpu.memory_space<vmem>>, vector<1x128xf32>
    %9 = arith.mulf %7, %8 : vector<1x128xf32>
    %10 = vector.broadcast %9 : vector<1x128xf32> to vector<512x128xf32>
    %11 = arith.subf %5, %10 : vector<512x128xf32>
    %12 = vector.broadcast %6 : vector<1x128xf32> to vector<512x128xf32>
    %13 = arith.mulf %12, %11 : vector<512x128xf32>
    %14 = vector.broadcast %3 : vector<1x128xf32> to vector<512x128xf32>
    %15 = arith.mulf %13, %14 : vector<512x128xf32>
    %c0_9 = arith.constant 0 : index
    %c0_10 = arith.constant 0 : index
    %16 = vector.load %arg6[%c0_9, %c0_10] : memref<1x128xf32, #tpu.memory_space<vmem>>, vector<1x128xf32>
    %17 = vector.broadcast %16 : vector<1x128xf32> to vector<512x128xf32>
    %18 = arith.addf %15, %17 : vector<512x128xf32>
    %cst_11 = arith.constant 0.000000e+00 : f32
    %19 = vector.broadcast %cst_11 : f32 to vector<512x128xf32>
    %20 = arith.maximumf %18, %19 : vector<512x128xf32>
    %c0_12 = arith.constant 0 : index
    %c0_13 = arith.constant 0 : index
    %21 = vector.load %arg2[%c0_12, %c0_13] : memref<512x128xbf16, #tpu.memory_space<vmem>>, vector<512x128xbf16>
    %c0_14 = arith.constant 0 : index
    %c0_15 = arith.constant 0 : index
    %22 = vector.load %arg8[%c0_14, %c0_15] : memref<128x128xbf16, #tpu.memory_space<vmem>>, vector<128x128xbf16>
    %cst_16 = arith.constant dense<0.000000e+00> : vector<512x128xf32>
    %23 = tpu.matmul %21, %22, %cst_16 {dimension_numbers = #tpu.dot_dimension_numbers<[1], [0], [0], [1], [0, 0, 1, 1], [], []>} : vector<512x128xbf16>, vector<128x128xbf16>, vector<512x128xf32> -> vector<512x128xf32>
    %c0_17 = arith.constant 0 : index
    %c0_18 = arith.constant 0 : index
    %24 = vector.load %arg9[%c0_17, %c0_18] : memref<1x128xf32, #tpu.memory_space<vmem>>, vector<1x128xf32>
    %25 = vector.broadcast %24 : vector<1x128xf32> to vector<512x128xf32>
    %26 = arith.addf %23, %25 : vector<512x128xf32>
    %27 = arith.addf %26, %20 : vector<512x128xf32>
    %c0_19 = arith.constant 0 : index
    %c0_20 = arith.constant 0 : index
    %28 = vector.load %arg10[%c0_19, %c0_20] : memref<512x128xf32, #tpu.memory_space<vmem>>, vector<512x128xf32>
    tpu.vector_store %arg10[%c0_19, %c0_20], %27 {strides = array<i32>} : memref<512x128xf32, #tpu.memory_space<vmem>>, vector<512x128xf32>,
    return
  }
  func.func @transform_0(%arg0: i32) -> (i32, i32) {
    %c0_i32 = arith.constant 0 : i32
    %c0_i32_0 = arith.constant 0 : i32
    return %arg0, %c0_i32 : i32, i32
  }
  func.func @transform_1(%arg0: i32) -> (i32, i32) {
    %c0_i32 = arith.constant 0 : i32
    %c0_i32_0 = arith.constant 0 : i32
    return %arg0, %c0_i32 : i32, i32
  }
  func.func @transform_2(%arg0: i32) -> (i32, i32) {
    %c0_i32 = arith.constant 0 : i32
    %c0_i32_0 = arith.constant 0 : i32
    %c0_i32_1 = arith.constant 0 : i32
    return %c0_i32, %c0_i32_0 : i32, i32
  }
  func.func @transform_3(%arg0: i32) -> (i32, i32) {
    %c0_i32 = arith.constant 0 : i32
    %c0_i32_0 = arith.constant 0 : i32
    %c0_i32_1 = arith.constant 0 : i32
    return %c0_i32, %c0_i32_0 : i32, i32
  }
  func.func @transform_4(%arg0: i32) -> (i32, i32) {
    %c0_i32 = arith.constant 0 : i32
    %c0_i32_0 = arith.constant 0 : i32
    %c0_i32_1 = arith.constant 0 : i32
    return %c0_i32, %c0_i32_0 : i32, i32
  }
  func.func @transform_5(%arg0: i32) -> (i32, i32) {
    %c0_i32 = arith.constant 0 : i32
    %c0_i32_0 = arith.constant 0 : i32
    %c0_i32_1 = arith.constant 0 : i32
    return %c0_i32, %c0_i32_0 : i32, i32
  }
  func.func @transform_6(%arg0: i32) -> (i32, i32) {
    %c0_i32 = arith.constant 0 : i32
    %c0_i32_0 = arith.constant 0 : i32
    %c0_i32_1 = arith.constant 0 : i32
    return %c0_i32, %c0_i32_0 : i32, i32
  }
  func.func @transform_7(%arg0: i32) -> (i32, i32) {
    %c0_i32 = arith.constant 0 : i32
    %c0_i32_0 = arith.constant 0 : i32
    %c0_i32_1 = arith.constant 0 : i32
    return %c0_i32, %c0_i32_0 : i32, i32
  }
  func.func @transform_8(%arg0: i32) -> (i32, i32) {
    %c0_i32 = arith.constant 0 : i32
    %c0_i32_0 = arith.constant 0 : i32
    %c0_i32_1 = arith.constant 0 : i32
    return %c0_i32, %c0_i32_0 : i32, i32
  }
  func.func @transform_9(%arg0: i32) -> (i32, i32) {
    %c0_i32 = arith.constant 0 : i32
    %c0_i32_0 = arith.constant 0 : i32
    return %arg0, %c0_i32 : i32, i32
  }
}

</mosaic_0001>

<bundles_post_ra>
// kernel: link_prediction_gnn_forward.5
= control target key start
LH: loop header
LB: loop body
LE: loop exit
PB: predicated region body
PF: predicated region fallthrough
CT: control target
= control target key end

     0   :  { %v169_v41 = vlaneseq  ;;  %s2762_s7 = inlined_call_operand.vmem [shape: bf16[128,128], index: 7, kind: input, shape index: {}]   ;;  %s2763_s1 = inlined_call_operand.vmem [shape: bf16[512,128], index: 1, kind: input, shape index: {}]   ;;  %s2764_s3 = inlined_call_operand.vmem [shape: f32[1,128], index: 3, kind: input, shape index: {}]   ;;  %s2765_s2 = inlined_call_operand.vmem [shape: f32[1,128], index: 2, kind: input, shape index: {}]   ;;  %s2766_s6 = inlined_call_operand.vmem [shape: f32[1,128], index: 6, kind: input, shape index: {}]   ;;  %s2767_s0 = inlined_call_operand.vmem [shape: bf16[512,128], index: 0, kind: input, shape index: {}]   ;;  %s2768_s4 = inlined_call_operand.vmem [shape: f32[1,128], index: 4, kind: input, shape index: {}]   ;;  %s2769_s5 = inlined_call_operand.vmem [shape: f32[1,128], index: 5, kind: input, shape index: {}]   ;;  %s2770_s8 = inlined_call_operand.vmem [shape: f32[1,128], index: 8, kind: input, shape index: {}]   ;;  %s2771_s9 = inlined_call_operand.vmem [shape: f32[512,128], index: 9, kind: output, shape index: {}]  }
   0x1   :  { %v1599_v0 = vld [vmem:[%s2762_s7] sm:$0xff]   ;;  %v1600_v1 = vld [vmem:[%s2762_s7 + $0x8] sm:$0xff]   ;;  %v1601_v2 = vld [vmem:[%s2762_s7 + $0x10] sm:$0xff]  }
   0x2   :  { %1503 = vmatprep.subr.bf16.mxu0 %v1599_v0  ;;  %1583 = vmatprep.subr.bf16.mxu1 %v1599_v0  ;;  %v1602_v3 = vld [vmem:[%s2762_s7 + $0x18] sm:$0xff]   ;;  %v1607_v4 = vld [vmem:[%s2763_s1] sm:$0xff]   ;;  %v1604_v7 = vld [vmem:[%s2762_s7 + $0x28] sm:$0xff]   ;;  %v170_v43 = vshrl.u32 %v169_v41, 7 }
   0x3   :  { %1504 = vmatpush3.bf16.msra.mxu0 %v1599_v0  ;;  %1591 = vmatpush3.bf16.msra.mxu1 %v1599_v0  ;;  %v1608_v5 = vld [vmem:[%s2763_s1 + $0x80] sm:$0xff]   ;;  %v1605_v8 = vld [vmem:[%s2762_s7 + $0x30] sm:$0xff]   ;;  %v1606_v9 = vld [vmem:[%s2762_s7 + $0x38] sm:$0xff]  }
   0x4   :  { %1505 = vmatprep.subr.bf16.mxu0 %v1600_v1  ;;  %1584 = vmatprep.subr.bf16.mxu1 %v1600_v1  ;;  %v1603_v6 = vld [vmem:[%s2762_s7 + $0x20] sm:$0xff]   ;;  %v1609_v10 = vld [vmem:[%s2763_s1 + $0x8] sm:$0xff]   ;;  %v1611_v12 = vld [vmem:[%s2763_s1 + $0x10] sm:$0xff]   ;;  %v171_v47 = vsub.s32 0, %v170_v43 }
   0x5   :  { %1519 = vmatprep.mubr.bf16.mxu0 %v1607_v4  ;;  %1551 = vmatprep.mubr.bf16.mxu1 %v1608_v5  ;;  %v1610_v11 = vld [vmem:[%s2763_s1 + $0x88] sm:$0xff]   ;;  %v1612_v13 = vld [vmem:[%s2763_s1 + $0x90] sm:$0xff]   ;;  %v1613_v14 = vld [vmem:[%s2763_s1 + $0x18] sm:$0xff]  }
   0x6   :  { %v1614_v15 = vld [vmem:[%s2763_s1 + $0x98] sm:$0xff]   ;;  %v1615_v16 = vld [vmem:[%s2763_s1 + $0x20] sm:$0xff]   ;;  %v1617_v18 = vld [vmem:[%s2763_s1 + $0x28] sm:$0xff]  }
   0x7   :  { %1506 = vmatpush3.bf16.msra.mxu0 %v1600_v1  ;;  %1592 = vmatpush3.bf16.msra.mxu1 %v1600_v1  ;;  %v1616_v17 = vld [vmem:[%s2763_s1 + $0xa0] sm:$0xff]   ;;  %v1618_v19 = vld [vmem:[%s2763_s1 + $0xa8] sm:$0xff]   ;;  %v1619_v20 = vld [vmem:[%s2763_s1 + $0x30] sm:$0xff]  }
   0x8   :  { %1507 = vmatprep.subr.bf16.mxu0 %v1601_v2  ;;  %1585 = vmatprep.subr.bf16.mxu1 %v1601_v2  ;;  %v1620_v21 = vld [vmem:[%s2763_s1 + $0xb0] sm:$0xff]   ;;  %v1621_v22 = vld [vmem:[%s2763_s1 + $0x38] sm:$0xff]   ;;  %v1623_v24 = vld [vmem:[%s2763_s1 + $0x40] sm:$0xff]  }
   0x9   :  { %v1622_v23 = vld [vmem:[%s2763_s1 + $0xb8] sm:$0xff]   ;;  %v1624_v25 = vld [vmem:[%s2763_s1 + $0xc0] sm:$0xff]   ;;  %v1625_v26 = vld [vmem:[%s2763_s1 + $0x48] sm:$0xff]  }
   0xa   :  { %v1626_v27 = vld [vmem:[%s2763_s1 + $0xc8] sm:$0xff]   ;;  %v1627_v28 = vld [vmem:[%s2763_s1 + $0x50] sm:$0xff]   ;;  %v1629_v30 = vld [vmem:[%s2763_s1 + $0x58] sm:$0xff]  }
   0xb   :  { %1508 = vmatpush3.bf16.msra.mxu0 %v1601_v2  ;;  %1593 = vmatpush3.bf16.msra.mxu1 %v1601_v2  ;;  %v1628_v29 = vld [vmem:[%s2763_s1 + $0xd0] sm:$0xff]   ;;  %v1630_v31 = vld [vmem:[%s2763_s1 + $0xd8] sm:$0xff]   ;;  %v1631_v32 = vld [vmem:[%s2763_s1 + $0x60] sm:$0xff]  }
   0xc   :  { %1509 = vmatprep.subr.bf16.mxu0 %v1602_v3  ;;  %1586 = vmatprep.subr.bf16.mxu1 %v1602_v3  ;;  %v1632_v33 = vld [vmem:[%s2763_s1 + $0xe0] sm:$0xff]   ;;  %v1633_v34 = vld [vmem:[%s2763_s1 + $0x68] sm:$0xff]   ;;  %v1635_v36 = vld [vmem:[%s2763_s1 + $0x70] sm:$0xff]  }
   0xd   :  { %v1634_v35 = vld [vmem:[%s2763_s1 + $0xe8] sm:$0xff]   ;;  %v1636_v37 = vld [vmem:[%s2763_s1 + $0xf0] sm:$0xff]   ;;  %v1637_v38 = vld [vmem:[%s2763_s1 + $0x78] sm:$0xff]  }
   0xe   :  { %v1638_v39 = vld [vmem:[%s2763_s1 + $0xf8] sm:$0xff]   ;;  %v33_v40 = vld [vmem:[%s2764_s3] sm:$0x1]  ;;  %v1432_v48 = vld [vmem:[%s2767_s0 + $0x8] sm:$0xff]  }
   0xf   :  { %1510 = vmatpush3.bf16.msra.mxu0 %v1602_v3  ;;  %1594 = vmatpush3.bf16.msra.mxu1 %v1602_v3  ;;  %v34_v42 = vadd.f32 1e-05, %v33_v40  ;;  %v165_v44 = vld [vmem:[%s2766_s6] sm:$0x1]  ;;  %v1310_v49 = vunpack.c.l.bf16 %v1432_v48  ;;  %v1448_v52 = vld [vmem:[%s2767_s0 + $0x88] sm:$0xff]   ;;  %v1311_v62 = vunpack.c.h.bf16 %v1432_v48  ;;  %v1434_v2 = vld [vmem:[%s2767_s0 + $0x18] sm:$0xff]  }
  0x10   :  { %1511 = vmatprep.subr.bf16.mxu0 %v1603_v6  ;;  %1587 = vmatprep.subr.bf16.mxu1 %v1603_v6  ;;  %v166_v45 = vld [vmem:[%s2765_s2] sm:$0x1]  ;;  %v1374_v57 = vunpack.c.l.bf16 %v1448_v52  ;;  %v1375_v63 = vunpack.c.h.bf16 %v1448_v52  ;;  %v1450_v5 = vld [vmem:[%s2767_s0 + $0x98] sm:$0xff]   ;;  %v1895_v41 = vld [vmem:[%s2767_s0 + $0x28] sm:$0xff]  }
  0x11   :  { %1639 = vrsqrt.f32 %v34_v42  ;;  %v167_v46 = vmul.f32 %v166_v45, %v165_v44  ;;  %v1305_v53 = vld [vmem:[%s2767_s0] sm:$0xff]  }
  0x12   :  { %v1837_v55 = vld [vmem:[%s2768_s4] ss:$0 sm:$0xff]  ;;  %v1306_v58 = vunpack.c.l.bf16 %v1305_v53  ;;  %v1307_v0 = vunpack.c.h.bf16 %v1305_v53 }
  0x13   :  { %1512 = vmatpush3.bf16.msra.mxu0 %v1603_v6  ;;  %1595 = vmatpush3.bf16.msra.mxu1 %v1603_v6  ;;  %v1825_v50 = vrot.slane %v167_v46, %v171_v47  ;;  %v1447_v56 = vld [vmem:[%s2767_s0 + $0x80] sm:$0xff]  }
  0x14   :  { %1513 = vmatprep.subr.bf16.mxu0 %v1604_v7  ;;  %1588 = vmatprep.subr.bf16.mxu1 %v1604_v7  ;;  %v1370_v61 = vunpack.c.l.bf16 %v1447_v56  ;;  %v1371_v1 = vunpack.c.h.bf16 %v1447_v56 }
  0x15   :  { %v176_v51 = vsub.f32 %v1310_v49, %v1825_v50  ;;  %v208_v3 = vsub.f32 %v1374_v57, %v1825_v50  ;;  %v174_v4 = vsub.f32 %v1306_v58, %v1825_v50 }
  0x17   :  { %1514 = vmatpush3.bf16.msra.mxu0 %v1604_v7  ;;  %1596 = vmatpush3.bf16.msra.mxu1 %v1604_v7  ;;  %v246_v59 = vmul.f32 %v1837_v55, %v176_v51  ;;  %v206_v7 = vsub.f32 %v1370_v61, %v1825_v50 }
  0x18   :  { %1515 = vmatprep.subr.bf16.mxu0 %v1605_v8  ;;  %1589 = vmatprep.subr.bf16.mxu1 %v1605_v8 }
  0x1b   :  { %1516 = vmatpush3.bf16.msra.mxu0 %v1605_v8  ;;  %1597 = vmatpush3.bf16.msra.mxu1 %v1605_v8  ;;  %v1640_v54 = vpop.eup %1639  ;;  %v177_v8 = vsub.f32 %v1311_v62, %v1825_v50 }
  0x1c   :  { %1517 = vmatprep.subr.bf16.mxu0 %v1606_v9  ;;  %1590 = vmatprep.subr.bf16.mxu1 %v1606_v9  ;;  %v1843_v60 = vrot.slane %v1640_v54, %v171_v47  ;;  %v1326_v54 = vunpack.c.l.bf16 %v1895_v41 }
  0x1e   :  { %v316_v6 = vmul.f32 %v1843_v60, %v246_v59 }
  0x1f   :  { %1518 = vmatpush3.bf16.msra.mxu0 %v1606_v9  ;;  %1598 = vmatpush3.bf16.msra.mxu1 %v1606_v9  ;;  %v1859_v9 = vld [vmem:[%s2769_s5] ss:$0 sm:$0xff] }
  0x22   :  { %1520 = vmatmul.mubr.bf16.vlgmr.msra.gmra.mrb[0].mxu0 %v1609_v10  ;;  %1552 = vmatmul.mubr.bf16.vlgmr.msra.gmra.mrb[0].mxu1 %v1610_v11  ;;  %v209_v10 = vsub.f32 %v1375_v63, %v1825_v50  ;;  %v175_v11 = vsub.f32 %v1307_v0, %v1825_v50 }
  0x23   :  { %1523 = vmatprep.mubr.bf16.mxu0 %v1611_v12  ;;  %1555 = vmatprep.mubr.bf16.mxu1 %v1612_v13  ;;  %v207_v12 = vsub.f32 %v1371_v1, %v1825_v50  ;;  %v1318_v13 = vunpack.c.l.bf16 %v1434_v2 }
  0x2a   :  { %1524 = vmatmul.mubr.bf16.gmra.mrb[4].mxu0 %v1613_v14  ;;  %1556 = vmatmul.mubr.bf16.gmra.mrb[4].mxu1 %v1614_v15  ;;  %v1433_v14 = vld [vmem:[%s2767_s0 + $0x10] sm:$0xff]   ;;  %v1382_v15 = vunpack.c.l.bf16 %v1450_v5 }
  0x2b   :  { %1527 = vmatprep.mubr.bf16.mxu0 %v1615_v16  ;;  %1559 = vmatprep.mubr.bf16.mxu1 %v1616_v17  ;;  %v278_v16 = vmul.f32 %v1837_v55, %v208_v3  ;;  %v244_v17 = vmul.f32 %v1837_v55, %v174_v4  ;;  %v1315_v44 = vunpack.c.h.bf16 %v1433_v14 }
  0x2d   :  { %v179_v63 = vsub.f32 %v1315_v44, %v1825_v50  ;;  %v1454_v44 = vld [vmem:[%s2767_s0 + $0xb8] sm:$0xff]  }
  0x32   :  { %1528 = vmatmul.mubr.bf16.gmra.mrb[8].mxu0 %v1617_v18  ;;  %1560 = vmatmul.mubr.bf16.gmra.mrb[8].mxu1 %v1618_v19  ;;  %v1449_v18 = vld [vmem:[%s2767_s0 + $0x90] sm:$0xff]   ;;  %v1873_v19 = vadd.f32 %v1859_v9, %v316_v6 }
  0x33   :  { %1531 = vmatprep.mubr.bf16.mxu0 %v1619_v20  ;;  %1563 = vmatprep.mubr.bf16.mxu1 %v1620_v21  ;;  %v276_v20 = vmul.f32 %v1837_v55, %v206_v7  ;;  %v247_v21 = vmul.f32 %v1837_v55, %v177_v8  ;;  %v1379_v45 = vunpack.c.h.bf16 %v1449_v18  ;;  %v184_v8 = vsub.f32 %v1326_v54, %v1825_v50 }
  0x35   :  { %v211_v0 = vsub.f32 %v1379_v45, %v1825_v50 }
  0x3a   :  { %1532 = vmatmul.mubr.bf16.gmra.mrb[12].mxu0 %v1621_v22  ;;  %1564 = vmatmul.mubr.bf16.gmra.mrb[12].mxu1 %v1622_v23  ;;  %v1314_v22 = vunpack.c.l.bf16 %v1433_v14  ;;  %v279_v23 = vmul.f32 %v1837_v55, %v209_v10  ;;  %v1452_v10 = vld [vmem:[%s2767_s0 + $0xa8] sm:$0xff]   ;;  %v1457_v14 = vld [vmem:[%s2767_s0 + $0xd0] sm:$0xff]  }
  0x3b   :  { %1535 = vmatprep.mubr.bf16.mxu0 %v1623_v24  ;;  %1567 = vmatprep.mubr.bf16.mxu1 %v1624_v25  ;;  %v245_v24 = vmul.f32 %v1837_v55, %v175_v11  ;;  %v277_v25 = vmul.f32 %v1837_v55, %v207_v12  ;;  %v1435_v11 = vld [vmem:[%s2767_s0 + $0x20] sm:$0xff]  }
  0x42   :  { %1536 = vmatmul.mubr.bf16.gmra.mrb[16].mxu0 %v1625_v26  ;;  %1568 = vmatmul.mubr.bf16.gmra.mrb[16].mxu1 %v1626_v27  ;;  %v180_v26 = vsub.f32 %v1318_v13, %v1825_v50  ;;  %v212_v27 = vsub.f32 %v1382_v15, %v1825_v50 }
  0x43   :  { %1539 = vmatprep.mubr.bf16.mxu0 %v1627_v28  ;;  %1571 = vmatprep.mubr.bf16.mxu1 %v1628_v29  ;;  %v1378_v28 = vunpack.c.l.bf16 %v1449_v18  ;;  %v348_v29 = vmul.f32 %v1843_v60, %v278_v16  ;;  %v1451_v16 = vld [vmem:[%s2767_s0 + $0xa0] sm:$0xff]  }
  0x44   :  { %v250_v40 = vmul.f32 %v1837_v55, %v180_v26  ;;  %v282_v42 = vmul.f32 %v1837_v55, %v212_v27  ;;  %v254_v27 = vmul.f32 %v1837_v55, %v184_v8 }
  0x45   :  { %v210_v43 = vsub.f32 %v1378_v28, %v1825_v50  ;;  %v1900_v46 = vadd.f32 %v1859_v9, %v348_v29  ;;  %v1386_v28 = vunpack.c.l.bf16 %v1451_v16  ;;  %v1327_v29 = vunpack.c.h.bf16 %v1895_v41 }
  0x46   :  { %v320_v59 = vmul.f32 %v1843_v60, %v250_v40  ;;  %v352_v61 = vmul.f32 %v1843_v60, %v282_v42 }
  0x47   :  { %v280_v62 = vmul.f32 %v1837_v55, %v210_v43 }
  0x48   :  { %v1947_v15 = vadd.f32 %v1859_v9, %v320_v59 }
  0x49   :  { %v350_v18 = vmul.f32 %v1843_v60, %v280_v62 }
  0x4a   :  { %1540 = vmatmul.mubr.bf16.gmra.mrb[20].mxu0 %v1629_v30  ;;  %1572 = vmatmul.mubr.bf16.gmra.mrb[20].mxu1 %v1630_v31  ;;  %v314_v30 = vmul.f32 %v1843_v60, %v244_v17  ;;  %v1319_v31 = vunpack.c.h.bf16 %v1434_v2  ;;  %v1953_v17 = vadd.f32 %v1859_v9, %v352_v61 }
  0x4b   :  { %1543 = vmatprep.mubr.bf16.mxu0 %v1631_v32  ;;  %1575 = vmatprep.mubr.bf16.mxu1 %v1632_v33  ;;  %v1383_v32 = vunpack.c.h.bf16 %v1450_v5  ;;  %v1410_v5 = vunpack.c.l.bf16 %v1457_v14 }
  0x4c   :  { %v1903_v47 = vadd.f32 %v1859_v9, %v314_v30  ;;  %v181_v48 = vsub.f32 %v1319_v31, %v1825_v50  ;;  %v1391_v31 = vunpack.c.h.bf16 %v1452_v10 }
  0x4d   :  { %v213_v49 = vsub.f32 %v1383_v32, %v1825_v50  ;;  %v1323_v32 = vunpack.c.h.bf16 %v1435_v11 }
  0x4e   :  { %v251_v3 = vmul.f32 %v1837_v55, %v181_v48  ;;  %v324_v48 = vmul.f32 %v1843_v60, %v254_v27  ;;  %v217_v54 = vsub.f32 %v1391_v31, %v1825_v50 }
  0x4f   :  { %v283_v4 = vmul.f32 %v1837_v55, %v213_v49  ;;  %v214_v49 = vsub.f32 %v1386_v28, %v1825_v50  ;;  %v183_v59 = vsub.f32 %v1323_v32, %v1825_v50 }
  0x52   :  { %1544 = vmatmul.mubr.bf16.gmra.mrb[24].mxu0 %v1633_v34  ;;  %1576 = vmatmul.mubr.bf16.gmra.mrb[24].mxu1 %v1634_v35  ;;  %v346_v34 = vmul.f32 %v1843_v60, %v276_v20  ;;  %v317_v35 = vmul.f32 %v1843_v60, %v247_v21  ;;  %v249_v20 = vmul.f32 %v1837_v55, %v179_v63  ;;  %v1437_v63 = vld [vmem:[%s2767_s0 + $0x30] sm:$0xff]  }
  0x53   :  { %1547 = vmatprep.mubr.bf16.mxu0 %v1635_v36  ;;  %1579 = vmatprep.mubr.bf16.mxu1 %v1636_v37  ;;  %v178_v36 = vsub.f32 %v1314_v22, %v1825_v50  ;;  %v349_v37 = vmul.f32 %v1843_v60, %v279_v23  ;;  %v281_v21 = vmul.f32 %v1837_v55, %v211_v0 }
  0x54   :  { %v1908_v51 = vadd.f32 %v1859_v9, %v346_v34  ;;  %v1911_v52 = vadd.f32 %v1859_v9, %v317_v35  ;;  %v321_v22 = vmul.f32 %v1843_v60, %v251_v3  ;;  %v353_v23 = vmul.f32 %v1843_v60, %v283_v4 }
  0x55   :  { %v248_v53 = vmul.f32 %v1837_v55, %v178_v36  ;;  %v1916_v56 = vadd.f32 %v1859_v9, %v349_v37  ;;  %v1387_v34 = vunpack.c.h.bf16 %v1451_v16  ;;  %v1968_v36 = vadd.f32 %v1859_v9, %v350_v18  ;;  %v1453_v18 = vld [vmem:[%s2767_s0 + $0xb0] sm:$0xff]  }
  0x56   :  { %v319_v37 = vmul.f32 %v1843_v60, %v249_v20  ;;  %v1976_v40 = vadd.f32 %v1859_v9, %v321_v22  ;;  %v1979_v41 = vadd.f32 %v1859_v9, %v353_v23  ;;  %v2011_v20 = vadd.f32 %v1859_v9, %v324_v48 }
  0x57   :  { %v318_v7 = vmul.f32 %v1843_v60, %v248_v53  ;;  %v185_v53 = vsub.f32 %v1327_v29, %v1825_v50  ;;  %v215_v61 = vsub.f32 %v1387_v34, %v1825_v50  ;;  %v1330_v23 = vunpack.c.l.bf16 %v1437_v63 }
  0x58   :  { %v1998_v3 = vadd.f32 %v1859_v9, %v319_v37  ;;  %v1394_v34 = vunpack.c.l.bf16 %v1453_v18 }
  0x59   :  { %v1961_v26 = vadd.f32 %v1859_v9, %v318_v7  ;;  %v1398_v7 = vunpack.c.l.bf16 %v1454_v44  ;;  %v255_v22 = vmul.f32 %v1837_v55, %v185_v53  ;;  %v285_v27 = vmul.f32 %v1837_v55, %v215_v61 }
  0x5a   :  { %1548 = vmatmul.mubr.bf16.gmra.mrb[28].mxu0 %v1637_v38  ;;  %1580 = vmatmul.mubr.bf16.gmra.mrb[28].mxu1 %v1638_v39  ;;  %v315_v38 = vmul.f32 %v1843_v60, %v245_v24  ;;  %v347_v39 = vmul.f32 %v1843_v60, %v277_v25  ;;  %v1390_v24 = vunpack.c.l.bf16 %v1452_v10  ;;  %v1322_v25 = vunpack.c.l.bf16 %v1435_v11 }
  0x5b   :  { %v220_v32 = vsub.f32 %v1398_v7, %v1825_v50  ;;  %v325_v53 = vmul.f32 %v1843_v60, %v255_v22 }
  0x5c   :  { %v1919_v57 = vadd.f32 %v1859_v9, %v315_v38  ;;  %v1922_v58 = vadd.f32 %v1859_v9, %v347_v39  ;;  %v351_v38 = vmul.f32 %v1843_v60, %v281_v21  ;;  %v1438_v39 = vld [vmem:[%s2767_s0 + $0x38] sm:$0xff]   ;;  %v216_v42 = vsub.f32 %v1390_v24, %v1825_v50 }
  0x5d   :  { %v182_v43 = vsub.f32 %v1322_v25, %v1825_v50  ;;  %v1334_v62 = vunpack.c.l.bf16 %v1438_v39  ;;  %v284_v21 = vmul.f32 %v1837_v55, %v214_v49  ;;  %v287_v24 = vmul.f32 %v1837_v55, %v217_v54 }
  0x5e   :  { %v2001_v4 = vadd.f32 %v1859_v9, %v351_v38  ;;  %v286_v11 = vmul.f32 %v1837_v55, %v216_v42  ;;  %v253_v25 = vmul.f32 %v1837_v55, %v183_v59  ;;  %v1335_v42 = vunpack.c.h.bf16 %v1438_v39  ;;  %v2035_v39 = vld [vmem:[%s2767_s0 + $0x48] sm:$0xff]  }
  0x5f   :  { %v252_v16 = vmul.f32 %v1837_v55, %v182_v43  ;;  %v188_v28 = vsub.f32 %v1334_v62, %v1825_v50  ;;  %v1399_v43 = vunpack.c.h.bf16 %v1454_v44  ;;  %v354_v49 = vmul.f32 %v1843_v60, %v284_v21 }
  0x60   :  { %v356_v37 = vmul.f32 %v1843_v60, %v286_v11  ;;  %v186_v54 = vsub.f32 %v1330_v23, %v1825_v50  ;;  %v357_v59 = vmul.f32 %v1843_v60, %v287_v24  ;;  %v323_v61 = vmul.f32 %v1843_v60, %v253_v25 }
  0x61   :  { %v322_v38 = vmul.f32 %v1843_v60, %v252_v16  ;;  %v355_v62 = vmul.f32 %v1843_v60, %v285_v27  ;;  %v258_v7 = vmul.f32 %v1837_v55, %v188_v28  ;;  %v290_v44 = vmul.f32 %v1837_v55, %v220_v32 }
  0x62   :  { %v218_v11 = vsub.f32 %v1394_v34, %v1825_v50  ;;  %v1331_v16 = vunpack.c.h.bf16 %v1437_v63  ;;  %v1395_v21 = vunpack.c.h.bf16 %v1453_v18  ;;  %v2040_v22 = vadd.f32 %v1859_v9, %v356_v37 }
  0x63   :  { %v2043_v23 = vadd.f32 %v1859_v9, %v322_v38  ;;  %v189_v24 = vsub.f32 %v1335_v42, %v1825_v50  ;;  %v221_v25 = vsub.f32 %v1399_v43, %v1825_v50  ;;  %v2048_v27 = vadd.f32 %v1859_v9, %v354_v49 }
  0x64   :  { %v2051_v28 = vadd.f32 %v1859_v9, %v325_v53  ;;  %v256_v32 = vmul.f32 %v1837_v55, %v186_v54  ;;  %v1342_v63 = vunpack.c.l.bf16 %v2035_v39  ;;  %v2056_v18 = vadd.f32 %v1859_v9, %v357_v59 }
  0x65   :  { %v2059_v34 = vadd.f32 %v1859_v9, %v323_v61  ;;  %v2062_v37 = vadd.f32 %v1859_v9, %v355_v62  ;;  %v328_v38 = vmul.f32 %v1843_v60, %v258_v7  ;;  %v360_v42 = vmul.f32 %v1843_v60, %v290_v44 }
  0x66   :  { %v288_v43 = vmul.f32 %v1837_v55, %v218_v11  ;;  %v187_v49 = vsub.f32 %v1331_v16, %v1825_v50  ;;  %v219_v53 = vsub.f32 %v1395_v21, %v1825_v50  ;;  %v259_v61 = vmul.f32 %v1837_v55, %v189_v24  ;;  %v1456_v16 = vld [vmem:[%s2767_s0 + $0xc8] sm:$0xff]   ;;  %v1439_v21 = vld [vmem:[%s2767_s0 + $0x40] sm:$0xff]  }
  0x67   :  { %v291_v48 = vmul.f32 %v1837_v55, %v221_v25  ;;  %v326_v44 = vmul.f32 %v1843_v60, %v256_v32  ;;  %v192_v11 = vsub.f32 %v1342_v63, %v1825_v50  ;;  %v2087_v7 = vadd.f32 %v1859_v9, %v328_v38  ;;  %v1455_v32 = vld [vmem:[%s2767_s0 + $0xc0] sm:$0xff]  }
  0x68   :  { %v2093_v63 = vadd.f32 %v1859_v9, %v360_v42  ;;  %v358_v59 = vmul.f32 %v1843_v60, %v288_v43  ;;  %v257_v54 = vmul.f32 %v1837_v55, %v187_v49  ;;  %v289_v24 = vmul.f32 %v1837_v55, %v219_v53 }
  0x69   :  { %v329_v25 = vmul.f32 %v1843_v60, %v259_v61  ;;  %v361_v62 = vmul.f32 %v1843_v60, %v291_v48  ;;  %v1406_v31 = vunpack.c.l.bf16 %v1456_v16  ;;  %v1338_v38 = vunpack.c.l.bf16 %v1439_v21 }
  0x6a   :  { %v2101_v29 = vadd.f32 %v1859_v9, %v326_v44  ;;  %v262_v10 = vmul.f32 %v1837_v55, %v192_v11  ;;  %v1402_v8 = vunpack.c.l.bf16 %v1455_v32  ;;  %v1343_v42 = vunpack.c.h.bf16 %v2035_v39  ;;  %v1442_v11 = vld [vmem:[%s2767_s0 + $0x58] sm:$0xff]  }
  0x6b   :  { %v1407_v0 = vunpack.c.h.bf16 %v1456_v16  ;;  %v1339_v49 = vunpack.c.h.bf16 %v1439_v21  ;;  %v1403_v45 = vunpack.c.h.bf16 %v1455_v32  ;;  %v2108_v61 = vadd.f32 %v1859_v9, %v358_v59 }
  0x6c   :  { %v327_v48 = vmul.f32 %v1843_v60, %v257_v54  ;;  %v359_v44 = vmul.f32 %v1843_v60, %v289_v24  ;;  %v2116_v39 = vadd.f32 %v1859_v9, %v329_v25  ;;  %v2119_v16 = vadd.f32 %v1859_v9, %v361_v62  ;;  %v1458_v54 = vld [vmem:[%s2767_s0 + $0xd8] sm:$0xff]  }
  0x6d   :  { %v224_v21 = vsub.f32 %v1406_v31, %v1825_v50  ;;  %v190_v32 = vsub.f32 %v1338_v38, %v1825_v50  ;;  %v332_v24 = vmul.f32 %v1843_v60, %v262_v10  ;;  %v222_v53 = vsub.f32 %v1402_v8, %v1825_v50  ;;  %v1441_v38 = vld [vmem:[%s2767_s0 + $0x50] sm:$0xff]  }
  0x6e   :  { %v193_v25 = vsub.f32 %v1343_v42, %v1825_v50  ;;  %v225_v43 = vsub.f32 %v1407_v0, %v1825_v50  ;;  %v191_v62 = vsub.f32 %v1339_v49, %v1825_v50  ;;  %v223_v31 = vsub.f32 %v1403_v45, %v1825_v50 }
  0x6f   :  { %v1350_v35 = vunpack.c.l.bf16 %v1442_v11  ;;  %v2138_v59 = vadd.f32 %v1859_v9, %v327_v48  ;;  %v2141_v8 = vadd.f32 %v1859_v9, %v359_v44  ;;  %v1414_v10 = vunpack.c.l.bf16 %v1458_v54 }
  0x70   :  { %v294_v45 = vmul.f32 %v1837_v55, %v224_v21  ;;  %v260_v49 = vmul.f32 %v1837_v55, %v190_v32  ;;  %v2151_v30 = vadd.f32 %v1859_v9, %v332_v24  ;;  %v292_v48 = vmul.f32 %v1837_v55, %v222_v53 }
  0x71   :  { %2781 = vst [vmem:[#allocation2_spill] sm:$0xff] %v2141_v8  ;;  %v263_v44 = vmul.f32 %v1837_v55, %v193_v25  ;;  %v1346_v13 = vunpack.c.l.bf16 %v1441_v38  ;;  %v295_v0 = vmul.f32 %v1837_v55, %v225_v43  ;;  %v261_v42 = vmul.f32 %v1837_v55, %v191_v62 }
  0x72   :  { %2782 = vst [vmem:[#allocation3_spill] sm:$0xff] %v2151_v30  ;;  %v293_v21 = vmul.f32 %v1837_v55, %v223_v31  ;;  %v196_v32 = vsub.f32 %v1350_v35, %v1825_v50  ;;  %v228_v24 = vsub.f32 %v1414_v10, %v1825_v50  ;;  %v364_v53 = vmul.f32 %v1843_v60, %v294_v45 }
  0x73   :  { %v330_v25 = vmul.f32 %v1843_v60, %v260_v49  ;;  %v1351_v2 = vunpack.c.h.bf16 %v1442_v11  ;;  %v1415_v1 = vunpack.c.h.bf16 %v1458_v54  ;;  %v362_v62 = vmul.f32 %v1843_v60, %v292_v48  ;;  %v2175_v11 = vld [vmem:[%s2767_s0 + $0x68] sm:$0xff]  }
  0x74   :  { %v333_v31 = vmul.f32 %v1843_v60, %v263_v44  ;;  %v194_v35 = vsub.f32 %v1346_v13, %v1825_v50  ;;  %v365_v12 = vmul.f32 %v1843_v60, %v295_v0  ;;  %v331_v6 = vmul.f32 %v1843_v60, %v261_v42 }
  0x75   :  { %v363_v10 = vmul.f32 %v1843_v60, %v293_v21  ;;  %v266_v45 = vmul.f32 %v1837_v55, %v196_v32  ;;  %v298_v54 = vmul.f32 %v1837_v55, %v228_v24  ;;  %v226_v49 = vsub.f32 %v1410_v5, %v1825_v50 }
  0x76   :  { %v1347_v48 = vunpack.c.h.bf16 %v1441_v38  ;;  %v1411_v44 = vunpack.c.h.bf16 %v1457_v14  ;;  %v2180_v13 = vadd.f32 %v1859_v9, %v364_v53  ;;  %v2183_v0 = vadd.f32 %v1859_v9, %v330_v25 }
  0x77   :  { %v197_v42 = vsub.f32 %v1351_v2, %v1825_v50  ;;  %v229_v21 = vsub.f32 %v1415_v1, %v1825_v50  ;;  %v2188_v32 = vadd.f32 %v1859_v9, %v362_v62  ;;  %v2191_v43 = vadd.f32 %v1859_v9, %v333_v31 }
  0x78   :  { %2783 = vst [vmem:[#allocation4_spill] sm:$0xff] %v2180_v13  ;;  %2784 = vst [vmem:[#allocation5_spill] sm:$0xff] %v2183_v0  ;;  %v264_v5 = vmul.f32 %v1837_v55, %v194_v35  ;;  %v1358_v14 = vunpack.c.l.bf16 %v2175_v11  ;;  %v2196_v38 = vadd.f32 %v1859_v9, %v365_v12  ;;  %v2199_v24 = vadd.f32 %v1859_v9, %v331_v6 }
  0x79   :  { %2785 = vst [vmem:[#allocation6_spill] sm:$0xff] %v2188_v32  ;;  %2786 = vst [vmem:[#allocation7_spill] sm:$0xff] %v2191_v43  ;;  %v2202_v2 = vadd.f32 %v1859_v9, %v363_v10  ;;  %v336_v1 = vmul.f32 %v1843_v60, %v266_v45  ;;  %v368_v53 = vmul.f32 %v1843_v60, %v298_v54  ;;  %v2216_v10 = vld [vmem:[%s2770_s8] ss:$0 sm:$0xff]  ;;  %v2792_v30 = vmax.f32 %v1903_v47, 0.0 }
  0x7a   :  { %2787 = vst [vmem:[#allocation8_spill] sm:$0xff] %v2196_v38  ;;  %2788 = vst [vmem:[#allocation9_spill] sm:$0xff] %v2199_v24  ;;  %v296_v25 = vmul.f32 %v1837_v55, %v226_v49  ;;  %v195_v62 = vsub.f32 %v1347_v48, %v1825_v50  ;;  %v227_v31 = vsub.f32 %v1411_v44, %v1825_v50  ;;  %v2795_v47 = vmax.f32 %v1916_v56, 0.0 }
  0x7b   :  { %2789 = vst [vmem:[#allocation10_spill] sm:$0xff] %v2202_v2  ;;  %v267_v6 = vmul.f32 %v1837_v55, %v197_v42  ;;  %v299_v33 = vmul.f32 %v1837_v55, %v229_v21  ;;  %v334_v49 = vmul.f32 %v1843_v60, %v264_v5  ;;  %v200_v48 = vsub.f32 %v1358_v14, %v1825_v50 }
  0x7c   :  { %v2226_v21 = vadd.f32 %v1859_v9, %v336_v1  ;;  %v2229_v13 = vadd.f32 %v1859_v9, %v368_v53  ;;  %v366_v54 = vmul.f32 %v1843_v60, %v296_v25  ;;  %v265_v5 = vmul.f32 %v1837_v55, %v195_v62 }
  0x7d   :  { %v297_v14 = vmul.f32 %v1837_v55, %v227_v31  ;;  %v337_v1 = vmul.f32 %v1843_v60, %v267_v6  ;;  %v369_v2 = vmul.f32 %v1843_v60, %v299_v33  ;;  %v2241_v62 = vadd.f32 %v1859_v9, %v334_v49 }
  0x7e   :  { %v270_v31 = vmul.f32 %v1837_v55, %v200_v48  ;;  %v2791_v33 = vmax.f32 %v1900_v46, 0.0  ;;  %v2258_v48 = vld [vmem:[%s2767_s0 + $0x60] sm:$0xff]  }
  0xf5   :  { %v1521_v35 = vpop.f32.mrb[0].mxu0  ;;  %v1553_v0 = vpop.f32.mrb[0].mxu1 }
  0xf6   :  { %v883_v44 = vadd.f32 %v1521_v35, %v2216_v10  ;;  %v1011_v12 = vadd.f32 %v1553_v0, %v2216_v10  ;;  %v874_v45 = vpop.f32.mrb[1].mxu0  ;;  %v1002_v42 = vpop.f32.mrb[1].mxu1  ;;  %v2247_v0 = vld [vmem:[%s2767_s0 + $0xe8] sm:$0xff]   ;;  %v2790_v35 = vmax.f32 %v1873_v19, 0.0  ;;  %v2793_v19 = vmax.f32 %v1908_v51, 0.0 }
  0xf7   :  { %v875_v24 = vadd.f32 %v2216_v10, %v874_v45  ;;  %v1003_v53 = vadd.f32 %v2216_v10, %v1002_v42  ;;  %v1522_v38 = vpop.f32.mrb[2].mxu0  ;;  %v1554_v25 = vpop.f32.mrb[2].mxu1  ;;  %v471_v51 = vmax.f32 %v2226_v21, 0.0 }
  0xf8   :  { %v1131_v6 = vadd.f32 %v883_v44, %v2790_v35  ;;  %v1163_v45 = vadd.f32 %v1011_v12, %v2791_v33  ;;  %v886_v42 = vadd.f32 %v1522_v38, %v2216_v10  ;;  %v1014_v43 = vadd.f32 %v1554_v25, %v2216_v10  ;;  %v877_v32 = vpop.f32.mrb[3].mxu0  ;;  %v1005_v49 = vpop.f32.mrb[3].mxu1 }
  0xf9   :  { %v1129_v8 = vadd.f32 %v875_v24, %v2792_v30  ;;  %v1161_v44 = vadd.f32 %v1003_v53, %v2793_v19  ;;  %v878_v46 = vadd.f32 %v2216_v10, %v877_v32  ;;  %v1006_v12 = vadd.f32 %v2216_v10, %v1005_v49  ;;  %v2281_v24 = vld [vmem:[%s2767_s0 + $0xe0] sm:$0xff]  }
  0xfa   :  { %1195 = vst [vmem:[%s2771_s9 + $0x10] sm:$0xff] %v1131_v6  ;;  %1227 = vst [vmem:[%s2771_s9 + $0x110] sm:$0xff] %v1163_v45  ;;  %v2794_v38 = vmax.f32 %v1911_v52, 0.0  ;;  %v1164_v30 = vadd.f32 %v1014_v43, %v2795_v47  ;;  %v1422_v32 = vunpack.c.l.bf16 %v2247_v0  ;;  %v2796_v52 = vmax.f32 %v1919_v57, 0.0 }
  0xfb   :  { %1193 = vst [vmem:[%s2771_s9] sm:$0xff] %v1129_v8  ;;  %1225 = vst [vmem:[%s2771_s9 + $0x100] sm:$0xff] %v1161_v44  ;;  %v2797_v43 = vmax.f32 %v1922_v58, 0.0  ;;  %v2294_v35 = vadd.f32 %v1859_v9, %v366_v54  ;;  %v1354_v6 = vunpack.c.l.bf16 %v2258_v48  ;;  %v2305_v57 = vadd.f32 %v1859_v9, %v337_v1 }
  0xfc   :  { %v1132_v25 = vadd.f32 %v886_v42, %v2794_v38  ;;  %v1130_v56 = vadd.f32 %v878_v46, %v2796_v52  ;;  %1228 = vst [vmem:[%s2771_s9 + $0x118] sm:$0xff] %v1164_v30  ;;  %v335_v58 = vmul.f32 %v1843_v60, %v265_v5  ;;  %v367_v54 = vmul.f32 %v1843_v60, %v297_v14 }
  0xfd   :  { %v1162_v53 = vadd.f32 %v1006_v12, %v2797_v43  ;;  %v1525_v33 = vpop.f32.mrb[4].mxu0  ;;  %v1557_v45 = vpop.f32.mrb[4].mxu1  ;;  %v2317_v49 = vadd.f32 %v1859_v9, %v369_v2  ;;  %v340_v1 = vmul.f32 %v1843_v60, %v270_v31  ;;  %v1418_v5 = vunpack.c.l.bf16 %v2281_v24 }
  0xfe   :  { %1196 = vst [vmem:[%s2771_s9 + $0x18] sm:$0xff] %v1132_v25  ;;  %1194 = vst [vmem:[%s2771_s9 + $0x8] sm:$0xff] %v1130_v56  ;;  %v899_v14 = vadd.f32 %v1525_v33, %v2216_v10  ;;  %v1027_v19 = vadd.f32 %v1557_v45, %v2216_v10  ;;  %v890_v44 = vpop.f32.mrb[5].mxu0  ;;  %v1018_v46 = vpop.f32.mrb[5].mxu1  ;;  %v232_v12 = vsub.f32 %v1422_v32, %v1825_v50  ;;  %v1359_v38 = vunpack.c.h.bf16 %v2175_v11 }
  0xff   :  { %1226 = vst [vmem:[%s2771_s9 + $0x108] sm:$0xff] %v1162_v53  ;;  %v891_v25 = vadd.f32 %v2216_v10, %v890_v44  ;;  %v1019_v47 = vadd.f32 %v2216_v10, %v1018_v46  ;;  %v1526_v2 = vpop.f32.mrb[6].mxu0  ;;  %v1558_v30 = vpop.f32.mrb[6].mxu1  ;;  %v198_v31 = vsub.f32 %v1354_v6, %v1825_v50  ;;  %v1423_v52 = vunpack.c.h.bf16 %v2247_v0 }
 0x100   :  { %v2798_v56 = vmax.f32 %v1947_v15, 0.0  ;;  %v2799_v53 = vmax.f32 %v1953_v17, 0.0  ;;  %v902_v32 = vadd.f32 %v1526_v2, %v2216_v10  ;;  %v1030_v11 = vadd.f32 %v1558_v30, %v2216_v10  ;;  %v893_v45 = vpop.f32.mrb[7].mxu0  ;;  %v1021_v44 = vpop.f32.mrb[7].mxu1 }
 0x101   :  { %v2800_v46 = vmax.f32 %v1961_v26, 0.0  ;;  %v2801_v8 = vmax.f32 %v1968_v36, 0.0  ;;  %v894_v0 = vadd.f32 %v2216_v10, %v893_v45  ;;  %v1022_v15 = vadd.f32 %v2216_v10, %v1021_v44 }
 0x102   :  { %v1135_v43 = vadd.f32 %v899_v14, %v2798_v56  ;;  %v1167_v33 = vadd.f32 %v1027_v19, %v2799_v53  ;;  %v2802_v17 = vmax.f32 %v1976_v40, 0.0  ;;  %v2803_v26 = vmax.f32 %v1979_v41, 0.0 }
 0x103   :  { %v1133_v42 = vadd.f32 %v891_v25, %v2800_v46  ;;  %v1165_v6 = vadd.f32 %v1019_v47, %v2801_v8  ;;  %v230_v36 = vsub.f32 %v1418_v5, %v1825_v50  ;;  %v1355_v8 = vunpack.c.h.bf16 %v2258_v48 }
 0x104   :  { %1199 = vst [vmem:[%s2771_s9 + $0x30] sm:$0xff] %v1135_v43  ;;  %1231 = vst [vmem:[%s2771_s9 + $0x130] sm:$0xff] %v1167_v33  ;;  %v1136_v14 = vadd.f32 %v902_v32, %v2802_v17  ;;  %v1168_v19 = vadd.f32 %v1030_v11, %v2803_v26  ;;  %v2804_v25 = vmax.f32 %v1998_v3, 0.0  ;;  %v2805_v40 = vmax.f32 %v2001_v4, 0.0 }
 0x105   :  { %1197 = vst [vmem:[%s2771_s9 + $0x20] sm:$0xff] %v1133_v42  ;;  %1229 = vst [vmem:[%s2771_s9 + $0x120] sm:$0xff] %v1165_v6  ;;  %v302_v41 = vmul.f32 %v1837_v55, %v232_v12  ;;  %v1419_v5 = vunpack.c.h.bf16 %v2281_v24  ;;  %v501_v48 = vmax.f32 %v2294_v35, 0.0  ;;  %v472_v3 = vmax.f32 %v2305_v57, 0.0  ;;  %v1529_v24 = vpop.f32.mrb[8].mxu0  ;;  %v1561_v12 = vpop.f32.mrb[8].mxu1 }
 0x106   :  { %v1134_v47 = vadd.f32 %v894_v0, %v2804_v25  ;;  %v1166_v2 = vadd.f32 %v1022_v15, %v2805_v40  ;;  %1200 = vst [vmem:[%s2771_s9 + $0x38] sm:$0xff] %v1136_v14  ;;  %1232 = vst [vmem:[%s2771_s9 + $0x138] sm:$0xff] %v1168_v19  ;;  %v2374_v42 = vadd.f32 %v1859_v9, %v335_v58  ;;  %v906_v33 = vpop.f32.mrb[9].mxu0  ;;  %v1034_v32 = vpop.f32.mrb[9].mxu1  ;;  %v2806_v6 = vmax.f32 %v2011_v20, 0.0 }
 0x107   :  { %v2377_v4 = vadd.f32 %v1859_v9, %v367_v54  ;;  %v2386_v30 = vadd.f32 %v1859_v9, %v340_v1  ;;  %v268_v56 = vmul.f32 %v1837_v55, %v198_v31  ;;  %v201_v58 = vsub.f32 %v1359_v38, %v1825_v50  ;;  %v1530_v46 = vpop.f32.mrb[10].mxu0  ;;  %v1562_v31 = vpop.f32.mrb[10].mxu1 }
 0x108   :  { %1198 = vst [vmem:[%s2771_s9 + $0x28] sm:$0xff] %v1134_v47  ;;  %1230 = vst [vmem:[%s2771_s9 + $0x128] sm:$0xff] %v1166_v2  ;;  %v233_v54 = vsub.f32 %v1423_v52, %v1825_v50  ;;  %v915_v43 = vadd.f32 %v1529_v24, %v2216_v10  ;;  %v1043_v53 = vadd.f32 %v1561_v12, %v2216_v10  ;;  %v2807_v15 = vmax.f32 %v2040_v22, 0.0  ;;  %v909_v19 = vpop.f32.mrb[11].mxu0 }
 0x109   :  { %v300_v11 = vmul.f32 %v1837_v55, %v230_v36  ;;  %v199_v45 = vsub.f32 %v1355_v8, %v1825_v50  ;;  %v907_v44 = vadd.f32 %v2216_v10, %v906_v33  ;;  %v1035_v1 = vadd.f32 %v2216_v10, %v1034_v32  ;;  %v1037_v36 = vpop.f32.mrb[11].mxu1  ;;  %v2408_v8 = vld [vmem:[%s2767_s0 + $0x78] sm:$0xff]  }
 0x10a   :  { %v372_v38 = vmul.f32 %v1843_v60, %v302_v41  ;;  %v231_v52 = vsub.f32 %v1419_v5, %v1825_v50  ;;  %v1139_v0 = vadd.f32 %v915_v43, %v2806_v6  ;;  %v1171_v17 = vadd.f32 %v1043_v53, %v2807_v15 }
 0x10b   :  { %v918_v14 = vadd.f32 %v1530_v46, %v2216_v10  ;;  %v1046_v26 = vadd.f32 %v1562_v31, %v2216_v10  ;;  %v2808_v25 = vmax.f32 %v2043_v23, 0.0  ;;  %v2809_v20 = vmax.f32 %v2048_v27, 0.0 }
 0x10c   :  { %v910_v22 = vadd.f32 %v2216_v10, %v909_v19  ;;  %v1038_v2 = vadd.f32 %v2216_v10, %v1037_v36  ;;  %1203 = vst [vmem:[%s2771_s9 + $0x50] sm:$0xff] %v1139_v0  ;;  %1235 = vst [vmem:[%s2771_s9 + $0x150] sm:$0xff] %v1171_v17  ;;  %v2810_v41 = vmax.f32 %v2051_v28, 0.0  ;;  %v2811_v23 = vmax.f32 %v2056_v18, 0.0 }
 0x10d   :  { %v1137_v47 = vadd.f32 %v907_v44, %v2808_v25  ;;  %v1169_v40 = vadd.f32 %v1035_v1, %v2809_v20  ;;  %v271_v27 = vmul.f32 %v1837_v55, %v201_v58  ;;  %v303_v12 = vmul.f32 %v1837_v55, %v233_v54  ;;  %v2453_v44 = vld [vmem:[%s2767_s0 + $0xf8] sm:$0xff]   ;;  %v1533_v1 = vpop.f32.mrb[12].mxu0  ;;  %v1565_v46 = vpop.f32.mrb[12].mxu1  ;;  %v2478_v20 = vld [vmem:[%s2767_s0 + $0x70] sm:$0xff]  }
 0x10e   :  { %v1140_v5 = vadd.f32 %v918_v14, %v2810_v41  ;;  %v1172_v24 = vadd.f32 %v1046_v26, %v2811_v23  ;;  %v2812_v43 = vmax.f32 %v2059_v34, 0.0  ;;  %v2813_v28 = vmax.f32 %v2062_v37, 0.0  ;;  %v922_v14 = vpop.f32.mrb[13].mxu0  ;;  %v1050_v26 = vpop.f32.mrb[13].mxu1 }
 0x10f   :  { %1201 = vst [vmem:[%s2771_s9 + $0x40] sm:$0xff] %v1137_v47  ;;  %1233 = vst [vmem:[%s2771_s9 + $0x140] sm:$0xff] %v1169_v40  ;;  %v504_v18 = vmax.f32 %v2317_v49, 0.0  ;;  %v1366_v58 = vunpack.c.l.bf16 %v2408_v8  ;;  %v470_v54 = vmax.f32 %v2374_v42, 0.0  ;;  %v502_v34 = vmax.f32 %v2377_v4, 0.0  ;;  %v1534_v47 = vpop.f32.mrb[14].mxu0 }
 0x110   :  { %v1138_v53 = vadd.f32 %v910_v22, %v2812_v43  ;;  %v1170_v33 = vadd.f32 %v1038_v2, %v2813_v28  ;;  %1204 = vst [vmem:[%s2771_s9 + $0x58] sm:$0xff] %v1140_v5  ;;  %1236 = vst [vmem:[%s2771_s9 + $0x158] sm:$0xff] %v1172_v24  ;;  %v475_v32 = vmax.f32 %v2386_v30, 0.0  ;;  %v338_v37 = vmul.f32 %v1843_v60, %v268_v56  ;;  %v925_v24 = vpop.f32.mrb[15].mxu0 }
 0x111   :  { %v2462_v31 = vadd.f32 %v1859_v9, %v372_v38  ;;  %v370_v56 = vmul.f32 %v1843_v60, %v300_v11  ;;  %v269_v6 = vmul.f32 %v1837_v55, %v199_v45  ;;  %v301_v0 = vmul.f32 %v1837_v55, %v231_v52  ;;  %v1566_v11 = vpop.f32.mrb[14].mxu1 }
 0x112   :  { %1202 = vst [vmem:[%s2771_s9 + $0x48] sm:$0xff] %v1138_v53  ;;  %1234 = vst [vmem:[%s2771_s9 + $0x148] sm:$0xff] %v1170_v33  ;;  %v931_v15 = vadd.f32 %v1533_v1, %v2216_v10  ;;  %v1059_v17 = vadd.f32 %v1565_v46, %v2216_v10  ;;  %v341_v19 = vmul.f32 %v1843_v60, %v271_v27  ;;  %v1430_v52 = vunpack.c.l.bf16 %v2453_v44  ;;  %v1053_v27 = vpop.f32.mrb[15].mxu1 }
 0x113   :  { %v373_v36 = vmul.f32 %v1843_v60, %v303_v12  ;;  %v923_v25 = vadd.f32 %v2216_v10, %v922_v14  ;;  %v1051_v38 = vadd.f32 %v2216_v10, %v1050_v26  ;;  %v204_v45 = vsub.f32 %v1366_v58, %v1825_v50  ;;  %v2489_v12 = vld [vmem:[%s2767_s0 + $0xf0] sm:$0xff]   ;;  %v2821_v14 = vld [vmem:[#allocation2_spill] sm:$0xff] }
 0x114   :  { %v2814_v40 = vmax.f32 %v2087_v7, 0.0  ;;  %v2815_v2 = vmax.f32 %v2093_v63, 0.0  ;;  %v934_v5 = vadd.f32 %v1534_v47, %v2216_v10  ;;  %v1062_v23 = vadd.f32 %v1566_v11, %v2216_v10 }
 0x115   :  { %v2816_v43 = vmax.f32 %v2101_v29, 0.0  ;;  %v2817_v7 = vmax.f32 %v2108_v61, 0.0  ;;  %v926_v63 = vadd.f32 %v2216_v10, %v925_v24  ;;  %v1054_v33 = vadd.f32 %v2216_v10, %v1053_v27  ;;  %v1537_v11 = vpop.f32.mrb[16].mxu0 }
 0x116   :  { %v1143_v22 = vadd.f32 %v931_v15, %v2814_v40  ;;  %v1175_v41 = vadd.f32 %v1059_v17, %v2815_v2  ;;  %v2818_v58 = vmax.f32 %v2116_v39, 0.0  ;;  %v2819_v29 = vmax.f32 %v2119_v16, 0.0  ;;  %v1569_v40 = vpop.f32.mrb[16].mxu1 }
 0x117   :  { %v1141_v53 = vadd.f32 %v923_v25, %v2816_v43  ;;  %v1173_v28 = vadd.f32 %v1051_v38, %v2817_v7  ;;  %v2508_v61 = vadd.f32 %v1859_v9, %v338_v37  ;;  %v1362_v15 = vunpack.c.l.bf16 %v2478_v20 }
 0x118   :  { %1207 = vst [vmem:[%s2771_s9 + $0x70] sm:$0xff] %v1143_v22  ;;  %1239 = vst [vmem:[%s2771_s9 + $0x170] sm:$0xff] %v1175_v41  ;;  %v1144_v1 = vadd.f32 %v934_v5, %v2818_v58  ;;  %v1176_v46 = vadd.f32 %v1062_v23, %v2819_v29  ;;  %v2820_v17 = vmax.f32 %v2138_v59, 0.0  ;;  %v2822_v26 = vmax.f32 %v2821_v14, 0.0  ;;  %v938_v5 = vpop.f32.mrb[17].mxu0  ;;  %v1066_v23 = vpop.f32.mrb[17].mxu1 }
 0x119   :  { %1205 = vst [vmem:[%s2771_s9 + $0x60] sm:$0xff] %v1141_v53  ;;  %1237 = vst [vmem:[%s2771_s9 + $0x160] sm:$0xff] %v1173_v28  ;;  %v2522_v25 = vadd.f32 %v1859_v9, %v370_v56  ;;  %v1426_v37 = vunpack.c.l.bf16 %v2489_v12  ;;  %v507_v38 = vmax.f32 %v2462_v31, 0.0  ;;  %v2533_v59 = vadd.f32 %v1859_v9, %v341_v19  ;;  %v2825_v28 = vld [vmem:[#allocation4_spill] sm:$0xff] }
 0x11a   :  { %v1142_v39 = vadd.f32 %v926_v63, %v2820_v17  ;;  %v1174_v16 = vadd.f32 %v1054_v33, %v2822_v26  ;;  %1208 = vst [vmem:[%s2771_s9 + $0x78] sm:$0xff] %v1144_v1  ;;  %1240 = vst [vmem:[%s2771_s9 + $0x178] sm:$0xff] %v1176_v46  ;;  %v339_v47 = vmul.f32 %v1843_v60, %v269_v6  ;;  %v1367_v6 = vunpack.c.h.bf16 %v2408_v8  ;;  %v2827_v46 = vld [vmem:[#allocation5_spill] sm:$0xff] }
 0x11b   :  { %v371_v56 = vmul.f32 %v1843_v60, %v301_v0  ;;  %v2544_v22 = vadd.f32 %v1859_v9, %v373_v36  ;;  %v274_v19 = vmul.f32 %v1837_v55, %v204_v45  ;;  %v236_v2 = vsub.f32 %v1430_v52, %v1825_v50  ;;  %v1538_v36 = vpop.f32.mrb[18].mxu0  ;;  %v1570_v55 = vpop.f32.mrb[18].mxu1  ;;  %v2823_v52 = vld [vmem:[#allocation3_spill] sm:$0xff] }
 0x11c   :  { %1206 = vst [vmem:[%s2771_s9 + $0x68] sm:$0xff] %v1142_v39  ;;  %1238 = vst [vmem:[%s2771_s9 + $0x168] sm:$0xff] %v1174_v16  ;;  %v947_v0 = vadd.f32 %v1537_v11, %v2216_v10  ;;  %v1075_v41 = vadd.f32 %v1569_v40, %v2216_v10  ;;  %v202_v24 = vsub.f32 %v1362_v15, %v1825_v50  ;;  %v1431_v27 = vunpack.c.h.bf16 %v2453_v44  ;;  %v941_v1 = vpop.f32.mrb[19].mxu0  ;;  %v1069_v29 = vpop.f32.mrb[19].mxu1  ;;  %v2829_v39 = vld [vmem:[#allocation6_spill] sm:$0xff] }
 0x11d   :  { %v939_v43 = vadd.f32 %v2216_v10, %v938_v5  ;;  %v1067_v9 = vadd.f32 %v2216_v10, %v1066_v23  ;;  %v234_v45 = vsub.f32 %v1426_v37, %v1825_v50  ;;  %v1363_v8 = vunpack.c.h.bf16 %v2478_v20  ;;  %v2831_v37 = vld [vmem:[#allocation7_spill] sm:$0xff]  ;;  %v1641_v23 = vld [vmem:[%s2768_s4] ss:$0 sm:$0xff] }
 0x11e   :  { %v2824_v53 = vmax.f32 %v2823_v52, 0.0  ;;  %v2826_v63 = vmax.f32 %v2825_v28, 0.0  ;;  %v950_v58 = vadd.f32 %v1538_v36, %v2216_v10  ;;  %v1078_v44 = vadd.f32 %v1570_v55, %v2216_v10  ;;  %v2835_v36 = vld [vmem:[#allocation9_spill] sm:$0xff] }
 0x11f   :  { %v2828_v15 = vmax.f32 %v2827_v46, 0.0  ;;  %v2830_v14 = vmax.f32 %v2829_v39, 0.0  ;;  %v942_v20 = vadd.f32 %v2216_v10, %v941_v1  ;;  %v1070_v16 = vadd.f32 %v2216_v10, %v1069_v29  ;;  %v1573_v1 = vpop.f32.mrb[20].mxu1 }
 0x120   :  { %v1147_v7 = vadd.f32 %v947_v0, %v2824_v53  ;;  %v1179_v33 = vadd.f32 %v1075_v41, %v2826_v63  ;;  %v2832_v11 = vmax.f32 %v2831_v37, 0.0  ;;  %v2833_v0 = vld [vmem:[#allocation8_spill] sm:$0xff]  ;;  %v2836_v55 = vmax.f32 %v2835_v36, 0.0  ;;  %v2837_v53 = vld [vmem:[#allocation10_spill] sm:$0xff] }
 0x121   :  { %v1145_v17 = vadd.f32 %v939_v43, %v2828_v15  ;;  %v1177_v26 = vadd.f32 %v1067_v9, %v2830_v14  ;;  %v2834_v41 = vmax.f32 %v2833_v0, 0.0  ;;  %v306_v43 = vmul.f32 %v1641_v23, %v236_v2  ;;  %v1082_v14 = vpop.f32.mrb[21].mxu1 }
 0x122   :  { %1211 = vst [vmem:[%s2771_s9 + $0x90] sm:$0xff] %v1147_v7  ;;  %1243 = vst [vmem:[%s2771_s9 + $0x190] sm:$0xff] %v1179_v33  ;;  %v1148_v40 = vadd.f32 %v950_v58, %v2832_v11  ;;  %v1427_v9 = vunpack.c.h.bf16 %v2489_v12  ;;  %v1146_v52 = vadd.f32 %v942_v20, %v2836_v55  ;;  %v2838_v7 = vmax.f32 %v2837_v53, 0.0  ;;  %v2606_v58 = vld [vmem:[%s2769_s5] ss:$0 sm:$0xff] }
 0x123   :  { %v1180_v5 = vadd.f32 %v1078_v44, %v2834_v41  ;;  %1209 = vst [vmem:[%s2771_s9 + $0x80] sm:$0xff] %v1145_v17  ;;  %1241 = vst [vmem:[%s2771_s9 + $0x180] sm:$0xff] %v1177_v26  ;;  %v205_v63 = vsub.f32 %v1367_v6, %v1825_v50  ;;  %v237_v2 = vsub.f32 %v1431_v27, %v1825_v50  ;;  %v473_v12 = vmax.f32 %v2508_v61, 0.0  ;;  %v1541_v44 = vpop.f32.mrb[20].mxu0 }
 0x124   :  { %v1178_v28 = vadd.f32 %v1070_v16, %v2838_v7  ;;  %1212 = vst [vmem:[%s2771_s9 + $0x98] sm:$0xff] %v1148_v40  ;;  %v505_v33 = vmax.f32 %v2522_v25, 0.0  ;;  %v2609_v6 = vadd.f32 %v2606_v58, %v339_v47  ;;  %v2612_v27 = vadd.f32 %v2606_v58, %v371_v56  ;;  %1210 = vst [vmem:[%s2771_s9 + $0x88] sm:$0xff] %v1146_v52  ;;  %v954_v39 = vpop.f32.mrb[21].mxu0 }
 0x125   :  { %1244 = vst [vmem:[%s2771_s9 + $0x198] sm:$0xff] %v1180_v5  ;;  %v344_v29 = vmul.f32 %v1843_v60, %v274_v19  ;;  %v272_v46 = vmul.f32 %v1641_v23, %v202_v24  ;;  %v304_v15 = vmul.f32 %v1641_v23, %v234_v45  ;;  %v203_v47 = vsub.f32 %v1363_v8, %v1825_v50  ;;  %v1542_v11 = vpop.f32.mrb[22].mxu0  ;;  %v1574_v19 = vpop.f32.mrb[22].mxu1 }
 0x126   :  { %1242 = vst [vmem:[%s2771_s9 + $0x188] sm:$0xff] %v1178_v28  ;;  %v963_v17 = vadd.f32 %v1541_v44, %v2216_v10  ;;  %v1091_v56 = vadd.f32 %v1573_v1, %v2216_v10  ;;  %v376_v26 = vmul.f32 %v1843_v60, %v306_v43  ;;  %v235_v20 = vsub.f32 %v1427_v9, %v1825_v50  ;;  %v957_v43 = vpop.f32.mrb[23].mxu0  ;;  %v1085_v50 = vpop.f32.mrb[23].mxu1 }
 0x127   :  { %v955_v16 = vadd.f32 %v2216_v10, %v954_v39  ;;  %v1083_v37 = vadd.f32 %v2216_v10, %v1082_v14  ;;  %v275_v24 = vmul.f32 %v1641_v23, %v205_v63  ;;  %v307_v45 = vmul.f32 %v1641_v23, %v237_v2  ;;  %v1545_v4 = vpop.f32.mrb[24].mxu0 }
 0x128   :  { %v1151_v8 = vadd.f32 %v963_v17, %v471_v51  ;;  %v2839_v40 = vmax.f32 %v2229_v13, 0.0  ;;  %v966_v41 = vadd.f32 %v1542_v11, %v2216_v10  ;;  %v1094_v5 = vadd.f32 %v1574_v19, %v2216_v10  ;;  %v970_v2 = vpop.f32.mrb[25].mxu0 }
 0x129   :  { %v2840_v9 = vmax.f32 %v2241_v62, 0.0  ;;  %v1181_v55 = vadd.f32 %v1083_v37, %v501_v48  ;;  %v958_v52 = vadd.f32 %v2216_v10, %v957_v43  ;;  %v1086_v21 = vadd.f32 %v2216_v10, %v1085_v50 }
 0x12a   :  { %v1183_v0 = vadd.f32 %v1091_v56, %v2839_v40  ;;  %1215 = vst [vmem:[%s2771_s9 + $0xb0] sm:$0xff] %v1151_v8  ;;  %v1152_v13 = vadd.f32 %v966_v41, %v472_v3  ;;  %v1184_v62 = vadd.f32 %v1094_v5, %v504_v18  ;;  %v342_v51 = vmul.f32 %v1843_v60, %v272_v46  ;;  %v1546_v46 = vpop.f32.mrb[26].mxu0 }
 0x12b   :  { %v1149_v36 = vadd.f32 %v955_v16, %v2840_v9  ;;  %v374_v35 = vmul.f32 %v1843_v60, %v304_v15  ;;  %1245 = vst [vmem:[%s2771_s9 + $0x1a0] sm:$0xff] %v1181_v55  ;;  %v1150_v48 = vadd.f32 %v958_v52, %v470_v54  ;;  %v1182_v57 = vadd.f32 %v1086_v21, %v502_v34  ;;  %v1577_v34 = vpop.f32.mrb[24].mxu1 }
 0x12c   :  { %1247 = vst [vmem:[%s2771_s9 + $0x1b0] sm:$0xff] %v1183_v0  ;;  %v273_v49 = vmul.f32 %v1641_v23, %v203_v47  ;;  %v305_v3 = vmul.f32 %v1641_v23, %v235_v20  ;;  %1216 = vst [vmem:[%s2771_s9 + $0xb8] sm:$0xff] %v1152_v13  ;;  %v476_v18 = vmax.f32 %v2533_v59, 0.0  ;;  %v508_v53 = vmax.f32 %v2544_v22, 0.0  ;;  %v973_v20 = vpop.f32.mrb[27].mxu0 }
 0x12d   :  { %1213 = vst [vmem:[%s2771_s9 + $0xa0] sm:$0xff] %v1149_v36  ;;  %1248 = vst [vmem:[%s2771_s9 + $0x1b8] sm:$0xff] %v1184_v62  ;;  %v474_v42 = vmax.f32 %v2609_v6, 0.0  ;;  %v506_v54 = vmax.f32 %v2612_v27, 0.0  ;;  %v415_v23 = vadd.f32 %v2606_v58, %v344_v29  ;;  %v447_v59 = vadd.f32 %v2606_v58, %v376_v26  ;;  %v1098_v6 = vpop.f32.mrb[25].mxu1  ;;  %v1549_v8 = vpop.f32.mrb[28].mxu0 }
 0x12e   :  { %1214 = vst [vmem:[%s2771_s9 + $0xa8] sm:$0xff] %v1150_v48  ;;  %1246 = vst [vmem:[%s2771_s9 + $0x1a8] sm:$0xff] %v1182_v57  ;;  %v345_v22 = vmul.f32 %v1843_v60, %v275_v24  ;;  %v377_v7 = vmul.f32 %v1843_v60, %v307_v45  ;;  %v979_v28 = vadd.f32 %v1545_v4, %v2216_v10  ;;  %v1578_v15 = vpop.f32.mrb[26].mxu1  ;;  %v986_v43 = vpop.f32.mrb[29].mxu0 }
 0x12f   :  { %v1107_v63 = vadd.f32 %v1577_v34, %v2216_v10  ;;  %v413_v27 = vadd.f32 %v2606_v58, %v342_v51  ;;  %v445_v44 = vadd.f32 %v2606_v58, %v374_v35  ;;  %v971_v1 = vadd.f32 %v2216_v10, %v970_v2  ;;  %v1101_v16 = vpop.f32.mrb[27].mxu1  ;;  %v1550_v21 = vpop.f32.mrb[30].mxu0 }
 0x130   :  { %v1099_v29 = vadd.f32 %v2216_v10, %v1098_v6  ;;  %v343_v47 = vmul.f32 %v1843_v60, %v273_v49  ;;  %v375_v17 = vmul.f32 %v1843_v60, %v305_v3  ;;  %v1155_v56 = vadd.f32 %v979_v28, %v475_v32  ;;  %v989_v3 = vpop.f32.mrb[31].mxu0 }
 0x131   :  { %v1187_v39 = vadd.f32 %v1107_v63, %v507_v38  ;;  %v982_v14 = vadd.f32 %v1546_v46, %v2216_v10  ;;  %v1110_v26 = vadd.f32 %v1578_v15, %v2216_v10  ;;  %v1153_v37 = vadd.f32 %v971_v1, %v473_v12 }
 0x132   :  { %v1185_v11 = vadd.f32 %v1099_v29, %v505_v33  ;;  %v974_v60 = vadd.f32 %v2216_v10, %v973_v20  ;;  %v1102_v30 = vadd.f32 %v2216_v10, %v1101_v16  ;;  %1219 = vst [vmem:[%s2771_s9 + $0xd0] sm:$0xff] %v1155_v56  ;;  %v416_v61 = vadd.f32 %v2606_v58, %v345_v22 }
 0x133   :  { %1251 = vst [vmem:[%s2771_s9 + $0x1d0] sm:$0xff] %v1187_v39  ;;  %v1156_v32 = vadd.f32 %v982_v14, %v476_v18  ;;  %v1188_v31 = vadd.f32 %v1110_v26, %v508_v53  ;;  %v448_v38 = vadd.f32 %v2606_v58, %v377_v7  ;;  %1217 = vst [vmem:[%s2771_s9 + $0xc0] sm:$0xff] %v1153_v37  ;;  %v479_v24 = vmax.f32 %v415_v23, 0.0 }
 0x134   :  { %1249 = vst [vmem:[%s2771_s9 + $0x1c0] sm:$0xff] %v1185_v11  ;;  %v1154_v25 = vadd.f32 %v974_v60, %v474_v42  ;;  %v1186_v12 = vadd.f32 %v1102_v30, %v506_v54  ;;  %v414_v33 = vadd.f32 %v2606_v58, %v343_v47  ;;  %v446_v19 = vadd.f32 %v2606_v58, %v375_v17  ;;  %v1581_v58 = vpop.f32.mrb[28].mxu1 }
 0x135   :  { %1220 = vst [vmem:[%s2771_s9 + $0xd8] sm:$0xff] %v1156_v32  ;;  %1252 = vst [vmem:[%s2771_s9 + $0x1d8] sm:$0xff] %v1188_v31  ;;  %v511_v45 = vmax.f32 %v447_v59, 0.0  ;;  %v477_v40 = vmax.f32 %v413_v27, 0.0  ;;  %v509_v0 = vmax.f32 %v445_v44, 0.0  ;;  %v995_v41 = vadd.f32 %v1549_v8, %v2216_v10  ;;  %v1114_v50 = vpop.f32.mrb[29].mxu1 }
 0x136   :  { %1218 = vst [vmem:[%s2771_s9 + $0xc8] sm:$0xff] %v1154_v25  ;;  %1250 = vst [vmem:[%s2771_s9 + $0x1c8] sm:$0xff] %v1186_v12  ;;  %v1123_v5 = vadd.f32 %v1581_v58, %v2216_v10  ;;  %v480_v9 = vmax.f32 %v416_v61, 0.0  ;;  %v512_v36 = vmax.f32 %v448_v38, 0.0  ;;  %v987_v55 = vadd.f32 %v2216_v10, %v986_v43  ;;  %v1582_v13 = vpop.f32.mrb[30].mxu1 }
 0x137   :  { %v1115_v52 = vadd.f32 %v2216_v10, %v1114_v50  ;;  %v478_v62 = vmax.f32 %v414_v33, 0.0  ;;  %v510_v51 = vmax.f32 %v446_v19, 0.0  ;;  %v1159_v35 = vadd.f32 %v995_v41, %v479_v24  ;;  %v1117_v18 = vpop.f32.mrb[31].mxu1 }
 0x138   :  { %v1191_v48 = vadd.f32 %v1123_v5, %v511_v45  ;;  %v998_v57 = vadd.f32 %v1550_v21, %v2216_v10  ;;  %v1126_v49 = vadd.f32 %v1582_v13, %v2216_v10  ;;  %v1157_v53 = vadd.f32 %v987_v55, %v477_v40 }
 0x139   :  { %v1189_v42 = vadd.f32 %v1115_v52, %v509_v0  ;;  %v990_v54 = vadd.f32 %v2216_v10, %v989_v3  ;;  %v1118_v4 = vadd.f32 %v2216_v10, %v1117_v18  ;;  %1223 = vst [vmem:[%s2771_s9 + $0xf0] sm:$0xff] %v1159_v35 }
 0x13a   :  { %1255 = vst [vmem:[%s2771_s9 + $0x1f0] sm:$0xff] %v1191_v48  ;;  %v1160_v34 = vadd.f32 %v998_v57, %v480_v9  ;;  %v1192_v23 = vadd.f32 %v1126_v49, %v512_v36  ;;  %1221 = vst [vmem:[%s2771_s9 + $0xe0] sm:$0xff] %v1157_v53 }
 0x13b   :  { %1253 = vst [vmem:[%s2771_s9 + $0x1e0] sm:$0xff] %v1189_v42  ;;  %v1158_v59 = vadd.f32 %v990_v54, %v478_v62  ;;  %v1190_v10 = vadd.f32 %v1118_v4, %v510_v51 }
 0x13c   :  { %1224 = vst [vmem:[%s2771_s9 + $0xf8] sm:$0xff] %v1160_v34  ;;  %1256 = vst [vmem:[%s2771_s9 + $0x1f8] sm:$0xff] %v1192_v23 }
 0x13d   :  { %1222 = vst [vmem:[%s2771_s9 + $0xe8] sm:$0xff] %v1158_v59  ;;  %1254 = vst [vmem:[%s2771_s9 + $0x1e8] sm:$0xff] %v1190_v10 }

// kernel: link_prediction_gnn_forward.3
= control target key start
LH: loop header
LB: loop body
LE: loop exit
PB: predicated region body
PF: predicated region fallthrough
CT: control target
= control target key end

     0   :  { %s4124_s22 = smov 0   ;;  %s4126_s7 = smov 0   ;;  %s4774_s0 = inlined_call_operand.vmem [shape: s8[512,512], index: 0, kind: input, shape index: {}]   ;;  %s4775_s1 = inlined_call_operand.vmem [shape: f32[512,1], index: 1, kind: input, shape index: {}]   ;;  %s4776_s2 = inlined_call_operand.vmem [shape: f32[512,1], index: 2, kind: input, shape index: {}]   ;;  %s4777_s3 = inlined_call_operand.vmem [shape: bf16[512,128], index: 3, kind: input, shape index: {}]   ;;  %s4778_s4 = inlined_call_operand.vmem [shape: f32[1,128], index: 4, kind: input, shape index: {}, may-alias: {4,5,6,7,8}]   ;;  %s4779_s5 = inlined_call_operand.vmem [shape: f32[1,128], index: 5, kind: input, shape index: {}, may-alias: {4,5,6,7,8}]   ;;  %s4780_s6 = inlined_call_operand.vmem [shape: f32[1,128], index: 6, kind: input, shape index: {}, may-alias: {4,5,6,7,8}]   ;;  %s4781_s7 = inlined_call_operand.vmem [shape: f32[1,128], index: 7, kind: input, shape index: {}, may-alias: {4,5,6,7,8}]   ;;  %s4782_s8 = inlined_call_operand.vmem [shape: f32[1,128], index: 8, kind: input, shape index: {}, may-alias: {4,5,6,7,8}]   ;;  %s4783_s9 = inlined_call_operand.vmem [shape: bf16[128,128], index: 9, kind: input, shape index: {}]   ;;  %s4784_s10 = inlined_call_operand.vmem [shape: f32[1,128], index: 10, kind: input, shape index: {}]   ;;  %s4785_s11 = inlined_call_operand.vmem [shape: bf16[128,128], index: 11, kind: input, shape index: {}]   ;;  %s4786_s12 = inlined_call_operand.vmem [shape: bf16[512,128], index: 12, kind: output, shape index: {0}]   ;;  %s4787_s13 = inlined_call_operand.vmem [shape: f32[2,2,128], index: 13, kind: output, shape index: {1}]  }
   0x1   :  { %s4128_s8 = smov 0  }
   0x2 LB: > { %s36_s23 = sadd.s32 1, %s4047_s7  ;;  %p3186_p0 = scmp.ge.s32.totalorder %s4051_s8, 1  ;;  %s4051_s8 = sphi %s4128_s8, %s24_s8   ;;  %s4047_s7 = sphi %s4126_s7, %s4789_s7   ;;  %s4043_s22 = sphi %s4124_s22, %s4788_s22  }
   0x3   : > { %p38_p1 = scmp.ge.s32.totalorder %s36_s23, 2  ;;  %p433_p2 = scmp.lt.s32.totalorder %s4051_s8, 3 }
   0x5   : > { %s4791_s23 = smov (%p38_p1, %s36_s23), 0  ;;  %p434_p3 = pnand %p3186_p0, %p433_p2 }
   0x6   : > { %v3965_v0 = vld [vmem:[%s4777_s3 + $0x40] sm:$0xff] (!%p434_p3)   ;;  %s3187_s26 = sshll.u32 (!%p434_p3), %s4043_s22, 5  ;;  %v3967_v2 = vld [vmem:[%s4777_s3 + $0x48] sm:$0xff] (!%p434_p3)   ;;  %v3969_v4 = vld [vmem:[%s4777_s3 + $0x50] sm:$0xff] (!%p434_p3)   ;;  %v4053_v5 = vmov (!%p434_p3), 0   ;;  %p526_p5 = scmp.lt.s32.totalorder (!%p434_p3), %s4043_s22, 1 }
   0x7   : > { %437 = sbr.rel (%p434_p3) target bundleno = 751 (0x2ef), region = 68  ;;  %v3966_v1 = vld [vmem:[%s4777_s3] sm:$0xff] (!%p434_p3)   ;;  %p498_p4 = scmp.lt.s32.totalorder (!%p434_p3), %s3187_s26, 63  ;;  %3858 = vmatprep.subr.bf16.mxu1 (!%p434_p3), %v3965_v0  ;;  %3490 = vmatprep.subr.bf16.mxu0 (!%p434_p3), %v3965_v0  ;;  %v3968_v3 = vld [vmem:[%s4777_s3 + $0x8] sm:$0xff] (!%p434_p3)   ;;  %v3970_v6 = vld [vmem:[%s4777_s3 + $0x10] sm:$0xff] (!%p434_p3)   ;;  %vm2889_vm0 = vcmask (!%p434_p3), 1040384  }
   0x8   : > { %3866 = vmatpush3.bf16.msra.mxu1 (!%p434_p3), %v3966_v1  ;;  %3491 = vmatpush3.bf16.msra.mxu0 (!%p434_p3), %v3966_v1  ;;  %v3971_v7 = vld [vmem:[%s4777_s3 + $0x58] sm:$0xff] (!%p434_p3)   ;;  %v3973_v9 = vld [vmem:[%s4777_s3 + $0x60] sm:$0xff] (!%p434_p3)   ;;  %v3975_v11 = vld [vmem:[%s4777_s3 + $0x68] sm:$0xff] (!%p434_p3)  }
   0x9   : > { %3859 = vmatprep.subr.bf16.mxu1 (!%p434_p3), %v3967_v2  ;;  %3492 = vmatprep.subr.bf16.mxu0 (!%p434_p3), %v3967_v2  ;;  %v3972_v8 = vld [vmem:[%s4777_s3 + $0x18] sm:$0xff] (!%p434_p3)   ;;  %v3974_v10 = vld [vmem:[%s4777_s3 + $0x20] sm:$0xff] (!%p434_p3)   ;;  %v3976_v16 = vld [vmem:[%s4777_s3 + $0x28] sm:$0xff] (!%p434_p3)  }
   0xa   : > { %3963 = vset.pattern.permute.xlu0 (!%p434_p3), %v4053_v5  ;;  %3964 = vset.pattern.permute.xlu1 (!%p434_p3), %v4053_v5  ;;  %v3977_v18 = vld [vmem:[%s4777_s3 + $0x70] sm:$0xff] (!%p434_p3)   ;;  %v3979_v22 = vld [vmem:[%s4777_s3 + $0x78] sm:$0xff] (!%p434_p3)   ;;  %v3981_v30 = vld [vmem:[%s4777_s3 + $0xc0] sm:$0xff] (!%p434_p3)  }
   0xb   : > { %v3978_v19 = vld [vmem:[%s4777_s3 + $0x30] sm:$0xff] (!%p434_p3)   ;;  %v3980_v26 = vld [vmem:[%s4777_s3 + $0x38] sm:$0xff] (!%p434_p3)   ;;  %v3982_v32 = vld [vmem:[%s4777_s3 + $0x80] sm:$0xff] (!%p434_p3)  }
   0xc   : > { %3867 = vmatpush3.bf16.msra.mxu1 (!%p434_p3), %v3968_v3  ;;  %3493 = vmatpush3.bf16.msra.mxu0 (!%p434_p3), %v3968_v3  ;;  %v3983_v34 = vld [vmem:[%s4777_s3 + $0xc8] sm:$0xff] (!%p434_p3)   ;;  %v3985_v42 = vld [vmem:[%s4777_s3 + $0xd0] sm:$0xff] (!%p434_p3)   ;;  %v3987_v58 = vld [vmem:[%s4777_s3 + $0xd8] sm:$0xff] (!%p434_p3)  }
   0xd   : > { %3860 = vmatprep.subr.bf16.mxu1 (!%p434_p3), %v3969_v4  ;;  %3494 = vmatprep.subr.bf16.mxu0 (!%p434_p3), %v3969_v4  ;;  %v3984_v39 = vld [vmem:[%s4777_s3 + $0x88] sm:$0xff] (!%p434_p3)   ;;  %v3986_v52 = vld [vmem:[%s4777_s3 + $0x90] sm:$0xff] (!%p434_p3)   ;;  %v3988_v2 = vld [vmem:[%s4777_s3 + $0x98] sm:$0xff] (!%p434_p3)  }
   0xe   : > { %s4793_s26 = smov (!%p498_p4, %s3187_s26), 63  ;;  %v3989_v5 = vld [vmem:[%s4777_s3 + $0xe0] sm:$0xff]  }
   0xf   : > { %s4169_s5 = sshll.u32 %s4793_s26, 3 }
  0x10   : > { %3868 = vmatpush3.bf16.msra.mxu1 %v3970_v6  ;;  %3495 = vmatpush3.bf16.msra.mxu0 %v3970_v6  ;;  %s4181_s29 = scalar_lea.vmem %s4774_s0, %s4169_s5  ;;  %s4249_s24 = scalar_lea.vmem %s4775_s1, %s4169_s5 }
  0x11   : > { %3861 = vmatprep.subr.bf16.mxu1 %v3971_v7  ;;  %3496 = vmatprep.subr.bf16.mxu0 %v3971_v7  ;;  %v585_v12 = vld [vmem:[%s4181_s29 + $0x80] sm:$0xff]  ;;  %v586_v13 = vld [vmem:[%s4181_s29 + $0x88] sm:$0xff]  ;;  %v587_v23 = vld [vmem:[%s4181_s29 + $0x90] sm:$0xff]  ;;  %s4444_s19 = scalar_lea.vmem %s4776_s2, %s4169_s5 }
  0x12   : > { %v633_v14 = vunpack.c.l.s8.bf16 %v585_v12  ;;  %v635_v15 = vunpack.c.l.s8.bf16 %v586_v13  ;;  %v634_v20 = vunpack.c.h.s8.bf16 %v585_v12  ;;  %v636_v21 = vunpack.c.h.s8.bf16 %v586_v13  ;;  %v588_v24 = vld [vmem:[%s4181_s29 + $0x98] sm:$0xff]  ;;  %v4222_v35 = vld [vmem:[%s4181_s29 + $0xa0] sm:$0xff]  ;;  %v4225_v36 = vld [vmem:[%s4181_s29 + $0xa8] sm:$0xff] }
  0x13   : > { %v637_v27 = vunpack.c.l.s8.bf16 %v587_v23  ;;  %v639_v28 = vunpack.c.l.s8.bf16 %v588_v24  ;;  %v638_v37 = vunpack.c.h.s8.bf16 %v587_v23  ;;  %v640_v38 = vunpack.c.h.s8.bf16 %v588_v24  ;;  %v4240_v45 = vld [vmem:[%s4181_s29] sm:$0xff]  ;;  %v4243_v46 = vld [vmem:[%s4181_s29 + $0x8] sm:$0xff]  ;;  %v4253_v49 = vld [vmem:[%s4181_s29 + $0x10] sm:$0xff] }
  0x14   : > { %3869 = vmatpush3.bf16.msra.mxu1 %v3972_v8  ;;  %3497 = vmatpush3.bf16.msra.mxu0 %v3972_v8  ;;  %v3231_v17 = vcombine.high %v633_v14, %v635_v15  ;;  %v4205_v25 = vcombine.high %v634_v20, %v636_v21  ;;  %v4210_v29 = vcombine.low %v634_v20, %v636_v21  ;;  %v641_v40 = vunpack.c.l.s8.bf16 %v4222_v35  ;;  %v4256_v50 = vld [vmem:[%s4181_s29 + $0x18] sm:$0xff]  ;;  %v4262_v53 = vld [vmem:[%s4181_s29 + $0xb0] sm:$0xff]  ;;  %v1698_v59 = vld [vmem:[%s4249_s24] sm:$0xff] }
  0x15   : > { %3862 = vmatprep.subr.bf16.mxu1 %v3973_v9  ;;  %3498 = vmatprep.subr.bf16.mxu0 %v3973_v9  ;;  %v3230_v31 = vcombine.low %v633_v14, %v635_v15  ;;  %v3235_v33 = vcombine.high %v637_v27, %v639_v28  ;;  %v643_v41 = vunpack.c.l.s8.bf16 %v4225_v36  ;;  %v4235_v43 = vcombine.high %v638_v37, %v640_v38  ;;  %v4268_v57 = vld [vmem:[%s4181_s29 + $0xb8] sm:$0xff]  ;;  %v1700_v63 = vld [vmem:[%s4249_s24 + $0x10] sm:$0xff]  ;;  %v4281_v3 = vld [vmem:[%s4181_s29 + $0x20] sm:$0xff] }
  0x16   : > { %1373 = vmatprep.mubr.bf16.mxu1 %v3231_v17  ;;  %v4237_v44 = vcombine.low %v638_v37, %v640_v38  ;;  %v3234_v47 = vcombine.low %v637_v27, %v639_v28  ;;  %v601_v48 = vunpack.c.l.s8.bf16 %v4240_v45  ;;  %v603_v54 = vunpack.c.l.s8.bf16 %v4243_v46  ;;  %1732 = vperm.xlu0 %3963, %v1698_v59   ;;  %v4284_v4 = vld [vmem:[%s4181_s29 + $0x28] sm:$0xff]  ;;  %v4294_v12 = vld [vmem:[%s4181_s29 + $0xc0] sm:$0xff]  ;;  %v4313_v23 = vld [vmem:[%s4181_s29 + $0x30] sm:$0xff] }
  0x17   : > { %v3239_v51 = vcombine.high %v641_v40, %v643_v41  ;;  %v605_v55 = vunpack.c.l.s8.bf16 %v4253_v49  ;;  %v607_v56 = vunpack.c.l.s8.bf16 %v4256_v50  ;;  %v645_v0 = vunpack.c.l.s8.bf16 %v4262_v53  ;;  %v1699_v6 = vld [vmem:[%s4249_s24 + $0x8] sm:$0xff]  ;;  %1742 = vperm.xlu1 %3964, %v1700_v63   ;;  %v3990_v14 = vld [vmem:[%s4777_s3 + $0xa0] sm:$0xff]   ;;  %v4316_v24 = vld [vmem:[%s4181_s29 + $0x38] sm:$0xff] }
  0x18   : > { %3870 = vmatpush3.bf16.msra.mxu1 %v3974_v10  ;;  %3499 = vmatpush3.bf16.msra.mxu0 %v3974_v10  ;;  %v3199_v60 = vcombine.high %v601_v48, %v603_v54  ;;  %v3198_v61 = vcombine.low %v601_v48, %v603_v54  ;;  %v647_v1 = vunpack.c.l.s8.bf16 %v4268_v57  ;;  %v3238_v7 = vcombine.low %v641_v40, %v643_v41  ;;  %v1701_v10 = vld [vmem:[%s4249_s24 + $0x18] sm:$0xff]  ;;  %v4297_v13 = vld [vmem:[%s4181_s29 + $0xc8] sm:$0xff]  ;;  %v1702_v17 = vld [vmem:[%s4249_s24 + $0x20] sm:$0xff] }
  0x19   : > { %3863 = vmatprep.subr.bf16.mxu1 %v3975_v11  ;;  %3500 = vmatprep.subr.bf16.mxu0 %v3975_v11  ;;  %v3203_v62 = vcombine.high %v605_v55, %v607_v56  ;;  %v609_v8 = vunpack.c.l.s8.bf16 %v4281_v3  ;;  %v611_v9 = vunpack.c.l.s8.bf16 %v4284_v4  ;;  %v3991_v15 = vld [vmem:[%s4777_s3 + $0xe8] sm:$0xff]   ;;  %v1704_v27 = vld [vmem:[%s4249_s24 + $0x30] sm:$0xff]  ;;  %v4332_v38 = vld [vmem:[%s4181_s29 + $0xd8] sm:$0xff]  ;;  %v613_v40 = vunpack.c.l.s8.bf16 %v4313_v23 }
  0x1a   : > { %1309 = vmatprep.mubr.bf16.mxu0 %v3199_v60  ;;  %v3243_v11 = vcombine.high %v645_v0, %v647_v1  ;;  %1737 = vperm.xlu0 %3963, %v1699_v6   ;;  %v1703_v21 = vld [vmem:[%s4249_s24 + $0x28] sm:$0xff]  ;;  %v3994_v28 = vld [vmem:[%s4777_s3 + $0xb0] sm:$0xff]   ;;  %v615_v41 = vunpack.c.l.s8.bf16 %v4316_v24  ;;  %v648_v48 = vunpack.c.h.s8.bf16 %v4268_v57  ;;  %v650_v57 = vunpack.c.h.s8.bf16 %v4294_v12  ;;  %v597_v6 = vld [vmem:[%s4181_s29 + $0xe0] sm:$0xff] }
  0x1b   : > { %1747 = vperm.xlu1 %3964, %v1701_v10   ;;  %v3207_v20 = vcombine.high %v609_v8, %v611_v9  ;;  %v4329_v37 = vld [vmem:[%s4181_s29 + $0xd0] sm:$0xff]  ;;  %v3206_v54 = vcombine.low %v609_v8, %v611_v9  ;;  %v655_v60 = vunpack.c.l.s8.bf16 %v4332_v38 }
  0x1c   : > { %3871 = vmatpush3.bf16.msra.mxu1 %v3976_v16  ;;  %3501 = vmatpush3.bf16.msra.mxu0 %v3976_v16  ;;  %v3202_v16 = vcombine.low %v605_v55, %v607_v56  ;;  %v653_v59 = vunpack.c.l.s8.bf16 %v4329_v37  ;;  %v1708_v63 = vld [vmem:[%s4249_s24 + $0x50] sm:$0xff] }
  0x1d   : > { %3864 = vmatprep.subr.bf16.mxu1 %v3977_v18  ;;  %3502 = vmatprep.subr.bf16.mxu0 %v3977_v18  ;;  %v649_v18 = vunpack.c.l.s8.bf16 %v4294_v12  ;;  %v1710_v12 = vld [vmem:[%s4249_s24 + $0x60] sm:$0xff] }
  0x1e   : > { %1752 = vperm.xlu0 %3963, %v1702_v17   ;;  %v3251_v10 = vcombine.high %v653_v59, %v655_v60  ;;  %v657_v17 = vunpack.c.l.s8.bf16 %v597_v6 }
  0x1f   : > { %1757 = vperm.xlu1 %3964, %v1703_v21  }
  0x20   : > { %3872 = vmatpush3.bf16.msra.mxu1 %v3978_v19  ;;  %3503 = vmatpush3.bf16.msra.mxu0 %v3978_v19  ;;  %v651_v19 = vunpack.c.l.s8.bf16 %v4297_v13 }
  0x21   : > { %3865 = vmatprep.subr.bf16.mxu1 %v3979_v22  ;;  %3504 = vmatprep.subr.bf16.mxu0 %v3979_v22  ;;  %v3992_v22 = vld [vmem:[%s4777_s3 + $0xa8] sm:$0xff]  }
  0x22   : > { %1762 = vperm.xlu0 %3963, %v1704_v27   ;;  %v3250_v27 = vcombine.low %v653_v59, %v655_v60 }
  0x24   : > { %3873 = vmatpush3.bf16.msra.mxu1 %v3980_v26  ;;  %3505 = vmatpush3.bf16.msra.mxu0 %v3980_v26  ;;  %v3993_v26 = vld [vmem:[%s4777_s3 + $0xf0] sm:$0xff]  }
  0x25   : > { %3602 = vmatprep.subr.bf16.mxu1 %v3981_v30  ;;  %v1705_v30 = vld [vmem:[%s4249_s24 + $0x38] sm:$0xff] }
  0x26   : > { %1767 = vperm.xlu1 %3964, %v1705_v30  }
  0x27   : > { %1374 = vmatmul.mubr.bf16.vlgmr.msra.gmra.mrb[0].mxu1 %v3230_v31  ;;  %1310 = vmatmul.mubr.bf16.vlgmr.msra.gmra.mrb[0].mxu0 %v3198_v61  ;;  %v642_v31 = vunpack.c.h.s8.bf16 %v4222_v35  ;;  %v1706_v35 = vld [vmem:[%s4249_s24 + $0x40] sm:$0xff] }
  0x28   : > { %3603 = vmatpush3.bf16.msra.mxu1 %v3982_v32  ;;  %1381 = vmatprep.mubr.bf16.mxu1 %v3235_v33  ;;  %v644_v32 = vunpack.c.h.s8.bf16 %v4225_v36  ;;  %v3242_v33 = vcombine.low %v645_v0, %v647_v1  ;;  %v4359_v61 = vld [vmem:[%s4181_s29 + $0x40] sm:$0xff]  ;;  %v1709_v0 = vld [vmem:[%s4249_s24 + $0x58] sm:$0xff] }
  0x29   : > { %3604 = vmatprep.subr.bf16.mxu1 %v3983_v34  ;;  %1317 = vmatprep.mubr.bf16.mxu0 %v3203_v62  ;;  %v3247_v34 = vcombine.high %v649_v18, %v651_v19  ;;  %v4362_v62 = vld [vmem:[%s4181_s29 + $0x48] sm:$0xff]  ;;  %v617_v8 = vunpack.c.l.s8.bf16 %v4359_v61 }
  0x2a   : > { %v4342_v36 = vcombine.low %v642_v31, %v644_v32  ;;  %1772 = vperm.xlu0 %3963, %v1706_v35   ;;  %v619_v9 = vunpack.c.l.s8.bf16 %v4362_v62 }
  0x2c   : > { %3605 = vmatpush3.bf16.msra.mxu1 %v3984_v39  ;;  %v3995_v39 = vld [vmem:[%s4777_s3 + $0xf8] sm:$0xff]  }
  0x2d   : > { %3606 = vmatprep.subr.bf16.mxu1 %v3985_v42  ;;  %v4340_v42 = vcombine.high %v642_v31, %v644_v32  ;;  %v1713_v31 = vld [vmem:[%s4249_s24 + $0x78] sm:$0xff] }
  0x2e   : > { %1782 = vperm.xlu0 %3963, %v1708_v63   ;;  %v1717_v63 = vld [vmem:[%s4249_s24 + $0x98] sm:$0xff] }
  0x2f   : > { %1382 = vmatmul.mubr.bf16.gmra.mrb[4].mxu1 %v3234_v47  ;;  %1318 = vmatmul.mubr.bf16.gmra.mrb[4].mxu0 %v3202_v16  ;;  %v646_v47 = vunpack.c.h.s8.bf16 %v4262_v53  ;;  %v3211_v53 = vcombine.high %v613_v40, %v615_v41  ;;  %v656_v16 = vunpack.c.h.s8.bf16 %v4332_v38  ;;  %v1714_v38 = vld [vmem:[%s4249_s24 + $0x80] sm:$0xff] }
  0x30   : > { %1389 = vmatprep.mubr.bf16.mxu1 %v3239_v51  ;;  %3607 = vmatpush3.bf16.msra.mxu1 %v3986_v52  ;;  %v1707_v51 = vld [vmem:[%s4249_s24 + $0x48] sm:$0xff]  ;;  %v3996_v52 = vld [vmem:[%s4777_s3 + $0xb8] sm:$0xff]  }
  0x31   : > { %3608 = vmatprep.subr.bf16.mxu1 %v3987_v58  ;;  %1325 = vmatprep.mubr.bf16.mxu0 %v3207_v20  ;;  %v4350_v55 = vcombine.high %v646_v47, %v648_v48  ;;  %v4352_v56 = vcombine.low %v646_v47, %v648_v48  ;;  %v652_v58 = vunpack.c.h.s8.bf16 %v4297_v13  ;;  %v3215_v13 = vcombine.high %v617_v8, %v619_v9  ;;  %v4382_v20 = vld [vmem:[%s4181_s29 + $0x58] sm:$0xff] }
  0x32   : > { %1777 = vperm.xlu1 %3964, %v1707_v51   ;;  %1792 = vperm.xlu0 %3963, %v1710_v12   ;;  %v623_v30 = vunpack.c.l.s8.bf16 %v4382_v20  ;;  %v4397_v51 = vld [vmem:[%s4181_s29 + $0x60] sm:$0xff]  ;;  %v604_v12 = vunpack.c.h.s8.bf16 %v4243_v46 }
  0x33   : > { %v4366_v1 = vcombine.high %v650_v57, %v652_v58  ;;  %v625_v59 = vunpack.c.l.s8.bf16 %v4397_v51 }
  0x34   : > { %3609 = vmatpush3.bf16.msra.mxu1 %v3988_v2  ;;  %v4368_v2 = vcombine.low %v650_v57, %v652_v58  ;;  %v1716_v57 = vld [vmem:[%s4249_s24 + $0x90] sm:$0xff] }
  0x35   : > { %3610 = vmatprep.subr.bf16.mxu1 %v3989_v5  ;;  %v3246_v5 = vcombine.low %v649_v18, %v651_v19  ;;  %v4379_v19 = vld [vmem:[%s4181_s29 + $0x50] sm:$0xff] }
  0x36   : > { %1787 = vperm.xlu1 %3964, %v1709_v0  }
  0x37   : > { %1390 = vmatmul.mubr.bf16.gmra.mrb[8].mxu1 %v3238_v7  ;;  %1326 = vmatmul.mubr.bf16.gmra.mrb[8].mxu0 %v3206_v54  ;;  %v598_v7 = vld [vmem:[%s4181_s29 + $0xe8] sm:$0xff] }
  0x38   : > { %1397 = vmatprep.mubr.bf16.mxu1 %v3243_v11  ;;  %3611 = vmatpush3.bf16.msra.mxu1 %v3990_v14  ;;  %v3210_v11 = vcombine.low %v613_v40, %v615_v41  ;;  %v1711_v14 = vld [vmem:[%s4249_s24 + $0x68] sm:$0xff]  ;;  %v659_v18 = vunpack.c.l.s8.bf16 %v598_v7  ;;  %v658_v41 = vunpack.c.h.s8.bf16 %v597_v6  ;;  %v660_v35 = vunpack.c.h.s8.bf16 %v598_v7  ;;  %v1718_v6 = vld [vmem:[%s4249_s24 + $0xa0] sm:$0xff] }
  0x39   : > { %3612 = vmatprep.subr.bf16.mxu1 %v3991_v15  ;;  %1333 = vmatprep.mubr.bf16.mxu0 %v3211_v53  ;;  %v654_v15 = vunpack.c.h.s8.bf16 %v4329_v37  ;;  %v3214_v37 = vcombine.low %v617_v8, %v619_v9  ;;  %v1715_v40 = vld [vmem:[%s4249_s24 + $0x88] sm:$0xff] }
  0x3a   : > { %1797 = vperm.xlu1 %3964, %v1711_v14   ;;  %v3255_v32 = vcombine.high %v657_v17, %v659_v18  ;;  %v4402_v54 = vcombine.high %v658_v41, %v660_v35  ;;  %v4404_v53 = vcombine.low %v658_v41, %v660_v35  ;;  %v3254_v58 = vcombine.low %v657_v17, %v659_v18  ;;  %v1719_v8 = vld [vmem:[%s4249_s24 + $0xa8] sm:$0xff]  ;;  %v4418_v14 = vld [vmem:[%s4181_s29 + $0x78] sm:$0xff]  ;;  %v1720_v17 = vld [vmem:[%s4249_s24 + $0xb0] sm:$0xff] }
  0x3b   : > { %v4384_v21 = vcombine.high %v654_v15, %v656_v16  ;;  %v631_v46 = vunpack.c.l.s8.bf16 %v4418_v14  ;;  %v1726_v35 = vld [vmem:[%s4249_s24 + $0xe0] sm:$0xff] }
  0x3c   : > { %3613 = vmatpush3.bf16.msra.mxu1 %v3992_v22  ;;  %v4386_v22 = vcombine.low %v654_v15, %v656_v16 }
  0x3d   : > { %3614 = vmatprep.subr.bf16.mxu1 %v3993_v26  ;;  %v1712_v26 = vld [vmem:[%s4249_s24 + $0x70] sm:$0xff] }
  0x3e   : > { %1802 = vperm.xlu0 %3963, %v1712_v26   ;;  %1807 = vperm.xlu1 %3964, %v1713_v31   ;;  %v1721_v26 = vld [vmem:[%s4249_s24 + $0xb8] sm:$0xff] }
  0x3f   : > { %1398 = vmatmul.mubr.bf16.gmra.mrb[12].mxu1 %v3242_v33  ;;  %1334 = vmatmul.mubr.bf16.gmra.mrb[12].mxu0 %v3210_v11  ;;  %v599_v33 = vld [vmem:[%s4181_s29 + $0xf0] sm:$0xff]  ;;  %v602_v11 = vunpack.c.h.s8.bf16 %v4240_v45 }
  0x40   : > { %1405 = vmatprep.mubr.bf16.mxu1 %v3247_v34  ;;  %3615 = vmatpush3.bf16.msra.mxu1 %v3994_v28  ;;  %v621_v28 = vunpack.c.l.s8.bf16 %v4379_v19  ;;  %v600_v34 = vld [vmem:[%s4181_s29 + $0xf8] sm:$0xff]  ;;  %v661_v47 = vunpack.c.l.s8.bf16 %v599_v33  ;;  %v662_v9 = vunpack.c.h.s8.bf16 %v599_v33  ;;  %v606_v33 = vunpack.c.h.s8.bf16 %v4253_v49 }
  0x41   : > { %3616 = vmatprep.subr.bf16.mxu1 %v3995_v39  ;;  %1341 = vmatprep.mubr.bf16.mxu0 %v3215_v13  ;;  %v663_v48 = vunpack.c.l.s8.bf16 %v600_v34  ;;  %v4415_v13 = vld [vmem:[%s4181_s29 + $0x70] sm:$0xff]  ;;  %v610_v49 = vunpack.c.h.s8.bf16 %v4281_v3  ;;  %v2559_v3 = vld [vmem:[%s4444_s19] sm:$0xff] }
  0x42   : > { %v3219_v39 = vcombine.high %v621_v28, %v623_v30  ;;  %1812 = vperm.xlu0 %3963, %v1714_v38   ;;  %1817 = vperm.xlu1 %3964, %v1715_v40   ;;  %v629_v45 = vunpack.c.l.s8.bf16 %v4415_v13  ;;  %v3200_v38 = vcombine.low %v602_v11, %v604_v12 }
  0x43   : > { %v3259_v0 = vcombine.high %v661_v47, %v663_v48  ;;  %v3258_v18 = vcombine.low %v661_v47, %v663_v48  ;;  %v1727_v47 = vld [vmem:[%s4249_s24 + $0xe8] sm:$0xff]  ;;  %v1728_v48 = vld [vmem:[%s4249_s24 + $0xf0] sm:$0xff] }
  0x44   : > { %3617 = vmatpush3.bf16.msra.mxu1 %v3996_v52  ;;  %v4400_v52 = vld [vmem:[%s4181_s29 + $0x68] sm:$0xff]  ;;  %v3227_v31 = vcombine.high %v629_v45, %v631_v46  ;;  %v3226_v41 = vcombine.low %v629_v45, %v631_v46  ;;  %v2569_v46 = vld [vmem:[%s4444_s19 + $0x50] sm:$0xff] }
  0x45   : > { %v627_v60 = vunpack.c.l.s8.bf16 %v4400_v52  ;;  %v2568_v45 = vld [vmem:[%s4444_s19 + $0x48] sm:$0xff] }
  0x46   : > { %1822 = vperm.xlu0 %3963, %v1716_v57   ;;  %1827 = vperm.xlu1 %3964, %v1717_v63   ;;  %v616_v63 = vunpack.c.h.s8.bf16 %v4316_v24  ;;  %v620_v24 = vunpack.c.h.s8.bf16 %v4362_v62  ;;  %v624_v62 = vunpack.c.h.s8.bf16 %v4382_v20  ;;  %v628_v20 = vunpack.c.h.s8.bf16 %v4400_v52 }
  0x47   : > { %1406 = vmatmul.mubr.bf16.gmra.mrb[16].mxu1 %v3246_v5  ;;  %1342 = vmatmul.mubr.bf16.gmra.mrb[16].mxu0 %v3214_v37  ;;  %v3218_v5 = vcombine.low %v621_v28, %v623_v30  ;;  %v3223_v7 = vcombine.high %v625_v59, %v627_v60  ;;  %v3222_v28 = vcombine.low %v625_v59, %v627_v60  ;;  %v1722_v30 = vld [vmem:[%s4249_s24 + $0xc0] sm:$0xff]  ;;  %v1724_v37 = vld [vmem:[%s4249_s24 + $0xd0] sm:$0xff]  ;;  %v614_v60 = vunpack.c.h.s8.bf16 %v4313_v23 }
  0x48   : > { %1413 = vmatprep.mubr.bf16.mxu1 %v3251_v10  ;;  %1349 = vmatprep.mubr.bf16.mxu0 %v3219_v39  ;;  %v664_v10 = vunpack.c.h.s8.bf16 %v600_v34  ;;  %v608_v34 = vunpack.c.h.s8.bf16 %v4256_v50  ;;  %v1725_v39 = vld [vmem:[%s4249_s24 + $0xd8] sm:$0xff]  ;;  %v612_v50 = vunpack.c.h.s8.bf16 %v4284_v4  ;;  %v2560_v4 = vld [vmem:[%s4444_s19 + $0x8] sm:$0xff]  ;;  %v618_v23 = vunpack.c.h.s8.bf16 %v4359_v61 }
  0x49   : > { %v622_v61 = vunpack.c.h.s8.bf16 %v4379_v19  ;;  %v626_v19 = vunpack.c.h.s8.bf16 %v4397_v51  ;;  %v630_v51 = vunpack.c.h.s8.bf16 %v4415_v13  ;;  %v632_v52 = vunpack.c.h.s8.bf16 %v4418_v14  ;;  %v2581_v13 = vld [vmem:[%s4444_s19 + $0xb0] sm:$0xff] }
  0x4a   : > { %1832 = vperm.xlu0 %3963, %v1718_v6   ;;  %v4420_v15 = vcombine.high %v662_v9, %v664_v10  ;;  %v4422_v16 = vcombine.low %v662_v9, %v664_v10  ;;  %1837 = vperm.xlu1 %3964, %v1719_v8   ;;  %v3205_v40 = vcombine.high %v606_v33, %v608_v34  ;;  %v2562_v6 = vld [vmem:[%s4444_s19 + $0x18] sm:$0xff]  ;;  %v2563_v8 = vld [vmem:[%s4444_s19 + $0x20] sm:$0xff]  ;;  %v2564_v9 = vld [vmem:[%s4444_s19 + $0x28] sm:$0xff] }
  0x4b   : > { %v3204_v57 = vcombine.low %v606_v33, %v608_v34  ;;  %v3209_v59 = vcombine.high %v610_v49, %v612_v50  ;;  %v2565_v10 = vld [vmem:[%s4444_s19 + $0x30] sm:$0xff]  ;;  %v3220_v33 = vcombine.low %v622_v61, %v624_v62  ;;  %v2574_v34 = vld [vmem:[%s4444_s19 + $0x78] sm:$0xff]  ;;  %v3228_v14 = vcombine.low %v630_v51, %v632_v52 }
  0x4e   : > { %1842 = vperm.xlu0 %3963, %v1720_v17   ;;  %1847 = vperm.xlu1 %3964, %v1721_v26   ;;  %v3217_v17 = vcombine.high %v618_v23, %v620_v24  ;;  %v3216_v26 = vcombine.low %v618_v23, %v620_v24 }
  0x4f   : > { %1414 = vmatmul.mubr.bf16.gmra.mrb[20].mxu1 %v3250_v27  ;;  %1350 = vmatmul.mubr.bf16.gmra.mrb[20].mxu0 %v3218_v5  ;;  %v3201_v27 = vcombine.high %v602_v11, %v604_v12  ;;  %v3208_v5 = vcombine.low %v610_v49, %v612_v50  ;;  %v3212_v11 = vcombine.low %v614_v60, %v616_v63  ;;  %v2566_v12 = vld [vmem:[%s4444_s19 + $0x38] sm:$0xff]  ;;  %v2579_v49 = vld [vmem:[%s4444_s19 + $0xa0] sm:$0xff]  ;;  %v2580_v50 = vld [vmem:[%s4444_s19 + $0xa8] sm:$0xff] }
  0x50   : > { %1421 = vmatprep.mubr.bf16.mxu1 %v3255_v32  ;;  %1357 = vmatprep.mubr.bf16.mxu0 %v3223_v7  ;;  %v1723_v32 = vld [vmem:[%s4249_s24 + $0xc8] sm:$0xff]  ;;  %v3213_v7 = vcombine.high %v614_v60, %v616_v63  ;;  %v2589_v63 = vld [vmem:[%s4444_s19 + $0xf0] sm:$0xff] }
  0x51   : > { %v2588_v60 = vld [vmem:[%s4444_s19 + $0xe8] sm:$0xff] }
  0x52   : > { %1852 = vperm.xlu0 %3963, %v1722_v30   ;;  %1857 = vperm.xlu1 %3964, %v1723_v32   ;;  %v2571_v30 = vld [vmem:[%s4444_s19 + $0x60] sm:$0xff]  ;;  %v2573_v32 = vld [vmem:[%s4444_s19 + $0x70] sm:$0xff] }
  0x56   : > { %1862 = vperm.xlu0 %3963, %v1724_v37   ;;  %1867 = vperm.xlu1 %3964, %v1725_v39   ;;  %v3225_v37 = vcombine.high %v626_v19, %v628_v20  ;;  %v2576_v39 = vld [vmem:[%s4444_s19 + $0x88] sm:$0xff] }
  0x57   : > { %1422 = vmatmul.mubr.bf16.gmra.mrb[24].mxu1 %v3254_v58  ;;  %1358 = vmatmul.mubr.bf16.gmra.mrb[24].mxu0 %v3222_v28  ;;  %v1729_v58 = vld [vmem:[%s4249_s24 + $0xf8] sm:$0xff]  ;;  %v3221_v28 = vcombine.high %v622_v61, %v624_v62  ;;  %s3197_s24 = sshll.u32 %s4043_s22, 8  ;;  %s4795_s22 = smov (!%p526_p5, %s4043_s22), 1 }
  0x58   : > { %1429 = vmatprep.mubr.bf16.mxu1 %v3259_v0  ;;  %1365 = vmatprep.mubr.bf16.mxu0 %v3227_v31  ;;  %v2561_v0 = vld [vmem:[%s4444_s19 + $0x10] sm:$0xff]  ;;  %v2572_v31 = vld [vmem:[%s4444_s19 + $0x68] sm:$0xff]  ;;  %s1922_s4 = sshra.s32 %s3197_s24, 3 }
  0x59   : > { %s3294_s20 = sshll.u32 %s1922_s4, 2 }
  0x5a   : > { %1872 = vperm.xlu0 %3963, %v1726_v35   ;;  %1877 = vperm.xlu1 %3964, %v1727_v47   ;;  %v2578_v35 = vld [vmem:[%s4444_s19 + $0x98] sm:$0xff]  ;;  %v3229_v47 = vcombine.high %v630_v51, %v632_v52  ;;  %s4604_s25 = scalar_lea.vmem %s4777_s3, %s3294_s20 }
  0x5e   : > { %1882 = vperm.xlu0 %3963, %v1728_v48   ;;  %1887 = vperm.xlu1 %3964, %v1729_v58   ;;  %v2582_v48 = vld [vmem:[%s4444_s19 + $0xb8] sm:$0xff]  ;;  %v2584_v58 = vld [vmem:[%s4444_s19 + $0xc8] sm:$0xff] }
  0x5f   : > { %1430 = vmatmul.mubr.bf16.gmra.mrb[28].mxu1 %v3258_v18  ;;  %1366 = vmatmul.mubr.bf16.gmra.mrb[28].mxu0 %v3226_v41  ;;  %v2567_v18 = vld [vmem:[%s4444_s19 + $0x40] sm:$0xff]  ;;  %v3224_v41 = vcombine.low %v626_v19, %v628_v20 }
  0x60   : > { %1470 = vmatprep.mubr.bf16.mxu1 %v3201_v27  ;;  %v2570_v27 = vld [vmem:[%s4444_s19 + $0x58] sm:$0xff] }
  0x62   : > { %2593 = vperm.xlu0 %3963, %v2559_v3   ;;  %2598 = vperm.xlu1 %3964, %v2560_v4   ;;  %v2586_v3 = vld [vmem:[%s4444_s19 + $0xd8] sm:$0xff]  ;;  %v2587_v4 = vld [vmem:[%s4444_s19 + $0xe0] sm:$0xff] }
  0x66   : > { %2603 = vperm.xlu0 %3963, %v2561_v0   ;;  %2608 = vperm.xlu1 %3964, %v2562_v6   ;;  %v2590_v0 = vld [vmem:[%s4444_s19 + $0xf8] sm:$0xff] }
  0x67   : > { %1471 = vmatmul.mubr.bf16.vlgmr.msra.gmra.mrb[32].mxu1 %v3200_v38  ;;  %v2575_v38 = vld [vmem:[%s4444_s19 + $0x80] sm:$0xff] }
  0x68   : > { %1478 = vmatprep.mubr.bf16.mxu1 %v3205_v40  ;;  %v2577_v40 = vld [vmem:[%s4444_s19 + $0x90] sm:$0xff] }
  0x6a   : > { %2613 = vperm.xlu0 %3963, %v2563_v8   ;;  %2618 = vperm.xlu1 %3964, %v2564_v9  }
  0x6e   : > { %2623 = vperm.xlu0 %3963, %v2565_v10   ;;  %2628 = vperm.xlu1 %3964, %v2566_v12  }
  0x6f   : > { %1479 = vmatmul.mubr.bf16.gmra.mrb[36].mxu1 %v3204_v57  ;;  %v2583_v57 = vld [vmem:[%s4444_s19 + $0xc0] sm:$0xff] }
  0x70   : > { %1486 = vmatprep.mubr.bf16.mxu1 %v3209_v59  ;;  %v2585_v59 = vld [vmem:[%s4444_s19 + $0xd0] sm:$0xff] }
  0x72   : > { %2633 = vperm.xlu0 %3963, %v2567_v18   ;;  %2638 = vperm.xlu1 %3964, %v2568_v45   ;;  %v4543_v18 = vld [vmem:[%s4785_s11] sm:$0xff]  }
  0x76   : > { %2643 = vperm.xlu0 %3963, %v2569_v46   ;;  %2648 = vperm.xlu1 %3964, %v2570_v27  }
  0x77   : > { %1487 = vmatmul.mubr.bf16.gmra.mrb[40].mxu1 %v3208_v5 }
  0x78   : > { %1494 = vmatprep.mubr.bf16.mxu1 %v3213_v7 }
  0x7a   : > { %2653 = vperm.xlu0 %3963, %v2571_v30   ;;  %2658 = vperm.xlu1 %3964, %v2572_v31  }
  0x7e   : > { %2663 = vperm.xlu0 %3963, %v2573_v32   ;;  %2668 = vperm.xlu1 %3964, %v2574_v34  }
  0x7f   : > { %1495 = vmatmul.mubr.bf16.gmra.mrb[44].mxu1 %v3212_v11 }
  0x80   : > { %1502 = vmatprep.mubr.bf16.mxu1 %v3217_v17 }
  0x82   : > { %2673 = vperm.xlu0 %3963, %v2575_v38   ;;  %2678 = vperm.xlu1 %3964, %v2576_v39  }
  0x86   : > { %2683 = vperm.xlu0 %3963, %v2577_v40   ;;  %2688 = vperm.xlu1 %3964, %v2578_v35  }
  0x87   : > { %1503 = vmatmul.mubr.bf16.gmra.mrb[48].mxu1 %v3216_v26 }
  0x88   : > { %1510 = vmatprep.mubr.bf16.mxu1 %v3221_v28 }
  0x8a   : > { %2693 = vperm.xlu0 %3963, %v2579_v49   ;;  %2698 = vperm.xlu1 %3964, %v2580_v50  }
  0x8e   : > { %2703 = vperm.xlu0 %3963, %v2581_v13   ;;  %2708 = vperm.xlu1 %3964, %v2582_v48  }
  0x8f   : > { %1511 = vmatmul.mubr.bf16.gmra.mrb[52].mxu1 %v3220_v33 }
  0x90   : > { %1518 = vmatprep.mubr.bf16.mxu1 %v3225_v37 }
  0x92   : > { %2713 = vperm.xlu0 %3963, %v2583_v57   ;;  %2718 = vperm.xlu1 %3964, %v2584_v58  }
  0x96   : > { %2723 = vperm.xlu0 %3963, %v2585_v59   ;;  %2728 = vperm.xlu1 %3964, %v2586_v3  }
  0x97   : > { %1519 = vmatmul.mubr.bf16.gmra.mrb[56].mxu1 %v3224_v41 }
  0x98   : > { %1526 = vmatprep.mubr.bf16.mxu1 %v3229_v47 }
  0x9a   : > { %2733 = vperm.xlu0 %3963, %v2587_v4   ;;  %2738 = vperm.xlu1 %3964, %v2588_v60  }
  0x9e   : > { %2743 = vperm.xlu0 %3963, %v2589_v63   ;;  %2748 = vperm.xlu1 %3964, %v2590_v0  }
  0x9f   : > { %1527 = vmatmul.mubr.bf16.gmra.mrb[60].mxu1 %v3228_v14 }
  0xa0   : > { %1534 = vmatprep.mubr.bf16.mxu1 %v4205_v25  ;;  %v3997_v25 = vld [vmem:[%s4783_s9] sm:$0xff]  }
  0xa1   : > { %3762 = vmatprep.subr.bf16.mxu0 %v3997_v25 }
  0xa2   : > { %3763 = vmatpush3.bf16.msra.mxu0 %v3997_v25 }
  0xa7   : > { %1535 = vmatmul.mubr.bf16.gmra.mrb[64].mxu1 %v4210_v29  ;;  %v3998_v29 = vld [vmem:[%s4783_s9 + $0x8] sm:$0xff]  }
  0xa8   : > { %1542 = vmatprep.mubr.bf16.mxu1 %v4235_v43  ;;  %3764 = vmatprep.subr.bf16.mxu0 %v3998_v29  ;;  %v3999_v43 = vld [vmem:[%s4783_s9 + $0x10] sm:$0xff]  }
  0xa9   : > { %3765 = vmatpush3.bf16.msra.mxu0 %v3998_v29 }
  0xaa   : > { %3766 = vmatprep.subr.bf16.mxu0 %v3999_v43 }
  0xad   : > { %3767 = vmatpush3.bf16.msra.mxu0 %v3999_v43 }
  0xaf   : > { %1543 = vmatmul.mubr.bf16.gmra.mrb[68].mxu1 %v4237_v44  ;;  %v4000_v44 = vld [vmem:[%s4783_s9 + $0x18] sm:$0xff]  }
  0xb0   : > { %1550 = vmatprep.mubr.bf16.mxu1 %v4340_v42  ;;  %3768 = vmatprep.subr.bf16.mxu0 %v4000_v44  ;;  %v4001_v42 = vld [vmem:[%s4783_s9 + $0x20] sm:$0xff]  }
  0xb1   : > { %3769 = vmatpush3.bf16.msra.mxu0 %v4000_v44 }
  0xb2   : > { %3770 = vmatprep.subr.bf16.mxu0 %v4001_v42 }
  0xb5   : > { %3771 = vmatpush3.bf16.msra.mxu0 %v4001_v42 }
  0xb7   : > { %1551 = vmatmul.mubr.bf16.gmra.mrb[72].mxu1 %v4342_v36  ;;  %v4002_v36 = vld [vmem:[%s4783_s9 + $0x28] sm:$0xff]  }
  0xb8   : > { %1558 = vmatprep.mubr.bf16.mxu1 %v4350_v55  ;;  %3772 = vmatprep.subr.bf16.mxu0 %v4002_v36  ;;  %v4003_v55 = vld [vmem:[%s4783_s9 + $0x30] sm:$0xff]  }
  0xb9   : > { %3773 = vmatpush3.bf16.msra.mxu0 %v4002_v36 }
  0xba   : > { %3774 = vmatprep.subr.bf16.mxu0 %v4003_v55 }
  0xbd   : > { %3775 = vmatpush3.bf16.msra.mxu0 %v4003_v55 }
  0xbf   : > { %1559 = vmatmul.mubr.bf16.gmra.mrb[76].mxu1 %v4352_v56  ;;  %v4004_v56 = vld [vmem:[%s4783_s9 + $0x38] sm:$0xff]  }
  0xc0   : > { %1566 = vmatprep.mubr.bf16.mxu1 %v4366_v1  ;;  %3776 = vmatprep.subr.bf16.mxu0 %v4004_v56 }
  0xc1   : > { %3777 = vmatpush3.bf16.msra.mxu0 %v4004_v56 }
  0xc2   : > { %3810 = vmatprep.subr.bf16.mxu0 %v4543_v18 }
  0xc7   : > { %1567 = vmatmul.mubr.bf16.gmra.mrb[80].mxu1 %v4368_v2 }
  0xc8   : > { %1574 = vmatprep.mubr.bf16.mxu1 %v4384_v21 }
  0xcf   : > { %1575 = vmatmul.mubr.bf16.gmra.mrb[84].mxu1 %v4386_v22 }
  0xd0   : > { %1582 = vmatprep.mubr.bf16.mxu1 %v4402_v54 }
  0xd7   : > { %1583 = vmatmul.mubr.bf16.gmra.mrb[88].mxu1 %v4404_v53 }
  0xd8   : > { %1590 = vmatprep.mubr.bf16.mxu1 %v4420_v15 }
  0xdf   : > { %1591 = vmatmul.mubr.bf16.gmra.mrb[92].mxu1 %v4422_v16 }
  0xfa   : > { %v3554_v1 = vpop.f32.mrb[0].mxu1  ;;  %v3506_v24 = vpop.f32.mrb[0].mxu0 }
  0xfb   : > { %v3555_v2 = vpop.f32.mrb[1].mxu1  ;;  %v3507_v15 = vpop.f32.mrb[1].mxu0 }
  0xfc   : > { %v4528_v5 = vadd.f32 %v3555_v2, %v3554_v1  ;;  %v3557_v21 = vpop.f32.mrb[2].mxu1  ;;  %v4536_v10 = vadd.f32 %v3507_v15, %v3506_v24  ;;  %v3509_v16 = vpop.f32.mrb[2].mxu0 }
  0xfd   : > { %v3558_v6 = vpop.f32.mrb[3].mxu1  ;;  %v3510_v11 = vpop.f32.mrb[3].mxu0 }
  0xfe   : > { %v4530_v7 = vadd.f32 %v3558_v6, %v3557_v21  ;;  %v4538_v12 = vadd.f32 %v3510_v11, %v3509_v16 }
 0x102   : > { %v3560_v8 = vpop.f32.mrb[4].mxu1  ;;  %v3512_v26 = vpop.f32.mrb[4].mxu0 }
 0x103   : > { %v3561_v9 = vpop.f32.mrb[5].mxu1  ;;  %v3513_v28 = vpop.f32.mrb[5].mxu0 }
 0x104   : > { %v4532_v23 = vadd.f32 %v3561_v9, %v3560_v8  ;;  %v3563_v22 = vpop.f32.mrb[6].mxu1  ;;  %v4550_v30 = vadd.f32 %v3513_v28, %v3512_v26  ;;  %v3515_v31 = vpop.f32.mrb[6].mxu0 }
 0x105   : > { %v3564_v54 = vpop.f32.mrb[7].mxu1  ;;  %v3516_v19 = vpop.f32.mrb[7].mxu0 }
 0x106   : > { %v4534_v53 = vadd.f32 %v3564_v54, %v3563_v22  ;;  %v4552_v20 = vadd.f32 %v3516_v19, %v3515_v31 }
 0x10a   : > { %v3566_v17 = vpop.f32.mrb[8].mxu1  ;;  %v3518_v39 = vpop.f32.mrb[8].mxu0 }
 0x10b   : > { %v3567_v45 = vpop.f32.mrb[9].mxu1  ;;  %v3519_v52 = vpop.f32.mrb[9].mxu0 }
 0x10c   : > { %v4545_v61 = vadd.f32 %v3567_v45, %v3566_v17  ;;  %v3569_v62 = vpop.f32.mrb[10].mxu1  ;;  %v4558_v40 = vadd.f32 %v3519_v52, %v3518_v39  ;;  %v3521_v41 = vpop.f32.mrb[10].mxu0 }
 0x10d   : > { %v3570_v46 = vpop.f32.mrb[11].mxu1  ;;  %v3522_v35 = vpop.f32.mrb[11].mxu0 }
 0x10e   : > { %v4548_v27 = vadd.f32 %v3570_v46, %v3569_v62  ;;  %v4560_v47 = vadd.f32 %v3522_v35, %v3521_v41 }
 0x112   : > { %v3572_v32 = vpop.f32.mrb[12].mxu1  ;;  %v3524_v57 = vpop.f32.mrb[12].mxu0 }
 0x113   : > { %v3573_v33 = vpop.f32.mrb[13].mxu1  ;;  %v3525_v59 = vpop.f32.mrb[13].mxu0 }
 0x114   : > { %v4554_v34 = vadd.f32 %v3573_v33, %v3572_v32  ;;  %v3575_v37 = vpop.f32.mrb[14].mxu1  ;;  %v4566_v3 = vadd.f32 %v3525_v59, %v3524_v57  ;;  %v3527_v4 = vpop.f32.mrb[14].mxu0 }
 0x115   : > { %v3576_v38 = vpop.f32.mrb[15].mxu1  ;;  %v3528_v60 = vpop.f32.mrb[15].mxu0 }
 0x116   : > { %v4556_v51 = vadd.f32 %v3576_v38, %v3575_v37  ;;  %v4568_v63 = vadd.f32 %v3528_v60, %v3527_v4 }
 0x11a   : > { %v3578_v49 = vpop.f32.mrb[16].mxu1  ;;  %v3530_v42 = vpop.f32.mrb[16].mxu0 }
 0x11b   : > { %v3579_v50 = vpop.f32.mrb[17].mxu1  ;;  %v3531_v55 = vpop.f32.mrb[17].mxu0 }
 0x11c   : > { %v4562_v13 = vadd.f32 %v3579_v50, %v3578_v49  ;;  %v3581_v14 = vpop.f32.mrb[18].mxu1  ;;  %v4574_v56 = vadd.f32 %v3531_v55, %v3530_v42  ;;  %v3533_v1 = vpop.f32.mrb[18].mxu0 }
 0x11d   : > { %v3582_v48 = vpop.f32.mrb[19].mxu1  ;;  %v3534_v2 = vpop.f32.mrb[19].mxu0 }
 0x11e   : > { %v4564_v58 = vadd.f32 %v3582_v48, %v3581_v14  ;;  %v4576_v21 = vadd.f32 %v3534_v2, %v3533_v1  ;;  %v1733_v49 = vpop.permute.xlu0 %1732 }
 0x122   : > { %v3584_v0 = vpop.f32.mrb[20].mxu1  ;;  %v3536_v24 = vpop.f32.mrb[20].mxu0 }
 0x123   : > { %v3585_v25 = vpop.f32.mrb[21].mxu1  ;;  %v3537_v16 = vpop.f32.mrb[21].mxu0 }
 0x124   : > { %v4570_v29 = vadd.f32 %v3585_v25, %v3584_v0  ;;  %v3587_v43 = vpop.f32.mrb[22].mxu1  ;;  %v4582_v11 = vadd.f32 %v3537_v16, %v3536_v24  ;;  %v3539_v17 = vpop.f32.mrb[22].mxu0 }
 0x125   : > { %v3588_v44 = vpop.f32.mrb[23].mxu1  ;;  %v3540_v45 = vpop.f32.mrb[23].mxu0 }
 0x126   : > { %v4572_v36 = vadd.f32 %v3588_v44, %v3587_v43  ;;  %v4584_v62 = vadd.f32 %v3540_v45, %v3539_v17  ;;  %v1738_v55 = vpop.permute.xlu0 %1737 }
 0x12a   : > { %v3590_v6 = vpop.f32.mrb[24].mxu1  ;;  %v3542_v32 = vpop.f32.mrb[24].mxu0 }
 0x12b   : > { %v3591_v8 = vpop.f32.mrb[25].mxu1  ;;  %v3543_v37 = vpop.f32.mrb[25].mxu0 }
 0x12c   : > { %v4578_v9 = vadd.f32 %v3591_v8, %v3590_v6  ;;  %v3593_v22 = vpop.f32.mrb[26].mxu1  ;;  %v4590_v38 = vadd.f32 %v3543_v37, %v3542_v32  ;;  %v3545_v39 = vpop.f32.mrb[26].mxu0 }
 0x12d   : > { %v3594_v54 = vpop.f32.mrb[27].mxu1  ;;  %v3546_v52 = vpop.f32.mrb[27].mxu0 }
 0x12e   : > { %v4580_v15 = vadd.f32 %v3594_v54, %v3593_v22  ;;  %v4592_v41 = vadd.f32 %v3546_v52, %v3545_v39  ;;  %v1743_v8 = vpop.permute.xlu1 %1742 }
 0x132   : > { %v3596_v46 = vpop.f32.mrb[28].mxu1  ;;  %v3548_v59 = vpop.f32.mrb[28].mxu0 }
 0x133   : > { %v3597_v26 = vpop.f32.mrb[29].mxu1  ;;  %v3549_v0 = vpop.f32.mrb[29].mxu0 }
 0x134   : > { %v4586_v28 = vadd.f32 %v3597_v26, %v3596_v46  ;;  %v3599_v31 = vpop.f32.mrb[30].mxu1  ;;  %v4596_v25 = vadd.f32 %v3549_v0, %v3548_v59  ;;  %v3551_v43 = vpop.f32.mrb[30].mxu0 }
 0x135   : > { %v3600_v19 = vpop.f32.mrb[31].mxu1  ;;  %v3552_v42 = vpop.f32.mrb[31].mxu0 }
 0x136   : > { %v4588_v33 = vadd.f32 %v3600_v19, %v3599_v31  ;;  %v4599_v1 = vadd.f32 %v3552_v42, %v3551_v43  ;;  %v1748_v26 = vpop.permute.xlu1 %1747 }
 0x13a   : > { %v3618_v35 = vpop.f32.mrb[32].mxu1  ;;  %v1758_v59 = vpop.permute.xlu1 %1757 }
 0x13b   : > { %v3619_v50 = vpop.f32.mrb[33].mxu1 }
 0x13c   : > { %v3620_v14 = vadd.f32 %v3619_v50, %v3618_v35  ;;  %v3621_v48 = vpop.f32.mrb[34].mxu1 }
 0x13d   : > { %v3622_v57 = vpop.f32.mrb[35].mxu1 }
 0x13e   : > { %v1473_v4 = vadd.f32 %v3620_v14, %v4536_v10  ;;  %v3623_v60 = vadd.f32 %v3622_v57, %v3621_v48  ;;  %v4007_v48 = vld [vmem:[%s4785_s11 + $0x10] sm:$0xff]   ;;  %v1753_v57 = vpop.permute.xlu0 %1752 }
 0x140   : > { %v1476_v44 = vadd.f32 %v3623_v60, %v4538_v12  ;;  %v1890_v10 = vmul.f32 %v1733_v49, %v1473_v4  ;;  %v4006_v49 = vld [vmem:[%s4785_s11 + $0x8] sm:$0xff]  }
 0x142   : > { %v1891_v2 = vmul.f32 %v1738_v55, %v1476_v44  ;;  %v3624_v6 = vpop.f32.mrb[36].mxu1 }
 0x143   : > { %v3625_v22 = vpop.f32.mrb[37].mxu1 }
 0x144   : > { %v3626_v54 = vadd.f32 %v3625_v22, %v3624_v6  ;;  %v3627_v24 = vpop.f32.mrb[38].mxu1  ;;  %v1958_v16 = vpack.c.bf16 %v1891_v2, %v1890_v10  ;;  %v4009_v6 = vld [vmem:[%s4785_s11 + $0x20] sm:$0xff]   ;;  %v1768_v22 = vpop.permute.xlu1 %1767 }
 0x145   : > { %v3628_v17 = vpop.f32.mrb[39].mxu1 }
 0x146   : > { %v1481_v12 = vadd.f32 %v3626_v54, %v4550_v30  ;;  %v3629_v45 = vadd.f32 %v3628_v17, %v3627_v24  ;;  %3778 = vmatprep.mubr.bf16.mxu0 %v1958_v16 }
 0x148   : > { %v1484_v46 = vadd.f32 %v3629_v45, %v4552_v20  ;;  %v1892_v31 = vmul.f32 %v1743_v8, %v1481_v12  ;;  %v1763_v8 = vpop.permute.xlu0 %1762 }
 0x14a   : > { %v1893_v19 = vmul.f32 %v1748_v26, %v1484_v46  ;;  %v3630_v32 = vpop.f32.mrb[40].mxu1 }
 0x14b   : > { %v3631_v37 = vpop.f32.mrb[41].mxu1 }
 0x14c   : > { %v1959_v39 = vpack.c.bf16 %v1893_v19, %v1892_v31  ;;  %v3632_v52 = vadd.f32 %v3631_v37, %v3630_v32  ;;  %v3633_v35 = vpop.f32.mrb[42].mxu1  ;;  %v4011_v32 = vld [vmem:[%s4785_s11 + $0x30] sm:$0xff]   ;;  %v1773_v37 = vpop.permute.xlu0 %1772 }
 0x14d   : > { %v3634_v50 = vpop.f32.mrb[43].mxu1 }
 0x14e   : > { %v1489_v14 = vadd.f32 %v3632_v52, %v4558_v40  ;;  %v3635_v30 = vadd.f32 %v3634_v50, %v3633_v35  ;;  %3779 = vmatmul.mubr.bf16.vlgmr.msra.gmra.mrb[32].mxu0 %v1959_v39  ;;  %v1778_v39 = vpop.permute.xlu1 %1777 }
 0x14f   : > { %3811 = vmatpush3.bf16.msra.mxu0 %v4543_v18  ;;  %v4008_v18 = vld [vmem:[%s4785_s11 + $0x18] sm:$0xff]  }
 0x150   : > { %v1492_v20 = vadd.f32 %v3635_v30, %v4560_v47  ;;  %3812 = vmatprep.subr.bf16.mxu0 %v4006_v49  ;;  %v1894_v4 = vmul.f32 %v1753_v57, %v1489_v14 }
 0x152   : > { %v1895_v60 = vmul.f32 %v1758_v59, %v1492_v20  ;;  %v3636_v0 = vpop.f32.mrb[44].mxu1 }
 0x153   : > { %v3637_v43 = vpop.f32.mrb[45].mxu1  ;;  %3813 = vmatpush3.bf16.msra.mxu0 %v4006_v49 }
 0x154   : > { %v3638_v44 = vadd.f32 %v3637_v43, %v3636_v0  ;;  %v3639_v40 = vpop.f32.mrb[46].mxu1  ;;  %v1960_v42 = vpack.c.bf16 %v1895_v60, %v1894_v4  ;;  %3814 = vmatprep.subr.bf16.mxu0 %v4007_v48  ;;  %v1783_v4 = vpop.permute.xlu0 %1782 }
 0x155   : > { %v3640_v47 = vpop.f32.mrb[47].mxu1  ;;  %v1788_v60 = vpop.permute.xlu1 %1787 }
 0x156   : > { %v1497_v55 = vadd.f32 %v3638_v44, %v4566_v3  ;;  %v3641_v10 = vadd.f32 %v3640_v47, %v3639_v40  ;;  %3782 = vmatprep.mubr.bf16.mxu0 %v1960_v42 }
 0x157   : > { %3815 = vmatpush3.bf16.msra.mxu0 %v4007_v48 }
 0x158   : > { %v1500_v2 = vadd.f32 %v3641_v10, %v4568_v63  ;;  %3816 = vmatprep.subr.bf16.mxu0 %v4008_v18  ;;  %v1896_v54 = vmul.f32 %v1763_v8, %v1497_v55  ;;  %v4010_v63 = vld [vmem:[%s4785_s11 + $0x28] sm:$0xff]  }
 0x15a   : > { %v1897_v24 = vmul.f32 %v1768_v22, %v1500_v2  ;;  %v3642_v16 = vpop.f32.mrb[48].mxu1 }
 0x15b   : > { %v3643_v17 = vpop.f32.mrb[49].mxu1  ;;  %3817 = vmatpush3.bf16.msra.mxu0 %v4008_v18 }
 0x15c   : > { %v3644_v12 = vadd.f32 %v3643_v17, %v3642_v16  ;;  %v3645_v45 = vpop.f32.mrb[50].mxu1  ;;  %v1961_v3 = vpack.c.bf16 %v1897_v24, %v1896_v54  ;;  %3818 = vmatprep.subr.bf16.mxu0 %v4009_v6 }
 0x15d   : > { %v3646_v46 = vpop.f32.mrb[51].mxu1 }
 0x15e   : > { %v1505_v26 = vadd.f32 %v3644_v12, %v4574_v56  ;;  %v3647_v31 = vadd.f32 %v3646_v46, %v3645_v45  ;;  %3783 = vmatmul.mubr.bf16.gmra.mrb[36].mxu0 %v1961_v3 }
 0x15f   : > { %3819 = vmatpush3.bf16.msra.mxu0 %v4009_v6  ;;  %v1793_v6 = vpop.permute.xlu0 %1792 }
 0x160   : > { %v1508_v19 = vadd.f32 %v3647_v31, %v4576_v21  ;;  %3820 = vmatprep.subr.bf16.mxu0 %v4010_v63  ;;  %v1898_v52 = vmul.f32 %v1773_v37, %v1505_v26  ;;  %v4012_v21 = vld [vmem:[%s4785_s11 + $0x38] sm:$0xff]  }
 0x162   : > { %v1899_v35 = vmul.f32 %v1778_v39, %v1508_v19  ;;  %v3648_v49 = vpop.f32.mrb[52].mxu1 }
 0x163   : > { %v3649_v50 = vpop.f32.mrb[53].mxu1  ;;  %3821 = vmatpush3.bf16.msra.mxu0 %v4010_v63  ;;  %v1803_v46 = vpop.permute.xlu0 %1802 }
 0x164   : > { %v3650_v14 = vadd.f32 %v3649_v50, %v3648_v49  ;;  %v3651_v30 = vpop.f32.mrb[54].mxu1  ;;  %v1962_v56 = vpack.c.bf16 %v1899_v35, %v1898_v52  ;;  %3822 = vmatprep.subr.bf16.mxu0 %v4011_v32 }
 0x165   : > { %v3652_v20 = vpop.f32.mrb[55].mxu1 }
 0x166   : > { %v1513_v48 = vadd.f32 %v3650_v14, %v4582_v11  ;;  %v3653_v57 = vadd.f32 %v3652_v20, %v3651_v30  ;;  %3786 = vmatprep.mubr.bf16.mxu0 %v1962_v56 }
 0x167   : > { %3823 = vmatpush3.bf16.msra.mxu0 %v4011_v32  ;;  %v1813_v14 = vpop.permute.xlu0 %1812 }
 0x168   : > { %v1516_v59 = vadd.f32 %v3653_v57, %v4584_v62  ;;  %3824 = vmatprep.subr.bf16.mxu0 %v4012_v21  ;;  %v1900_v0 = vmul.f32 %v1783_v4, %v1513_v48  ;;  %v1798_v62 = vpop.permute.xlu1 %1797 }
 0x16a   : > { %v1901_v43 = vmul.f32 %v1788_v60, %v1516_v59  ;;  %v3654_v44 = vpop.f32.mrb[56].mxu1 }
 0x16b   : > { %v3655_v40 = vpop.f32.mrb[57].mxu1  ;;  %3825 = vmatpush3.bf16.msra.mxu0 %v4012_v21 }
 0x16c   : > { %v3656_v42 = vadd.f32 %v3655_v40, %v3654_v44  ;;  %v3657_v18 = vpop.f32.mrb[58].mxu1  ;;  %v1963_v47 = vpack.c.bf16 %v1901_v43, %v1900_v0  ;;  %v1808_v26 = vpop.permute.xlu1 %1807 }
 0x16d   : > { %v3658_v55 = vpop.f32.mrb[59].mxu1  ;;  %v1823_v43 = vpop.permute.xlu0 %1822 }
 0x16e   : > { %v1521_v10 = vadd.f32 %v3656_v42, %v4590_v38  ;;  %v3659_v11 = vadd.f32 %v3658_v55, %v3657_v18  ;;  %3787 = vmatmul.mubr.bf16.gmra.mrb[40].mxu0 %v1963_v47 }
 0x170   : > { %v1524_v2 = vadd.f32 %v3659_v11, %v4592_v41  ;;  %v1902_v8 = vmul.f32 %v1793_v6, %v1521_v10  ;;  %v1818_v30 = vpop.permute.xlu1 %1817 }
 0x172   : > { %v1903_v22 = vmul.f32 %v1798_v62, %v1524_v2  ;;  %v3660_v54 = vpop.f32.mrb[60].mxu1  ;;  %v1833_v62 = vpop.permute.xlu0 %1832 }
 0x173   : > { %v3661_v24 = vpop.f32.mrb[61].mxu1 }
 0x174   : > { %v3662_v16 = vadd.f32 %v3661_v24, %v3660_v54  ;;  %v3663_v17 = vpop.f32.mrb[62].mxu1  ;;  %v1964_v12 = vpack.c.bf16 %v1903_v22, %v1902_v8  ;;  %v1828_v44 = vpop.permute.xlu1 %1827 }
 0x175   : > { %v3664_v45 = vpop.f32.mrb[63].mxu1 }
 0x176   : > { %v1529_v3 = vadd.f32 %v3662_v16, %v4596_v25  ;;  %v3665_v63 = vadd.f32 %v3664_v45, %v3663_v17  ;;  %3790 = vmatprep.mubr.bf16.mxu0 %v1964_v12 }
 0x178   : > { %v1532_v38 = vadd.f32 %v3665_v63, %v4599_v1  ;;  %v1904_v31 = vmul.f32 %v1803_v46, %v1529_v3  ;;  %v1838_v8 = vpop.permute.xlu1 %1837 }
 0x17a   : > { %v1905_v41 = vmul.f32 %v1808_v26, %v1532_v38  ;;  %v3666_v19 = vpop.f32.mrb[64].mxu1  ;;  %v1843_v38 = vpop.permute.xlu0 %1842 }
 0x17b   : > { %v3667_v32 = vpop.f32.mrb[65].mxu1 }
 0x17c   : > { %v3668_v37 = vadd.f32 %v3667_v32, %v3666_v19  ;;  %v3669_v39 = vpop.f32.mrb[66].mxu1  ;;  %v1965_v52 = vpack.c.bf16 %v1905_v41, %v1904_v31  ;;  %v1848_v46 = vpop.permute.xlu1 %1847 }
 0x17d   : > { %v3670_v35 = vpop.f32.mrb[67].mxu1 }
 0x17e   : > { %v1537_v49 = vadd.f32 %v3668_v37, %v4528_v5  ;;  %v3671_v50 = vadd.f32 %v3670_v35, %v3669_v39  ;;  %3791 = vmatmul.mubr.bf16.gmra.mrb[44].mxu0 %v1965_v52 }
 0x180   : > { %v1540_v25 = vadd.f32 %v3671_v50, %v4530_v7  ;;  %v1906_v56 = vmul.f32 %v1813_v14, %v1537_v49  ;;  %v1853_v49 = vpop.permute.xlu0 %1852  ;;  %v1858_v50 = vpop.permute.xlu1 %1857 }
 0x182   : > { %v1907_v1 = vmul.f32 %v1818_v30, %v1540_v25  ;;  %v3672_v21 = vpop.f32.mrb[68].mxu1 }
 0x183   : > { %v3673_v20 = vpop.f32.mrb[69].mxu1 }
 0x184   : > { %v3674_v48 = vadd.f32 %v3673_v20, %v3672_v21  ;;  %v3675_v57 = vpop.f32.mrb[70].mxu1  ;;  %v1966_v59 = vpack.c.bf16 %v1907_v1, %v1906_v56 }
 0x185   : > { %v3676_v4 = vpop.f32.mrb[71].mxu1 }
 0x186   : > { %v1545_v60 = vadd.f32 %v3674_v48, %v4532_v23  ;;  %v3677_v0 = vadd.f32 %v3676_v4, %v3675_v57  ;;  %3794 = vmatprep.mubr.bf16.mxu0 %v1966_v59  ;;  %v1863_v59 = vpop.permute.xlu0 %1862  ;;  %v1868_v4 = vpop.permute.xlu1 %1867 }
 0x188   : > { %v1548_v5 = vadd.f32 %v3677_v0, %v4534_v53  ;;  %v1908_v40 = vmul.f32 %v1823_v43, %v1545_v60 }
 0x18a   : > { %v1909_v7 = vmul.f32 %v1828_v44, %v1548_v5  ;;  %v3678_v42 = vpop.f32.mrb[72].mxu1 }
 0x18b   : > { %v3679_v18 = vpop.f32.mrb[73].mxu1 }
 0x18c   : > { %v3680_v47 = vadd.f32 %v3679_v18, %v3678_v42  ;;  %v3681_v55 = vpop.f32.mrb[74].mxu1  ;;  %v1967_v10 = vpack.c.bf16 %v1909_v7, %v1908_v40 }
 0x18d   : > { %v3682_v11 = vpop.f32.mrb[75].mxu1 }
 0x18e   : > { %v1553_v2 = vadd.f32 %v3680_v47, %v4545_v61  ;;  %v3683_v6 = vadd.f32 %v3682_v11, %v3681_v55  ;;  %3795 = vmatmul.mubr.bf16.gmra.mrb[48].mxu0 %v1967_v10  ;;  %v1873_v47 = vpop.permute.xlu0 %1872  ;;  %v1878_v55 = vpop.permute.xlu1 %1877 }
 0x190   : > { %v1556_v23 = vadd.f32 %v3683_v6, %v4548_v27  ;;  %v1910_v22 = vmul.f32 %v1833_v62, %v1553_v2 }
 0x192   : > { %v1911_v53 = vmul.f32 %v1838_v8, %v1556_v23  ;;  %v3684_v54 = vpop.f32.mrb[76].mxu1 }
 0x193   : > { %v3685_v24 = vpop.f32.mrb[77].mxu1 }
 0x194   : > { %v3686_v16 = vadd.f32 %v3685_v24, %v3684_v54  ;;  %v3687_v17 = vpop.f32.mrb[78].mxu1  ;;  %v1968_v12 = vpack.c.bf16 %v1911_v53, %v1910_v22  ;;  %v1883_v53 = vpop.permute.xlu0 %1882 }
 0x195   : > { %v3688_v45 = vpop.f32.mrb[79].mxu1  ;;  %v1888_v54 = vpop.permute.xlu1 %1887 }
 0x196   : > { %v1561_v3 = vadd.f32 %v3686_v16, %v4554_v34  ;;  %v3689_v63 = vadd.f32 %v3688_v45, %v3687_v17  ;;  %3798 = vmatprep.mubr.bf16.mxu0 %v1968_v12  ;;  %v4013_v17 = vld [vmem:[%s4604_s25] sm:$0xff]   ;;  %v4014_v45 = vld [vmem:[%s4604_s25 + $0x8] sm:$0xff]  }
 0x198   : > { %v1564_v61 = vadd.f32 %v3689_v63, %v4556_v51  ;;  %v1912_v26 = vmul.f32 %v1843_v38, %v1561_v3  ;;  %v4016_v3 = vld [vmem:[%s4604_s25 + $0x18] sm:$0xff]   ;;  %v4018_v63 = vld [vmem:[%s4604_s25 + $0x28] sm:$0xff]  }
 0x199   : > { %v4020_v38 = vld [vmem:[%s4604_s25 + $0x38] sm:$0xff]  }
 0x19a   : > { %v1913_v27 = vmul.f32 %v1848_v46, %v1564_v61  ;;  %v3690_v31 = vpop.f32.mrb[80].mxu1  ;;  %v4019_v61 = vld [vmem:[%s4604_s25 + $0x30] sm:$0xff]   ;;  %v4021_v46 = vld [vmem:[%s4604_s25 + $0x40] sm:$0xff]  }
 0x19b   : > { %v3691_v41 = vpop.f32.mrb[81].mxu1 }
 0x19c   : > { %v3692_v19 = vadd.f32 %v3691_v41, %v3690_v31  ;;  %v3693_v32 = vpop.f32.mrb[82].mxu1  ;;  %v1969_v37 = vpack.c.bf16 %v1913_v27, %v1912_v26  ;;  %v4022_v26 = vld [vmem:[%s4604_s25 + $0x48] sm:$0xff]   ;;  %v4023_v27 = vld [vmem:[%s4604_s25 + $0x50] sm:$0xff]   ;;  %v4024_v31 = vld [vmem:[%s4604_s25 + $0x58] sm:$0xff]  }
 0x19d   : > { %v3694_v39 = vpop.f32.mrb[83].mxu1  ;;  %v4025_v41 = vld [vmem:[%s4604_s25 + $0x60] sm:$0xff]  }
 0x19e   : > { %v1569_v52 = vadd.f32 %v3692_v19, %v4562_v13  ;;  %v3695_v35 = vadd.f32 %v3694_v39, %v3693_v32  ;;  %3799 = vmatmul.mubr.bf16.gmra.mrb[52].mxu0 %v1969_v37  ;;  %v4026_v19 = vld [vmem:[%s4604_s25 + $0x68] sm:$0xff]   ;;  %v4027_v32 = vld [vmem:[%s4604_s25 + $0x70] sm:$0xff]   ;;  %v4028_v37 = vld [vmem:[%s4604_s25 + $0x78] sm:$0xff]   ;;  %v2594_v39 = vpop.permute.xlu0 %2593 }
 0x1a0   : > { %v1572_v34 = vadd.f32 %v3695_v35, %v4564_v58  ;;  %v1914_v25 = vmul.f32 %v1853_v49, %v1569_v52  ;;  %v2599_v52 = vpop.permute.xlu1 %2598 }
 0x1a2   : > { %v1915_v51 = vmul.f32 %v1858_v50, %v1572_v34  ;;  %v3696_v14 = vpop.f32.mrb[84].mxu1  ;;  %v2604_v35 = vpop.permute.xlu0 %2603 }
 0x1a3   : > { %v3697_v30 = vpop.f32.mrb[85].mxu1 }
 0x1a4   : > { %v3698_v56 = vadd.f32 %v3697_v30, %v3696_v14  ;;  %v3699_v1 = vpop.f32.mrb[86].mxu1  ;;  %v1970_v21 = vpack.c.bf16 %v1915_v51, %v1914_v25  ;;  %v2609_v34 = vpop.permute.xlu1 %2608 }
 0x1a5   : > { %v3700_v20 = vpop.f32.mrb[87].mxu1 }
 0x1a6   : > { %v1577_v48 = vadd.f32 %v3698_v56, %v4570_v29  ;;  %v3701_v57 = vadd.f32 %v3700_v20, %v3699_v1  ;;  %3802 = vmatprep.mubr.bf16.mxu0 %v1970_v21  ;;  %v2614_v49 = vpop.permute.xlu0 %2613  ;;  %v4681_v56 = vld [vmem:[%s4784_s10] ss:$0 sm:$0xff] }
 0x1a8   : > { %v1580_v13 = vadd.f32 %v3701_v57, %v4572_v36  ;;  %v1916_v60 = vmul.f32 %v1863_v59, %v1577_v48  ;;  %v2619_v50 = vpop.permute.xlu1 %2618 }
 0x1aa   : > { %v1917_v58 = vmul.f32 %v1868_v4, %v1580_v13  ;;  %v3702_v0 = vpop.f32.mrb[88].mxu1  ;;  %v2624_v25 = vpop.permute.xlu0 %2623 }
 0x1ab   : > { %v3703_v5 = vpop.f32.mrb[89].mxu1 }
 0x1ac   : > { %v3704_v43 = vadd.f32 %v3703_v5, %v3702_v0  ;;  %v3705_v44 = vpop.f32.mrb[90].mxu1  ;;  %v1971_v40 = vpack.c.bf16 %v1917_v58, %v1916_v60  ;;  %v2629_v51 = vpop.permute.xlu1 %2628 }
 0x1ad   : > { %v3706_v7 = vpop.f32.mrb[91].mxu1 }
 0x1ae   : > { %v1585_v42 = vadd.f32 %v3704_v43, %v4578_v9  ;;  %v3707_v18 = vadd.f32 %v3706_v7, %v3705_v44  ;;  %3803 = vmatmul.mubr.bf16.gmra.mrb[56].mxu0 %v1971_v40  ;;  %v4674_v14 = vpop.permute.xlu0 %2633 }
 0x1b0   : > { %v1588_v29 = vadd.f32 %v3707_v18, %v4580_v15  ;;  %v1918_v10 = vmul.f32 %v1873_v47, %v1585_v42  ;;  %v4676_v30 = vpop.permute.xlu1 %2638 }
 0x1b2   : > { %v1919_v36 = vmul.f32 %v1878_v55, %v1588_v29  ;;  %v3708_v11 = vpop.f32.mrb[92].mxu1  ;;  %v4683_v1 = vpop.permute.xlu0 %2643 }
 0x1b3   : > { %v3709_v2 = vpop.f32.mrb[93].mxu1 }
 0x1b4   : > { %v3710_v6 = vadd.f32 %v3709_v2, %v3708_v11  ;;  %v3711_v23 = vpop.f32.mrb[94].mxu1  ;;  %v1972_v62 = vpack.c.bf16 %v1919_v36, %v1918_v10  ;;  %v4688_v59 = vpop.permute.xlu1 %2648 }
 0x1b5   : > { %v3712_v8 = vpop.f32.mrb[95].mxu1 }
 0x1b6   : > { %v1593_v22 = vadd.f32 %v3710_v6, %v4586_v28  ;;  %v3713_v9 = vadd.f32 %v3712_v8, %v3711_v23  ;;  %3806 = vmatprep.mubr.bf16.mxu0 %v1972_v62  ;;  %v4015_v28 = vld [vmem:[%s4604_s25 + $0x10] sm:$0xff]   ;;  %v4697_v43 = vpop.permute.xlu0 %2653 }
 0x1b8   : > { %v1596_v15 = vadd.f32 %v3713_v9, %v4588_v33  ;;  %v1920_v24 = vmul.f32 %v1883_v53, %v1593_v22  ;;  %v4017_v33 = vld [vmem:[%s4604_s25 + $0x20] sm:$0xff]   ;;  %s3195_s25 = sshll.u32 %s4793_s26, 2  ;;  %v4701_v10 = vpop.permute.xlu1 %2658  ;;  %s3196_s26 = sshll.u32 %s4795_s22, 1 }
 0x1b9   : > { %s4694_s30 = scalar_lea.vmem %s4786_s12, %s3195_s25  ;;  %s529_s16 = scalar_lea.vmem %s4787_s13, %s3196_s26 }
 0x1ba   : > { %v1921_v16 = vmul.f32 %v1888_v54, %v1596_v15  ;;  %v4706_v53 = vpop.permute.xlu0 %2663 }
 0x1bc   : > { %v1973_v12 = vpack.c.bf16 %v1921_v16, %v1920_v24 }
 0x1be   : > { %3807 = vmatmul.mubr.bf16.gmra.mrb[60].mxu0 %v1973_v12 }
 0x1bf   : > { %3826 = vmatprep.mubr.bf16.mxu0 %v4013_v17 }
 0x1c6   : > { %3827 = vmatmul.mubr.bf16.vlgmr.msra.gmra.mrb[32].mxu0 %v4014_v45 }
 0x1c7   : > { %3830 = vmatprep.mubr.bf16.mxu0 %v4015_v28 }
 0x1ce   : > { %3831 = vmatmul.mubr.bf16.gmra.mrb[36].mxu0 %v4016_v3 }
 0x1cf   : > { %3834 = vmatprep.mubr.bf16.mxu0 %v4017_v33 }
 0x1d6   : > { %3835 = vmatmul.mubr.bf16.gmra.mrb[40].mxu0 %v4018_v63 }
 0x1d7   : > { %3838 = vmatprep.mubr.bf16.mxu0 %v4019_v61  ;;  %v2669_v61 = vpop.permute.xlu1 %2668 }
 0x1de   : > { %3839 = vmatmul.mubr.bf16.gmra.mrb[44].mxu0 %v4020_v38 }
 0x1df   : > { %3842 = vmatprep.mubr.bf16.mxu0 %v4021_v46 }
 0x1e6   : > { %3843 = vmatmul.mubr.bf16.gmra.mrb[48].mxu0 %v4022_v26 }
 0x1e7   : > { %3846 = vmatprep.mubr.bf16.mxu0 %v4023_v27 }
 0x1ee   : > { %3847 = vmatmul.mubr.bf16.gmra.mrb[52].mxu0 %v4024_v31 }
 0x1ef   : > { %3850 = vmatprep.mubr.bf16.mxu0 %v4025_v41 }
 0x1f6   : > { %3851 = vmatmul.mubr.bf16.gmra.mrb[56].mxu0 %v4026_v19 }
 0x1f7   : > { %3854 = vmatprep.mubr.bf16.mxu0 %v4027_v32 }
 0x1fe   : > { %3855 = vmatmul.mubr.bf16.gmra.mrb[60].mxu0 %v4028_v37  ;;  %v4712_v37 = vpop.permute.xlu0 %2673 }
 0x299   : > { %v3828_v21 = vpop.f32.mrb[32].mxu0 }
 0x29a   : > { %v2400_v20 = vpop.f32.mrb[33].mxu0  ;;  %v3874_v48 = vadd.f32 %v3828_v21, %v4681_v56 }
 0x29b   : > { %v3875_v57 = vadd.f32 %v4681_v56, %v2400_v20  ;;  %v3829_v13 = vpop.f32.mrb[34].mxu0 }
 0x29c   : > { %v3876_v4 = vadd.f32 %v3829_v13, %v4681_v56  ;;  %v2403_v60 = vpop.f32.mrb[35].mxu0  ;;  %v2753_v44 = vmul.f32 %v3874_v48, %v2604_v35  ;;  %v4718_v13 = vpop.permute.xlu1 %2678 }
 0x29d   : > { %v2751_v58 = vmul.f32 %v3875_v57, %v2594_v39  ;;  %v3877_v0 = vadd.f32 %v4681_v56, %v2403_v60 }
 0x29e   : > { %v3403_v5 = vpack.c.bf16 %v3876_v4, %v3874_v48  ;;  %v2754_v42 = vmul.f32 %v3876_v4, %v2609_v34  ;;  %v2822_v2 = vmul.f32 %v2753_v44, %v2753_v44 }
 0x29f   : > { %v2752_v40 = vmul.f32 %v3877_v0, %v2599_v52  ;;  %v3398_v7 = vpack.c.bf16 %v3877_v0, %v3875_v57  ;;  %v2820_v18 = vmul.f32 %v2751_v58, %v2751_v58 }
 0x2a0   : > { %3475 = vst [vmem:[%s4694_s30 + $0x8] sm:$0xff] %v3403_v5   ;;  %v2823_v22 = vmul.f32 %v2754_v42, %v2754_v42 }
 0x2a1   : > { %v2783_v29 = vadd.f32 %v2752_v40, %v2751_v58  ;;  %v2821_v47 = vmul.f32 %v2752_v40, %v2752_v40  ;;  %3399 = vst [vmem:[%s4694_s30] sm:$0xff] %v3398_v7   ;;  %v3832_v55 = vpop.f32.mrb[36].mxu0 }
 0x2a2   : > { %v3878_v36 = vadd.f32 %v3832_v55, %v4681_v56  ;;  %v2416_v11 = vpop.f32.mrb[37].mxu0 }
 0x2a3   : > { %v2784_v6 = vadd.f32 %v2783_v29, %v2753_v44  ;;  %v2852_v23 = vadd.f32 %v2821_v47, %v2820_v18  ;;  %v3879_v62 = vadd.f32 %v4681_v56, %v2416_v11  ;;  %v3833_v8 = vpop.f32.mrb[38].mxu0 }
 0x2a4   : > { %v3880_v9 = vadd.f32 %v3833_v8, %v4681_v56  ;;  %v2419_v15 = vpop.f32.mrb[39].mxu0  ;;  %v2757_v12 = vmul.f32 %v3878_v36, %v2624_v25 }
 0x2a5   : > { %v2853_v54 = vadd.f32 %v2852_v23, %v2822_v2  ;;  %v2755_v24 = vmul.f32 %v3879_v62, %v2614_v49  ;;  %v2785_v16 = vadd.f32 %v2784_v6, %v2754_v42  ;;  %v3881_v17 = vadd.f32 %v4681_v56, %v2419_v15  ;;  %v2684_v42 = vpop.permute.xlu0 %2683 }
 0x2a6   : > { %v3413_v45 = vpack.c.bf16 %v3880_v9, %v3878_v36  ;;  %v2758_v38 = vmul.f32 %v3880_v9, %v2629_v51  ;;  %v2826_v39 = vmul.f32 %v2757_v12, %v2757_v12 }
 0x2a7   : > { %v2786_v28 = vadd.f32 %v2785_v16, %v2755_v24  ;;  %v2824_v3 = vmul.f32 %v2755_v24, %v2755_v24  ;;  %v2854_v33 = vadd.f32 %v2853_v54, %v2823_v22  ;;  %v2756_v63 = vmul.f32 %v3881_v17, %v2619_v50 }
 0x2a8   : > { %3477 = vst [vmem:[%s4694_s30 + $0x18] sm:$0xff] %v3413_v45   ;;  %v3408_v46 = vpack.c.bf16 %v3881_v17, %v3879_v62  ;;  %v2827_v50 = vmul.f32 %v2758_v38, %v2758_v38 }
 0x2a9   : > { %v2855_v26 = vadd.f32 %v2854_v33, %v2824_v3  ;;  %v2787_v27 = vadd.f32 %v2786_v28, %v2756_v63  ;;  %v2825_v31 = vmul.f32 %v2756_v63, %v2756_v63  ;;  %v3836_v41 = vpop.f32.mrb[40].mxu0  ;;  %v2694_v17 = vpop.permute.xlu0 %2693 }
 0x2aa   : > { %3476 = vst [vmem:[%s4694_s30 + $0x10] sm:$0xff] %v3408_v46   ;;  %v3882_v19 = vadd.f32 %v3836_v41, %v4681_v56  ;;  %v2432_v32 = vpop.f32.mrb[41].mxu0 }
 0x2ab   : > { %v2788_v52 = vadd.f32 %v2787_v27, %v2757_v12  ;;  %v2856_v35 = vadd.f32 %v2855_v26, %v2825_v31  ;;  %v3883_v34 = vadd.f32 %v4681_v56, %v2432_v32  ;;  %v3837_v49 = vpop.f32.mrb[42].mxu0 }
 0x2ac   : > { %v3884_v25 = vadd.f32 %v3837_v49, %v4681_v56  ;;  %v2435_v51 = vpop.f32.mrb[43].mxu0  ;;  %v2761_v4 = vmul.f32 %v3882_v19, %v4683_v1 }
 0x2ad   : > { %v2857_v21 = vadd.f32 %v2856_v35, %v2826_v39  ;;  %v2759_v20 = vmul.f32 %v3883_v34, %v4674_v14  ;;  %v2789_v48 = vadd.f32 %v2788_v52, %v2758_v38  ;;  %v3885_v57 = vadd.f32 %v4681_v56, %v2435_v51 }
 0x2ae   : > { %v3423_v60 = vpack.c.bf16 %v3884_v25, %v3882_v19  ;;  %v2762_v40 = vmul.f32 %v3884_v25, %v4688_v59  ;;  %v2830_v1 = vmul.f32 %v2761_v4, %v2761_v4 }
 0x2af   : > { %v2790_v58 = vadd.f32 %v2789_v48, %v2759_v20  ;;  %v2828_v0 = vmul.f32 %v2759_v20, %v2759_v20  ;;  %v2858_v5 = vadd.f32 %v2857_v21, %v2827_v50  ;;  %v2760_v44 = vmul.f32 %v3885_v57, %v4676_v30  ;;  %v2689_v30 = vpop.permute.xlu1 %2688 }
 0x2b0   : > { %3479 = vst [vmem:[%s4694_s30 + $0x28] sm:$0xff] %v3423_v60   ;;  %v3418_v7 = vpack.c.bf16 %v3885_v57, %v3883_v34  ;;  %v2831_v59 = vmul.f32 %v2762_v40, %v2762_v40  ;;  %v2704_v34 = vpop.permute.xlu0 %2703 }
 0x2b1   : > { %v2859_v14 = vadd.f32 %v2858_v5, %v2828_v0  ;;  %v2791_v18 = vadd.f32 %v2790_v58, %v2760_v44  ;;  %v2829_v29 = vmul.f32 %v2760_v44, %v2760_v44  ;;  %v3840_v47 = vpop.f32.mrb[44].mxu0 }
 0x2b2   : > { %3478 = vst [vmem:[%s4694_s30 + $0x20] sm:$0xff] %v3418_v7   ;;  %v3886_v55 = vadd.f32 %v3840_v47, %v4681_v56  ;;  %v2448_v36 = vpop.f32.mrb[45].mxu0 }
 0x2b3   : > { %v2792_v11 = vadd.f32 %v2791_v18, %v2761_v4  ;;  %v2860_v2 = vadd.f32 %v2859_v14, %v2829_v29  ;;  %v3887_v6 = vadd.f32 %v4681_v56, %v2448_v36  ;;  %v3841_v23 = vpop.f32.mrb[46].mxu0  ;;  %v2699_v27 = vpop.permute.xlu1 %2698 }
 0x2b4   : > { %v3888_v62 = vadd.f32 %v3841_v23, %v4681_v56  ;;  %v2451_v8 = vpop.f32.mrb[47].mxu0  ;;  %v2765_v24 = vmul.f32 %v3886_v55, %v4706_v53  ;;  %v2714_v29 = vpop.permute.xlu0 %2713 }
 0x2b5   : > { %v2861_v22 = vadd.f32 %v2860_v2, %v2830_v1  ;;  %v2763_v9 = vmul.f32 %v3887_v6, %v4697_v43  ;;  %v2793_v15 = vadd.f32 %v2792_v11, %v2762_v40  ;;  %v3889_v54 = vadd.f32 %v4681_v56, %v2451_v8 }
 0x2b6   : > { %v3433_v16 = vpack.c.bf16 %v3888_v62, %v3886_v55  ;;  %v2766_v33 = vmul.f32 %v3888_v62, %v2669_v61  ;;  %v2834_v53 = vmul.f32 %v2765_v24, %v2765_v24 }
 0x2b7   : > { %v2794_v12 = vadd.f32 %v2793_v15, %v2763_v9  ;;  %v2832_v45 = vmul.f32 %v2763_v9, %v2763_v9  ;;  %v2862_v28 = vadd.f32 %v2861_v22, %v2831_v59  ;;  %v2764_v3 = vmul.f32 %v3889_v54, %v4701_v10  ;;  %v2709_v58 = vpop.permute.xlu1 %2708 }
 0x2b8   : > { %3481 = vst [vmem:[%s4694_s30 + $0x38] sm:$0xff] %v3433_v16   ;;  %v3428_v63 = vpack.c.bf16 %v3889_v54, %v3887_v6  ;;  %v2835_v35 = vmul.f32 %v2766_v33, %v2766_v33 }
 0x2b9   : > { %v2863_v38 = vadd.f32 %v2862_v28, %v2832_v45  ;;  %v2795_v46 = vadd.f32 %v2794_v12, %v2764_v3  ;;  %v2833_v26 = vmul.f32 %v2764_v3, %v2764_v3  ;;  %v3844_v43 = vpop.f32.mrb[48].mxu0  ;;  %v2724_v45 = vpop.permute.xlu0 %2723 }
 0x2ba   : > { %3480 = vst [vmem:[%s4694_s30 + $0x30] sm:$0xff] %v3428_v63   ;;  %v3890_v31 = vadd.f32 %v3844_v43, %v4681_v56  ;;  %v2464_v41 = vpop.f32.mrb[49].mxu0 }
 0x2bb   : > { %v2796_v19 = vadd.f32 %v2795_v46, %v2765_v24  ;;  %v2864_v32 = vadd.f32 %v2863_v38, %v2833_v26  ;;  %v3891_v39 = vadd.f32 %v4681_v56, %v2464_v41  ;;  %v3845_v52 = vpop.f32.mrb[50].mxu0  ;;  %v2719_v62 = vpop.permute.xlu1 %2718 }
 0x2bc   : > { %v3892_v10 = vadd.f32 %v3845_v52, %v4681_v56  ;;  %v2467_v61 = vpop.f32.mrb[51].mxu0  ;;  %v2769_v21 = vmul.f32 %v3890_v31, %v2684_v42 }
 0x2bd   : > { %v2865_v49 = vadd.f32 %v2864_v32, %v2834_v53  ;;  %v2767_v50 = vmul.f32 %v3891_v39, %v4712_v37  ;;  %v2797_v25 = vadd.f32 %v2796_v19, %v2766_v33  ;;  %v3893_v51 = vadd.f32 %v4681_v56, %v2467_v61 }
 0x2be   : > { %v3443_v20 = vpack.c.bf16 %v3892_v10, %v3890_v31  ;;  %v2770_v0 = vmul.f32 %v3892_v10, %v2689_v30  ;;  %v2838_v42 = vmul.f32 %v2769_v21, %v2769_v21 }
 0x2bf   : > { %v2798_v48 = vadd.f32 %v2797_v25, %v2767_v50  ;;  %v2836_v57 = vmul.f32 %v2767_v50, %v2767_v50  ;;  %v2866_v4 = vadd.f32 %v2865_v49, %v2835_v35  ;;  %v2768_v60 = vmul.f32 %v3893_v51, %v4718_v13  ;;  %v2729_v53 = vpop.permute.xlu1 %2728  ;;  %v2734_v49 = vpop.permute.xlu0 %2733 }
 0x2c0   : > { %3483 = vst [vmem:[%s4694_s30 + $0x48] sm:$0xff] %v3443_v20   ;;  %v3438_v5 = vpack.c.bf16 %v3893_v51, %v3891_v39  ;;  %v2839_v13 = vmul.f32 %v2770_v0, %v2770_v0 }
 0x2c1   : > { %v2867_v44 = vadd.f32 %v2866_v4, %v2836_v57  ;;  %v2799_v40 = vadd.f32 %v2798_v48, %v2768_v60  ;;  %v2837_v7 = vmul.f32 %v2768_v60, %v2768_v60  ;;  %v3848_v14 = vpop.f32.mrb[52].mxu0 }
 0x2c2   : > { %3482 = vst [vmem:[%s4694_s30 + $0x40] sm:$0xff] %v3438_v5   ;;  %v3894_v37 = vadd.f32 %v3848_v14, %v4681_v56  ;;  %v2480_v18 = vpop.f32.mrb[53].mxu0 }
 0x2c3   : > { %v2800_v47 = vadd.f32 %v2799_v40, %v2769_v21  ;;  %v2868_v55 = vadd.f32 %v2867_v44, %v2837_v7  ;;  %v3895_v36 = vadd.f32 %v4681_v56, %v2480_v18  ;;  %v3849_v1 = vpop.f32.mrb[54].mxu0 }
 0x2c4   : > { %v3896_v11 = vadd.f32 %v3849_v1, %v4681_v56  ;;  %v2483_v2 = vpop.f32.mrb[55].mxu0  ;;  %v2773_v8 = vmul.f32 %v3894_v37, %v2704_v34 }
 0x2c5   : > { %v2869_v6 = vadd.f32 %v2868_v55, %v2838_v42  ;;  %v2771_v23 = vmul.f32 %v3895_v36, %v2694_v17  ;;  %v2801_v30 = vadd.f32 %v2800_v47, %v2770_v0  ;;  %v3897_v59 = vadd.f32 %v4681_v56, %v2483_v2  ;;  %v2739_v0 = vpop.permute.xlu1 %2738  ;;  %v2744_v55 = vpop.permute.xlu0 %2743 }
 0x2c6   : > { %v3453_v22 = vpack.c.bf16 %v3896_v11, %v3894_v37  ;;  %v2774_v16 = vmul.f32 %v3896_v11, %v2709_v58  ;;  %v2842_v46 = vmul.f32 %v2773_v8, %v2773_v8 }
 0x2c7   : > { %v2802_v9 = vadd.f32 %v2801_v30, %v2771_v23  ;;  %v2840_v15 = vmul.f32 %v2771_v23, %v2771_v23  ;;  %v2870_v54 = vadd.f32 %v2869_v6, %v2839_v13  ;;  %v2772_v24 = vmul.f32 %v3897_v59, %v2699_v27 }
 0x2c8   : > { %3485 = vst [vmem:[%s4694_s30 + $0x58] sm:$0xff] %v3453_v22   ;;  %v3448_v12 = vpack.c.bf16 %v3897_v59, %v3895_v36  ;;  %v2843_v27 = vmul.f32 %v2774_v16, %v2774_v16 }
 0x2c9   : > { %v2871_v28 = vadd.f32 %v2870_v54, %v2840_v15  ;;  %v2803_v3 = vadd.f32 %v2802_v9, %v2772_v24  ;;  %v2841_v33 = vmul.f32 %v2772_v24, %v2772_v24  ;;  %v3852_v63 = vpop.f32.mrb[56].mxu0 }
 0x2ca   : > { %3484 = vst [vmem:[%s4694_s30 + $0x50] sm:$0xff] %v3448_v12   ;;  %v3898_v17 = vadd.f32 %v3852_v63, %v4681_v56  ;;  %v2496_v38 = vpop.f32.mrb[57].mxu0 }
 0x2cb   : > { %v2804_v26 = vadd.f32 %v2803_v3, %v2773_v8  ;;  %v2872_v43 = vadd.f32 %v2871_v28, %v2841_v33  ;;  %v3899_v31 = vadd.f32 %v4681_v56, %v2496_v38  ;;  %v3853_v41 = vpop.f32.mrb[58].mxu0  ;;  %v2749_v8 = vpop.permute.xlu1 %2748 }
 0x2cc   : > { %v3900_v19 = vadd.f32 %v3853_v41, %v4681_v56  ;;  %v2499_v32 = vpop.f32.mrb[59].mxu0  ;;  %v2777_v61 = vmul.f32 %v3898_v17, %v2724_v45 }
 0x2cd   : > { %v2873_v39 = vadd.f32 %v2872_v43, %v2842_v46  ;;  %v2775_v52 = vmul.f32 %v3899_v31, %v2714_v29  ;;  %v2805_v35 = vadd.f32 %v2804_v26, %v2774_v16  ;;  %v3901_v10 = vadd.f32 %v4681_v56, %v2499_v32 }
 0x2ce   : > { %v3463_v34 = vpack.c.bf16 %v3900_v19, %v3898_v17  ;;  %v2778_v20 = vmul.f32 %v3900_v19, %v2729_v53  ;;  %v2846_v40 = vmul.f32 %v2777_v61, %v2777_v61 }
 0x2cf   : > { %v2806_v50 = vadd.f32 %v2805_v35, %v2775_v52  ;;  %v2844_v25 = vmul.f32 %v2775_v52, %v2775_v52  ;;  %v2874_v51 = vadd.f32 %v2873_v39, %v2843_v27  ;;  %v2776_v21 = vmul.f32 %v3901_v10, %v2719_v62 }
 0x2d0   : > { %3487 = vst [vmem:[%s4694_s30 + $0x68] sm:$0xff] %v3463_v34   ;;  %v3458_v48 = vpack.c.bf16 %v3901_v10, %v3899_v31  ;;  %v2847_v29 = vmul.f32 %v2778_v20, %v2778_v20 }
 0x2d1   : > { %v2875_v57 = vadd.f32 %v2874_v51, %v2844_v25  ;;  %v2807_v4 = vadd.f32 %v2806_v50, %v2776_v21  ;;  %v2845_v60 = vmul.f32 %v2776_v21, %v2776_v21  ;;  %v3856_v58 = vpop.f32.mrb[60].mxu0 }
 0x2d2   : > { %3486 = vst [vmem:[%s4694_s30 + $0x60] sm:$0xff] %v3458_v48   ;;  %v3902_v5 = vadd.f32 %v3856_v58, %v4681_v56  ;;  %v2512_v44 = vpop.f32.mrb[61].mxu0 }
 0x2d3   : > { %v2808_v7 = vadd.f32 %v2807_v4, %v2777_v61  ;;  %v2876_v14 = vadd.f32 %v2875_v57, %v2845_v60  ;;  %v3903_v37 = vadd.f32 %v4681_v56, %v2512_v44  ;;  %v3857_v18 = vpop.f32.mrb[62].mxu0 }
 0x2d4   : > { %v3904_v42 = vadd.f32 %v3857_v18, %v4681_v56  ;;  %v2515_v47 = vpop.f32.mrb[63].mxu0  ;;  %v2781_v2 = vmul.f32 %v3902_v5, %v2744_v55 }
 0x2d5   : > { %v2877_v36 = vadd.f32 %v2876_v14, %v2846_v40  ;;  %v2779_v1 = vmul.f32 %v3903_v37, %v2734_v49  ;;  %v2809_v13 = vadd.f32 %v2808_v7, %v2778_v20  ;;  %v3905_v11 = vadd.f32 %v4681_v56, %v2515_v47 }
 0x2d6   : > { %v3473_v6 = vpack.c.bf16 %v3904_v42, %v3902_v5  ;;  %v2782_v15 = vmul.f32 %v3904_v42, %v2749_v8  ;;  %v2850_v16 = vmul.f32 %v2781_v2, %v2781_v2 }
 0x2d7   : > { %v2810_v23 = vadd.f32 %v2809_v13, %v2779_v1  ;;  %v2848_v30 = vmul.f32 %v2779_v1, %v2779_v1  ;;  %v2878_v59 = vadd.f32 %v2877_v36, %v2847_v29  ;;  %v2780_v62 = vmul.f32 %v3905_v11, %v2739_v0 }
 0x2d8   : > { %3489 = vst [vmem:[%s4694_s30 + $0x78] sm:$0xff] %v3473_v6   ;;  %v3468_v22 = vpack.c.bf16 %v3905_v11, %v3903_v37  ;;  %v2851_v56 = vmul.f32 %v2782_v15, %v2782_v15 }
 0x2d9   : > { %v2879_v9 = vadd.f32 %v2878_v59, %v2848_v30  ;;  %v2811_v54 = vadd.f32 %v2810_v23, %v2780_v62  ;;  %v2849_v24 = vmul.f32 %v2780_v62, %v2780_v62 }
 0x2da   : > { %3488 = vst [vmem:[%s4694_s30 + $0x70] sm:$0xff] %v3468_v22  }
 0x2db   : > { %v2812_v12 = vadd.f32 %v2811_v54, %v2781_v2  ;;  %v2880_v45 = vadd.f32 %v2879_v9, %v2849_v24 }
 0x2dd   : > { %v2813_v28 = vadd.f32 %v2812_v12, %v2782_v15  ;;  %v2881_v3 = vadd.f32 %v2880_v45, %v2850_v16 }
 0x2df   : > { %v2814_v33 = vrot.slane %v2813_v28, 4  ;;  %v2882_v63 = vadd.f32 %v2881_v3, %v2851_v56 }
 0x2e1   : > { %v2815_v17 = vadd.f32 %v2814_v33, %v2813_v28  ;;  %v2883_v38 = vrot.slane %v2882_v63, 4 }
 0x2e3   : > { %v2816_v46 = vrot.slane %v2815_v17, 2  ;;  %v2884_v26 = vadd.f32 %v2883_v38, %v2882_v63 }
 0x2e5   : > { %v2817_v43 = vadd.f32 %v2816_v46, %v2815_v17  ;;  %v2885_v31 = vrot.slane %v2884_v26, 2 }
 0x2e7   : > { %v2818_v41 = vrot.slane %v2817_v43, 1  ;;  %v2886_v53 = vadd.f32 %v2885_v31, %v2884_v26 }
 0x2e9   : > { %v2887_v27 = vrot.slane %v2886_v53, 1  ;;  %v2819_v19 = vadd.f32 %v2818_v41, %v2817_v43 }
 0x2eb   : > { %v2888_v32 = vadd.f32 %v2887_v27, %v2886_v53 }
 0x2ed   : > { %v2890_v39 = vsel %vm2889_vm0, %v2819_v19, %v2888_v32 }
 0x2ee   : > { %2891 = vst [vmem:[%s529_s16] sm:$0x3] %v2890_v39 }
 0x2ef PF: > { %s24_s8 = sadd.s32 1, %s4051_s8   ;;  %s4788_s22 = smov %s4047_s7 }
 0x2f0   : > { %p21_p6 = scmp.ge.s32.totalorder %s24_s8, 4   ;;  %s4789_s7 = smov %s4791_s23 }
 0x2f2   :  { %23 = sbr.rel (!%p21_p6) target bundleno = 2 (0x2), region = 126 }

// kernel: link_prediction_gnn_forward.4
= control target key start
LH: loop header
LB: loop body
LE: loop exit
PB: predicated region body
PF: predicated region fallthrough
CT: control target
= control target key end

     0   :  { %s4676_s25 = smov 0   ;;  %s4678_s26 = smov 0   ;;  %s5738_s0 = inlined_call_operand.vmem [shape: s8[512,512], index: 0, kind: input, shape index: {}]   ;;  %s5739_s1 = inlined_call_operand.vmem [shape: f32[512,1], index: 1, kind: input, shape index: {}]   ;;  %s5740_s2 = inlined_call_operand.vmem [shape: f32[512,1], index: 2, kind: input, shape index: {}]   ;;  %s5741_s3 = inlined_call_operand.vmem [shape: bf16[512,128], index: 3, kind: input, shape index: {}]   ;;  %s5742_s4 = inlined_call_operand.vmem [shape: f32[1,128], index: 4, kind: input, shape index: {}]   ;;  %s5743_s5 = inlined_call_operand.vmem [shape: f32[1,128], index: 5, kind: input, shape index: {}]   ;;  %s5744_s6 = inlined_call_operand.vmem [shape: f32[1,128], index: 6, kind: input, shape index: {}]   ;;  %s5745_s7 = inlined_call_operand.vmem [shape: f32[1,128], index: 7, kind: input, shape index: {}]   ;;  %s5746_s8 = inlined_call_operand.vmem [shape: f32[1,128], index: 8, kind: input, shape index: {}]   ;;  %s5747_s9 = inlined_call_operand.vmem [shape: bf16[128,128], index: 9, kind: input, shape index: {}]   ;;  %s5748_s10 = inlined_call_operand.vmem [shape: f32[1,128], index: 10, kind: input, shape index: {}]   ;;  %s5749_s11 = inlined_call_operand.vmem [shape: bf16[128,128], index: 11, kind: input, shape index: {}]   ;;  %s5750_s12 = inlined_call_operand.vmem [shape: bf16[512,128], index: 12, kind: output, shape index: {0}]   ;;  %s5751_s13 = inlined_call_operand.vmem [shape: f32[2,2,128], index: 13, kind: output, shape index: {1}]  }
   0x1   :  { %s4680_s27 = smov 0  }
   0x2 LB: > { %s36_s28 = sadd.s32 1, %s4599_s26  ;;  %p3586_p0 = scmp.ge.s32.totalorder %s4603_s27, 1  ;;  %s4603_s27 = sphi %s4680_s27, %s24_s27   ;;  %s4599_s26 = sphi %s4678_s26, %s5754_s26   ;;  %s4595_s25 = sphi %s4676_s25, %s5753_s25  }
   0x3   : > { %p38_p1 = scmp.ge.s32.totalorder %s36_s28, 2  ;;  %p433_p2 = scmp.lt.s32.totalorder %s4603_s27, 3 }
   0x5   : > { %s5756_s28 = smov (%p38_p1, %s36_s28), 0  ;;  %p434_p3 = pnand %p3586_p0, %p433_p2 }
   0x6   : > { %v4030_v0 = vld [vmem:[%s5741_s3 + $0x40] sm:$0xff] (!%p434_p3)   ;;  %v837_v2 = vlaneseq (!%p434_p3)  ;;  %v4031_v11 = vld [vmem:[%s5741_s3 + $0x48] sm:$0xff] (!%p434_p3)   ;;  %v4032_v16 = vld [vmem:[%s5741_s3 + $0x50] sm:$0xff] (!%p434_p3)   ;;  %s3587_s18 = sshll.u32 (!%p434_p3), %s4595_s25, 5  ;;  %s3597_s20 = sshll.u32 (!%p434_p3), %s4595_s25, 8  ;;  %vm3289_vm0 = vcmask (!%p434_p3), 1040384  }
   0x7   : > { %437 = sbr.rel (%p434_p3) target bundleno = 783 (0x30f), region = 68  ;;  %v765_v1 = vld [vmem:[%s5743_s5] sm:$0x1] (!%p434_p3)  ;;  %v3785_v6 = vunpack.c.l.bf16 (!%p434_p3), %v4030_v0  ;;  %v3786_v7 = vunpack.c.h.bf16 (!%p434_p3), %v4030_v0  ;;  %v3789_v14 = vunpack.c.l.bf16 (!%p434_p3), %v4031_v11  ;;  %v4023_v15 = vld [vmem:[%s5741_s3 + $0x8] sm:$0xff] (!%p434_p3)   ;;  %v4024_v17 = vld [vmem:[%s5741_s3 + $0x10] sm:$0xff] (!%p434_p3)   ;;  %v3790_v19 = vunpack.c.h.bf16 (!%p434_p3), %v4031_v11  ;;  %p4854_p4 = scmp.lt.s32.totalorder (!%p434_p3), %s3587_s18, 63 }
   0x8   : > { %v766_v3 = vadd.f32 (!%p434_p3), 1e-05, %v765_v1  ;;  %v833_v4 = vld [vmem:[%s5746_s8] sm:$0x1] (!%p434_p3)  ;;  %v838_v9 = vshrl.u32 (!%p434_p3), %v837_v2, 7  ;;  %v3757_v20 = vunpack.c.l.bf16 (!%p434_p3), %v4023_v15  ;;  %v3758_v21 = vunpack.c.h.bf16 (!%p434_p3), %v4023_v15  ;;  %v4033_v22 = vld [vmem:[%s5741_s3 + $0x58] sm:$0xff] (!%p434_p3)  }
   0x9   : > { %v834_v5 = vld [vmem:[%s5742_s4] sm:$0x1] (!%p434_p3)  ;;  %v4025_v23 = vld [vmem:[%s5741_s3 + $0x18] sm:$0xff] (!%p434_p3)   ;;  %v3793_v25 = vunpack.c.l.bf16 (!%p434_p3), %v4032_v16  ;;  %v3794_v26 = vunpack.c.h.bf16 (!%p434_p3), %v4032_v16  ;;  %v3761_v27 = vunpack.c.l.bf16 (!%p434_p3), %v4024_v17  ;;  %v3762_v28 = vunpack.c.h.bf16 (!%p434_p3), %v4024_v17  ;;  %p526_p5 = scmp.lt.s32.totalorder (!%p434_p3), %s4595_s25, 1 }
   0xa   : > { %v835_v8 = vmul.f32 (!%p434_p3), %v834_v5, %v833_v4  ;;  %v3752_v10 = vld [vmem:[%s5741_s3] sm:$0xff] (!%p434_p3)   ;;  %4575 = vrsqrt.f32 (!%p434_p3), %v766_v3  ;;  %v4723_v18 = vsub.s32 (!%p434_p3), 0, %v838_v9  ;;  %v3797_v31 = vunpack.c.l.bf16 (!%p434_p3), %v4033_v22 }
   0xb   : > { %v3753_v12 = vunpack.c.l.bf16 (!%p434_p3), %v3752_v10  ;;  %v3754_v13 = vunpack.c.h.bf16 (!%p434_p3), %v3752_v10  ;;  %v4734_v24 = vld [vmem:[%s5741_s3 + $0x60] sm:$0xff] (!%p434_p3)   ;;  %v3798_v32 = vunpack.c.h.bf16 (!%p434_p3), %v4033_v22  ;;  %v3765_v33 = vunpack.c.l.bf16 (!%p434_p3), %v4025_v23 }
   0xc   : > { %v4739_v29 = vld [vmem:[%s5741_s3 + $0x20] sm:$0xff] (!%p434_p3)   ;;  %v4742_v30 = vrot.slane (!%p434_p3), %v835_v8, %v4723_v18  ;;  %v3766_v35 = vunpack.c.h.bf16 (!%p434_p3), %v4025_v23  ;;  %v3801_v36 = vunpack.c.l.bf16 (!%p434_p3), %v4734_v24  ;;  %v3802_v37 = vunpack.c.h.bf16 (!%p434_p3), %v4734_v24 }
   0xd   : > { %v4747_v34 = vld [vmem:[%s5744_s6] ss:$0 sm:$0xff] (!%p434_p3)  ;;  %v3769_v38 = vunpack.c.l.bf16 (!%p434_p3), %v4739_v29 }
   0xe   : > { %v858_v39 = vsub.f32 %v3785_v6, %v4742_v30  ;;  %v859_v40 = vsub.f32 %v3786_v7, %v4742_v30  ;;  %v842_v41 = vsub.f32 %v3753_v12, %v4742_v30  ;;  %v843_v42 = vsub.f32 %v3754_v13, %v4742_v30  ;;  %v4785_v4 = vld [vmem:[%s5745_s7] ss:$0 sm:$0xff]  ;;  %s5758_s18 = smov (!%p4854_p4, %s3587_s18), 63  ;;  %s5760_s25 = smov (!%p526_p5, %s4595_s25), 1 }
   0xf   : > { %v860_v43 = vsub.f32 %v3789_v14, %v4742_v30  ;;  %v861_v44 = vsub.f32 %v3790_v19, %v4742_v30  ;;  %v844_v45 = vsub.f32 %v3757_v20, %v4742_v30  ;;  %v845_v46 = vsub.f32 %v3758_v21, %v4742_v30  ;;  %s4892_s15 = sshll.u32 %s5758_s18, 3  ;;  %s3595_s29 = sshll.u32 %s5758_s18, 2 }
  0x10   : > { %v928_v47 = vmul.f32 %v4747_v34, %v858_v39  ;;  %v929_v48 = vmul.f32 %v4747_v34, %v859_v40  ;;  %v912_v49 = vmul.f32 %v4747_v34, %v842_v41  ;;  %v913_v50 = vmul.f32 %v4747_v34, %v843_v42  ;;  %s4907_s21 = scalar_lea.vmem %s5738_s0, %s4892_s15  ;;  %s5198_s19 = scalar_lea.vmem %s5739_s1, %s4892_s15 }
  0x11   : > { %v930_v51 = vmul.f32 %v4747_v34, %v860_v43  ;;  %v931_v52 = vmul.f32 %v4747_v34, %v861_v44  ;;  %v914_v53 = vmul.f32 %v4747_v34, %v844_v45  ;;  %v915_v54 = vmul.f32 %v4747_v34, %v845_v46  ;;  %s5310_s22 = scalar_lea.vmem %s5740_s2, %s4892_s15  ;;  %s2178_s15 = sshra.s32 %s3597_s20, 3 }
  0x12   : > { %v862_v55 = vsub.f32 %v3793_v25, %v4742_v30  ;;  %v863_v56 = vsub.f32 %v3794_v26, %v4742_v30  ;;  %v846_v57 = vsub.f32 %v3761_v27, %v4742_v30  ;;  %v847_v58 = vsub.f32 %v3762_v28, %v4742_v30  ;;  %s3664_s23 = sshll.u32 %s2178_s15, 2  ;;  %s5658_s14 = scalar_lea.vmem %s5750_s12, %s3595_s29 }
  0x13   : > { %v864_v60 = vsub.f32 %v3797_v31, %v4742_v30  ;;  %v865_v61 = vsub.f32 %v3798_v32, %v4742_v30  ;;  %v848_v62 = vsub.f32 %v3765_v33, %v4742_v30  ;;  %v849_v63 = vsub.f32 %v3766_v35, %v4742_v30  ;;  %s5457_s17 = scalar_lea.vmem %s5741_s3, %s3664_s23  ;;  %s3596_s18 = sshll.u32 %s5760_s25, 1 }
  0x14   : > { %v4576_v59 = vpop.eup %4575  ;;  %v932_v1 = vmul.f32 %v4747_v34, %v862_v55  ;;  %v933_v2 = vmul.f32 %v4747_v34, %v863_v56  ;;  %v916_v3 = vmul.f32 %v4747_v34, %v846_v57  ;;  %v917_v5 = vmul.f32 %v4747_v34, %v847_v58 }
  0x15   : > { %v4777_v0 = vrot.slane %v4576_v59, %v4723_v18  ;;  %v934_v6 = vmul.f32 %v4747_v34, %v864_v60  ;;  %v935_v7 = vmul.f32 %v4747_v34, %v865_v61  ;;  %v918_v8 = vmul.f32 %v4747_v34, %v848_v62  ;;  %v4035_v61 = vld [vmem:[%s5741_s3 + $0x68] sm:$0xff]  }
  0x16   : > { %v919_v55 = vmul.f32 %v4747_v34, %v849_v63  ;;  %v3805_v24 = vunpack.c.l.bf16 %v4035_v61 }
  0x17   : > { %v998_v9 = vmul.f32 %v4777_v0, %v928_v47  ;;  %v999_v10 = vmul.f32 %v4777_v0, %v929_v48  ;;  %v982_v11 = vmul.f32 %v4777_v0, %v912_v49  ;;  %v983_v12 = vmul.f32 %v4777_v0, %v913_v50 }
  0x18   : > { %v1000_v13 = vmul.f32 %v4777_v0, %v930_v51  ;;  %v1001_v14 = vmul.f32 %v4777_v0, %v931_v52  ;;  %v984_v15 = vmul.f32 %v4777_v0, %v914_v53  ;;  %v985_v16 = vmul.f32 %v4777_v0, %v915_v54 }
  0x19   : > { %v1069_v17 = vadd.f32 %v4785_v4, %v998_v9  ;;  %v1070_v19 = vadd.f32 %v4785_v4, %v999_v10  ;;  %v1053_v20 = vadd.f32 %v4785_v4, %v982_v11  ;;  %v1054_v21 = vadd.f32 %v4785_v4, %v983_v12  ;;  %v4027_v12 = vld [vmem:[%s5741_s3 + $0x28] sm:$0xff]  }
  0x1a   : > { %v1071_v22 = vadd.f32 %v4785_v4, %v1000_v13  ;;  %v1072_v23 = vadd.f32 %v4785_v4, %v1001_v14  ;;  %v1055_v25 = vadd.f32 %v4785_v4, %v984_v15  ;;  %v1056_v26 = vadd.f32 %v4785_v4, %v985_v16 }
  0x1b   : > { %v1133_v27 = vmax.f32 %v1069_v17, 0.0  ;;  %v1134_v28 = vmax.f32 %v1070_v19, 0.0  ;;  %v1117_v31 = vmax.f32 %v1053_v20, 0.0  ;;  %v1118_v32 = vmax.f32 %v1054_v21, 0.0 }
  0x1c   : > { %v1135_v33 = vmax.f32 %v1071_v22, 0.0  ;;  %v1136_v35 = vmax.f32 %v1072_v23, 0.0  ;;  %v1119_v39 = vmax.f32 %v1055_v25, 0.0  ;;  %v1120_v40 = vmax.f32 %v1056_v26, 0.0  ;;  %v4036_v26 = vld [vmem:[%s5741_s3 + $0x70] sm:$0xff]  }
  0x1d   : > { %v1189_v41 = vpack.c.bf16 %v1134_v28, %v1133_v27  ;;  %v1181_v42 = vpack.c.bf16 %v1118_v32, %v1117_v31  ;;  %v1002_v43 = vmul.f32 %v4777_v0, %v932_v1  ;;  %v1003_v44 = vmul.f32 %v4777_v0, %v933_v2 }
  0x1e   : > { %v1190_v45 = vpack.c.bf16 %v1136_v35, %v1135_v33  ;;  %v1182_v46 = vpack.c.bf16 %v1120_v40, %v1119_v39  ;;  %v986_v47 = vmul.f32 %v4777_v0, %v916_v3  ;;  %v987_v48 = vmul.f32 %v4777_v0, %v917_v5 }
  0x1f   : > { %4452 = vmatprep.subr.bf16.mxu1 %v1189_v41  ;;  %v1073_v49 = vadd.f32 %v4785_v4, %v1002_v43  ;;  %v1074_v50 = vadd.f32 %v4785_v4, %v1003_v44  ;;  %v1004_v51 = vmul.f32 %v4777_v0, %v934_v6  ;;  %v1005_v52 = vmul.f32 %v4777_v0, %v935_v7 }
  0x20   : > { %4460 = vmatpush3.bf16.msra.mxu1 %v1181_v42  ;;  %v1057_v53 = vadd.f32 %v4785_v4, %v986_v47  ;;  %v1058_v54 = vadd.f32 %v4785_v4, %v987_v48  ;;  %v988_v56 = vmul.f32 %v4777_v0, %v918_v8  ;;  %4084 = vmatprep.subr.bf16.mxu0 %v1189_v41  ;;  %v3773_v22 = vunpack.c.l.bf16 %v4027_v12 }
  0x21   : > { %4453 = vmatprep.subr.bf16.mxu1 %v1190_v45  ;;  %v1137_v57 = vmax.f32 %v1073_v49, 0.0  ;;  %v1138_v58 = vmax.f32 %v1074_v50, 0.0  ;;  %v1075_v59 = vadd.f32 %v4785_v4, %v1004_v51  ;;  %v1076_v60 = vadd.f32 %v4785_v4, %v1005_v52  ;;  %4085 = vmatpush3.bf16.msra.mxu0 %v1181_v42 }
  0x22   : > { %v1121_v62 = vmax.f32 %v1057_v53, 0.0  ;;  %v1122_v1 = vmax.f32 %v1058_v54, 0.0  ;;  %v989_v2 = vmul.f32 %v4777_v0, %v919_v55  ;;  %v1059_v63 = vadd.f32 %v4785_v4, %v988_v56  ;;  %4086 = vmatprep.subr.bf16.mxu0 %v1190_v45  ;;  %v4028_v53 = vld [vmem:[%s5741_s3 + $0x30] sm:$0xff]  }
  0x23   : > { %v1191_v3 = vpack.c.bf16 %v1138_v58, %v1137_v57  ;;  %v1139_v5 = vmax.f32 %v1075_v59, 0.0  ;;  %v1140_v6 = vmax.f32 %v1076_v60, 0.0  ;;  %v866_v7 = vsub.f32 %v3801_v36, %v4742_v30 }
  0x24   : > { %4461 = vmatpush3.bf16.msra.mxu1 %v1182_v46  ;;  %v1183_v8 = vpack.c.bf16 %v1122_v1, %v1121_v62  ;;  %v1060_v9 = vadd.f32 %v4785_v4, %v989_v2  ;;  %v1123_v10 = vmax.f32 %v1059_v63, 0.0  ;;  %v867_v11 = vsub.f32 %v3802_v37, %v4742_v30 }
  0x25   : > { %4454 = vmatprep.subr.bf16.mxu1 %v1191_v3  ;;  %v1192_v13 = vpack.c.bf16 %v1140_v6, %v1139_v5  ;;  %v936_v14 = vmul.f32 %v4747_v34, %v866_v7  ;;  %v3770_v36 = vunpack.c.h.bf16 %v4739_v29  ;;  %v850_v15 = vsub.f32 %v3769_v38, %v4742_v30  ;;  %4087 = vmatpush3.bf16.msra.mxu0 %v1182_v46 }
  0x26   : > { %v1124_v16 = vmax.f32 %v1060_v9, 0.0  ;;  %v937_v17 = vmul.f32 %v4747_v34, %v867_v11  ;;  %v3806_v37 = vunpack.c.h.bf16 %v4035_v61  ;;  %4088 = vmatprep.subr.bf16.mxu0 %v1191_v3  ;;  %v868_v38 = vsub.f32 %v3805_v24, %v4742_v30  ;;  %v4037_v3 = vld [vmem:[%s5741_s3 + $0x78] sm:$0xff]  }
  0x27   : > { %v1006_v19 = vmul.f32 %v4777_v0, %v936_v14  ;;  %v851_v20 = vsub.f32 %v3770_v36, %v4742_v30  ;;  %v920_v21 = vmul.f32 %v4747_v34, %v850_v15  ;;  %v3774_v32 = vunpack.c.h.bf16 %v4027_v12  ;;  %v4029_v9 = vld [vmem:[%s5741_s3 + $0x38] sm:$0xff]  }
  0x28   : > { %4462 = vmatpush3.bf16.msra.mxu1 %v1183_v8  ;;  %v1184_v23 = vpack.c.bf16 %v1124_v16, %v1123_v10  ;;  %v1007_v29 = vmul.f32 %v4777_v0, %v937_v17  ;;  %v869_v25 = vsub.f32 %v3806_v37, %v4742_v30  ;;  %v938_v35 = vmul.f32 %v4747_v34, %v868_v38 }
  0x29   : > { %4455 = vmatprep.subr.bf16.mxu1 %v1192_v13  ;;  %v1077_v27 = vadd.f32 %v4785_v4, %v1006_v19  ;;  %v921_v28 = vmul.f32 %v4747_v34, %v851_v20  ;;  %v990_v31 = vmul.f32 %v4777_v0, %v920_v21  ;;  %v852_v40 = vsub.f32 %v3773_v22, %v4742_v30 }
  0x2a   : > { %v1078_v33 = vadd.f32 %v4785_v4, %v1007_v29  ;;  %v939_v39 = vmul.f32 %v4747_v34, %v869_v25  ;;  %4089 = vmatpush3.bf16.msra.mxu0 %v1183_v8  ;;  %v853_v44 = vsub.f32 %v3774_v32, %v4742_v30  ;;  %v1008_v46 = vmul.f32 %v4777_v0, %v938_v35 }
  0x2b   : > { %v1141_v41 = vmax.f32 %v1077_v27, 0.0  ;;  %v991_v42 = vmul.f32 %v4777_v0, %v921_v28  ;;  %v1061_v43 = vadd.f32 %v4785_v4, %v990_v31  ;;  %4090 = vmatprep.subr.bf16.mxu0 %v1192_v13  ;;  %v922_v48 = vmul.f32 %v4747_v34, %v852_v40  ;;  %v4918_v27 = vld [vmem:[%s4907_s21 + $0x80] sm:$0xff] }
  0x2c   : > { %4463 = vmatpush3.bf16.msra.mxu1 %v1184_v23  ;;  %v1142_v45 = vmax.f32 %v1078_v33, 0.0  ;;  %v1009_v47 = vmul.f32 %v4777_v0, %v939_v39  ;;  %v923_v51 = vmul.f32 %v4747_v34, %v853_v44  ;;  %v3809_v52 = vunpack.c.l.bf16 %v4036_v26 }
  0x2d   : > { %v1062_v49 = vadd.f32 %v4785_v4, %v991_v42  ;;  %v1125_v50 = vmax.f32 %v1061_v43, 0.0  ;;  %v1079_v55 = vadd.f32 %v4785_v4, %v1008_v46  ;;  %v992_v57 = vmul.f32 %v4777_v0, %v922_v48 }
  0x2e   : > { %v1193_v54 = vpack.c.bf16 %v1142_v45, %v1141_v41  ;;  %v1080_v56 = vadd.f32 %v4785_v4, %v1009_v47  ;;  %4091 = vmatpush3.bf16.msra.mxu0 %v1184_v23  ;;  %v993_v59 = vmul.f32 %v4777_v0, %v923_v51  ;;  %v3810_v60 = vunpack.c.h.bf16 %v4036_v26  ;;  %v4930_v45 = vld [vmem:[%s4907_s21 + $0x88] sm:$0xff]  ;;  %v4046_v51 = vld [vmem:[%s5741_s3 + $0xc0] sm:$0xff]  }
  0x2f   : > { %v1126_v58 = vmax.f32 %v1062_v49, 0.0  ;;  %v870_v61 = vsub.f32 %v3809_v52, %v4742_v30  ;;  %v1143_v62 = vmax.f32 %v1079_v55, 0.0  ;;  %v1063_v2 = vadd.f32 %v4785_v4, %v992_v57 }
  0x30   : > { %4456 = vmatprep.subr.bf16.mxu1 %v1193_v54  ;;  %v1144_v1 = vmax.f32 %v1080_v56, 0.0  ;;  %v3777_v63 = vunpack.c.l.bf16 %v4028_v53  ;;  %4092 = vmatprep.subr.bf16.mxu0 %v1193_v54  ;;  %v1064_v6 = vadd.f32 %v4785_v4, %v993_v59  ;;  %v871_v7 = vsub.f32 %v3810_v60, %v4742_v30 }
  0x31   : > { %v1185_v5 = vpack.c.bf16 %v1126_v58, %v1125_v50  ;;  %v940_v8 = vmul.f32 %v4747_v34, %v870_v61  ;;  %v1127_v11 = vmax.f32 %v1063_v2, 0.0  ;;  %v3778_v12 = vunpack.c.h.bf16 %v4028_v53 }
  0x32   : > { %v1194_v10 = vpack.c.bf16 %v1144_v1, %v1143_v62  ;;  %v854_v13 = vsub.f32 %v3777_v63, %v4742_v30  ;;  %v1128_v14 = vmax.f32 %v1064_v6, 0.0  ;;  %v941_v36 = vmul.f32 %v4747_v34, %v871_v7  ;;  %v4038_v62 = vld [vmem:[%s5741_s3 + $0x80] sm:$0xff]   ;;  %v4953_v6 = vld [vmem:[%s4907_s21 + $0x98] sm:$0xff] }
  0x33   : > { %4464 = vmatpush3.bf16.msra.mxu1 %v1185_v5  ;;  %v1010_v15 = vmul.f32 %v4777_v0, %v940_v8  ;;  %v3813_v16 = vunpack.c.l.bf16 %v4037_v3  ;;  %4093 = vmatpush3.bf16.msra.mxu0 %v1185_v5  ;;  %v855_v17 = vsub.f32 %v3778_v12, %v4742_v30  ;;  %v3814_v37 = vunpack.c.h.bf16 %v4037_v3  ;;  %v4950_v5 = vld [vmem:[%s4907_s21 + $0x90] sm:$0xff] }
  0x34   : > { %4457 = vmatprep.subr.bf16.mxu1 %v1194_v10  ;;  %v924_v24 = vmul.f32 %v4747_v34, %v854_v13  ;;  %v3781_v19 = vunpack.c.l.bf16 %v4029_v9  ;;  %4094 = vmatprep.subr.bf16.mxu0 %v1194_v10  ;;  %v1186_v20 = vpack.c.bf16 %v1128_v14, %v1127_v11  ;;  %v1011_v21 = vmul.f32 %v4777_v0, %v941_v36  ;;  %v4047_v11 = vld [vmem:[%s5741_s3 + $0xc8] sm:$0xff]  }
  0x35   : > { %v1081_v22 = vadd.f32 %v4785_v4, %v1010_v15  ;;  %v872_v23 = vsub.f32 %v3813_v16, %v4742_v30  ;;  %v925_v29 = vmul.f32 %v4747_v34, %v855_v17  ;;  %v873_v25 = vsub.f32 %v3814_v37, %v4742_v30 }
  0x36   : > { %v994_v38 = vmul.f32 %v4777_v0, %v924_v24  ;;  %v3782_v26 = vunpack.c.h.bf16 %v4029_v9  ;;  %v1082_v28 = vadd.f32 %v4785_v4, %v1011_v21  ;;  %v856_v33 = vsub.f32 %v3781_v19, %v4742_v30 }
  0x37   : > { %4465 = vmatpush3.bf16.msra.mxu1 %v1186_v20  ;;  %v1145_v31 = vmax.f32 %v1081_v22, 0.0  ;;  %v942_v32 = vmul.f32 %v4747_v34, %v872_v23  ;;  %4095 = vmatpush3.bf16.msra.mxu0 %v1186_v20  ;;  %v995_v35 = vmul.f32 %v4777_v0, %v925_v29  ;;  %v943_v40 = vmul.f32 %v4747_v34, %v873_v25  ;;  %v4039_v22 = vld [vmem:[%s5741_s3 + $0x88] sm:$0xff]  }
  0x38   : > { %v1065_v39 = vadd.f32 %v4785_v4, %v994_v38  ;;  %v857_v41 = vsub.f32 %v3782_v26, %v4742_v30  ;;  %v1146_v42 = vmax.f32 %v1082_v28, 0.0  ;;  %v926_v44 = vmul.f32 %v4747_v34, %v856_v33 }
  0x39   : > { %v1012_v43 = vmul.f32 %v4777_v0, %v942_v32  ;;  %v633_v46 = vunpack.c.l.s8.bf16 %v4918_v27  ;;  %v1066_v47 = vadd.f32 %v4785_v4, %v995_v35  ;;  %v1013_v49 = vmul.f32 %v4777_v0, %v943_v40 }
  0x3a   : > { %v1129_v48 = vmax.f32 %v1065_v39, 0.0  ;;  %v927_v50 = vmul.f32 %v4747_v34, %v857_v41  ;;  %v1195_v52 = vpack.c.bf16 %v1146_v42, %v1145_v31  ;;  %v996_v54 = vmul.f32 %v4777_v0, %v926_v44 }
  0x3b   : > { %v1083_v53 = vadd.f32 %v4785_v4, %v1012_v43  ;;  %v1130_v55 = vmax.f32 %v1066_v47, 0.0  ;;  %v1084_v56 = vadd.f32 %v4785_v4, %v1013_v49  ;;  %v635_v58 = vunpack.c.l.s8.bf16 %v4930_v45 }
  0x3c   : > { %v997_v57 = vmul.f32 %v4777_v0, %v927_v50  ;;  %4458 = vmatprep.subr.bf16.mxu1 %v1195_v52  ;;  %v1067_v60 = vadd.f32 %v4785_v4, %v996_v54  ;;  %v3849_v61 = vunpack.c.l.bf16 %v4046_v51  ;;  %4096 = vmatprep.subr.bf16.mxu0 %v1195_v52  ;;  %v3850_v9 = vunpack.c.h.bf16 %v4046_v51 }
  0x3d   : > { %v1147_v59 = vmax.f32 %v1083_v53, 0.0  ;;  %v1187_v1 = vpack.c.bf16 %v1130_v55, %v1129_v48  ;;  %v1148_v2 = vmax.f32 %v1084_v56, 0.0  ;;  %v3633_v3 = vcombine.high %v633_v46, %v635_v58  ;;  %v4990_v55 = vld [vmem:[%s4907_s21 + $0xa8] sm:$0xff] }
  0x3e   : > { %v1068_v63 = vadd.f32 %v4785_v4, %v997_v57  ;;  %v1131_v7 = vmax.f32 %v1067_v60, 0.0  ;;  %v3632_v8 = vcombine.low %v633_v46, %v635_v58  ;;  %v890_v10 = vsub.f32 %v3849_v61, %v4742_v30  ;;  %v4980_v46 = vld [vmem:[%s4907_s21 + $0xa0] sm:$0xff]  ;;  %v4048_v60 = vld [vmem:[%s5741_s3 + $0xd0] sm:$0xff]  }
  0x3f   : > { %4466 = vmatpush3.bf16.msra.mxu1 %v1187_v1  ;;  %v1196_v12 = vpack.c.bf16 %v1148_v2, %v1147_v59  ;;  %1629 = vmatprep.mubr.bf16.mxu1 %v3633_v3  ;;  %v3817_v14 = vunpack.c.l.bf16 %v4038_v62  ;;  %v3818_v36 = vunpack.c.h.bf16 %v4038_v62  ;;  %v891_v15 = vsub.f32 %v3850_v9, %v4742_v30  ;;  %v4040_v9 = vld [vmem:[%s5741_s3 + $0x90] sm:$0xff]  }
  0x40   : > { %v1132_v13 = vmax.f32 %v1068_v63, 0.0  ;;  %v960_v16 = vmul.f32 %v4747_v34, %v890_v10  ;;  %v637_v17 = vunpack.c.l.s8.bf16 %v4950_v5  ;;  %v639_v24 = vunpack.c.l.s8.bf16 %v4953_v6  ;;  %4097 = vmatpush3.bf16.msra.mxu0 %v1187_v1 }
  0x41   : > { %4459 = vmatprep.subr.bf16.mxu1 %v1196_v12  ;;  %v874_v19 = vsub.f32 %v3817_v14, %v4742_v30  ;;  %v875_v20 = vsub.f32 %v3818_v36, %v4742_v30  ;;  %v3853_v21 = vunpack.c.l.bf16 %v4047_v11  ;;  %4098 = vmatprep.subr.bf16.mxu0 %v1196_v12  ;;  %v961_v23 = vmul.f32 %v4747_v34, %v891_v15  ;;  %v5008_v14 = vld [vmem:[%s4907_s21 + $0xb0] sm:$0xff] }
  0x42   : > { %v1188_v37 = vpack.c.bf16 %v1132_v13, %v1131_v7  ;;  %v1030_v29 = vmul.f32 %v4777_v0, %v960_v16  ;;  %v3637_v38 = vcombine.high %v637_v17, %v639_v24  ;;  %v3636_v25 = vcombine.low %v637_v17, %v639_v24 }
  0x43   : > { %v944_v26 = vmul.f32 %v4747_v34, %v874_v19  ;;  %v945_v28 = vmul.f32 %v4747_v34, %v875_v20  ;;  %v3854_v31 = vunpack.c.h.bf16 %v4047_v11  ;;  %v892_v32 = vsub.f32 %v3853_v21, %v4742_v30  ;;  %v5014_v21 = vld [vmem:[%s4907_s21 + $0xb8] sm:$0xff] }
  0x44   : > { %4467 = vmatpush3.bf16.msra.mxu1 %v1188_v37  ;;  %v1031_v33 = vmul.f32 %v4777_v0, %v961_v23  ;;  %v1101_v35 = vadd.f32 %v4785_v4, %v1030_v29  ;;  %v3821_v39 = vunpack.c.l.bf16 %v4039_v22  ;;  %v3822_v40 = vunpack.c.h.bf16 %v4039_v22  ;;  %4099 = vmatpush3.bf16.msra.mxu0 %v1188_v37  ;;  %v4049_v22 = vld [vmem:[%s5741_s3 + $0xd8] sm:$0xff]  }
  0x45   : > { %v1014_v41 = vmul.f32 %v4777_v0, %v944_v26  ;;  %v1015_v42 = vmul.f32 %v4777_v0, %v945_v28  ;;  %v893_v43 = vsub.f32 %v3854_v31, %v4742_v30  ;;  %v962_v44 = vmul.f32 %v4747_v34, %v892_v32 }
  0x46   : > { %v1102_v47 = vadd.f32 %v4785_v4, %v1031_v33  ;;  %v1165_v48 = vmax.f32 %v1101_v35, 0.0  ;;  %v876_v49 = vsub.f32 %v3821_v39, %v4742_v30  ;;  %v877_v50 = vsub.f32 %v3822_v40, %v4742_v30 }
  0x47   : > { %1630 = vmatmul.mubr.bf16.vlgmr.msra.gmra.mrb[0].mxu1 %v3632_v8  ;;  %v1085_v51 = vadd.f32 %v4785_v4, %v1014_v41  ;;  %v1086_v52 = vadd.f32 %v4785_v4, %v1015_v42  ;;  %v963_v53 = vmul.f32 %v4747_v34, %v893_v43  ;;  %v1032_v54 = vmul.f32 %v4777_v0, %v962_v44 }
  0x48   : > { %1637 = vmatprep.mubr.bf16.mxu1 %v3637_v38  ;;  %v1166_v56 = vmax.f32 %v1102_v47, 0.0  ;;  %v946_v57 = vmul.f32 %v4747_v34, %v876_v49  ;;  %v947_v58 = vmul.f32 %v4747_v34, %v877_v50  ;;  %v641_v59 = vunpack.c.l.s8.bf16 %v4980_v46  ;;  %v4041_v47 = vld [vmem:[%s5741_s3 + $0x98] sm:$0xff]  }
  0x49   : > { %v1149_v61 = vmax.f32 %v1085_v51, 0.0  ;;  %v1150_v62 = vmax.f32 %v1086_v52, 0.0  ;;  %v1033_v1 = vmul.f32 %v4777_v0, %v963_v53  ;;  %v1103_v2 = vadd.f32 %v4785_v4, %v1032_v54 }
  0x4a   : > { %v1205_v63 = vpack.c.bf16 %v1166_v56, %v1165_v48  ;;  %v1016_v3 = vmul.f32 %v4777_v0, %v946_v57  ;;  %v1017_v7 = vmul.f32 %v4777_v0, %v947_v58  ;;  %v643_v8 = vunpack.c.l.s8.bf16 %v4990_v55 }
  0x4b   : > { %v1197_v10 = vpack.c.bf16 %v1150_v62, %v1149_v61  ;;  %v1104_v11 = vadd.f32 %v4785_v4, %v1033_v1  ;;  %v1167_v12 = vmax.f32 %v1103_v2, 0.0  ;;  %v3857_v13 = vunpack.c.l.bf16 %v4048_v60  ;;  %v5040_v61 = vld [vmem:[%s4907_s21 + $0xc0] sm:$0xff] }
  0x4c   : > { %4196 = vmatprep.subr.bf16.mxu1 %v1205_v63  ;;  %v1087_v36 = vadd.f32 %v4785_v4, %v1016_v3  ;;  %v1088_v15 = vadd.f32 %v4785_v4, %v1017_v7  ;;  %v3641_v16 = vcombine.high %v641_v59, %v643_v8  ;;  %v3640_v17 = vcombine.low %v641_v59, %v643_v8 }
  0x4d   : > { %4197 = vmatpush3.bf16.msra.mxu1 %v1197_v10  ;;  %v1168_v24 = vmax.f32 %v1104_v11, 0.0  ;;  %v3858_v37 = vunpack.c.h.bf16 %v4048_v60  ;;  %v894_v19 = vsub.f32 %v3857_v13, %v4742_v30  ;;  %v3825_v20 = vunpack.c.l.bf16 %v4040_v9  ;;  %v5050_v10 = vld [vmem:[%s4907_s21 + $0xc8] sm:$0xff]  ;;  %v4050_v11 = vld [vmem:[%s5741_s3 + $0xe0] sm:$0xff]  }
  0x4e   : > { %v1151_v23 = vmax.f32 %v1087_v36, 0.0  ;;  %v1152_v29 = vmax.f32 %v1088_v15, 0.0  ;;  %v3826_v38 = vunpack.c.h.bf16 %v4040_v9  ;;  %v645_v26 = vunpack.c.l.s8.bf16 %v5008_v14 }
  0x4f   : > { %1638 = vmatmul.mubr.bf16.gmra.mrb[4].mxu1 %v3636_v25  ;;  %v1206_v28 = vpack.c.bf16 %v1168_v24, %v1167_v12  ;;  %v895_v31 = vsub.f32 %v3858_v37, %v4742_v30  ;;  %v964_v32 = vmul.f32 %v4747_v34, %v894_v19  ;;  %v878_v33 = vsub.f32 %v3825_v20, %v4742_v30 }
  0x50   : > { %1645 = vmatprep.mubr.bf16.mxu1 %v3641_v16  ;;  %v1198_v35 = vpack.c.bf16 %v1152_v29, %v1151_v23  ;;  %v879_v39 = vsub.f32 %v3826_v38, %v4742_v30  ;;  %v647_v40 = vunpack.c.l.s8.bf16 %v5014_v21  ;;  %v3861_v41 = vunpack.c.l.bf16 %v4049_v22  ;;  %v4042_v29 = vld [vmem:[%s5741_s3 + $0xa0] sm:$0xff]  }
  0x51   : > { %4198 = vmatprep.subr.bf16.mxu1 %v1206_v28  ;;  %v965_v25 = vmul.f32 %v4747_v34, %v895_v31  ;;  %v1034_v42 = vmul.f32 %v4777_v0, %v964_v32  ;;  %v948_v43 = vmul.f32 %v4747_v34, %v878_v33  ;;  %v3862_v44 = vunpack.c.h.bf16 %v4049_v22  ;;  %v5068_v32 = vld [vmem:[%s4907_s21 + $0xd0] sm:$0xff] }
  0x52   : > { %4199 = vmatpush3.bf16.msra.mxu1 %v1198_v35  ;;  %v949_v48 = vmul.f32 %v4747_v34, %v879_v39  ;;  %v3645_v49 = vcombine.high %v645_v26, %v647_v40  ;;  %v3644_v50 = vcombine.low %v645_v26, %v647_v40  ;;  %v896_v51 = vsub.f32 %v3861_v41, %v4742_v30 }
  0x53   : > { %v1035_v52 = vmul.f32 %v4777_v0, %v965_v25  ;;  %v1105_v53 = vadd.f32 %v4785_v4, %v1034_v42  ;;  %v1018_v54 = vmul.f32 %v4777_v0, %v948_v43  ;;  %v897_v56 = vsub.f32 %v3862_v44, %v4742_v30  ;;  %v5074_v43 = vld [vmem:[%s4907_s21 + $0xd8] sm:$0xff]  ;;  %v4051_v44 = vld [vmem:[%s5741_s3 + $0xe8] sm:$0xff]  }
  0x54   : > { %v1019_v57 = vmul.f32 %v4777_v0, %v949_v48  ;;  %v966_v58 = vmul.f32 %v4747_v34, %v896_v51  ;;  %v3829_v59 = vunpack.c.l.bf16 %v4041_v47  ;;  %v3830_v60 = vunpack.c.h.bf16 %v4041_v47 }
  0x55   : > { %v1106_v62 = vadd.f32 %v4785_v4, %v1035_v52  ;;  %v1169_v1 = vmax.f32 %v1105_v53, 0.0  ;;  %v1089_v2 = vadd.f32 %v4785_v4, %v1018_v54  ;;  %v967_v63 = vmul.f32 %v4747_v34, %v897_v56 }
  0x56   : > { %v1090_v3 = vadd.f32 %v4785_v4, %v1019_v57  ;;  %v1036_v7 = vmul.f32 %v4777_v0, %v966_v58  ;;  %v880_v8 = vsub.f32 %v3829_v59, %v4742_v30  ;;  %v881_v9 = vsub.f32 %v3830_v60, %v4742_v30 }
  0x57   : > { %1646 = vmatmul.mubr.bf16.gmra.mrb[8].mxu1 %v3640_v17  ;;  %v1170_v12 = vmax.f32 %v1106_v62, 0.0  ;;  %v1153_v13 = vmax.f32 %v1089_v2, 0.0  ;;  %v1037_v36 = vmul.f32 %v4777_v0, %v967_v63  ;;  %v649_v15 = vunpack.c.l.s8.bf16 %v5040_v61  ;;  %v4043_v63 = vld [vmem:[%s5741_s3 + $0xa8] sm:$0xff]  }
  0x58   : > { %1653 = vmatprep.mubr.bf16.mxu1 %v3645_v49  ;;  %v1154_v16 = vmax.f32 %v1090_v3, 0.0  ;;  %v1107_v17 = vadd.f32 %v4785_v4, %v1036_v7  ;;  %v950_v24 = vmul.f32 %v4747_v34, %v880_v8  ;;  %v951_v37 = vmul.f32 %v4747_v34, %v881_v9 }
  0x59   : > { %v1207_v19 = vpack.c.bf16 %v1170_v12, %v1169_v1  ;;  %v1108_v20 = vadd.f32 %v4785_v4, %v1037_v36  ;;  %v651_v22 = vunpack.c.l.s8.bf16 %v5050_v10  ;;  %v3865_v23 = vunpack.c.l.bf16 %v4050_v11 }
  0x5a   : > { %v1199_v38 = vpack.c.bf16 %v1154_v16, %v1153_v13  ;;  %v1171_v26 = vmax.f32 %v1107_v17, 0.0  ;;  %v1020_v28 = vmul.f32 %v4777_v0, %v950_v24  ;;  %v1021_v31 = vmul.f32 %v4777_v0, %v951_v37  ;;  %v5100_v37 = vld [vmem:[%s4907_s21 + $0xe0] sm:$0xff] }
  0x5b   : > { %4200 = vmatprep.subr.bf16.mxu1 %v1207_v19  ;;  %v1172_v33 = vmax.f32 %v1108_v20, 0.0  ;;  %v3649_v35 = vcombine.high %v649_v15, %v651_v22  ;;  %v3866_v39 = vunpack.c.h.bf16 %v4050_v11  ;;  %v898_v25 = vsub.f32 %v3865_v23, %v4742_v30 }
  0x5c   : > { %4201 = vmatpush3.bf16.msra.mxu1 %v1199_v38  ;;  %v1091_v40 = vadd.f32 %v4785_v4, %v1020_v28  ;;  %v1092_v41 = vadd.f32 %v4785_v4, %v1021_v31  ;;  %v3833_v42 = vunpack.c.l.bf16 %v4042_v29  ;;  %v3834_v49 = vunpack.c.h.bf16 %v4042_v29  ;;  %v5109_v31 = vld [vmem:[%s4907_s21 + $0xe8] sm:$0xff] }
  0x5d   : > { %v1208_v47 = vpack.c.bf16 %v1172_v33, %v1171_v26  ;;  %v899_v48 = vsub.f32 %v3866_v39, %v4742_v30  ;;  %v653_v51 = vunpack.c.l.s8.bf16 %v5068_v32  ;;  %v968_v54 = vmul.f32 %v4747_v34, %v898_v25  ;;  %v4052_v33 = vld [vmem:[%s5741_s3 + $0xf0] sm:$0xff]  }
  0x5e   : > { %v1155_v52 = vmax.f32 %v1091_v40, 0.0  ;;  %v1156_v53 = vmax.f32 %v1092_v41, 0.0  ;;  %v882_v56 = vsub.f32 %v3833_v42, %v4742_v30  ;;  %v883_v58 = vsub.f32 %v3834_v49, %v4742_v30 }
  0x5f   : > { %1654 = vmatmul.mubr.bf16.gmra.mrb[12].mxu1 %v3644_v50  ;;  %4202 = vmatprep.subr.bf16.mxu1 %v1208_v47  ;;  %v969_v57 = vmul.f32 %v4747_v34, %v899_v48  ;;  %v655_v59 = vunpack.c.l.s8.bf16 %v5074_v43  ;;  %v3869_v60 = vunpack.c.l.bf16 %v4051_v44  ;;  %v1038_v1 = vmul.f32 %v4777_v0, %v968_v54 }
  0x60   : > { %1661 = vmatprep.mubr.bf16.mxu1 %v3649_v35  ;;  %v1200_v62 = vpack.c.bf16 %v1156_v53, %v1155_v52  ;;  %v952_v50 = vmul.f32 %v4747_v34, %v882_v56  ;;  %v3870_v2 = vunpack.c.h.bf16 %v4051_v44  ;;  %v3648_v3 = vcombine.low %v649_v15, %v651_v22 }
  0x61   : > { %v1039_v7 = vmul.f32 %v4777_v0, %v969_v57  ;;  %v953_v8 = vmul.f32 %v4747_v34, %v883_v58  ;;  %v3653_v9 = vcombine.high %v653_v51, %v655_v59  ;;  %v1109_v11 = vadd.f32 %v4785_v4, %v1038_v1 }
  0x62   : > { %4203 = vmatpush3.bf16.msra.mxu1 %v1200_v62  ;;  %v1022_v12 = vmul.f32 %v4777_v0, %v952_v50  ;;  %v900_v13 = vsub.f32 %v3869_v60, %v4742_v30  ;;  %v901_v36 = vsub.f32 %v3870_v2, %v4742_v30  ;;  %v3837_v15 = vunpack.c.l.bf16 %v4043_v63  ;;  %v4044_v60 = vld [vmem:[%s5741_s3 + $0xb0] sm:$0xff]  }
  0x63   : > { %v1110_v16 = vadd.f32 %v4785_v4, %v1039_v7  ;;  %v1023_v17 = vmul.f32 %v4777_v0, %v953_v8  ;;  %v3838_v24 = vunpack.c.h.bf16 %v4043_v63  ;;  %v1173_v19 = vmax.f32 %v1109_v11, 0.0  ;;  %v4053_v11 = vld [vmem:[%s5741_s3 + $0xf8] sm:$0xff]  }
  0x64   : > { %v1093_v20 = vadd.f32 %v4785_v4, %v1022_v12  ;;  %v970_v22 = vmul.f32 %v4747_v34, %v900_v13  ;;  %v971_v23 = vmul.f32 %v4747_v34, %v901_v36  ;;  %v884_v26 = vsub.f32 %v3837_v15, %v4742_v30 }
  0x65   : > { %v1174_v29 = vmax.f32 %v1110_v16, 0.0  ;;  %v1094_v38 = vadd.f32 %v4785_v4, %v1023_v17  ;;  %v885_v28 = vsub.f32 %v3838_v24, %v4742_v30  ;;  %v657_v41 = vunpack.c.l.s8.bf16 %v5100_v37  ;;  %v4579_v17 = vld [vmem:[%s5744_s6] ss:$0 sm:$0xff] }
  0x66   : > { %v1157_v35 = vmax.f32 %v1093_v20, 0.0  ;;  %v1040_v39 = vmul.f32 %v4777_v0, %v970_v22  ;;  %v1041_v40 = vmul.f32 %v4777_v0, %v971_v23  ;;  %v954_v44 = vmul.f32 %v4747_v34, %v884_v26 }
  0x67   : > { %1662 = vmatmul.mubr.bf16.gmra.mrb[16].mxu1 %v3648_v3  ;;  %v1209_v25 = vpack.c.bf16 %v1174_v29, %v1173_v19  ;;  %v1158_v42 = vmax.f32 %v1094_v38, 0.0  ;;  %v955_v47 = vmul.f32 %v4747_v34, %v885_v28  ;;  %v659_v52 = vunpack.c.l.s8.bf16 %v5109_v31  ;;  %v5128_v34 = vld [vmem:[%s4907_s21 + $0xf0] sm:$0xff] }
  0x68   : > { %1669 = vmatprep.mubr.bf16.mxu1 %v3653_v9  ;;  %v1111_v48 = vadd.f32 %v4785_v4, %v1040_v39  ;;  %v1112_v49 = vadd.f32 %v4785_v4, %v1041_v40  ;;  %v3873_v53 = vunpack.c.l.bf16 %v4052_v33  ;;  %v1024_v56 = vmul.f32 %v4777_v0, %v954_v44  ;;  %v5135_v9 = vld [vmem:[%s4907_s21 + $0xf8] sm:$0xff] }
  0x69   : > { %4204 = vmatprep.subr.bf16.mxu1 %v1209_v25  ;;  %v1201_v54 = vpack.c.bf16 %v1158_v42, %v1157_v35  ;;  %v1025_v57 = vmul.f32 %v4777_v0, %v955_v47  ;;  %v3874_v58 = vunpack.c.h.bf16 %v4052_v33  ;;  %v3652_v62 = vcombine.low %v653_v51, %v655_v59  ;;  %v4045_v33 = vld [vmem:[%s5741_s3 + $0xb8] sm:$0xff]  }
  0x6a   : > { %v1175_v1 = vmax.f32 %v1111_v48, 0.0  ;;  %v1176_v50 = vmax.f32 %v1112_v49, 0.0  ;;  %v3657_v2 = vcombine.high %v657_v41, %v659_v52  ;;  %v1095_v63 = vadd.f32 %v4785_v4, %v1024_v56 }
  0x6b   : > { %4205 = vmatpush3.bf16.msra.mxu1 %v1201_v54  ;;  %v1096_v3 = vadd.f32 %v4785_v4, %v1025_v57  ;;  %v902_v7 = vsub.f32 %v3873_v53, %v4742_v30  ;;  %v903_v8 = vsub.f32 %v3874_v58, %v4742_v30  ;;  %v3841_v51 = vunpack.c.l.bf16 %v4044_v60  ;;  %v5161_v54 = vld [vmem:[%s4907_s21] sm:$0xff] }
  0x6c   : > { %v1210_v12 = vpack.c.bf16 %v1176_v50, %v1175_v1  ;;  %v3842_v59 = vunpack.c.h.bf16 %v4044_v60  ;;  %v661_v13 = vunpack.c.l.s8.bf16 %v5128_v34  ;;  %v1159_v36 = vmax.f32 %v1095_v63, 0.0  ;;  %v4580_v1 = vld [vmem:[%s5745_s7] ss:$0 sm:$0xff] }
  0x6d   : > { %v1160_v16 = vmax.f32 %v1096_v3, 0.0  ;;  %v972_v15 = vmul.f32 %v4579_v17, %v902_v7  ;;  %v973_v24 = vmul.f32 %v4579_v17, %v903_v8  ;;  %v886_v19 = vsub.f32 %v3841_v51, %v4742_v30  ;;  %v570_v3 = vld [vmem:[%s4907_s21 + $0x8] sm:$0xff] }
  0x6e   : > { %4206 = vmatprep.subr.bf16.mxu1 %v1210_v12  ;;  %v887_v20 = vsub.f32 %v3842_v59, %v4742_v30  ;;  %v663_v22 = vunpack.c.l.s8.bf16 %v5135_v9  ;;  %v3877_v23 = vunpack.c.l.bf16 %v4053_v11  ;;  %v3878_v28 = vunpack.c.h.bf16 %v4053_v11 }
  0x6f   : > { %1670 = vmatmul.mubr.bf16.gmra.mrb[20].mxu1 %v3652_v62  ;;  %v1202_v29 = vpack.c.bf16 %v1160_v16, %v1159_v36  ;;  %v1042_v38 = vmul.f32 %v4777_v0, %v972_v15  ;;  %v1043_v26 = vmul.f32 %v4777_v0, %v973_v24  ;;  %v3656_v35 = vcombine.low %v657_v41, %v659_v52 }
  0x70   : > { %1677 = vmatprep.mubr.bf16.mxu1 %v3657_v2  ;;  %v956_v39 = vmul.f32 %v4579_v17, %v886_v19  ;;  %v957_v40 = vmul.f32 %v4579_v17, %v887_v20  ;;  %v3661_v25 = vcombine.high %v661_v13, %v663_v22  ;;  %v904_v47 = vsub.f32 %v3877_v23, %v4742_v30 }
  0x71   : > { %4207 = vmatpush3.bf16.msra.mxu1 %v1202_v29  ;;  %v1113_v42 = vadd.f32 %v4785_v4, %v1042_v38  ;;  %v1114_v44 = vadd.f32 %v4785_v4, %v1043_v26  ;;  %v905_v48 = vsub.f32 %v3878_v28, %v4742_v30  ;;  %v3845_v41 = vunpack.c.l.bf16 %v4045_v33  ;;  %v5177_v38 = vld [vmem:[%s4907_s21 + $0x10] sm:$0xff]  ;;  %v5180_v26 = vld [vmem:[%s4907_s21 + $0x18] sm:$0xff] }
  0x72   : > { %v1026_v49 = vmul.f32 %v4777_v0, %v956_v39  ;;  %v1027_v53 = vmul.f32 %v4777_v0, %v957_v40  ;;  %v3846_v52 = vunpack.c.h.bf16 %v4045_v33  ;;  %v974_v58 = vmul.f32 %v4579_v17, %v904_v47 }
  0x73   : > { %v1177_v56 = vmax.f32 %v1113_v42, 0.0  ;;  %v1178_v57 = vmax.f32 %v1114_v44, 0.0  ;;  %v975_v60 = vmul.f32 %v4579_v17, %v905_v48  ;;  %v888_v2 = vsub.f32 %v3845_v41, %v4742_v30  ;;  %v5185_v42 = vld [vmem:[%s4907_s21 + $0x20] sm:$0xff]  ;;  %v5188_v44 = vld [vmem:[%s4907_s21 + $0x28] sm:$0xff] }
  0x74   : > { %v1097_v62 = vadd.f32 %v4785_v4, %v1026_v49  ;;  %v1098_v50 = vadd.f32 %v4580_v1, %v1027_v53  ;;  %v889_v63 = vsub.f32 %v3846_v52, %v4742_v30  ;;  %v1044_v8 = vmul.f32 %v4777_v0, %v974_v58 }
  0x75   : > { %v1211_v7 = vpack.c.bf16 %v1178_v57, %v1177_v56  ;;  %v1045_v11 = vmul.f32 %v4777_v0, %v975_v60  ;;  %v601_v12 = vunpack.c.l.s8.bf16 %v5161_v54  ;;  %v958_v59 = vmul.f32 %v4579_v17, %v888_v2  ;;  %v1954_v60 = vld [vmem:[%s5198_s19] sm:$0xff]  ;;  %v5205_v2 = vld [vmem:[%s4907_s21 + $0x30] sm:$0xff] }
  0x76   : > { %v1161_v4 = vmax.f32 %v1097_v62, 0.0  ;;  %v1162_v51 = vmax.f32 %v1098_v50, 0.0  ;;  %v959_v36 = vmul.f32 %v4579_v17, %v889_v63  ;;  %v1115_v16 = vadd.f32 %v4580_v1, %v1044_v8  ;;  %v1956_v62 = vld [vmem:[%s5198_s19 + $0x10] sm:$0xff]  ;;  %v5208_v63 = vld [vmem:[%s4907_s21 + $0x38] sm:$0xff] }
  0x77   : > { %1678 = vmatmul.mubr.bf16.gmra.mrb[24].mxu1 %v3656_v35  ;;  %4208 = vmatprep.subr.bf16.mxu1 %v1211_v7  ;;  %v1116_v15 = vadd.f32 %v4580_v1, %v1045_v11  ;;  %v602_v30 = vunpack.c.h.s8.bf16 %v5161_v54  ;;  %v603_v24 = vunpack.c.l.s8.bf16 %v570_v3  ;;  %v1028_v20 = vmul.f32 %v4777_v0, %v958_v59  ;;  %v1957_v59 = vld [vmem:[%s5198_s19 + $0x18] sm:$0xff] }
  0x78   : > { %1685 = vmatprep.mubr.bf16.mxu1 %v3661_v25  ;;  %v1203_v19 = vpack.c.bf16 %v1162_v51, %v1161_v4  ;;  %v1029_v23 = vmul.f32 %v4777_v0, %v959_v36  ;;  %v604_v29 = vunpack.c.h.s8.bf16 %v570_v3  ;;  %v1179_v17 = vmax.f32 %v1115_v16, 0.0 }
  0x79   : > { %v1180_v28 = vmax.f32 %v1116_v15, 0.0  ;;  %v3601_v33 = vcombine.high %v601_v12, %v603_v24  ;;  %v3600_v35 = vcombine.low %v601_v12, %v603_v24  ;;  %v3660_v39 = vcombine.low %v661_v13, %v663_v22  ;;  %v1955_v12 = vld [vmem:[%s5198_s19 + $0x8] sm:$0xff]  ;;  %v5219_v15 = vld [vmem:[%s4907_s21 + $0x40] sm:$0xff] }
  0x7a   : > { %4209 = vmatpush3.bf16.msra.mxu1 %v1203_v19  ;;  %v1099_v40 = vadd.f32 %v4580_v1, %v1028_v20  ;;  %v1100_v25 = vadd.f32 %v4580_v1, %v1029_v23  ;;  %v3603_v47 = vcombine.high %v602_v30, %v604_v29  ;;  %v605_v48 = vunpack.c.l.s8.bf16 %v5177_v38  ;;  %v5225_v19 = vld [vmem:[%s4907_s21 + $0x48] sm:$0xff] }
  0x7b   : > { %v1212_v0 = vpack.c.bf16 %v1180_v28, %v1179_v17  ;;  %1565 = vmatprep.mubr.bf16.mxu0 %v3601_v33  ;;  %v607_v49 = vunpack.c.l.s8.bf16 %v5180_v26  ;;  %v609_v13 = vunpack.c.l.s8.bf16 %v5185_v42  ;;  %v611_v22 = vunpack.c.l.s8.bf16 %v5188_v44  ;;  %v1959_v20 = vld [vmem:[%s5198_s19 + $0x28] sm:$0xff]  ;;  %v1960_v33 = vld [vmem:[%s5198_s19 + $0x30] sm:$0xff] }
  0x7c   : > { %v1163_v53 = vmax.f32 %v1099_v40, 0.0  ;;  %v1164_v41 = vmax.f32 %v1100_v25, 0.0  ;;  %1566 = vmatmul.mubr.bf16.vlgmr.msra.gmra.mrb[0].mxu0 %v3600_v35  ;;  %v606_v56 = vunpack.c.h.s8.bf16 %v5177_v38  ;;  %v608_v57 = vunpack.c.h.s8.bf16 %v5180_v26 }
  0x7d   : > { %4210 = vmatprep.subr.bf16.mxu1 %v1212_v0  ;;  %v3605_v52 = vcombine.high %v605_v48, %v607_v49  ;;  %v3604_v58 = vcombine.low %v605_v48, %v607_v49  ;;  %v3609_v1 = vcombine.high %v609_v13, %v611_v22  ;;  %v3602_v50 = vcombine.low %v602_v30, %v604_v29 }
  0x7e   : > { %v1204_v54 = vpack.c.bf16 %v1164_v41, %v1163_v53  ;;  %v4605_v3 = vmov 0   ;;  %v3607_v7 = vcombine.high %v606_v56, %v608_v57  ;;  %v634_v8 = vunpack.c.h.s8.bf16 %v4918_v27 }
  0x7f   : > { %1686 = vmatmul.mubr.bf16.gmra.mrb[28].mxu1 %v3660_v39  ;;  %1573 = vmatprep.mubr.bf16.mxu0 %v3605_v52  ;;  %v636_v11 = vunpack.c.h.s8.bf16 %v4930_v45  ;;  %v613_v4 = vunpack.c.l.s8.bf16 %v5205_v2  ;;  %v615_v51 = vunpack.c.l.s8.bf16 %v5208_v63  ;;  %v610_v36 = vunpack.c.h.s8.bf16 %v5185_v42  ;;  %v1958_v45 = vld [vmem:[%s5198_s19 + $0x20] sm:$0xff] }
  0x80   : > { %1726 = vmatprep.mubr.bf16.mxu1 %v3603_v47  ;;  %4211 = vmatpush3.bf16.msra.mxu1 %v1204_v54  ;;  %v612_v16 = vunpack.c.h.s8.bf16 %v5188_v44  ;;  %v3608_v27 = vcombine.low %v609_v13, %v611_v22  ;;  %v3606_v23 = vcombine.low %v606_v56, %v608_v57  ;;  %v617_v26 = vunpack.c.l.s8.bf16 %v5219_v15  ;;  %v1961_v44 = vld [vmem:[%s5198_s19 + $0x38] sm:$0xff]  ;;  %v1962_v52 = vld [vmem:[%s5198_s19 + $0x40] sm:$0xff]  ;;  %v1963_v22 = vld [vmem:[%s5198_s19 + $0x48] sm:$0xff] }
  0x81   : > { %4557 = vset.pattern.permute.xlu0 %v4605_v3  ;;  %4558 = vset.pattern.permute.xlu1 %v4605_v3  ;;  %v5222_v30 = vcombine.high %v634_v8, %v636_v11  ;;  %v3613_v24 = vcombine.high %v613_v4, %v615_v51  ;;  %v5228_v29 = vcombine.low %v634_v8, %v636_v11  ;;  %v646_v17 = vunpack.c.h.s8.bf16 %v5008_v14  ;;  %v5265_v57 = vld [vmem:[%s4907_s21 + $0x50] sm:$0xff]  ;;  %v1966_v8 = vld [vmem:[%s5198_s19 + $0x60] sm:$0xff] }
  0x82   : > { %1988 = vperm.xlu0 %4557, %v1954_v60   ;;  %1998 = vperm.xlu1 %4558, %v1956_v62   ;;  %v3611_v38 = vcombine.high %v610_v36, %v612_v16  ;;  %v619_v28 = vunpack.c.l.s8.bf16 %v5225_v19  ;;  %v648_v35 = vunpack.c.h.s8.bf16 %v5014_v21  ;;  %v650_v39 = vunpack.c.h.s8.bf16 %v5040_v61  ;;  %v1964_v62 = vld [vmem:[%s5198_s19 + $0x50] sm:$0xff] }
  0x83   : > { %v652_v40 = vunpack.c.h.s8.bf16 %v5050_v10  ;;  %v614_v25 = vunpack.c.h.s8.bf16 %v5205_v2  ;;  %v616_v42 = vunpack.c.h.s8.bf16 %v5208_v63  ;;  %v654_v14 = vunpack.c.h.s8.bf16 %v5068_v32  ;;  %v1965_v2 = vld [vmem:[%s5198_s19 + $0x58] sm:$0xff] }
  0x84   : > { %1574 = vmatmul.mubr.bf16.gmra.mrb[4].mxu0 %v3604_v58  ;;  %v5241_v0 = vcombine.high %v646_v17, %v648_v35  ;;  %v5243_v47 = vcombine.low %v646_v17, %v648_v35  ;;  %v656_v10 = vunpack.c.h.s8.bf16 %v5074_v43  ;;  %v658_v48 = vunpack.c.h.s8.bf16 %v5100_v37 }
  0x85   : > { %1581 = vmatprep.mubr.bf16.mxu0 %v3609_v1  ;;  %v5245_v21 = vcombine.high %v650_v39, %v652_v40  ;;  %v5247_v61 = vcombine.low %v650_v39, %v652_v40  ;;  %v660_v32 = vunpack.c.h.s8.bf16 %v5109_v31  ;;  %v662_v49 = vunpack.c.h.s8.bf16 %v5128_v34  ;;  %v5268_v34 = vld [vmem:[%s4907_s21 + $0x58] sm:$0xff]  ;;  %v1972_v39 = vld [vmem:[%s5198_s19 + $0x90] sm:$0xff] }
  0x86   : > { %1993 = vperm.xlu0 %4557, %v1955_v12   ;;  %2003 = vperm.xlu1 %4558, %v1957_v59   ;;  %v3612_v53 = vcombine.low %v613_v4, %v615_v51  ;;  %v3617_v41 = vcombine.high %v617_v26, %v619_v28  ;;  %v664_v13 = vunpack.c.h.s8.bf16 %v5135_v9  ;;  %v5256_v54 = vcombine.high %v654_v14, %v656_v10  ;;  %v1967_v12 = vld [vmem:[%s5198_s19 + $0x68] sm:$0xff]  ;;  %v581_v51 = vld [vmem:[%s4907_s21 + $0x60] sm:$0xff] }
  0x87   : > { %1727 = vmatmul.mubr.bf16.vlgmr.msra.gmra.mrb[32].mxu1 %v3602_v50  ;;  %v5258_v56 = vcombine.low %v654_v14, %v656_v10  ;;  %v5260_v43 = vcombine.high %v658_v48, %v660_v32  ;;  %v5262_v37 = vcombine.low %v658_v48, %v660_v32  ;;  %v3610_v31 = vcombine.low %v610_v36, %v612_v16  ;;  %v582_v59 = vld [vmem:[%s4907_s21 + $0x68] sm:$0xff]  ;;  %v1968_v16 = vld [vmem:[%s5198_s19 + $0x70] sm:$0xff]  ;;  %v1974_v48 = vld [vmem:[%s5198_s19 + $0xa0] sm:$0xff] }
  0x88   : > { %1734 = vmatprep.mubr.bf16.mxu1 %v3607_v7  ;;  %v5270_v58 = vcombine.high %v662_v49, %v664_v13  ;;  %v5272_v60 = vcombine.low %v662_v49, %v664_v13  ;;  %v3615_v9 = vcombine.high %v614_v25, %v616_v42  ;;  %v621_v1 = vunpack.c.l.s8.bf16 %v5265_v57  ;;  %v1975_v49 = vld [vmem:[%s5198_s19 + $0xa8] sm:$0xff]  ;;  %v1977_v13 = vld [vmem:[%s5198_s19 + $0xb8] sm:$0xff] }
  0x89   : > { %v623_v50 = vunpack.c.l.s8.bf16 %v5268_v34  ;;  %v618_v63 = vunpack.c.h.s8.bf16 %v5219_v15  ;;  %v620_v3 = vunpack.c.h.s8.bf16 %v5225_v19  ;;  %v3616_v7 = vcombine.low %v617_v26, %v619_v28  ;;  %v1971_v26 = vld [vmem:[%s5198_s19 + $0x88] sm:$0xff]  ;;  %v583_v28 = vld [vmem:[%s4907_s21 + $0x70] sm:$0xff] }
  0x8a   : > { %2008 = vperm.xlu0 %4557, %v1958_v45   ;;  %2013 = vperm.xlu1 %4558, %v1959_v20   ;;  %v3614_v4 = vcombine.low %v614_v25, %v616_v42  ;;  %v627_v15 = vunpack.c.l.s8.bf16 %v582_v59  ;;  %v1969_v45 = vld [vmem:[%s5198_s19 + $0x78] sm:$0xff]  ;;  %v624_v19 = vunpack.c.h.s8.bf16 %v5268_v34  ;;  %v629_v40 = vunpack.c.l.s8.bf16 %v583_v28  ;;  %v1978_v34 = vld [vmem:[%s5198_s19 + $0xc0] sm:$0xff] }
  0x8b   : > { %v3621_v11 = vcombine.high %v621_v1, %v623_v50  ;;  %v3619_v36 = vcombine.high %v618_v63, %v620_v3  ;;  %v3620_v20 = vcombine.low %v621_v1, %v623_v50  ;;  %v3618_v17 = vcombine.low %v618_v63, %v620_v3  ;;  %v1973_v42 = vld [vmem:[%s5198_s19 + $0x98] sm:$0xff]  ;;  %v1980_v50 = vld [vmem:[%s5198_s19 + $0xd0] sm:$0xff]  ;;  %v1982_v63 = vld [vmem:[%s5198_s19 + $0xe0] sm:$0xff] }
  0x8c   : > { %1582 = vmatmul.mubr.bf16.gmra.mrb[8].mxu0 %v3608_v27  ;;  %v625_v27 = vunpack.c.l.s8.bf16 %v581_v51  ;;  %v628_v14 = vunpack.c.h.s8.bf16 %v582_v59  ;;  %v1983_v3 = vld [vmem:[%s5198_s19 + $0xe8] sm:$0xff] }
  0x8d   : > { %1589 = vmatprep.mubr.bf16.mxu0 %v3613_v24  ;;  %v622_v24 = vunpack.c.h.s8.bf16 %v5265_v57  ;;  %v2960_v59 = vld [vmem:[%s5310_s22 + $0x8] sm:$0xff] }
  0x8e   : > { %2018 = vperm.xlu0 %4557, %v1960_v33   ;;  %2023 = vperm.xlu1 %4558, %v1961_v44   ;;  %v584_v33 = vld [vmem:[%s4907_s21 + $0x78] sm:$0xff]  ;;  %v626_v44 = vunpack.c.h.s8.bf16 %v581_v51  ;;  %v3624_v10 = vcombine.low %v625_v27, %v627_v15  ;;  %v2959_v51 = vld [vmem:[%s5310_s22] sm:$0xff] }
  0x8f   : > { %1735 = vmatmul.mubr.bf16.gmra.mrb[36].mxu1 %v3606_v23  ;;  %v1970_v23 = vld [vmem:[%s5198_s19 + $0x80] sm:$0xff]  ;;  %v3623_v35 = vcombine.high %v622_v24, %v624_v19  ;;  %v631_v25 = vunpack.c.l.s8.bf16 %v584_v33 }
  0x90   : > { %1742 = vmatprep.mubr.bf16.mxu1 %v3611_v38  ;;  %v3625_v38 = vcombine.high %v625_v27, %v627_v15  ;;  %v2962_v27 = vld [vmem:[%s5310_s22 + $0x18] sm:$0xff]  ;;  %v2964_v15 = vld [vmem:[%s5310_s22 + $0x28] sm:$0xff] }
  0x91   : > { %v3629_v32 = vcombine.high %v629_v40, %v631_v25  ;;  %v3628_v57 = vcombine.low %v629_v40, %v631_v25  ;;  %v4563_v40 = vld [vmem:[%s5747_s9 + $0x20] sm:$0xff]   ;;  %v2973_v25 = vld [vmem:[%s5310_s22 + $0x70] sm:$0xff] }
  0x92   : > { %2028 = vperm.xlu0 %4557, %v1962_v52   ;;  %2033 = vperm.xlu1 %4558, %v1963_v22   ;;  %v1976_v52 = vld [vmem:[%s5198_s19 + $0xb0] sm:$0xff]  ;;  %v630_v22 = vunpack.c.h.s8.bf16 %v583_v28  ;;  %v2970_v28 = vld [vmem:[%s5310_s22 + $0x58] sm:$0xff] }
  0x94   : > { %1590 = vmatmul.mubr.bf16.gmra.mrb[12].mxu0 %v3612_v53  ;;  %v3622_v53 = vcombine.low %v622_v24, %v624_v19  ;;  %v4559_v19 = vld [vmem:[%s5747_s9] sm:$0xff]  }
  0x95   : > { %1597 = vmatprep.mubr.bf16.mxu0 %v3617_v41  ;;  %v3627_v41 = vcombine.high %v626_v44, %v628_v14  ;;  %4356 = vmatprep.subr.bf16.mxu0 %v4559_v19 }
  0x96   : > { %2038 = vperm.xlu0 %4557, %v1964_v62   ;;  %2043 = vperm.xlu1 %4558, %v1965_v2   ;;  %v3626_v62 = vcombine.low %v626_v44, %v628_v14  ;;  %v1981_v2 = vld [vmem:[%s5198_s19 + $0xd8] sm:$0xff]  ;;  %v2975_v44 = vld [vmem:[%s5310_s22 + $0x80] sm:$0xff]  ;;  %v2976_v14 = vld [vmem:[%s5310_s22 + $0x88] sm:$0xff] }
  0x97   : > { %1743 = vmatmul.mubr.bf16.gmra.mrb[40].mxu1 %v3610_v31  ;;  %v632_v31 = vunpack.c.h.s8.bf16 %v584_v33  ;;  %4357 = vmatpush3.bf16.msra.mxu0 %v4559_v19  ;;  %v4562_v33 = vld [vmem:[%s5747_s9 + $0x18] sm:$0xff]  }
  0x98   : > { %1750 = vmatprep.mubr.bf16.mxu1 %v3615_v9  ;;  %v1979_v9 = vld [vmem:[%s5198_s19 + $0xc8] sm:$0xff] }
  0x99   : > { %v3631_v1 = vcombine.high %v630_v22, %v632_v31 }
  0x9a   : > { %2048 = vperm.xlu0 %4557, %v1966_v8   ;;  %2053 = vperm.xlu1 %4558, %v1967_v12   ;;  %v1984_v8 = vld [vmem:[%s5198_s19 + $0xf0] sm:$0xff]  ;;  %v638_v12 = vunpack.c.h.s8.bf16 %v4950_v5  ;;  %v642_v5 = vunpack.c.h.s8.bf16 %v4980_v46  ;;  %v4560_v46 = vld [vmem:[%s5747_s9 + $0x8] sm:$0xff]  }
  0x9b   : > { %4358 = vmatprep.subr.bf16.mxu0 %v4560_v46 }
  0x9c   : > { %1598 = vmatmul.mubr.bf16.gmra.mrb[16].mxu0 %v3616_v7  ;;  %v3630_v7 = vcombine.low %v630_v22, %v632_v31  ;;  %v2987_v22 = vld [vmem:[%s5310_s22 + $0xe0] sm:$0xff]  ;;  %v2990_v31 = vld [vmem:[%s5310_s22 + $0xf8] sm:$0xff] }
  0x9d   : > { %1605 = vmatprep.mubr.bf16.mxu0 %v3621_v11  ;;  %v1985_v11 = vld [vmem:[%s5198_s19 + $0xf8] sm:$0xff]  ;;  %4359 = vmatpush3.bf16.msra.mxu0 %v4560_v46  ;;  %s529_s19 = scalar_lea.vmem %s5751_s13, %s3596_s18 }
  0x9e   : > { %2058 = vperm.xlu0 %4557, %v1968_v16   ;;  %2063 = vperm.xlu1 %4558, %v1969_v45   ;;  %v2961_v16 = vld [vmem:[%s5310_s22 + $0x10] sm:$0xff] }
  0x9f   : > { %1751 = vmatmul.mubr.bf16.gmra.mrb[44].mxu1 %v3614_v4  ;;  %v640_v4 = vunpack.c.h.s8.bf16 %v4953_v6  ;;  %v644_v6 = vunpack.c.h.s8.bf16 %v4990_v55  ;;  %v2967_v55 = vld [vmem:[%s5310_s22 + $0x40] sm:$0xff] }
  0xa0   : > { %1758 = vmatprep.mubr.bf16.mxu1 %v3619_v36 }
  0xa1   : > { %v3639_v36 = vcombine.high %v638_v12, %v640_v4  ;;  %v3638_v45 = vcombine.low %v638_v12, %v640_v4  ;;  %v3643_v24 = vcombine.high %v642_v5, %v644_v6 }
  0xa2   : > { %2068 = vperm.xlu0 %4557, %v1970_v23   ;;  %2073 = vperm.xlu1 %4558, %v1971_v26   ;;  %v2968_v23 = vld [vmem:[%s5310_s22 + $0x48] sm:$0xff]  ;;  %v4561_v26 = vld [vmem:[%s5747_s9 + $0x10] sm:$0xff]  }
  0xa3   : > { %4360 = vmatprep.subr.bf16.mxu0 %v4561_v26 }
  0xa4   : > { %1606 = vmatmul.mubr.bf16.gmra.mrb[20].mxu0 %v3620_v20  ;;  %v2966_v20 = vld [vmem:[%s5310_s22 + $0x38] sm:$0xff] }
  0xa5   : > { %1613 = vmatprep.mubr.bf16.mxu0 %v3625_v38  ;;  %v3642_v38 = vcombine.low %v642_v5, %v644_v6  ;;  %4361 = vmatpush3.bf16.msra.mxu0 %v4561_v26 }
  0xa6   : > { %2078 = vperm.xlu0 %4557, %v1972_v39   ;;  %2083 = vperm.xlu1 %4558, %v1973_v42   ;;  %v2972_v39 = vld [vmem:[%s5310_s22 + $0x68] sm:$0xff] }
  0xa7   : > { %1759 = vmatmul.mubr.bf16.gmra.mrb[48].mxu1 %v3618_v17  ;;  %v2969_v17 = vld [vmem:[%s5310_s22 + $0x50] sm:$0xff]  ;;  %4362 = vmatprep.subr.bf16.mxu0 %v4562_v33  ;;  %v4564_v42 = vld [vmem:[%s5747_s9 + $0x28] sm:$0xff]  }
  0xa8   : > { %1766 = vmatprep.mubr.bf16.mxu1 %v3623_v35  ;;  %v2971_v35 = vld [vmem:[%s5310_s22 + $0x60] sm:$0xff] }
  0xa9   : > { %4363 = vmatpush3.bf16.msra.mxu0 %v4562_v33 }
  0xaa   : > { %2088 = vperm.xlu0 %4557, %v1974_v48   ;;  %2093 = vperm.xlu1 %4558, %v1975_v49   ;;  %v4566_v48 = vld [vmem:[%s5747_s9 + $0x38] sm:$0xff]   ;;  %v2980_v49 = vld [vmem:[%s5310_s22 + $0xa8] sm:$0xff] }
  0xab   : > { %4364 = vmatprep.subr.bf16.mxu0 %v4563_v40 }
  0xac   : > { %1614 = vmatmul.mubr.bf16.gmra.mrb[24].mxu0 %v3624_v10  ;;  %v2978_v10 = vld [vmem:[%s5310_s22 + $0x98] sm:$0xff] }
  0xad   : > { %1621 = vmatprep.mubr.bf16.mxu0 %v3629_v32  ;;  %4365 = vmatpush3.bf16.msra.mxu0 %v4563_v40  ;;  %v2979_v32 = vld [vmem:[%s5310_s22 + $0xa0] sm:$0xff] }
  0xae   : > { %2098 = vperm.xlu0 %4557, %v1976_v52   ;;  %2103 = vperm.xlu1 %4558, %v1977_v13   ;;  %v2985_v52 = vld [vmem:[%s5310_s22 + $0xd0] sm:$0xff]  ;;  %v2986_v13 = vld [vmem:[%s5310_s22 + $0xd8] sm:$0xff] }
  0xaf   : > { %1767 = vmatmul.mubr.bf16.gmra.mrb[52].mxu1 %v3622_v53  ;;  %4366 = vmatprep.subr.bf16.mxu0 %v4564_v42  ;;  %v2982_v53 = vld [vmem:[%s5310_s22 + $0xb8] sm:$0xff] }
  0xb0   : > { %1774 = vmatprep.mubr.bf16.mxu1 %v3627_v41  ;;  %v2984_v41 = vld [vmem:[%s5310_s22 + $0xc8] sm:$0xff] }
  0xb1   : > { %4367 = vmatpush3.bf16.msra.mxu0 %v4564_v42 }
  0xb2   : > { %2108 = vperm.xlu0 %4557, %v1978_v34   ;;  %2113 = vperm.xlu1 %4558, %v1979_v9  }
  0xb4   : > { %1622 = vmatmul.mubr.bf16.gmra.mrb[28].mxu0 %v3628_v57 }
  0xb6   : > { %2118 = vperm.xlu0 %4557, %v1980_v50   ;;  %2123 = vperm.xlu1 %4558, %v1981_v2  }
  0xb7   : > { %1775 = vmatmul.mubr.bf16.gmra.mrb[56].mxu1 %v3626_v62 }
  0xb8   : > { %1782 = vmatprep.mubr.bf16.mxu1 %v3631_v1 }
  0xba   : > { %2128 = vperm.xlu0 %4557, %v1982_v63   ;;  %2133 = vperm.xlu1 %4558, %v1983_v3  }
  0xbe   : > { %2138 = vperm.xlu0 %4557, %v1984_v8   ;;  %2143 = vperm.xlu1 %4558, %v1985_v11  }
  0xbf   : > { %1783 = vmatmul.mubr.bf16.gmra.mrb[60].mxu1 %v3630_v7 }
  0xc0   : > { %1790 = vmatprep.mubr.bf16.mxu1 %v5222_v30  ;;  %v2963_v30 = vld [vmem:[%s5310_s22 + $0x20] sm:$0xff] }
  0xc2   : > { %2993 = vperm.xlu0 %4557, %v2959_v51   ;;  %2998 = vperm.xlu1 %4558, %v2960_v59  }
  0xc6   : > { %3003 = vperm.xlu0 %4557, %v2961_v16   ;;  %3008 = vperm.xlu1 %4558, %v2962_v27  }
  0xc7   : > { %1791 = vmatmul.mubr.bf16.gmra.mrb[64].mxu1 %v5228_v29  ;;  %v2965_v29 = vld [vmem:[%s5310_s22 + $0x30] sm:$0xff] }
  0xc8   : > { %1798 = vmatprep.mubr.bf16.mxu1 %v3639_v36 }
  0xca   : > { %3013 = vperm.xlu0 %4557, %v2963_v30   ;;  %3018 = vperm.xlu1 %4558, %v2964_v15  }
  0xce   : > { %3023 = vperm.xlu0 %4557, %v2965_v29   ;;  %3028 = vperm.xlu1 %4558, %v2966_v20  }
  0xcf   : > { %1799 = vmatmul.mubr.bf16.gmra.mrb[68].mxu1 %v3638_v45 }
  0xd0   : > { %1806 = vmatprep.mubr.bf16.mxu1 %v3643_v24 }
  0xd2   : > { %3033 = vperm.xlu0 %4557, %v2967_v55   ;;  %3038 = vperm.xlu1 %4558, %v2968_v23  }
  0xd6   : > { %3043 = vperm.xlu0 %4557, %v2969_v17   ;;  %3048 = vperm.xlu1 %4558, %v2970_v28  }
  0xd7   : > { %1807 = vmatmul.mubr.bf16.gmra.mrb[72].mxu1 %v3642_v38 }
  0xd8   : > { %1814 = vmatprep.mubr.bf16.mxu1 %v5241_v0  ;;  %v2974_v0 = vld [vmem:[%s5310_s22 + $0x78] sm:$0xff] }
  0xda   : > { %3053 = vperm.xlu0 %4557, %v2971_v35   ;;  %3058 = vperm.xlu1 %4558, %v2972_v39  }
  0xde   : > { %3063 = vperm.xlu0 %4557, %v2973_v25   ;;  %3068 = vperm.xlu1 %4558, %v2974_v0  }
  0xdf   : > { %1815 = vmatmul.mubr.bf16.gmra.mrb[76].mxu1 %v5243_v47  ;;  %v4565_v47 = vld [vmem:[%s5747_s9 + $0x30] sm:$0xff]  }
  0xe0   : > { %1822 = vmatprep.mubr.bf16.mxu1 %v5245_v21  ;;  %v2977_v21 = vld [vmem:[%s5310_s22 + $0x90] sm:$0xff]  ;;  %4368 = vmatprep.subr.bf16.mxu0 %v4565_v47 }
  0xe1   : > { %4369 = vmatpush3.bf16.msra.mxu0 %v4565_v47 }
  0xe2   : > { %3073 = vperm.xlu0 %4557, %v2975_v44   ;;  %3078 = vperm.xlu1 %4558, %v2976_v14  }
  0xe3   : > { %4370 = vmatprep.subr.bf16.mxu0 %v4566_v48 }
  0xe5   : > { %4371 = vmatpush3.bf16.msra.mxu0 %v4566_v48 }
  0xe6   : > { %3083 = vperm.xlu0 %4557, %v2977_v21   ;;  %3088 = vperm.xlu1 %4558, %v2978_v10  }
  0xe7   : > { %1823 = vmatmul.mubr.bf16.gmra.mrb[80].mxu1 %v5247_v61  ;;  %v2981_v61 = vld [vmem:[%s5310_s22 + $0xb0] sm:$0xff] }
  0xe8   : > { %1830 = vmatprep.mubr.bf16.mxu1 %v5256_v54  ;;  %v2983_v54 = vld [vmem:[%s5310_s22 + $0xc0] sm:$0xff] }
  0xea   : > { %3093 = vperm.xlu0 %4557, %v2979_v32   ;;  %3098 = vperm.xlu1 %4558, %v2980_v49  }
  0xee   : > { %3103 = vperm.xlu0 %4557, %v2981_v61   ;;  %3108 = vperm.xlu1 %4558, %v2982_v53  }
  0xef   : > { %1831 = vmatmul.mubr.bf16.gmra.mrb[84].mxu1 %v5258_v56  ;;  %v2988_v56 = vld [vmem:[%s5310_s22 + $0xe8] sm:$0xff] }
  0xf0   : > { %1838 = vmatprep.mubr.bf16.mxu1 %v5260_v43  ;;  %v2989_v43 = vld [vmem:[%s5310_s22 + $0xf0] sm:$0xff] }
  0xf2   : > { %3113 = vperm.xlu0 %4557, %v2983_v54   ;;  %3118 = vperm.xlu1 %4558, %v2984_v41  }
  0xf6   : > { %3123 = vperm.xlu0 %4557, %v2985_v52   ;;  %3128 = vperm.xlu1 %4558, %v2986_v13  }
  0xf7   : > { %1839 = vmatmul.mubr.bf16.gmra.mrb[88].mxu1 %v5262_v37 }
  0xf8   : > { %1846 = vmatprep.mubr.bf16.mxu1 %v5270_v58 }
  0xfa   : > { %3133 = vperm.xlu0 %4557, %v2987_v22   ;;  %3138 = vperm.xlu1 %4558, %v2988_v56  }
  0xfe   : > { %3143 = vperm.xlu0 %4557, %v2989_v43   ;;  %3148 = vperm.xlu1 %4558, %v2990_v31  }
  0xff   : > { %1847 = vmatmul.mubr.bf16.gmra.mrb[92].mxu1 %v5272_v60  ;;  %v5395_v60 = vld [vmem:[%s5749_s11] sm:$0xff]  }
 0x100   : > { %4404 = vmatprep.subr.bf16.mxu0 %v5395_v60 }
 0x101   : > { %v1989_v41 = vpop.permute.xlu0 %1988 }
 0x11a   : > { %v4148_v57 = vpop.f32.mrb[0].mxu1 }
 0x11b   : > { %v4149_v34 = vpop.f32.mrb[1].mxu1 }
 0x11c   : > { %v5384_v9 = vadd.f32 %v4149_v34, %v4148_v57  ;;  %v4151_v62 = vpop.f32.mrb[2].mxu1 }
 0x11d   : > { %v4152_v37 = vpop.f32.mrb[3].mxu1 }
 0x11e   : > { %v5386_v1 = vadd.f32 %v4152_v37, %v4151_v62 }
 0x122   : > { %v4154_v58 = vpop.f32.mrb[4].mxu1 }
 0x123   : > { %v4155_v50 = vpop.f32.mrb[5].mxu1 }
 0x124   : > { %v5388_v2 = vadd.f32 %v4155_v50, %v4154_v58  ;;  %v4157_v63 = vpop.f32.mrb[6].mxu1 }
 0x125   : > { %v4158_v3 = vpop.f32.mrb[7].mxu1 }
 0x126   : > { %v5390_v7 = vadd.f32 %v4158_v3, %v4157_v63  ;;  %v1999_v63 = vpop.permute.xlu1 %1998 }
 0x12a   : > { %v4160_v8 = vpop.f32.mrb[8].mxu1 }
 0x12b   : > { %v4161_v11 = vpop.f32.mrb[9].mxu1 }
 0x12c   : > { %v5397_v12 = vadd.f32 %v4161_v11, %v4160_v8  ;;  %v4163_v4 = vpop.f32.mrb[10].mxu1  ;;  %v1994_v11 = vpop.permute.xlu0 %1993 }
 0x12d   : > { %v4164_v51 = vpop.f32.mrb[11].mxu1 }
 0x12e   : > { %v5400_v59 = vadd.f32 %v4164_v51, %v4163_v4 }
 0x132   : > { %v4166_v36 = vpop.f32.mrb[12].mxu1 }
 0x133   : > { %v4167_v16 = vpop.f32.mrb[13].mxu1 }
 0x134   : > { %v5402_v27 = vadd.f32 %v4167_v16, %v4166_v36  ;;  %v4169_v5 = vpop.f32.mrb[14].mxu1 }
 0x135   : > { %v4170_v6 = vpop.f32.mrb[15].mxu1 }
 0x136   : > { %v5404_v30 = vadd.f32 %v4170_v6, %v4169_v5 }
 0x13a   : > { %v4172_v15 = vpop.f32.mrb[16].mxu1 }
 0x13b   : > { %v4173_v45 = vpop.f32.mrb[17].mxu1 }
 0x13c   : > { %v5406_v24 = vadd.f32 %v4173_v45, %v4172_v15  ;;  %v4175_v19 = vpop.f32.mrb[18].mxu1 }
 0x13d   : > { %v4176_v29 = vpop.f32.mrb[19].mxu1 }
 0x13e   : > { %v5408_v20 = vadd.f32 %v4176_v29, %v4175_v19 }
 0x142   : > { %v4178_v46 = vpop.f32.mrb[20].mxu1 }
 0x143   : > { %v4179_v55 = vpop.f32.mrb[21].mxu1 }
 0x144   : > { %v5410_v23 = vadd.f32 %v4179_v55, %v4178_v46  ;;  %v4181_v38 = vpop.f32.mrb[22].mxu1 }
 0x145   : > { %v4182_v26 = vpop.f32.mrb[23].mxu1 }
 0x146   : > { %v5412_v17 = vadd.f32 %v4182_v26, %v4181_v38 }
 0x14a   : > { %v4184_v28 = vpop.f32.mrb[24].mxu1 }
 0x14b   : > { %v4185_v33 = vpop.f32.mrb[25].mxu1 }
 0x14c   : > { %v5414_v35 = vadd.f32 %v4185_v33, %v4184_v28  ;;  %v4187_v39 = vpop.f32.mrb[26].mxu1 }
 0x14d   : > { %v4188_v40 = vpop.f32.mrb[27].mxu1 }
 0x14e   : > { %v5416_v25 = vadd.f32 %v4188_v40, %v4187_v39  ;;  %v2004_v40 = vpop.permute.xlu1 %2003 }
 0x14f   : > { %v4100_v0 = vpop.f32.mrb[0].mxu0 }
 0x150   : > { %v4101_v42 = vpop.f32.mrb[1].mxu0 }
 0x151   : > { %v4102_v14 = vadd.f32 %v4101_v42, %v4100_v0  ;;  %v4103_v47 = vpop.f32.mrb[2].mxu0 }
 0x152   : > { %v4190_v44 = vpop.f32.mrb[28].mxu1  ;;  %v4104_v10 = vpop.f32.mrb[3].mxu0 }
 0x153   : > { %v4191_v21 = vpop.f32.mrb[29].mxu1  ;;  %v4105_v49 = vadd.f32 %v4104_v10, %v4103_v47 }
 0x154   : > { %v5418_v48 = vadd.f32 %v4191_v21, %v4190_v44  ;;  %v4193_v32 = vpop.f32.mrb[30].mxu1 }
 0x155   : > { %v4194_v61 = vpop.f32.mrb[31].mxu1 }
 0x156   : > { %v5420_v53 = vadd.f32 %v4194_v61, %v4193_v32 }
 0x157   : > { %v4106_v54 = vpop.f32.mrb[4].mxu0 }
 0x158   : > { %v4107_v52 = vpop.f32.mrb[5].mxu0 }
 0x159   : > { %v4108_v22 = vadd.f32 %v4107_v52, %v4106_v54  ;;  %v4109_v56 = vpop.f32.mrb[6].mxu0  ;;  %v4568_v52 = vld [vmem:[%s5749_s11 + $0x8] sm:$0xff]  }
 0x15a   : > { %v4212_v13 = vpop.f32.mrb[32].mxu1  ;;  %v4110_v31 = vpop.f32.mrb[7].mxu0 }
 0x15b   : > { %v4213_v43 = vpop.f32.mrb[33].mxu1  ;;  %v4111_v62 = vadd.f32 %v4110_v31, %v4109_v56 }
 0x15c   : > { %v4214_v57 = vadd.f32 %v4213_v43, %v4212_v13  ;;  %v4215_v34 = vpop.f32.mrb[34].mxu1  ;;  %v2009_v43 = vpop.permute.xlu0 %2008 }
 0x15d   : > { %v4216_v37 = vpop.f32.mrb[35].mxu1 }
 0x15e   : > { %v1729_v58 = vadd.f32 %v4214_v57, %v4102_v14  ;;  %v4217_v50 = vadd.f32 %v4216_v37, %v4215_v34  ;;  %v4569_v34 = vld [vmem:[%s5749_s11 + $0x10] sm:$0xff]  }
 0x15f   : > { %v4112_v8 = vpop.f32.mrb[8].mxu0 }
 0x160   : > { %v1732_v3 = vadd.f32 %v4217_v50, %v4105_v49  ;;  %v4113_v4 = vpop.f32.mrb[9].mxu0  ;;  %v2146_v51 = vmul.f32 %v1989_v41, %v1729_v58 }
 0x161   : > { %v4114_v5 = vadd.f32 %v4113_v4, %v4112_v8  ;;  %v4115_v6 = vpop.f32.mrb[10].mxu0 }
 0x162   : > { %v2147_v36 = vmul.f32 %v1994_v11, %v1732_v3  ;;  %v4218_v16 = vpop.f32.mrb[36].mxu1  ;;  %v4116_v45 = vpop.f32.mrb[11].mxu0 }
 0x163   : > { %v4219_v15 = vpop.f32.mrb[37].mxu1  ;;  %v4117_v55 = vadd.f32 %v4116_v45, %v4115_v6 }
 0x164   : > { %v4220_v19 = vadd.f32 %v4219_v15, %v4218_v16  ;;  %v4221_v29 = vpop.f32.mrb[38].mxu1  ;;  %v2454_v46 = vpack.c.bf16 %v2147_v36, %v2146_v51 }
 0x165   : > { %v4222_v38 = vpop.f32.mrb[39].mxu1 }
 0x166   : > { %v1737_v26 = vadd.f32 %v4220_v19, %v4108_v22  ;;  %v4223_v28 = vadd.f32 %v4222_v38, %v4221_v29  ;;  %4372 = vmatprep.mubr.bf16.mxu0 %v2454_v46  ;;  %v2019_v19 = vpop.permute.xlu0 %2018 }
 0x167   : > { %v4118_v39 = vpop.f32.mrb[12].mxu0 }
 0x168   : > { %v1740_v33 = vadd.f32 %v4223_v28, %v4111_v62  ;;  %v4119_v0 = vpop.f32.mrb[13].mxu0  ;;  %v2148_v42 = vmul.f32 %v1999_v63, %v1737_v26  ;;  %v2014_v62 = vpop.permute.xlu1 %2013 }
 0x169   : > { %v4120_v47 = vadd.f32 %v4119_v0, %v4118_v39  ;;  %v4121_v21 = vpop.f32.mrb[14].mxu0 }
 0x16a   : > { %v2149_v44 = vmul.f32 %v2004_v40, %v1740_v33  ;;  %v4224_v14 = vpop.f32.mrb[40].mxu1  ;;  %v4122_v32 = vpop.f32.mrb[15].mxu0 }
 0x16b   : > { %v4225_v10 = vpop.f32.mrb[41].mxu1  ;;  %v4123_v41 = vadd.f32 %v4122_v32, %v4121_v21  ;;  %v4572_v32 = vld [vmem:[%s5749_s11 + $0x28] sm:$0xff]  }
 0x16c   : > { %v2455_v49 = vpack.c.bf16 %v2149_v44, %v2148_v42  ;;  %v4226_v61 = vadd.f32 %v4225_v10, %v4224_v14  ;;  %v4227_v54 = vpop.f32.mrb[42].mxu1  ;;  %v2024_v38 = vpop.permute.xlu1 %2023 }
 0x16d   : > { %v4228_v13 = vpop.f32.mrb[43].mxu1 }
 0x16e   : > { %v1745_v22 = vadd.f32 %v4226_v61, %v4114_v5  ;;  %v4229_v56 = vadd.f32 %v4228_v13, %v4227_v54  ;;  %4373 = vmatmul.mubr.bf16.vlgmr.msra.gmra.mrb[32].mxu0 %v2455_v49  ;;  %v4570_v5 = vld [vmem:[%s5749_s11 + $0x18] sm:$0xff]  }
 0x16f   : > { %4405 = vmatpush3.bf16.msra.mxu0 %v5395_v60  ;;  %v4124_v57 = vpop.f32.mrb[16].mxu0 }
 0x170   : > { %v1748_v31 = vadd.f32 %v4229_v56, %v4117_v55  ;;  %4406 = vmatprep.subr.bf16.mxu0 %v4568_v52  ;;  %v4125_v37 = vpop.f32.mrb[17].mxu0  ;;  %v2150_v58 = vmul.f32 %v2009_v43, %v1745_v22  ;;  %v4571_v55 = vld [vmem:[%s5749_s11 + $0x20] sm:$0xff]   ;;  %v4573_v22 = vld [vmem:[%s5749_s11 + $0x30] sm:$0xff]   ;;  %v2034_v56 = vpop.permute.xlu1 %2033 }
 0x171   : > { %v4126_v3 = vadd.f32 %v4125_v37, %v4124_v57  ;;  %v4127_v8 = vpop.f32.mrb[18].mxu0 }
 0x172   : > { %v2151_v50 = vmul.f32 %v2014_v62, %v1748_v31  ;;  %v4230_v63 = vpop.f32.mrb[44].mxu1  ;;  %v4128_v4 = vpop.f32.mrb[19].mxu0 }
 0x173   : > { %v4231_v11 = vpop.f32.mrb[45].mxu1  ;;  %4407 = vmatpush3.bf16.msra.mxu0 %v4568_v52  ;;  %v4129_v16 = vadd.f32 %v4128_v4, %v4127_v8  ;;  %v4574_v4 = vld [vmem:[%s5749_s11 + $0x38] sm:$0xff]  }
 0x174   : > { %v4232_v51 = vadd.f32 %v4231_v11, %v4230_v63  ;;  %v4233_v60 = vpop.f32.mrb[46].mxu1  ;;  %v2456_v36 = vpack.c.bf16 %v2151_v50, %v2150_v58  ;;  %4408 = vmatprep.subr.bf16.mxu0 %v4569_v34 }
 0x175   : > { %v4234_v6 = vpop.f32.mrb[47].mxu1 }
 0x176   : > { %v1753_v15 = vadd.f32 %v4232_v51, %v4120_v47  ;;  %v4235_v45 = vadd.f32 %v4234_v6, %v4233_v60  ;;  %4376 = vmatprep.mubr.bf16.mxu0 %v2456_v36 }
 0x177   : > { %4409 = vmatpush3.bf16.msra.mxu0 %v4569_v34  ;;  %v4130_v46 = vpop.f32.mrb[20].mxu0 }
 0x178   : > { %v1756_v29 = vadd.f32 %v4235_v45, %v4123_v41  ;;  %4410 = vmatprep.subr.bf16.mxu0 %v4570_v5  ;;  %v4131_v26 = vpop.f32.mrb[21].mxu0  ;;  %v2152_v28 = vmul.f32 %v2019_v19, %v1753_v15  ;;  %v2029_v41 = vpop.permute.xlu0 %2028  ;;  %v2214_v19 = vld [vmem:[%s5743_s5] sm:$0x1] }
 0x179   : > { %v4132_v40 = vadd.f32 %v4131_v26, %v4130_v46  ;;  %v4133_v0 = vpop.f32.mrb[22].mxu0  ;;  %v2044_v15 = vpop.permute.xlu1 %2043 }
 0x17a   : > { %v2153_v33 = vmul.f32 %v2024_v38, %v1756_v29  ;;  %v4236_v39 = vpop.f32.mrb[48].mxu1  ;;  %v4134_v44 = vpop.f32.mrb[23].mxu0 }
 0x17b   : > { %v4237_v42 = vpop.f32.mrb[49].mxu1  ;;  %4411 = vmatpush3.bf16.msra.mxu0 %v4570_v5  ;;  %v4135_v10 = vadd.f32 %v4134_v44, %v4133_v0  ;;  %v2215_v44 = vadd.f32 1e-05, %v2214_v19 }
 0x17c   : > { %v4238_v14 = vadd.f32 %v4237_v42, %v4236_v39  ;;  %v4239_v47 = vpop.f32.mrb[50].mxu1  ;;  %v2457_v21 = vpack.c.bf16 %v2153_v33, %v2152_v28  ;;  %4412 = vmatprep.subr.bf16.mxu0 %v4571_v55 }
 0x17d   : > { %v4240_v49 = vpop.f32.mrb[51].mxu1  ;;  %4577 = vrsqrt.f32 %v2215_v44 }
 0x17e   : > { %v1761_v61 = vadd.f32 %v4238_v14, %v4126_v3  ;;  %v4241_v54 = vadd.f32 %v4240_v49, %v4239_v47  ;;  %4377 = vmatmul.mubr.bf16.gmra.mrb[36].mxu0 %v2457_v21  ;;  %v2054_v49 = vpop.permute.xlu1 %2053 }
 0x17f   : > { %4413 = vmatpush3.bf16.msra.mxu0 %v4571_v55  ;;  %v4136_v13 = vpop.f32.mrb[24].mxu0 }
 0x180   : > { %v1764_v52 = vadd.f32 %v4241_v54, %v4129_v16  ;;  %4414 = vmatprep.subr.bf16.mxu0 %v4572_v32  ;;  %v4137_v43 = vpop.f32.mrb[25].mxu0  ;;  %v2154_v31 = vmul.f32 %v2029_v41, %v1761_v61  ;;  %v2039_v16 = vpop.permute.xlu0 %2038  ;;  %v2250_v61 = vld [vmem:[%s5746_s8] sm:$0x1] }
 0x181   : > { %v4138_v62 = vadd.f32 %v4137_v43, %v4136_v13  ;;  %v4139_v37 = vpop.f32.mrb[26].mxu0  ;;  %v2251_v54 = vld [vmem:[%s5742_s4] sm:$0x1] }
 0x182   : > { %v2155_v57 = vmul.f32 %v2034_v56, %v1764_v52  ;;  %v4242_v34 = vpop.f32.mrb[52].mxu1  ;;  %v4140_v50 = vpop.f32.mrb[27].mxu0 }
 0x183   : > { %v4243_v58 = vpop.f32.mrb[53].mxu1  ;;  %4415 = vmatpush3.bf16.msra.mxu0 %v4572_v32  ;;  %v4141_v11 = vadd.f32 %v4140_v50, %v4139_v37 }
 0x184   : > { %v4244_v63 = vadd.f32 %v4243_v58, %v4242_v34  ;;  %v4245_v3 = vpop.f32.mrb[54].mxu1  ;;  %v2458_v8 = vpack.c.bf16 %v2155_v57, %v2154_v31  ;;  %4416 = vmatprep.subr.bf16.mxu0 %v4573_v22  ;;  %v2049_v32 = vpop.permute.xlu0 %2048  ;;  %v2252_v57 = vmul.f32 %v2251_v54, %v2250_v61 }
 0x185   : > { %v4246_v51 = vpop.f32.mrb[55].mxu1 }
 0x186   : > { %v1769_v60 = vadd.f32 %v4244_v63, %v4132_v40  ;;  %v4247_v36 = vadd.f32 %v4246_v51, %v4245_v3  ;;  %4380 = vmatprep.mubr.bf16.mxu0 %v2458_v8  ;;  %v5461_v63 = vrot.slane %v2252_v57, %v4723_v18 }
 0x187   : > { %4417 = vmatpush3.bf16.msra.mxu0 %v4573_v22  ;;  %v4142_v6 = vpop.f32.mrb[28].mxu0 }
 0x188   : > { %v1772_v5 = vadd.f32 %v4247_v36, %v4135_v10  ;;  %4418 = vmatprep.subr.bf16.mxu0 %v4574_v4  ;;  %v4143_v45 = vpop.f32.mrb[29].mxu0  ;;  %v2156_v29 = vmul.f32 %v2039_v16, %v1769_v60  ;;  %v2059_v8 = vpop.permute.xlu0 %2058 }
 0x189   : > { %v4144_v38 = vadd.f32 %v4143_v45, %v4142_v6  ;;  %v4145_v26 = vpop.f32.mrb[30].mxu0 }
 0x18a   : > { %v2157_v46 = vmul.f32 %v2044_v15, %v1772_v5  ;;  %v4248_v55 = vpop.f32.mrb[56].mxu1  ;;  %v4146_v33 = vpop.f32.mrb[31].mxu0 }
 0x18b   : > { %v4249_v28 = vpop.f32.mrb[57].mxu1  ;;  %4419 = vmatpush3.bf16.msra.mxu0 %v4574_v4  ;;  %v4147_v42 = vadd.f32 %v4146_v33, %v4145_v26  ;;  %v4578_v4 = vpop.eup %4577 }
 0x18c   : > { %v4250_v39 = vadd.f32 %v4249_v28, %v4248_v55  ;;  %v4251_v40 = vpop.f32.mrb[58].mxu1  ;;  %v2459_v0 = vpack.c.bf16 %v2157_v46, %v2156_v29  ;;  %v5467_v29 = vld [vmem:[%s5744_s6] ss:$0 sm:$0xff]  ;;  %v2069_v44 = vpop.permute.xlu0 %2068 }
 0x18d   : > { %v4252_v14 = vpop.f32.mrb[59].mxu1 }
 0x18e   : > { %v1777_v47 = vadd.f32 %v4250_v39, %v4138_v62  ;;  %v4253_v21 = vadd.f32 %v4252_v14, %v4251_v40  ;;  %4381 = vmatmul.mubr.bf16.gmra.mrb[40].mxu0 %v2459_v0  ;;  %v4068_v62 = vld [vmem:[%s5457_s17 + $0x78] sm:$0xff]  }
 0x18f   : > { %v3941_v3 = vunpack.c.l.bf16 %v4068_v62  ;;  %v3942_v16 = vunpack.c.h.bf16 %v4068_v62 }
 0x190   : > { %v1780_v10 = vadd.f32 %v4253_v21, %v4141_v11  ;;  %v2158_v41 = vmul.f32 %v2049_v32, %v1777_v47  ;;  %v2064_v11 = vpop.permute.xlu1 %2063  ;;  %v2079_v57 = vpop.permute.xlu0 %2078 }
 0x191   : > { %v2289_v5 = vsub.f32 %v3941_v3, %v5461_v63  ;;  %v2290_v46 = vsub.f32 %v3942_v16, %v5461_v63 }
 0x192   : > { %v2159_v52 = vmul.f32 %v2054_v49, %v1780_v10  ;;  %v4254_v13 = vpop.f32.mrb[60].mxu1 }
 0x193   : > { %v4255_v22 = vpop.f32.mrb[61].mxu1  ;;  %v2327_v26 = vmul.f32 %v5467_v29, %v2289_v5  ;;  %v2328_v39 = vmul.f32 %v5467_v29, %v2290_v46 }
 0x194   : > { %v4256_v56 = vadd.f32 %v4255_v22, %v4254_v13  ;;  %v4257_v43 = vpop.f32.mrb[62].mxu1  ;;  %v2460_v31 = vpack.c.bf16 %v2159_v52, %v2158_v41  ;;  %v2074_v14 = vpop.permute.xlu1 %2073 }
 0x195   : > { %v4258_v34 = vpop.f32.mrb[63].mxu1 }
 0x196   : > { %v1785_v37 = vadd.f32 %v4256_v56, %v4144_v38  ;;  %v4259_v58 = vadd.f32 %v4258_v34, %v4257_v43  ;;  %4384 = vmatprep.mubr.bf16.mxu0 %v2460_v31  ;;  %v5471_v38 = vrot.slane %v4578_v4, %v4723_v18 }
 0x198   : > { %v1788_v50 = vadd.f32 %v4259_v58, %v4147_v42  ;;  %v2160_v51 = vmul.f32 %v2059_v8, %v1785_v37  ;;  %v2365_v40 = vmul.f32 %v5471_v38, %v2327_v26  ;;  %v5481_v42 = vld [vmem:[%s5745_s7] ss:$0 sm:$0xff]  ;;  %v2366_v18 = vmul.f32 %v5471_v38, %v2328_v39  ;;  %v2084_v34 = vpop.permute.xlu1 %2083 }
 0x19a   : > { %v2161_v60 = vmul.f32 %v2064_v11, %v1788_v50  ;;  %v4260_v36 = vpop.f32.mrb[64].mxu1  ;;  %v2404_v47 = vadd.f32 %v5481_v42, %v2365_v40  ;;  %v2405_v32 = vadd.f32 %v5481_v42, %v2366_v18 }
 0x19b   : > { %v4261_v6 = vpop.f32.mrb[65].mxu1 }
 0x19c   : > { %v4262_v15 = vadd.f32 %v4261_v6, %v4260_v36  ;;  %v4263_v45 = vpop.f32.mrb[66].mxu1  ;;  %v2461_v19 = vpack.c.bf16 %v2161_v60, %v2160_v51  ;;  %v2436_v61 = vmax.f32 %v2404_v47, 0.0  ;;  %v2437_v52 = vmax.f32 %v2405_v32, 0.0  ;;  %v2089_v36 = vpop.permute.xlu0 %2088 }
 0x19d   : > { %v4264_v55 = vpop.f32.mrb[67].mxu1  ;;  %v2094_v16 = vpop.permute.xlu1 %2093 }
 0x19e   : > { %v1793_v28 = vadd.f32 %v4262_v15, %v5384_v9  ;;  %v4265_v33 = vadd.f32 %v4264_v55, %v4263_v45  ;;  %4385 = vmatmul.mubr.bf16.gmra.mrb[44].mxu0 %v2461_v19  ;;  %v5487_v43 = vpack.c.bf16 %v2437_v52, %v2436_v61 }
 0x1a0   : > { %v1796_v0 = vadd.f32 %v4265_v33, %v5386_v1  ;;  %v2162_v9 = vmul.f32 %v2069_v44, %v1793_v28  ;;  %v2099_v33 = vpop.permute.xlu0 %2098 }
 0x1a1   : > { %v2104_v39 = vpop.permute.xlu1 %2103 }
 0x1a2   : > { %v2163_v21 = vmul.f32 %v2074_v14, %v1796_v0  ;;  %v4266_v10 = vpop.f32.mrb[68].mxu1 }
 0x1a3   : > { %v4267_v49 = vpop.f32.mrb[69].mxu1 }
 0x1a4   : > { %v4268_v54 = vadd.f32 %v4267_v49, %v4266_v10  ;;  %v4269_v1 = vpop.f32.mrb[70].mxu1  ;;  %v2462_v41 = vpack.c.bf16 %v2163_v21, %v2162_v9  ;;  %v3880_v21 = vld [vmem:[%s5457_s17] sm:$0xff]   ;;  %v2109_v61 = vpop.permute.xlu0 %2108 }
 0x1a5   : > { %v4270_v13 = vpop.f32.mrb[71].mxu1  ;;  %v3881_v49 = vunpack.c.l.bf16 %v3880_v21 }
 0x1a6   : > { %v1801_v22 = vadd.f32 %v4268_v54, %v5388_v2  ;;  %v4271_v56 = vadd.f32 %v4270_v13, %v4269_v1  ;;  %4388 = vmatprep.mubr.bf16.mxu0 %v2462_v41  ;;  %v2114_v54 = vpop.permute.xlu1 %2113 }
 0x1a8   : > { %v1804_v31 = vadd.f32 %v4271_v56, %v5390_v7  ;;  %v2164_v62 = vmul.f32 %v2079_v57, %v1801_v22  ;;  %v2259_v57 = vsub.f32 %v3881_v49, %v5461_v63 }
 0x1aa   : > { %v2165_v37 = vmul.f32 %v2084_v34, %v1804_v31  ;;  %v4272_v58 = vpop.f32.mrb[72].mxu1  ;;  %v4054_v34 = vld [vmem:[%s5457_s17 + $0x8] sm:$0xff]  }
 0x1ab   : > { %v4273_v50 = vpop.f32.mrb[73].mxu1 }
 0x1ac   : > { %v4274_v3 = vadd.f32 %v4273_v50, %v4272_v58  ;;  %v4275_v8 = vpop.f32.mrb[74].mxu1  ;;  %v2463_v11 = vpack.c.bf16 %v2165_v37, %v2164_v62  ;;  %v4055_v58 = vld [vmem:[%s5457_s17 + $0x10] sm:$0xff]   ;;  %v3885_v50 = vunpack.c.l.bf16 %v4054_v34 }
 0x1ad   : > { %v4276_v4 = vpop.f32.mrb[75].mxu1 }
 0x1ae   : > { %v1809_v51 = vadd.f32 %v4274_v3, %v5397_v12  ;;  %v4277_v60 = vadd.f32 %v4276_v4, %v4275_v8  ;;  %4389 = vmatmul.mubr.bf16.gmra.mrb[48].mxu0 %v2463_v11  ;;  %v3886_v3 = vunpack.c.h.bf16 %v4054_v34  ;;  %v2297_v11 = vmul.f32 %v5467_v29, %v2259_v57 }
 0x1b0   : > { %v1812_v2 = vadd.f32 %v4277_v60, %v5400_v59  ;;  %v2166_v5 = vmul.f32 %v2089_v36, %v1809_v51  ;;  %v2119_v51 = vpop.permute.xlu0 %2118  ;;  %v2124_v60 = vpop.permute.xlu1 %2123  ;;  %v3890_v36 = vunpack.c.h.bf16 %v4055_v58 }
 0x1b2   : > { %v2167_v7 = vmul.f32 %v2094_v16, %v1812_v2  ;;  %v4278_v6 = vpop.f32.mrb[76].mxu1  ;;  %v3889_v2 = vunpack.c.l.bf16 %v4055_v58 }
 0x1b3   : > { %v4279_v15 = vpop.f32.mrb[77].mxu1 }
 0x1b4   : > { %v4280_v45 = vadd.f32 %v4279_v15, %v4278_v6  ;;  %v4281_v19 = vpop.f32.mrb[78].mxu1  ;;  %v2464_v46 = vpack.c.bf16 %v2167_v7, %v2166_v5  ;;  %v2261_v6 = vsub.f32 %v3885_v50, %v5461_v63  ;;  %v2262_v15 = vsub.f32 %v3886_v3, %v5461_v63 }
 0x1b5   : > { %v4282_v55 = vpop.f32.mrb[79].mxu1 }
 0x1b6   : > { %v1817_v26 = vadd.f32 %v4280_v45, %v5402_v27  ;;  %v4283_v28 = vadd.f32 %v4282_v55, %v4281_v19  ;;  %4392 = vmatprep.mubr.bf16.mxu0 %v2464_v46  ;;  %v2335_v46 = vmul.f32 %v5471_v38, %v2297_v11  ;;  %v4058_v11 = vld [vmem:[%s5457_s17 + $0x28] sm:$0xff]  }
 0x1b8   : > { %v1820_v12 = vadd.f32 %v4283_v28, %v5404_v30  ;;  %v2168_v59 = vmul.f32 %v2099_v33, %v1817_v26  ;;  %v3882_v30 = vunpack.c.h.bf16 %v3880_v21  ;;  %v2263_v28 = vsub.f32 %v3889_v2, %v5461_v63  ;;  %v2134_v21 = vpop.permute.xlu1 %2133 }
 0x1ba   : > { %v2169_v40 = vmul.f32 %v2104_v39, %v1820_v12  ;;  %v4284_v0 = vpop.f32.mrb[80].mxu1  ;;  %v2264_v12 = vsub.f32 %v3890_v36, %v5461_v63  ;;  %v4059_v36 = vld [vmem:[%s5457_s17 + $0x30] sm:$0xff]  }
 0x1bb   : > { %v4285_v18 = vpop.f32.mrb[81].mxu1 }
 0x1bc   : > { %v4286_v44 = vadd.f32 %v4285_v18, %v4284_v0  ;;  %v4287_v14 = vpop.f32.mrb[82].mxu1  ;;  %v2465_v47 = vpack.c.bf16 %v2169_v40, %v2168_v59  ;;  %v4056_v59 = vld [vmem:[%s5457_s17 + $0x18] sm:$0xff]   ;;  %v2299_v40 = vmul.f32 %v5467_v29, %v2261_v6  ;;  %v2300_v0 = vmul.f32 %v5467_v29, %v2262_v15 }
 0x1bd   : > { %v4288_v9 = vpop.f32.mrb[83].mxu1 }
 0x1be   : > { %v1825_v10 = vadd.f32 %v4286_v44, %v5406_v24  ;;  %v4289_v32 = vadd.f32 %v4288_v9, %v4287_v14  ;;  %4393 = vmatmul.mubr.bf16.gmra.mrb[52].mxu0 %v2465_v47  ;;  %v2260_v24 = vsub.f32 %v3882_v30, %v5461_v63  ;;  %v2374_v44 = vadd.f32 %v5481_v42, %v2335_v46  ;;  %v4057_v47 = vld [vmem:[%s5457_s17 + $0x20] sm:$0xff]   ;;  %v2129_v9 = vpop.permute.xlu0 %2128 }
 0x1c0   : > { %v1828_v27 = vadd.f32 %v4289_v32, %v5408_v20  ;;  %v2170_v1 = vmul.f32 %v2109_v61, %v1825_v10  ;;  %v2298_v4 = vmul.f32 %v5467_v29, %v2260_v24  ;;  %v2301_v10 = vmul.f32 %v5467_v29, %v2263_v28 }
 0x1c1   : > { %v3893_v32 = vunpack.c.l.bf16 %v4056_v59 }
 0x1c2   : > { %v2171_v41 = vmul.f32 %v2114_v54, %v1828_v27  ;;  %v4290_v52 = vpop.f32.mrb[84].mxu1  ;;  %v2336_v55 = vmul.f32 %v5471_v38, %v2298_v4  ;;  %v3894_v27 = vunpack.c.h.bf16 %v4056_v59  ;;  %v2339_v34 = vmul.f32 %v5471_v38, %v2301_v10 }
 0x1c3   : > { %v4291_v13 = vpop.f32.mrb[85].mxu1 }
 0x1c4   : > { %v4292_v22 = vadd.f32 %v4291_v13, %v4290_v52  ;;  %v4293_v56 = vpop.f32.mrb[86].mxu1  ;;  %v2466_v31 = vpack.c.bf16 %v2171_v41, %v2170_v1  ;;  %v2375_v14 = vadd.f32 %v5481_v42, %v2336_v55  ;;  %v2337_v1 = vmul.f32 %v5471_v38, %v2299_v40  ;;  %v4060_v40 = vld [vmem:[%s5457_s17 + $0x38] sm:$0xff]  }
 0x1c5   : > { %v4294_v62 = vpop.f32.mrb[87].mxu1  ;;  %v3897_v41 = vunpack.c.l.bf16 %v4057_v47  ;;  %v3898_v52 = vunpack.c.h.bf16 %v4057_v47  ;;  %v3905_v55 = vunpack.c.l.bf16 %v4059_v36 }
 0x1c6   : > { %v1833_v20 = vadd.f32 %v4292_v22, %v5410_v23  ;;  %v4295_v37 = vadd.f32 %v4294_v62, %v4293_v56  ;;  %4396 = vmatprep.mubr.bf16.mxu0 %v2466_v31  ;;  %v2406_v31 = vmax.f32 %v2374_v44, 0.0  ;;  %v2407_v57 = vmax.f32 %v2375_v14, 0.0 }
 0x1c7   : > { %v2267_v3 = vsub.f32 %v3897_v41, %v5461_v63  ;;  %v2271_v10 = vsub.f32 %v3905_v55, %v5461_v63 }
 0x1c8   : > { %v1836_v8 = vadd.f32 %v4295_v37, %v5412_v17  ;;  %v2172_v16 = vmul.f32 %v2119_v51, %v1833_v20  ;;  %v2265_v20 = vsub.f32 %v3893_v32, %v5461_v63  ;;  %v2266_v37 = vsub.f32 %v3894_v27, %v5461_v63 }
 0x1c9   : > { %v2438_v51 = vpack.c.bf16 %v2407_v57, %v2406_v31  ;;  %v3909_v32 = vunpack.c.l.bf16 %v4060_v40  ;;  %v3910_v27 = vunpack.c.h.bf16 %v4060_v40 }
 0x1ca   : > { %v2173_v5 = vmul.f32 %v2124_v60, %v1836_v8  ;;  %v4296_v7 = vpop.f32.mrb[88].mxu1  ;;  %v2268_v8 = vsub.f32 %v3898_v52, %v5461_v63  ;;  %v2376_v60 = vadd.f32 %v5481_v42, %v2337_v1  ;;  %v2304_v6 = vmul.f32 %v5467_v29, %v2266_v37 }
 0x1cb   : > { %v4297_v23 = vpop.f32.mrb[89].mxu1  ;;  %v2273_v57 = vsub.f32 %v3909_v32, %v5461_v63  ;;  %v4065_v32 = vld [vmem:[%s5457_s17 + $0x60] sm:$0xff]  }
 0x1cc   : > { %v4298_v45 = vadd.f32 %v4297_v23, %v4296_v7  ;;  %v4299_v19 = vpop.f32.mrb[90].mxu1  ;;  %v2467_v17 = vpack.c.bf16 %v2173_v5, %v2172_v16  ;;  %v2139_v16 = vpop.permute.xlu0 %2138  ;;  %v2378_v7 = vadd.f32 %v5481_v42, %v2339_v34  ;;  %v2303_v23 = vmul.f32 %v5467_v29, %v2265_v20  ;;  %v4062_v20 = vld [vmem:[%s5457_s17 + $0x48] sm:$0xff]  }
 0x1cd   : > { %v4300_v26 = vpop.f32.mrb[91].mxu1  ;;  %v2144_v5 = vpop.permute.xlu1 %2143  ;;  %v2306_v46 = vmul.f32 %v5467_v29, %v2268_v8  ;;  %v2342_v44 = vmul.f32 %v5471_v38, %v2304_v6  ;;  %v4063_v8 = vld [vmem:[%s5457_s17 + $0x50] sm:$0xff]  }
 0x1ce   : > { %v1841_v33 = vadd.f32 %v4298_v45, %v5414_v35  ;;  %v4301_v39 = vadd.f32 %v4300_v26, %v4299_v19  ;;  %4397 = vmatmul.mubr.bf16.gmra.mrb[56].mxu0 %v2467_v17  ;;  %v2302_v35 = vmul.f32 %v5467_v29, %v2264_v12  ;;  %v3901_v45 = vunpack.c.l.bf16 %v4058_v11 }
 0x1cf   : > { %v3902_v19 = vunpack.c.h.bf16 %v4058_v11  ;;  %v2305_v17 = vmul.f32 %v5467_v29, %v2267_v3  ;;  %v3906_v26 = vunpack.c.h.bf16 %v4059_v36  ;;  %v2408_v12 = vmax.f32 %v2376_v60, 0.0 }
 0x1d0   : > { %v1844_v18 = vadd.f32 %v4301_v39, %v5416_v25  ;;  %v2174_v49 = vmul.f32 %v2129_v9, %v1841_v33  ;;  %v2338_v25 = vmul.f32 %v5471_v38, %v2300_v0  ;;  %v2340_v62 = vmul.f32 %v5471_v38, %v2302_v35  ;;  %v4061_v0 = vld [vmem:[%s5457_s17 + $0x40] sm:$0xff]  }
 0x1d1   : > { %v2410_v39 = vmax.f32 %v2378_v7, 0.0  ;;  %v2269_v14 = vsub.f32 %v3901_v45, %v5461_v63  ;;  %v2270_v47 = vsub.f32 %v3902_v19, %v5461_v63  ;;  %v2343_v9 = vmul.f32 %v5471_v38, %v2305_v17 }
 0x1d2   : > { %v2175_v30 = vmul.f32 %v2134_v21, %v1844_v18  ;;  %v4302_v61 = vpop.f32.mrb[92].mxu1  ;;  %v2377_v2 = vadd.f32 %v5481_v42, %v2338_v25  ;;  %v2341_v18 = vmul.f32 %v5471_v38, %v2303_v23  ;;  %v2344_v21 = vmul.f32 %v5471_v38, %v2306_v46 }
 0x1d3   : > { %v4303_v54 = vpop.f32.mrb[93].mxu1  ;;  %v2272_v35 = vsub.f32 %v3906_v26, %v5461_v63  ;;  %v2381_v25 = vadd.f32 %v5481_v42, %v2342_v44  ;;  %v2307_v41 = vmul.f32 %v5467_v29, %v2269_v14  ;;  %v2308_v52 = vmul.f32 %v5467_v29, %v2270_v47  ;;  %v4064_v44 = vld [vmem:[%s5457_s17 + $0x58] sm:$0xff]  }
 0x1d4   : > { %v4304_v13 = vadd.f32 %v4303_v54, %v4302_v61  ;;  %v4305_v22 = vpop.f32.mrb[94].mxu1  ;;  %v2468_v56 = vpack.c.bf16 %v2175_v30, %v2174_v49  ;;  %v2409_v33 = vmax.f32 %v2377_v2, 0.0  ;;  %v3913_v49 = vunpack.c.l.bf16 %v4061_v0 }
 0x1d5   : > { %v4306_v24 = vpop.f32.mrb[95].mxu1  ;;  %v3914_v54 = vunpack.c.h.bf16 %v4061_v0  ;;  %v2380_v1 = vadd.f32 %v5481_v42, %v2341_v18  ;;  %v2310_v31 = vmul.f32 %v5467_v29, %v2272_v35  ;;  %v2346_v3 = vmul.f32 %v5471_v38, %v2308_v52 }
 0x1d6   : > { %v1849_v58 = vadd.f32 %v4304_v13, %v5418_v48  ;;  %v4307_v50 = vadd.f32 %v4306_v24, %v4305_v22  ;;  %4400 = vmatprep.mubr.bf16.mxu0 %v2468_v56  ;;  %v2379_v48 = vadd.f32 %v5481_v42, %v2340_v62  ;;  %v2439_v30 = vpack.c.bf16 %v2409_v33, %v2408_v12 }
 0x1d7   : > { %v2382_v13 = vadd.f32 %v5481_v42, %v2343_v9  ;;  %v2383_v22 = vadd.f32 %v5481_v42, %v2344_v21  ;;  %v2309_v56 = vmul.f32 %v5467_v29, %v2271_v10  ;;  %v2274_v24 = vsub.f32 %v3910_v27, %v5461_v63 }
 0x1d8   : > { %v1852_v4 = vadd.f32 %v4307_v50, %v5420_v53  ;;  %v2176_v15 = vmul.f32 %v2139_v16, %v1849_v58  ;;  %v2411_v59 = vmax.f32 %v2379_v48, 0.0  ;;  %v2275_v34 = vsub.f32 %v3913_v49, %v5461_v63 }
 0x1d9   : > { %v2276_v62 = vsub.f32 %v3914_v54, %v5461_v63  ;;  %v2412_v37 = vmax.f32 %v2380_v1, 0.0  ;;  %v2413_v58 = vmax.f32 %v2381_v25, 0.0  ;;  %v2345_v50 = vmul.f32 %v5471_v38, %v2307_v41 }
 0x1da   : > { %v2177_v53 = vmul.f32 %v2144_v5, %v1852_v4  ;;  %v2440_v61 = vpack.c.bf16 %v2411_v59, %v2410_v39  ;;  %v2414_v11 = vmax.f32 %v2382_v13, 0.0  ;;  %v2415_v4 = vmax.f32 %v2383_v22, 0.0 }
 0x1db   : > { %v2348_v60 = vmul.f32 %v5471_v38, %v2310_v31  ;;  %v2311_v2 = vmul.f32 %v5467_v29, %v2273_v57  ;;  %v2312_v36 = vmul.f32 %v5467_v29, %v2274_v24  ;;  %v2313_v16 = vmul.f32 %v5467_v29, %v2275_v34 }
 0x1dc   : > { %v2469_v28 = vpack.c.bf16 %v2177_v53, %v2176_v15  ;;  %v3917_v5 = vunpack.c.l.bf16 %v4062_v20  ;;  %v2314_v7 = vmul.f32 %v5467_v29, %v2276_v62  ;;  %v3918_v48 = vunpack.c.h.bf16 %v4062_v20 }
 0x1dd   : > { %v3921_v23 = vunpack.c.l.bf16 %v4063_v8  ;;  %v2441_v6 = vpack.c.bf16 %v2413_v58, %v2412_v37  ;;  %v2384_v15 = vadd.f32 %v5481_v42, %v2345_v50  ;;  %v2385_v53 = vadd.f32 %v5481_v42, %v2346_v3 }
 0x1de   : > { %4401 = vmatmul.mubr.bf16.gmra.mrb[60].mxu0 %v2469_v28  ;;  %v3922_v45 = vunpack.c.h.bf16 %v4063_v8  ;;  %v2442_v19 = vpack.c.bf16 %v2415_v4, %v2414_v11  ;;  %v2387_v46 = vadd.f32 %v5481_v42, %v2348_v60  ;;  %v2349_v55 = vmul.f32 %v5471_v38, %v2311_v2  ;;  %v4066_v8 = vld [vmem:[%s5457_s17 + $0x68] sm:$0xff]  }
 0x1df   : > { %4420 = vmatprep.mubr.bf16.mxu0 %v2438_v51  ;;  %v2347_v51 = vmul.f32 %v5471_v38, %v2309_v56  ;;  %v2350_v26 = vmul.f32 %v5471_v38, %v2312_v36  ;;  %v2351_v28 = vmul.f32 %v5471_v38, %v2313_v16  ;;  %v2277_v12 = vsub.f32 %v3917_v5, %v5461_v63 }
 0x1e0   : > { %v2352_v33 = vmul.f32 %v5471_v38, %v2314_v7  ;;  %v2278_v39 = vsub.f32 %v3918_v48, %v5461_v63  ;;  %v2279_v59 = vsub.f32 %v3921_v23, %v5461_v63  ;;  %v2416_v40 = vmax.f32 %v2384_v15, 0.0 }
 0x1e1   : > { %v2386_v17 = vadd.f32 %v5481_v42, %v2347_v51  ;;  %v2417_v0 = vmax.f32 %v2385_v53, 0.0  ;;  %v2280_v18 = vsub.f32 %v3922_v45, %v5461_v63  ;;  %v2419_v47 = vmax.f32 %v2387_v46, 0.0  ;;  %v4067_v51 = vld [vmem:[%s5457_s17 + $0x70] sm:$0xff]  }
 0x1e2   : > { %v2388_v9 = vadd.f32 %v5481_v42, %v2349_v55  ;;  %v2389_v21 = vadd.f32 %v5481_v42, %v2350_v26  ;;  %v2390_v10 = vadd.f32 %v5481_v42, %v2351_v28  ;;  %v2315_v35 = vmul.f32 %v5467_v29, %v2277_v12 }
 0x1e3   : > { %v2418_v14 = vmax.f32 %v2386_v17, 0.0  ;;  %v2391_v27 = vadd.f32 %v5481_v42, %v2352_v33  ;;  %v2316_v49 = vmul.f32 %v5467_v29, %v2278_v39  ;;  %v2443_v54 = vpack.c.bf16 %v2417_v0, %v2416_v40 }
 0x1e4   : > { %v2318_v1 = vmul.f32 %v5467_v29, %v2280_v18  ;;  %v3926_v25 = vunpack.c.h.bf16 %v4064_v44  ;;  %v3929_v52 = vunpack.c.l.bf16 %v4065_v32  ;;  %v3930_v13 = vunpack.c.h.bf16 %v4065_v32 }
 0x1e5   : > { %v2444_v41 = vpack.c.bf16 %v2419_v47, %v2418_v14  ;;  %v2420_v22 = vmax.f32 %v2388_v9, 0.0  ;;  %v2421_v56 = vmax.f32 %v2389_v21, 0.0  ;;  %v2422_v31 = vmax.f32 %v2390_v10, 0.0 }
 0x1e6   : > { %4421 = vmatmul.mubr.bf16.vlgmr.msra.gmra.mrb[32].mxu0 %v2439_v30  ;;  %v2317_v30 = vmul.f32 %v5467_v29, %v2279_v59  ;;  %v2353_v57 = vmul.f32 %v5471_v38, %v2315_v35  ;;  %v2423_v24 = vmax.f32 %v2391_v27, 0.0  ;;  %v2354_v34 = vmul.f32 %v5471_v38, %v2316_v49 }
 0x1e7   : > { %4424 = vmatprep.mubr.bf16.mxu0 %v2440_v61  ;;  %v3925_v61 = vunpack.c.l.bf16 %v4064_v44  ;;  %v2356_v37 = vmul.f32 %v5471_v38, %v2318_v1  ;;  %v2282_v58 = vsub.f32 %v3926_v25, %v5461_v63  ;;  %v2283_v50 = vsub.f32 %v3929_v52, %v5461_v63 }
 0x1e8   : > { %v2355_v62 = vmul.f32 %v5471_v38, %v2317_v30  ;;  %v2284_v3 = vsub.f32 %v3930_v13, %v5461_v63  ;;  %v2445_v11 = vpack.c.bf16 %v2421_v56, %v2420_v22  ;;  %v2392_v4 = vadd.f32 %v5481_v42, %v2353_v57 }
 0x1e9   : > { %v2281_v20 = vsub.f32 %v3925_v61, %v5461_v63  ;;  %v2446_v60 = vpack.c.bf16 %v2423_v24, %v2422_v31  ;;  %v2393_v2 = vadd.f32 %v5481_v42, %v2354_v34  ;;  %v2395_v5 = vadd.f32 %v5481_v42, %v2356_v37 }
 0x1ea   : > { %v2394_v36 = vadd.f32 %v5481_v42, %v2355_v62  ;;  %v2320_v7 = vmul.f32 %v5467_v29, %v2282_v58  ;;  %v3933_v48 = vunpack.c.l.bf16 %v4066_v8  ;;  %v3934_v23 = vunpack.c.h.bf16 %v4066_v8  ;;  %v2999_v58 = vpop.permute.xlu1 %2998 }
 0x1eb   : > { %v2319_v16 = vmul.f32 %v5467_v29, %v2281_v20  ;;  %v2322_v15 = vmul.f32 %v5467_v29, %v2284_v3  ;;  %v3937_v53 = vunpack.c.l.bf16 %v4067_v51  ;;  %v3938_v45 = vunpack.c.h.bf16 %v4067_v51 }
 0x1ec   : > { %v2425_v17 = vmax.f32 %v2393_v2, 0.0  ;;  %v2426_v46 = vmax.f32 %v2394_v36, 0.0  ;;  %v2427_v26 = vmax.f32 %v2395_v5, 0.0  ;;  %v2358_v28 = vmul.f32 %v5471_v38, %v2320_v7  ;;  %v5645_v2 = vld [vmem:[%s5748_s10] ss:$0 sm:$0xff] }
 0x1ed   : > { %v2357_v55 = vmul.f32 %v5471_v38, %v2319_v16  ;;  %v2285_v12 = vsub.f32 %v3933_v48, %v5461_v63  ;;  %v2286_v33 = vsub.f32 %v3934_v23, %v5461_v63  ;;  %v2360_v59 = vmul.f32 %v5471_v38, %v2322_v15 }
 0x1ee   : > { %4425 = vmatmul.mubr.bf16.gmra.mrb[36].mxu0 %v2441_v6  ;;  %v2321_v6 = vmul.f32 %v5467_v29, %v2283_v50  ;;  %v2287_v40 = vsub.f32 %v3937_v53, %v5461_v63  ;;  %v2288_v0 = vsub.f32 %v3938_v45, %v5461_v63  ;;  %v2448_v14 = vpack.c.bf16 %v2427_v26, %v2426_v46  ;;  %v3009_v3 = vpop.permute.xlu1 %3008 }
 0x1ef   : > { %4428 = vmatprep.mubr.bf16.mxu0 %v2442_v19  ;;  %v2424_v19 = vmax.f32 %v2392_v4, 0.0  ;;  %v2396_v44 = vadd.f32 %v5481_v42, %v2357_v55  ;;  %v2397_v47 = vadd.f32 %v5481_v42, %v2358_v28  ;;  %v2323_v9 = vmul.f32 %v5467_v29, %v2285_v12 }
 0x1f0   : > { %v2359_v39 = vmul.f32 %v5471_v38, %v2321_v6  ;;  %v2324_v21 = vmul.f32 %v5467_v29, %v2286_v33  ;;  %v2399_v35 = vadd.f32 %v5481_v42, %v2360_v59  ;;  %v2325_v32 = vmul.f32 %v5467_v29, %v2287_v40 }
 0x1f1   : > { %v2447_v18 = vpack.c.bf16 %v2425_v17, %v2424_v19  ;;  %v2326_v27 = vmul.f32 %v5467_v29, %v2288_v0  ;;  %v2428_v63 = vmax.f32 %v2396_v44, 0.0  ;;  %v2429_v49 = vmax.f32 %v2397_v47, 0.0 }
 0x1f2   : > { %v2398_v10 = vadd.f32 %v5481_v42, %v2359_v39  ;;  %v2361_v30 = vmul.f32 %v5471_v38, %v2323_v9  ;;  %v2362_v61 = vmul.f32 %v5471_v38, %v2324_v21  ;;  %v2431_v1 = vmax.f32 %v2399_v35, 0.0 }
 0x1f3   : > { %v2363_v25 = vmul.f32 %v5471_v38, %v2325_v32  ;;  %v2449_v52 = vpack.c.bf16 %v2429_v49, %v2428_v63 }
 0x1f4   : > { %v2400_v13 = vadd.f32 %v5481_v42, %v2361_v30  ;;  %v2401_v22 = vadd.f32 %v5481_v42, %v2362_v61 }
 0x1f5   : > { %v2402_v56 = vadd.f32 %v5481_v42, %v2363_v25 }
 0x1f6   : > { %4429 = vmatmul.mubr.bf16.gmra.mrb[40].mxu0 %v2443_v54  ;;  %v2430_v54 = vmax.f32 %v2398_v10, 0.0  ;;  %v2432_v57 = vmax.f32 %v2400_v13, 0.0  ;;  %v2433_v24 = vmax.f32 %v2401_v22, 0.0 }
 0x1f7   : > { %4432 = vmatprep.mubr.bf16.mxu0 %v2444_v41  ;;  %v2364_v41 = vmul.f32 %v5471_v38, %v2326_v27  ;;  %v2434_v34 = vmax.f32 %v2402_v56, 0.0  ;;  %v2994_v38 = vpop.permute.xlu0 %2993 }
 0x1f8   : > { %v2450_v29 = vpack.c.bf16 %v2431_v1, %v2430_v54  ;;  %v2451_v20 = vpack.c.bf16 %v2433_v24, %v2432_v57 }
 0x1f9   : > { %v2403_v31 = vadd.f32 %v5481_v42, %v2364_v41 }
 0x1fb   : > { %v2435_v62 = vmax.f32 %v2403_v31, 0.0  ;;  %v3004_v50 = vpop.permute.xlu0 %3003 }
 0x1fd   : > { %v2452_v37 = vpack.c.bf16 %v2435_v62, %v2434_v34 }
 0x1fe   : > { %4433 = vmatmul.mubr.bf16.gmra.mrb[44].mxu0 %v2445_v11  ;;  %v3019_v11 = vpop.permute.xlu1 %3018 }
 0x1ff   : > { %4436 = vmatprep.mubr.bf16.mxu0 %v2446_v60  ;;  %v3014_v8 = vpop.permute.xlu0 %3013 }
 0x202   : > { %v3029_v4 = vpop.permute.xlu1 %3028 }
 0x203   : > { %v3024_v42 = vpop.permute.xlu0 %3023 }
 0x206   : > { %4437 = vmatmul.mubr.bf16.gmra.mrb[48].mxu0 %v2447_v18  ;;  %v5640_v60 = vpop.permute.xlu1 %3038 }
 0x207   : > { %4440 = vmatprep.mubr.bf16.mxu0 %v2448_v14  ;;  %v5638_v51 = vpop.permute.xlu0 %3033 }
 0x20a   : > { %v5652_v23 = vpop.permute.xlu1 %3048 }
 0x20b   : > { %v5647_v36 = vpop.permute.xlu0 %3043 }
 0x20e   : > { %4441 = vmatmul.mubr.bf16.gmra.mrb[52].mxu0 %v2449_v52  ;;  %v5665_v40 = vpop.permute.xlu1 %3058 }
 0x20f   : > { %4444 = vmatprep.mubr.bf16.mxu0 %v2450_v29  ;;  %v5661_v17 = vpop.permute.xlu0 %3053 }
 0x212   : > { %v3069_v22 = vpop.permute.xlu1 %3068 }
 0x213   : > { %v5670_v27 = vpop.permute.xlu0 %3063 }
 0x216   : > { %4445 = vmatmul.mubr.bf16.gmra.mrb[56].mxu0 %v2451_v20 }
 0x217   : > { %4448 = vmatprep.mubr.bf16.mxu0 %v2452_v37  ;;  %v5676_v37 = vpop.permute.xlu0 %3073 }
 0x21e   : > { %4449 = vmatmul.mubr.bf16.gmra.mrb[60].mxu0 %v5487_v43 }
 0x2b9   : > { %v4422_v43 = vpop.f32.mrb[32].mxu0 }
 0x2ba   : > { %v2800_v16 = vpop.f32.mrb[33].mxu0  ;;  %v4468_v5 = vadd.f32 %v4422_v43, %v5645_v2 }
 0x2bb   : > { %v4469_v7 = vadd.f32 %v5645_v2, %v2800_v16  ;;  %v4423_v48 = vpop.f32.mrb[34].mxu0 }
 0x2bc   : > { %v4470_v6 = vadd.f32 %v4423_v48, %v5645_v2  ;;  %v2803_v15 = vpop.f32.mrb[35].mxu0  ;;  %v3153_v46 = vmul.f32 %v4468_v5, %v3004_v50  ;;  %v5682_v48 = vpop.permute.xlu1 %3078 }
 0x2bd   : > { %v3151_v53 = vmul.f32 %v4469_v7, %v2994_v38  ;;  %v4471_v45 = vadd.f32 %v5645_v2, %v2803_v15 }
 0x2be   : > { %v3951_v19 = vpack.c.bf16 %v4470_v6, %v4468_v5  ;;  %v3154_v28 = vmul.f32 %v4470_v6, %v3009_v3  ;;  %v3222_v44 = vmul.f32 %v3153_v46, %v3153_v46 }
 0x2bf   : > { %v3152_v55 = vmul.f32 %v4471_v45, %v2999_v58  ;;  %v3946_v26 = vpack.c.bf16 %v4471_v45, %v4469_v7  ;;  %v3220_v12 = vmul.f32 %v3151_v53, %v3151_v53 }
 0x2c0   : > { %4069 = vst [vmem:[%s5658_s14 + $0x8] sm:$0xff] %v3951_v19   ;;  %v3223_v10 = vmul.f32 %v3154_v28, %v3154_v28 }
 0x2c1   : > { %v3183_v33 = vadd.f32 %v3152_v55, %v3151_v53  ;;  %v3221_v39 = vmul.f32 %v3152_v55, %v3152_v55  ;;  %3947 = vst [vmem:[%s5658_s14] sm:$0xff] %v3946_v26   ;;  %v4426_v59 = vpop.f32.mrb[36].mxu0 }
 0x2c2   : > { %v4472_v0 = vadd.f32 %v4426_v59, %v5645_v2  ;;  %v2816_v18 = vpop.f32.mrb[37].mxu0 }
 0x2c3   : > { %v3184_v14 = vadd.f32 %v3183_v33, %v3153_v46  ;;  %v3252_v47 = vadd.f32 %v3221_v39, %v3220_v12  ;;  %v4473_v9 = vadd.f32 %v5645_v2, %v2816_v18  ;;  %v4427_v21 = vpop.f32.mrb[38].mxu0 }
 0x2c4   : > { %v4474_v35 = vadd.f32 %v4427_v21, %v5645_v2  ;;  %v2819_v32 = vpop.f32.mrb[39].mxu0  ;;  %v3157_v54 = vmul.f32 %v4472_v0, %v3024_v42 }
 0x2c5   : > { %v3253_v63 = vadd.f32 %v3252_v47, %v3222_v44  ;;  %v3155_v49 = vmul.f32 %v4473_v9, %v3014_v8  ;;  %v3185_v30 = vadd.f32 %v3184_v14, %v3154_v28  ;;  %v4475_v61 = vadd.f32 %v5645_v2, %v2819_v32  ;;  %v3084_v28 = vpop.permute.xlu0 %3083 }
 0x2c6   : > { %v3961_v1 = vpack.c.bf16 %v4474_v35, %v4472_v0  ;;  %v3158_v29 = vmul.f32 %v4474_v35, %v3029_v4  ;;  %v3226_v38 = vmul.f32 %v3157_v54, %v3157_v54 }
 0x2c7   : > { %v3186_v25 = vadd.f32 %v3185_v30, %v3155_v49  ;;  %v3224_v41 = vmul.f32 %v3155_v49, %v3155_v49  ;;  %v3254_v52 = vadd.f32 %v3253_v63, %v3223_v10  ;;  %v3156_v13 = vmul.f32 %v4475_v61, %v3019_v11 }
 0x2c8   : > { %4071 = vst [vmem:[%s5658_s14 + $0x18] sm:$0xff] %v3961_v1   ;;  %v3956_v56 = vpack.c.bf16 %v4475_v61, %v4473_v9  ;;  %v3227_v11 = vmul.f32 %v3158_v29, %v3158_v29 }
 0x2c9   : > { %v3255_v31 = vadd.f32 %v3254_v52, %v3224_v41  ;;  %v3187_v57 = vadd.f32 %v3186_v25, %v3156_v13  ;;  %v3225_v24 = vmul.f32 %v3156_v13, %v3156_v13  ;;  %v4430_v34 = vpop.f32.mrb[40].mxu0  ;;  %v3094_v61 = vpop.permute.xlu0 %3093 }
 0x2ca   : > { %4070 = vst [vmem:[%s5658_s14 + $0x10] sm:$0xff] %v3956_v56   ;;  %v4476_v62 = vadd.f32 %v4430_v34, %v5645_v2  ;;  %v2832_v20 = vpop.f32.mrb[41].mxu0 }
 0x2cb   : > { %v3188_v58 = vadd.f32 %v3187_v57, %v3157_v54  ;;  %v3256_v50 = vadd.f32 %v3255_v31, %v3225_v24  ;;  %v4477_v3 = vadd.f32 %v5645_v2, %v2832_v20  ;;  %v4431_v8 = vpop.f32.mrb[42].mxu0 }
 0x2cc   : > { %v4478_v42 = vadd.f32 %v4431_v8, %v5645_v2  ;;  %v2835_v4 = vpop.f32.mrb[43].mxu0  ;;  %v3161_v6 = vmul.f32 %v4476_v62, %v5647_v36 }
 0x2cd   : > { %v3257_v43 = vadd.f32 %v3256_v50, %v3226_v38  ;;  %v3159_v16 = vmul.f32 %v4477_v3, %v5638_v51  ;;  %v3189_v5 = vadd.f32 %v3188_v58, %v3158_v29  ;;  %v4479_v7 = vadd.f32 %v5645_v2, %v2835_v4 }
 0x2ce   : > { %v3971_v15 = vpack.c.bf16 %v4478_v42, %v4476_v62  ;;  %v3162_v55 = vmul.f32 %v4478_v42, %v5652_v23  ;;  %v3230_v36 = vmul.f32 %v3161_v6, %v3161_v6 }
 0x2cf   : > { %v3190_v53 = vadd.f32 %v3189_v5, %v3159_v16  ;;  %v3228_v45 = vmul.f32 %v3159_v16, %v3159_v16  ;;  %v3258_v19 = vadd.f32 %v3257_v43, %v3227_v11  ;;  %v3160_v46 = vmul.f32 %v4479_v7, %v5640_v60  ;;  %v3089_v60 = vpop.permute.xlu1 %3088 }
 0x2d0   : > { %4073 = vst [vmem:[%s5658_s14 + $0x28] sm:$0xff] %v3971_v15   ;;  %v3966_v26 = vpack.c.bf16 %v4479_v7, %v4477_v3  ;;  %v3231_v23 = vmul.f32 %v3162_v55, %v3162_v55  ;;  %v3104_v3 = vpop.permute.xlu0 %3103 }
 0x2d1   : > { %v3259_v51 = vadd.f32 %v3258_v19, %v3228_v45  ;;  %v3191_v12 = vadd.f32 %v3190_v53, %v3160_v46  ;;  %v3229_v33 = vmul.f32 %v3160_v46, %v3160_v46  ;;  %v4434_v39 = vpop.f32.mrb[44].mxu0 }
 0x2d2   : > { %4072 = vst [vmem:[%s5658_s14 + $0x20] sm:$0xff] %v3966_v26   ;;  %v4480_v59 = vadd.f32 %v4434_v39, %v5645_v2  ;;  %v2848_v0 = vpop.f32.mrb[45].mxu0 }
 0x2d3   : > { %v3192_v18 = vadd.f32 %v3191_v12, %v3161_v6  ;;  %v3260_v44 = vadd.f32 %v3259_v51, %v3229_v33  ;;  %v4481_v14 = vadd.f32 %v5645_v2, %v2848_v0  ;;  %v4435_v47 = vpop.f32.mrb[46].mxu0  ;;  %v3099_v57 = vpop.permute.xlu1 %3098 }
 0x2d4   : > { %v4482_v9 = vadd.f32 %v4435_v47, %v5645_v2  ;;  %v2851_v21 = vpop.f32.mrb[47].mxu0  ;;  %v3165_v49 = vmul.f32 %v4480_v59, %v5670_v27  ;;  %v3114_v33 = vpop.permute.xlu0 %3113 }
 0x2d5   : > { %v3261_v10 = vadd.f32 %v3260_v44, %v3230_v36  ;;  %v3163_v35 = vmul.f32 %v4481_v14, %v5661_v17  ;;  %v3193_v32 = vadd.f32 %v3192_v18, %v3162_v55  ;;  %v4483_v63 = vadd.f32 %v5645_v2, %v2851_v21 }
 0x2d6   : > { %v3981_v30 = vpack.c.bf16 %v4482_v9, %v4480_v59  ;;  %v3166_v52 = vmul.f32 %v4482_v9, %v3069_v22  ;;  %v3234_v27 = vmul.f32 %v3165_v49, %v3165_v49 }
 0x2d7   : > { %v3194_v54 = vadd.f32 %v3193_v32, %v3163_v35  ;;  %v3232_v1 = vmul.f32 %v3163_v35, %v3163_v35  ;;  %v3262_v25 = vadd.f32 %v3261_v10, %v3231_v23  ;;  %v3164_v41 = vmul.f32 %v4483_v63, %v5665_v40  ;;  %v3109_v53 = vpop.permute.xlu1 %3108 }
 0x2d8   : > { %4075 = vst [vmem:[%s5658_s14 + $0x38] sm:$0xff] %v3981_v30   ;;  %v3976_v13 = vpack.c.bf16 %v4483_v63, %v4481_v14  ;;  %v3235_v50 = vmul.f32 %v3166_v52, %v3166_v52 }
 0x2d9   : > { %v3263_v29 = vadd.f32 %v3262_v25, %v3232_v1  ;;  %v3195_v56 = vadd.f32 %v3194_v54, %v3164_v41  ;;  %v3233_v31 = vmul.f32 %v3164_v41, %v3164_v41  ;;  %v4438_v17 = vpop.f32.mrb[48].mxu0  ;;  %v3124_v1 = vpop.permute.xlu0 %3123 }
 0x2da   : > { %4074 = vst [vmem:[%s5658_s14 + $0x30] sm:$0xff] %v3976_v13   ;;  %v4484_v24 = vadd.f32 %v4438_v17, %v5645_v2  ;;  %v2864_v34 = vpop.f32.mrb[49].mxu0 }
 0x2db   : > { %v3196_v62 = vadd.f32 %v3195_v56, %v3165_v49  ;;  %v3264_v20 = vadd.f32 %v3263_v29, %v3233_v31  ;;  %v4485_v38 = vadd.f32 %v5645_v2, %v2864_v34  ;;  %v4439_v58 = vpop.f32.mrb[50].mxu0  ;;  %v3119_v9 = vpop.permute.xlu1 %3118 }
 0x2dc   : > { %v4486_v40 = vadd.f32 %v4439_v58, %v5645_v2  ;;  %v2867_v22 = vpop.f32.mrb[51].mxu0  ;;  %v3169_v43 = vmul.f32 %v4484_v24, %v3084_v28 }
 0x2dd   : > { %v3265_v8 = vadd.f32 %v3264_v20, %v3234_v27  ;;  %v3167_v11 = vmul.f32 %v4485_v38, %v5676_v37  ;;  %v3197_v42 = vadd.f32 %v3196_v62, %v3166_v52  ;;  %v4487_v4 = vadd.f32 %v5645_v2, %v2867_v22 }
 0x2de   : > { %v3991_v16 = vpack.c.bf16 %v4486_v40, %v4484_v24  ;;  %v3170_v45 = vmul.f32 %v4486_v40, %v3089_v60  ;;  %v3238_v28 = vmul.f32 %v3169_v43, %v3169_v43 }
 0x2df   : > { %v3198_v5 = vadd.f32 %v3197_v42, %v3167_v11  ;;  %v3236_v7 = vmul.f32 %v3167_v11, %v3167_v11  ;;  %v3266_v6 = vadd.f32 %v3265_v8, %v3235_v50  ;;  %v3168_v15 = vmul.f32 %v4487_v4, %v5682_v48  ;;  %v3129_v27 = vpop.permute.xlu1 %3128  ;;  %v3134_v8 = vpop.permute.xlu0 %3133 }
 0x2e0   : > { %4077 = vst [vmem:[%s5658_s14 + $0x48] sm:$0xff] %v3991_v16   ;;  %v3986_v19 = vpack.c.bf16 %v4487_v4, %v4485_v38  ;;  %v3239_v48 = vmul.f32 %v3170_v45, %v3170_v45 }
 0x2e1   : > { %v3267_v46 = vadd.f32 %v3266_v6, %v3236_v7  ;;  %v3199_v55 = vadd.f32 %v3198_v5, %v3168_v15  ;;  %v3237_v26 = vmul.f32 %v3168_v15, %v3168_v15  ;;  %v4442_v51 = vpop.f32.mrb[52].mxu0 }
 0x2e2   : > { %4076 = vst [vmem:[%s5658_s14 + $0x40] sm:$0xff] %v3986_v19   ;;  %v4488_v37 = vadd.f32 %v4442_v51, %v5645_v2  ;;  %v2880_v12 = vpop.f32.mrb[53].mxu0 }
 0x2e3   : > { %v3200_v39 = vadd.f32 %v3199_v55, %v3169_v43  ;;  %v3268_v59 = vadd.f32 %v3267_v46, %v3237_v26  ;;  %v4489_v0 = vadd.f32 %v5645_v2, %v2880_v12  ;;  %v4443_v36 = vpop.f32.mrb[54].mxu0 }
 0x2e4   : > { %v4490_v18 = vadd.f32 %v4443_v36, %v5645_v2  ;;  %v2883_v44 = vpop.f32.mrb[55].mxu0  ;;  %v3173_v21 = vmul.f32 %v4488_v37, %v3104_v3 }
 0x2e5   : > { %v3269_v14 = vadd.f32 %v3268_v59, %v3238_v28  ;;  %v3171_v47 = vmul.f32 %v4489_v0, %v3094_v61  ;;  %v3201_v60 = vadd.f32 %v3200_v39, %v3170_v45  ;;  %v4491_v23 = vadd.f32 %v5645_v2, %v2883_v44  ;;  %v3139_v45 = vpop.permute.xlu1 %3138  ;;  %v3144_v59 = vpop.permute.xlu0 %3143 }
 0x2e6   : > { %v4001_v10 = vpack.c.bf16 %v4490_v18, %v4488_v37  ;;  %v3174_v30 = vmul.f32 %v4490_v18, %v3109_v53  ;;  %v3242_v56 = vmul.f32 %v3173_v21, %v3173_v21 }
 0x2e7   : > { %v3202_v35 = vadd.f32 %v3201_v60, %v3171_v47  ;;  %v3240_v32 = vmul.f32 %v3171_v47, %v3171_v47  ;;  %v3270_v63 = vadd.f32 %v3269_v14, %v3239_v48  ;;  %v3172_v49 = vmul.f32 %v4491_v23, %v3099_v57 }
 0x2e8   : > { %4079 = vst [vmem:[%s5658_s14 + $0x58] sm:$0xff] %v4001_v10   ;;  %v3996_v54 = vpack.c.bf16 %v4491_v23, %v4489_v0  ;;  %v3243_v57 = vmul.f32 %v3174_v30, %v3174_v30 }
 0x2e9   : > { %v3271_v25 = vadd.f32 %v3270_v63, %v3240_v32  ;;  %v3203_v41 = vadd.f32 %v3202_v35, %v3172_v49  ;;  %v3241_v52 = vmul.f32 %v3172_v49, %v3172_v49  ;;  %v4446_v13 = vpop.f32.mrb[56].mxu0 }
 0x2ea   : > { %4078 = vst [vmem:[%s5658_s14 + $0x50] sm:$0xff] %v3996_v54   ;;  %v4492_v61 = vadd.f32 %v4446_v13, %v5645_v2  ;;  %v2896_v29 = vpop.f32.mrb[57].mxu0 }
 0x2eb   : > { %v3204_v31 = vadd.f32 %v3203_v41, %v3173_v21  ;;  %v3272_v17 = vadd.f32 %v3271_v25, %v3241_v52  ;;  %v4493_v24 = vadd.f32 %v5645_v2, %v2896_v29  ;;  %v4447_v34 = vpop.f32.mrb[58].mxu0  ;;  %v3149_v21 = vpop.permute.xlu1 %3148 }
 0x2ec   : > { %v4494_v62 = vadd.f32 %v4447_v34, %v5645_v2  ;;  %v2899_v20 = vpop.f32.mrb[59].mxu0  ;;  %v3177_v22 = vmul.f32 %v4492_v61, %v3124_v1 }
 0x2ed   : > { %v3273_v38 = vadd.f32 %v3272_v17, %v3242_v56  ;;  %v3175_v58 = vmul.f32 %v4493_v24, %v3114_v33  ;;  %v3205_v50 = vadd.f32 %v3204_v31, %v3174_v30  ;;  %v4495_v40 = vadd.f32 %v5645_v2, %v2899_v20 }
 0x2ee   : > { %v4011_v3 = vpack.c.bf16 %v4494_v62, %v4492_v61  ;;  %v3178_v16 = vmul.f32 %v4494_v62, %v3129_v27  ;;  %v3246_v55 = vmul.f32 %v3177_v22, %v3177_v22 }
 0x2ef   : > { %v3206_v11 = vadd.f32 %v3205_v50, %v3175_v58  ;;  %v3244_v42 = vmul.f32 %v3175_v58, %v3175_v58  ;;  %v3274_v4 = vadd.f32 %v3273_v38, %v3243_v57  ;;  %v3176_v43 = vmul.f32 %v4495_v40, %v3119_v9 }
 0x2f0   : > { %4081 = vst [vmem:[%s5658_s14 + $0x68] sm:$0xff] %v4011_v3   ;;  %v4006_v5 = vpack.c.bf16 %v4495_v40, %v4493_v24  ;;  %v3247_v33 = vmul.f32 %v3178_v16, %v3178_v16 }
 0x2f1   : > { %v3275_v7 = vadd.f32 %v3274_v4, %v3244_v42  ;;  %v3207_v6 = vadd.f32 %v3206_v11, %v3176_v43  ;;  %v3245_v15 = vmul.f32 %v3176_v43, %v3176_v43  ;;  %v4450_v53 = vpop.f32.mrb[60].mxu0 }
 0x2f2   : > { %4080 = vst [vmem:[%s5658_s14 + $0x60] sm:$0xff] %v4006_v5   ;;  %v4496_v19 = vadd.f32 %v4450_v53, %v5645_v2  ;;  %v2912_v46 = vpop.f32.mrb[61].mxu0 }
 0x2f3   : > { %v3208_v26 = vadd.f32 %v3207_v6, %v3177_v22  ;;  %v3276_v51 = vadd.f32 %v3275_v7, %v3245_v15  ;;  %v4497_v37 = vadd.f32 %v5645_v2, %v2912_v46  ;;  %v4451_v12 = vpop.f32.mrb[62].mxu0 }
 0x2f4   : > { %v4498_v28 = vadd.f32 %v4451_v12, %v5645_v2  ;;  %v2915_v39 = vpop.f32.mrb[63].mxu0  ;;  %v3181_v44 = vmul.f32 %v4496_v19, %v3144_v59 }
 0x2f5   : > { %v3277_v0 = vadd.f32 %v3276_v51, %v3246_v55  ;;  %v3179_v36 = vmul.f32 %v4497_v37, %v3134_v8  ;;  %v3209_v48 = vadd.f32 %v3208_v26, %v3178_v16  ;;  %v4499_v18 = vadd.f32 %v5645_v2, %v2915_v39 }
 0x2f6   : > { %v4021_v14 = vpack.c.bf16 %v4498_v28, %v4496_v19  ;;  %v3182_v32 = vmul.f32 %v4498_v28, %v3149_v21  ;;  %v3250_v30 = vmul.f32 %v3181_v44, %v3181_v44 }
 0x2f7   : > { %v3210_v47 = vadd.f32 %v3209_v48, %v3179_v36  ;;  %v3248_v60 = vmul.f32 %v3179_v36, %v3179_v36  ;;  %v3278_v23 = vadd.f32 %v3277_v0, %v3247_v33  ;;  %v3180_v9 = vmul.f32 %v4499_v18, %v3139_v45 }
 0x2f8   : > { %4083 = vst [vmem:[%s5658_s14 + $0x78] sm:$0xff] %v4021_v14   ;;  %v4016_v10 = vpack.c.bf16 %v4499_v18, %v4497_v37  ;;  %v3251_v2 = vmul.f32 %v3182_v32, %v3182_v32 }
 0x2f9   : > { %v3279_v35 = vadd.f32 %v3278_v23, %v3248_v60  ;;  %v3211_v63 = vadd.f32 %v3210_v47, %v3180_v9  ;;  %v3249_v49 = vmul.f32 %v3180_v9, %v3180_v9 }
 0x2fa   : > { %4082 = vst [vmem:[%s5658_s14 + $0x70] sm:$0xff] %v4016_v10  }
 0x2fb   : > { %v3212_v54 = vadd.f32 %v3211_v63, %v3181_v44  ;;  %v3280_v1 = vadd.f32 %v3279_v35, %v3249_v49 }
 0x2fd   : > { %v3213_v25 = vadd.f32 %v3212_v54, %v3182_v32  ;;  %v3281_v41 = vadd.f32 %v3280_v1, %v3250_v30 }
 0x2ff   : > { %v3214_v52 = vrot.slane %v3213_v25, 4  ;;  %v3282_v13 = vadd.f32 %v3281_v41, %v3251_v2 }
 0x301   : > { %v3215_v61 = vadd.f32 %v3214_v52, %v3213_v25  ;;  %v3283_v29 = vrot.slane %v3282_v13, 4 }
 0x303   : > { %v3216_v56 = vrot.slane %v3215_v61, 2  ;;  %v3284_v31 = vadd.f32 %v3283_v29, %v3282_v13 }
 0x305   : > { %v3217_v17 = vadd.f32 %v3216_v56, %v3215_v61  ;;  %v3285_v24 = vrot.slane %v3284_v31, 2 }
 0x307   : > { %v3218_v34 = vrot.slane %v3217_v17, 1  ;;  %v3286_v27 = vadd.f32 %v3285_v24, %v3284_v31 }
 0x309   : > { %v3287_v57 = vrot.slane %v3286_v27, 1  ;;  %v3219_v62 = vadd.f32 %v3218_v34, %v3217_v17 }
 0x30b   : > { %v3288_v20 = vadd.f32 %v3287_v57, %v3286_v27 }
 0x30d   : > { %v3290_v38 = vsel %vm3289_vm0, %v3219_v62, %v3288_v20 }
 0x30e   : > { %3291 = vst [vmem:[%s529_s19] sm:$0x3] %v3290_v38 }
 0x30f PF: > { %s24_s27 = sadd.s32 1, %s4603_s27   ;;  %s5753_s25 = smov %s4599_s26 }
 0x310   : > { %p21_p6 = scmp.ge.s32.totalorder %s24_s27, 4   ;;  %s5754_s26 = smov %s5756_s28 }
 0x312   :  { %23 = sbr.rel (!%p21_p6) target bundleno = 2 (0x2), region = 126 }

</bundles_post_ra>
